<compile_context>
chip_gen: v7x
topology: tpu7x:2x2x1
jax: 0.10.0
libtpu: 0.0.40
codegen_flags: <defaults>
</compile_context>

<pallas_src>
import functools
import math

import jax
import jax.numpy as jnp
from jax.experimental import pallas as pl
from jax.experimental.pallas import tpu as pltpu

LANE = 128      # TPU vreg lane width
SUBLANE = 8     # TPU vreg sublane count (f32)


def _round_up(x, m):
    return ((x + m - 1) // m) * m


def encoder_lstm_kernel(x_ref, w_ref, b_ref, h_ref, c_ref):
    """Fused multi-layer LSTM over the whole sequence in one kernel call.

    x_ref : (S, Bp, INp)         padded embedded input sequence (time-major)
    w_ref : (L, INp + Hp, 4*Hp)  fused [W_ih^T ; W_hh^T], per-gate lane-padded
    b_ref : (L, 1, 4*Hp)         combined bias (b_ih + b_hh), per-gate padded
    h_ref : (L, Bp, Hp)          OUTPUT final hidden state (also the state)
    c_ref : (L, Bp, Hp)          OUTPUT final cell state   (also the state)
    """
    S = x_ref.shape[0]
    L, Bp, Hp = h_ref.shape

    # Recurrent state lives directly in the VMEM-resident output refs.
    h_ref[...] = jnp.zeros_like(h_ref)
    c_ref[...] = jnp.zeros_like(c_ref)

    # Hoist the bias broadcast out of the time loop (not CSE'd otherwise).
    b_bcast = [jnp.broadcast_to(b_ref[l], (Bp, 4 * Hp)) for l in range(L)]

    def step(t, carry):
        layer_in = x_ref[t]                          # (Bp, INp)
        for l in range(L):                           # static unroll over layers
            h_prev = h_ref[l]                        # (Bp, Hp)
            c_prev = c_ref[l]
            # One fused MXU matmul per layer per step; concat boundary is
            # lane-aligned because INp == Hp == multiple of 128.
            xh = jnp.concatenate([layer_in, h_prev], axis=1)   # (Bp, INp+Hp)
            gates = jnp.dot(xh, w_ref[l],
                            preferred_element_type=jnp.float32) + b_bcast[l]
            # Gate slices are lane-aligned: each gate occupies its own Hp=128
            # column block.  PyTorch gate ordering [i, f, g, o].
            i_g = jax.nn.sigmoid(gates[:, 0 * Hp:1 * Hp])
            f_g = jax.nn.sigmoid(gates[:, 1 * Hp:2 * Hp])
            g_g = jnp.tanh(gates[:, 2 * Hp:3 * Hp])
            o_g = jax.nn.sigmoid(gates[:, 3 * Hp:4 * Hp])
            c_new = f_g * c_prev + i_g * g_g
            h_new = o_g * jnp.tanh(c_new)
            h_ref[l] = h_new
            c_ref[l] = c_new
            layer_in = h_new                         # next layer, same t
        return carry

    jax.lax.fori_loop(0, S, step, 0, unroll=True)


def init_encoder_params(key, input_dim, emb_dim, hid_dim, n_layers):
    """Deterministic parameter init matching the PyTorch module's shapes."""
    keys = jax.random.split(key, 1 + 4 * n_layers)
    params = {}
    # nn.Embedding default init: N(0, 1)
    params["embedding"] = jax.random.normal(
        keys[0], (input_dim, emb_dim), dtype=jnp.float32)

    k = 1.0 / math.sqrt(hid_dim)
    raw_layers = []
    for l in range(n_layers):
        in_dim = emb_dim if l == 0 else hid_dim
        kw = keys[1 + 4 * l: 1 + 4 * (l + 1)]
        # nn.LSTM default init: U(-1/sqrt(H), 1/sqrt(H))
        w_ih = jax.random.uniform(kw[0], (4 * hid_dim, in_dim),
                                  minval=-k, maxval=k, dtype=jnp.float32)
        w_hh = jax.random.uniform(kw[1], (4 * hid_dim, hid_dim),
                                  minval=-k, maxval=k, dtype=jnp.float32)
        b_ih = jax.random.uniform(kw[2], (4 * hid_dim,),
                                  minval=-k, maxval=k, dtype=jnp.float32)
        b_hh = jax.random.uniform(kw[3], (4 * hid_dim,),
                                  minval=-k, maxval=k, dtype=jnp.float32)
        raw_layers.append(dict(w_ih=w_ih, w_hh=w_hh, b_ih=b_ih, b_hh=b_hh))
    params["layers_raw"] = raw_layers

    # Build fused, lane-padded kernel parameters.
    H, E = hid_dim, emb_dim
    Hp = _round_up(H, LANE)
    INp = max(_round_up(E, LANE), Hp)
    assert INp == Hp, "fused layer stacking assumes padded emb == padded hid"
    W = jnp.zeros((n_layers, INp + Hp, 4 * Hp), jnp.float32)
    Bb = jnp.zeros((n_layers, 1, 4 * Hp), jnp.float32)
    for l, lay in enumerate(raw_layers):
        din = lay["w_ih"].shape[1]
        bias = lay["b_ih"] + lay["b_hh"]
        for g in range(4):  # PyTorch gate order [i, f, g, o]
            W = W.at[l, :din, g * Hp:g * Hp + H].set(
                lay["w_ih"][g * H:(g + 1) * H, :].T)
            W = W.at[l, INp:INp + H, g * Hp:g * Hp + H].set(
                lay["w_hh"][g * H:(g + 1) * H, :].T)
            Bb = Bb.at[l, 0, g * Hp:g * Hp + H].set(bias[g * H:(g + 1) * H])
    params["w_fused"] = W        # (L, INp+Hp, 4*Hp)
    params["b_fused"] = Bb       # (L, 1, 4*Hp)
    return params


@functools.partial(jax.jit, static_argnames=("hid_dim",))
def encoder_forward(params, src, *, hid_dim):
    """Forward pass of Encoder.  src: (seq_len, batch) int32.

    Returns (hidden, cell), each (n_layers, batch, hid_dim).
    """
    # Embedding lookup (glue, plain JAX gather).
    embedded = jnp.take(params["embedding"], src, axis=0)   # (S, B, E)
    # TODO(synk): nn.Dropout is identity at inference; training-mode dropout
    # (on embeddings and between LSTM layers) is not applied here.
    S, B, E = embedded.shape

    w_fused = params["w_fused"]
    b_fused = params["b_fused"]
    L = w_fused.shape[0]
    Hp = w_fused.shape[2] // 4
    INp = w_fused.shape[1] - Hp
    Bp = _round_up(max(B, 1), SUBLANE)

    # Zero-pad batch to a sublane multiple and features to the padded input
    # width.  Padded feature lanes have zero weights/bias so they stay exactly
    # zero through the recurrence; padded batch rows are independent of real
    # rows and are sliced off below.
    x_pad = jnp.zeros((S, Bp, INp), jnp.float32).at[:, :B, :E].set(embedded)

    vmem = pl.BlockSpec(memory_space=pltpu.MemorySpace.VMEM)
    h_pad, c_pad = pl.pallas_call(
        encoder_lstm_kernel,
        out_shape=(jax.ShapeDtypeStruct((L, Bp, Hp), jnp.float32),
                   jax.ShapeDtypeStruct((L, Bp, Hp), jnp.float32)),
        in_specs=[vmem, vmem, vmem],
        out_specs=(vmem, vmem),
    )(x_pad, w_fused, b_fused)

    hidden = h_pad[:, :B, :hid_dim]
    cell = c_pad[:, :B, :hid_dim]
    return hidden, cell


def _reference_forward(params, src, hid_dim):
    """Pure-JAX reference (lax.scan LSTM) to validate the Pallas kernel."""
    embedded = jnp.take(params["embedding"], src, axis=0)
    x = embedded
    H = hid_dim
    hiddens, cells = [], []
    for lay in params["layers_raw"]:
        B = x.shape[1]
        w_ih_t = lay["w_ih"].T
        w_hh_t = lay["w_hh"].T
        b = (lay["b_ih"] + lay["b_hh"])[None, :]

        def step(carry, x_t, w_ih_t=w_ih_t, w_hh_t=w_hh_t, b=b):
            h, c = carry
            gates = (jnp.dot(x_t, w_ih_t, precision="highest")
                     + jnp.dot(h, w_hh_t, precision="highest") + b)
            i = jax.nn.sigmoid(gates[:, 0 * H:1 * H])
            f = jax.nn.sigmoid(gates[:, 1 * H:2 * H])
            g = jnp.tanh(gates[:, 2 * H:3 * H])
            o = jax.nn.sigmoid(gates[:, 3 * H:4 * H])
            c_new = f * c + i * g
            h_new = o * jnp.tanh(c_new)
            return (h_new, c_new), h_new

        h0 = jnp.zeros((B, H), jnp.float32)
        c0 = jnp.zeros((B, H), jnp.float32)
        (h_n, c_n), out_seq = jax.lax.scan(step, (h0, c0), x)
        hiddens.append(h_n)
        cells.append(c_n)
        x = out_seq
    return jnp.stack(hiddens, 0), jnp.stack(cells, 0)


if __name__ == "__main__":
    # Small shapes consistent with the module's forward.
    INPUT_DIM = 50    # vocab size
    EMB_DIM = 32
    HID_DIM = 32
    N_LAYERS = 2
    DROPOUT = 0.5     # identity at inference
    SEQ_LEN = 8
    BATCH = 2

    key = jax.random.PRNGKey(0)
    pkey, skey = jax.random.split(key)
    params = init_encoder_params(pkey, INPUT_DIM, EMB_DIM, HID_DIM, N_LAYERS)

    src = jax.random.randint(skey, (SEQ_LEN, BATCH), 0, INPUT_DIM,
                             dtype=jnp.int32)

    hidden, cell = encoder_forward(params, src, hid_dim=HID_DIM)
    jax.block_until_ready((hidden, cell))

    # Validate against a pure-JAX reference implementation.
    ref_hidden, ref_cell = _reference_forward(params, src, HID_DIM)
    assert hidden.shape == (N_LAYERS, BATCH, HID_DIM)
    assert cell.shape == (N_LAYERS, BATCH, HID_DIM)
    assert jnp.allclose(hidden, ref_hidden, atol=1e-4, rtol=1e-4)
    assert jnp.allclose(cell, ref_cell, atol=1e-4, rtol=1e-4)

    print("KERNEL_OK")
</pallas_src>

<mosaic_0001>
module attributes {stable_mosaic.version = 11 : i64} {
  func.func @encoder_lstm_kernel(%arg0: memref<8x8x128xf32, #tpu.memory_space<vmem>>, %arg1: memref<2x256x512xf32, #tpu.memory_space<vmem>>, %arg2: memref<2x1x512xf32, #tpu.memory_space<vmem>>, %arg3: memref<2x8x128xf32, #tpu.memory_space<vmem>>, %arg4: memref<2x8x128xf32, #tpu.memory_space<vmem>>) attributes {dimension_semantics = [], scalar_prefetch = 0 : i64, scratch_operands = 0 : i64, tpu.core_type = #tpu.core_type<tc>} {
    %cst = arith.constant 0.000000e+00 : f32
    %0 = vector.broadcast %cst : f32 to vector<2x8x128xf32>
    %c0 = arith.constant 0 : index
    %c0_0 = arith.constant 0 : index
    %c0_1 = arith.constant 0 : index
    %1 = vector.load %arg3[%c0, %c0_0, %c0_1] : memref<2x8x128xf32, #tpu.memory_space<vmem>>, vector<2x8x128xf32>
    tpu.vector_store %arg3[%c0, %c0_0, %c0_1], %0 {strides = array<i32>} : memref<2x8x128xf32, #tpu.memory_space<vmem>>, vector<2x8x128xf32>,
    %cst_2 = arith.constant 0.000000e+00 : f32
    %2 = vector.broadcast %cst_2 : f32 to vector<2x8x128xf32>
    %c0_3 = arith.constant 0 : index
    %c0_4 = arith.constant 0 : index
    %c0_5 = arith.constant 0 : index
    %3 = vector.load %arg4[%c0_3, %c0_4, %c0_5] : memref<2x8x128xf32, #tpu.memory_space<vmem>>, vector<2x8x128xf32>
    tpu.vector_store %arg4[%c0_3, %c0_4, %c0_5], %2 {strides = array<i32>} : memref<2x8x128xf32, #tpu.memory_space<vmem>>, vector<2x8x128xf32>,
    %c0_6 = arith.constant 0 : index
    %c0_7 = arith.constant 0 : index
    %c0_8 = arith.constant 0 : index
    %4 = vector.load %arg2[%c0_6, %c0_7, %c0_8] : memref<2x1x512xf32, #tpu.memory_space<vmem>>, vector<1x1x512xf32>
    %5 = vector.shape_cast %4 : vector<1x1x512xf32> to vector<1x512xf32>
    %6 = vector.shape_cast %5 : vector<1x512xf32> to vector<1x512xf32>
    %7 = vector.broadcast %6 : vector<1x512xf32> to vector<8x512xf32>
    %c1 = arith.constant 1 : index
    %c0_9 = arith.constant 0 : index
    %c0_10 = arith.constant 0 : index
    %8 = vector.load %arg2[%c1, %c0_9, %c0_10] : memref<2x1x512xf32, #tpu.memory_space<vmem>>, vector<1x1x512xf32>
    %9 = vector.shape_cast %8 : vector<1x1x512xf32> to vector<1x512xf32>
    %10 = vector.shape_cast %9 : vector<1x512xf32> to vector<1x512xf32>
    %11 = vector.broadcast %10 : vector<1x512xf32> to vector<8x512xf32>
    %c0_i32 = arith.constant 0 : i32
    %12 = arith.index_cast %c0_i32 : i32 to index
    %c0_11 = arith.constant 0 : index
    %c0_12 = arith.constant 0 : index
    %13 = vector.load %arg0[%12, %c0_11, %c0_12] : memref<8x8x128xf32, #tpu.memory_space<vmem>>, vector<1x8x128xf32>
    %14 = vector.shape_cast %13 : vector<1x8x128xf32> to vector<8x128xf32>
    %c0_13 = arith.constant 0 : index
    %c0_14 = arith.constant 0 : index
    %c0_15 = arith.constant 0 : index
    %15 = vector.load %arg3[%c0_13, %c0_14, %c0_15] : memref<2x8x128xf32, #tpu.memory_space<vmem>>, vector<1x8x128xf32>
    %16 = vector.shape_cast %15 : vector<1x8x128xf32> to vector<8x128xf32>
    %c0_16 = arith.constant 0 : index
    %c0_17 = arith.constant 0 : index
    %c0_18 = arith.constant 0 : index
    %17 = vector.load %arg4[%c0_16, %c0_17, %c0_18] : memref<2x8x128xf32, #tpu.memory_space<vmem>>, vector<1x8x128xf32>
    %18 = vector.shape_cast %17 : vector<1x8x128xf32> to vector<8x128xf32>
    %19 = tpu.concatenate %14, %16 in 1 : vector<8x128xf32>, vector<8x128xf32> -> vector<8x256xf32>
    %c0_19 = arith.constant 0 : index
    %c0_20 = arith.constant 0 : index
    %c0_21 = arith.constant 0 : index
    %20 = vector.load %arg1[%c0_19, %c0_20, %c0_21] : memref<2x256x512xf32, #tpu.memory_space<vmem>>, vector<1x256x512xf32>
    %21 = vector.shape_cast %20 : vector<1x256x512xf32> to vector<256x512xf32>
    %cst_22 = arith.constant dense<0.000000e+00> : vector<8x512xf32>
    %22 = tpu.matmul %19, %21, %cst_22 {dimension_numbers = #tpu.dot_dimension_numbers<[1], [0], [0], [1], [0, 0, 1, 1], [], []>} : vector<8x256xf32>, vector<256x512xf32>, vector<8x512xf32> -> vector<8x512xf32>
    %23 = arith.addf %22, %7 : vector<8x512xf32>
    %24 = vector.extract_strided_slice %23 {offsets = [0, 0], sizes = [8, 128], strides = [1, 1]} : vector<8x512xf32> to vector<8x128xf32>
    %25 = arith.negf %24 : vector<8x128xf32>
    %26 = math.exp %25 : vector<8x128xf32>
    %cst_23 = arith.constant 1.000000e+00 : f32
    %27 = vector.broadcast %cst_23 : f32 to vector<8x128xf32>
    %28 = arith.addf %27, %26 : vector<8x128xf32>
    %29 = arith.divf %27, %28 : vector<8x128xf32>
    %30 = vector.extract_strided_slice %23 {offsets = [0, 128], sizes = [8, 128], strides = [1, 1]} : vector<8x512xf32> to vector<8x128xf32>
    %31 = arith.negf %30 : vector<8x128xf32>
    %32 = math.exp %31 : vector<8x128xf32>
    %cst_24 = arith.constant 1.000000e+00 : f32
    %33 = vector.broadcast %cst_24 : f32 to vector<8x128xf32>
    %34 = arith.addf %33, %32 : vector<8x128xf32>
    %35 = arith.divf %33, %34 : vector<8x128xf32>
    %36 = vector.extract_strided_slice %23 {offsets = [0, 256], sizes = [8, 128], strides = [1, 1]} : vector<8x512xf32> to vector<8x128xf32>
    %37 = math.tanh %36 : vector<8x128xf32>
    %38 = vector.extract_strided_slice %23 {offsets = [0, 384], sizes = [8, 128], strides = [1, 1]} : vector<8x512xf32> to vector<8x128xf32>
    %39 = arith.negf %38 : vector<8x128xf32>
    %40 = math.exp %39 : vector<8x128xf32>
    %cst_25 = arith.constant 1.000000e+00 : f32
    %41 = vector.broadcast %cst_25 : f32 to vector<8x128xf32>
    %42 = arith.addf %41, %40 : vector<8x128xf32>
    %43 = arith.divf %41, %42 : vector<8x128xf32>
    %44 = arith.mulf %35, %18 : vector<8x128xf32>
    %45 = arith.mulf %29, %37 : vector<8x128xf32>
    %46 = arith.addf %44, %45 : vector<8x128xf32>
    %47 = math.tanh %46 : vector<8x128xf32>
    %48 = arith.mulf %43, %47 : vector<8x128xf32>
    %c0_26 = arith.constant 0 : index
    %c0_27 = arith.constant 0 : index
    %c0_28 = arith.constant 0 : index
    %49 = vector.load %arg3[%c0_26, %c0_27, %c0_28] : memref<2x8x128xf32, #tpu.memory_space<vmem>>, vector<1x8x128xf32>
    %50 = vector.shape_cast %49 : vector<1x8x128xf32> to vector<8x128xf32>
    %51 = vector.shape_cast %48 : vector<8x128xf32> to vector<1x8x128xf32>
    tpu.vector_store %arg3[%c0_26, %c0_27, %c0_28], %51 {strides = array<i32>} : memref<2x8x128xf32, #tpu.memory_space<vmem>>, vector<1x8x128xf32>,
    %c0_29 = arith.constant 0 : index
    %c0_30 = arith.constant 0 : index
    %c0_31 = arith.constant 0 : index
    %52 = vector.load %arg4[%c0_29, %c0_30, %c0_31] : memref<2x8x128xf32, #tpu.memory_space<vmem>>, vector<1x8x128xf32>
    %53 = vector.shape_cast %52 : vector<1x8x128xf32> to vector<8x128xf32>
    %54 = vector.shape_cast %46 : vector<8x128xf32> to vector<1x8x128xf32>
    tpu.vector_store %arg4[%c0_29, %c0_30, %c0_31], %54 {strides = array<i32>} : memref<2x8x128xf32, #tpu.memory_space<vmem>>, vector<1x8x128xf32>,
    %c1_32 = arith.constant 1 : index
    %c0_33 = arith.constant 0 : index
    %c0_34 = arith.constant 0 : index
    %55 = vector.load %arg3[%c1_32, %c0_33, %c0_34] : memref<2x8x128xf32, #tpu.memory_space<vmem>>, vector<1x8x128xf32>
    %56 = vector.shape_cast %55 : vector<1x8x128xf32> to vector<8x128xf32>
    %c1_35 = arith.constant 1 : index
    %c0_36 = arith.constant 0 : index
    %c0_37 = arith.constant 0 : index
    %57 = vector.load %arg4[%c1_35, %c0_36, %c0_37] : memref<2x8x128xf32, #tpu.memory_space<vmem>>, vector<1x8x128xf32>
    %58 = vector.shape_cast %57 : vector<1x8x128xf32> to vector<8x128xf32>
    %59 = tpu.concatenate %48, %56 in 1 : vector<8x128xf32>, vector<8x128xf32> -> vector<8x256xf32>
    %c1_38 = arith.constant 1 : index
    %c0_39 = arith.constant 0 : index
    %c0_40 = arith.constant 0 : index
    %60 = vector.load %arg1[%c1_38, %c0_39, %c0_40] : memref<2x256x512xf32, #tpu.memory_space<vmem>>, vector<1x256x512xf32>
    %61 = vector.shape_cast %60 : vector<1x256x512xf32> to vector<256x512xf32>
    %cst_41 = arith.constant dense<0.000000e+00> : vector<8x512xf32>
    %62 = tpu.matmul %59, %61, %cst_41 {dimension_numbers = #tpu.dot_dimension_numbers<[1], [0], [0], [1], [0, 0, 1, 1], [], []>} : vector<8x256xf32>, vector<256x512xf32>, vector<8x512xf32> -> vector<8x512xf32>
    %63 = arith.addf %62, %11 : vector<8x512xf32>
    %64 = vector.extract_strided_slice %63 {offsets = [0, 0], sizes = [8, 128], strides = [1, 1]} : vector<8x512xf32> to vector<8x128xf32>
    %65 = arith.negf %64 : vector<8x128xf32>
    %66 = math.exp %65 : vector<8x128xf32>
    %cst_42 = arith.constant 1.000000e+00 : f32
    %67 = vector.broadcast %cst_42 : f32 to vector<8x128xf32>
    %68 = arith.addf %67, %66 : vector<8x128xf32>
    %69 = arith.divf %67, %68 : vector<8x128xf32>
    %70 = vector.extract_strided_slice %63 {offsets = [0, 128], sizes = [8, 128], strides = [1, 1]} : vector<8x512xf32> to vector<8x128xf32>
    %71 = arith.negf %70 : vector<8x128xf32>
    %72 = math.exp %71 : vector<8x128xf32>
    %cst_43 = arith.constant 1.000000e+00 : f32
    %73 = vector.broadcast %cst_43 : f32 to vector<8x128xf32>
    %74 = arith.addf %73, %72 : vector<8x128xf32>
    %75 = arith.divf %73, %74 : vector<8x128xf32>
    %76 = vector.extract_strided_slice %63 {offsets = [0, 256], sizes = [8, 128], strides = [1, 1]} : vector<8x512xf32> to vector<8x128xf32>
    %77 = math.tanh %76 : vector<8x128xf32>
    %78 = vector.extract_strided_slice %63 {offsets = [0, 384], sizes = [8, 128], strides = [1, 1]} : vector<8x512xf32> to vector<8x128xf32>
    %79 = arith.negf %78 : vector<8x128xf32>
    %80 = math.exp %79 : vector<8x128xf32>
    %cst_44 = arith.constant 1.000000e+00 : f32
    %81 = vector.broadcast %cst_44 : f32 to vector<8x128xf32>
    %82 = arith.addf %81, %80 : vector<8x128xf32>
    %83 = arith.divf %81, %82 : vector<8x128xf32>
    %84 = arith.mulf %75, %58 : vector<8x128xf32>
    %85 = arith.mulf %69, %77 : vector<8x128xf32>
    %86 = arith.addf %84, %85 : vector<8x128xf32>
    %87 = math.tanh %86 : vector<8x128xf32>
    %88 = arith.mulf %83, %87 : vector<8x128xf32>
    %c1_45 = arith.constant 1 : index
    %c0_46 = arith.constant 0 : index
    %c0_47 = arith.constant 0 : index
    %89 = vector.load %arg3[%c1_45, %c0_46, %c0_47] : memref<2x8x128xf32, #tpu.memory_space<vmem>>, vector<1x8x128xf32>
    %90 = vector.shape_cast %89 : vector<1x8x128xf32> to vector<8x128xf32>
    %91 = vector.shape_cast %88 : vector<8x128xf32> to vector<1x8x128xf32>
    tpu.vector_store %arg3[%c1_45, %c0_46, %c0_47], %91 {strides = array<i32>} : memref<2x8x128xf32, #tpu.memory_space<vmem>>, vector<1x8x128xf32>,
    %c1_48 = arith.constant 1 : index
    %c0_49 = arith.constant 0 : index
    %c0_50 = arith.constant 0 : index
    %92 = vector.load %arg4[%c1_48, %c0_49, %c0_50] : memref<2x8x128xf32, #tpu.memory_space<vmem>>, vector<1x8x128xf32>
    %93 = vector.shape_cast %92 : vector<1x8x128xf32> to vector<8x128xf32>
    %94 = vector.shape_cast %86 : vector<8x128xf32> to vector<1x8x128xf32>
    tpu.vector_store %arg4[%c1_48, %c0_49, %c0_50], %94 {strides = array<i32>} : memref<2x8x128xf32, #tpu.memory_space<vmem>>, vector<1x8x128xf32>,
    %c1_i32 = arith.constant 1 : i32
    %95 = arith.index_cast %c1_i32 : i32 to index
    %c0_51 = arith.constant 0 : index
    %c0_52 = arith.constant 0 : index
    %96 = vector.load %arg0[%95, %c0_51, %c0_52] : memref<8x8x128xf32, #tpu.memory_space<vmem>>, vector<1x8x128xf32>
    %97 = vector.shape_cast %96 : vector<1x8x128xf32> to vector<8x128xf32>
    %c0_53 = arith.constant 0 : index
    %c0_54 = arith.constant 0 : index
    %c0_55 = arith.constant 0 : index
    %98 = vector.load %arg3[%c0_53, %c0_54, %c0_55] : memref<2x8x128xf32, #tpu.memory_space<vmem>>, vector<1x8x128xf32>
    %99 = vector.shape_cast %98 : vector<1x8x128xf32> to vector<8x128xf32>
    %c0_56 = arith.constant 0 : index
    %c0_57 = arith.constant 0 : index
    %c0_58 = arith.constant 0 : index
    %100 = vector.load %arg4[%c0_56, %c0_57, %c0_58] : memref<2x8x128xf32, #tpu.memory_space<vmem>>, vector<1x8x128xf32>
    %101 = vector.shape_cast %100 : vector<1x8x128xf32> to vector<8x128xf32>
    %102 = tpu.concatenate %97, %99 in 1 : vector<8x128xf32>, vector<8x128xf32> -> vector<8x256xf32>
    %c0_59 = arith.constant 0 : index
    %c0_60 = arith.constant 0 : index
    %c0_61 = arith.constant 0 : index
    %103 = vector.load %arg1[%c0_59, %c0_60, %c0_61] : memref<2x256x512xf32, #tpu.memory_space<vmem>>, vector<1x256x512xf32>
    %104 = vector.shape_cast %103 : vector<1x256x512xf32> to vector<256x512xf32>
    %cst_62 = arith.constant dense<0.000000e+00> : vector<8x512xf32>
    %105 = tpu.matmul %102, %104, %cst_62 {dimension_numbers = #tpu.dot_dimension_numbers<[1], [0], [0], [1], [0, 0, 1, 1], [], []>} : vector<8x256xf32>, vector<256x512xf32>, vector<8x512xf32> -> vector<8x512xf32>
    %106 = arith.addf %105, %7 : vector<8x512xf32>
    %107 = vector.extract_strided_slice %106 {offsets = [0, 0], sizes = [8, 128], strides = [1, 1]} : vector<8x512xf32> to vector<8x128xf32>
    %108 = arith.negf %107 : vector<8x128xf32>
    %109 = math.exp %108 : vector<8x128xf32>
    %cst_63 = arith.constant 1.000000e+00 : f32
    %110 = vector.broadcast %cst_63 : f32 to vector<8x128xf32>
    %111 = arith.addf %110, %109 : vector<8x128xf32>
    %112 = arith.divf %110, %111 : vector<8x128xf32>
    %113 = vector.extract_strided_slice %106 {offsets = [0, 128], sizes = [8, 128], strides = [1, 1]} : vector<8x512xf32> to vector<8x128xf32>
    %114 = arith.negf %113 : vector<8x128xf32>
    %115 = math.exp %114 : vector<8x128xf32>
    %cst_64 = arith.constant 1.000000e+00 : f32
    %116 = vector.broadcast %cst_64 : f32 to vector<8x128xf32>
    %117 = arith.addf %116, %115 : vector<8x128xf32>
    %118 = arith.divf %116, %117 : vector<8x128xf32>
    %119 = vector.extract_strided_slice %106 {offsets = [0, 256], sizes = [8, 128], strides = [1, 1]} : vector<8x512xf32> to vector<8x128xf32>
    %120 = math.tanh %119 : vector<8x128xf32>
    %121 = vector.extract_strided_slice %106 {offsets = [0, 384], sizes = [8, 128], strides = [1, 1]} : vector<8x512xf32> to vector<8x128xf32>
    %122 = arith.negf %121 : vector<8x128xf32>
    %123 = math.exp %122 : vector<8x128xf32>
    %cst_65 = arith.constant 1.000000e+00 : f32
    %124 = vector.broadcast %cst_65 : f32 to vector<8x128xf32>
    %125 = arith.addf %124, %123 : vector<8x128xf32>
    %126 = arith.divf %124, %125 : vector<8x128xf32>
    %127 = arith.mulf %118, %101 : vector<8x128xf32>
    %128 = arith.mulf %112, %120 : vector<8x128xf32>
    %129 = arith.addf %127, %128 : vector<8x128xf32>
    %130 = math.tanh %129 : vector<8x128xf32>
    %131 = arith.mulf %126, %130 : vector<8x128xf32>
    %c0_66 = arith.constant 0 : index
    %c0_67 = arith.constant 0 : index
    %c0_68 = arith.constant 0 : index
    %132 = vector.load %arg3[%c0_66, %c0_67, %c0_68] : memref<2x8x128xf32, #tpu.memory_space<vmem>>, vector<1x8x128xf32>
    %133 = vector.shape_cast %132 : vector<1x8x128xf32> to vector<8x128xf32>
    %134 = vector.shape_cast %131 : vector<8x128xf32> to vector<1x8x128xf32>
    tpu.vector_store %arg3[%c0_66, %c0_67, %c0_68], %134 {strides = array<i32>} : memref<2x8x128xf32, #tpu.memory_space<vmem>>, vector<1x8x128xf32>,
    %c0_69 = arith.constant 0 : index
    %c0_70 = arith.constant 0 : index
    %c0_71 = arith.constant 0 : index
    %135 = vector.load %arg4[%c0_69, %c0_70, %c0_71] : memref<2x8x128xf32, #tpu.memory_space<vmem>>, vector<1x8x128xf32>
    %136 = vector.shape_cast %135 : vector<1x8x128xf32> to vector<8x128xf32>
    %137 = vector.shape_cast %129 : vector<8x128xf32> to vector<1x8x128xf32>
    tpu.vector_store %arg4[%c0_69, %c0_70, %c0_71], %137 {strides = array<i32>} : memref<2x8x128xf32, #tpu.memory_space<vmem>>, vector<1x8x128xf32>,
    %c1_72 = arith.constant 1 : index
    %c0_73 = arith.constant 0 : index
    %c0_74 = arith.constant 0 : index
    %138 = vector.load %arg3[%c1_72, %c0_73, %c0_74] : memref<2x8x128xf32, #tpu.memory_space<vmem>>, vector<1x8x128xf32>
    %139 = vector.shape_cast %138 : vector<1x8x128xf32> to vector<8x128xf32>
    %c1_75 = arith.constant 1 : index
    %c0_76 = arith.constant 0 : index
    %c0_77 = arith.constant 0 : index
    %140 = vector.load %arg4[%c1_75, %c0_76, %c0_77] : memref<2x8x128xf32, #tpu.memory_space<vmem>>, vector<1x8x128xf32>
    %141 = vector.shape_cast %140 : vector<1x8x128xf32> to vector<8x128xf32>
    %142 = tpu.concatenate %131, %139 in 1 : vector<8x128xf32>, vector<8x128xf32> -> vector<8x256xf32>
    %c1_78 = arith.constant 1 : index
    %c0_79 = arith.constant 0 : index
    %c0_80 = arith.constant 0 : index
    %143 = vector.load %arg1[%c1_78, %c0_79, %c0_80] : memref<2x256x512xf32, #tpu.memory_space<vmem>>, vector<1x256x512xf32>
    %144 = vector.shape_cast %143 : vector<1x256x512xf32> to vector<256x512xf32>
    %cst_81 = arith.constant dense<0.000000e+00> : vector<8x512xf32>
    %145 = tpu.matmul %142, %144, %cst_81 {dimension_numbers = #tpu.dot_dimension_numbers<[1], [0], [0], [1], [0, 0, 1, 1], [], []>} : vector<8x256xf32>, vector<256x512xf32>, vector<8x512xf32> -> vector<8x512xf32>
    %146 = arith.addf %145, %11 : vector<8x512xf32>
    %147 = vector.extract_strided_slice %146 {offsets = [0, 0], sizes = [8, 128], strides = [1, 1]} : vector<8x512xf32> to vector<8x128xf32>
    %148 = arith.negf %147 : vector<8x128xf32>
    %149 = math.exp %148 : vector<8x128xf32>
    %cst_82 = arith.constant 1.000000e+00 : f32
    %150 = vector.broadcast %cst_82 : f32 to vector<8x128xf32>
    %151 = arith.addf %150, %149 : vector<8x128xf32>
    %152 = arith.divf %150, %151 : vector<8x128xf32>
    %153 = vector.extract_strided_slice %146 {offsets = [0, 128], sizes = [8, 128], strides = [1, 1]} : vector<8x512xf32> to vector<8x128xf32>
    %154 = arith.negf %153 : vector<8x128xf32>
    %155 = math.exp %154 : vector<8x128xf32>
    %cst_83 = arith.constant 1.000000e+00 : f32
    %156 = vector.broadcast %cst_83 : f32 to vector<8x128xf32>
    %157 = arith.addf %156, %155 : vector<8x128xf32>
    %158 = arith.divf %156, %157 : vector<8x128xf32>
    %159 = vector.extract_strided_slice %146 {offsets = [0, 256], sizes = [8, 128], strides = [1, 1]} : vector<8x512xf32> to vector<8x128xf32>
    %160 = math.tanh %159 : vector<8x128xf32>
    %161 = vector.extract_strided_slice %146 {offsets = [0, 384], sizes = [8, 128], strides = [1, 1]} : vector<8x512xf32> to vector<8x128xf32>
    %162 = arith.negf %161 : vector<8x128xf32>
    %163 = math.exp %162 : vector<8x128xf32>
    %cst_84 = arith.constant 1.000000e+00 : f32
    %164 = vector.broadcast %cst_84 : f32 to vector<8x128xf32>
    %165 = arith.addf %164, %163 : vector<8x128xf32>
    %166 = arith.divf %164, %165 : vector<8x128xf32>
    %167 = arith.mulf %158, %141 : vector<8x128xf32>
    %168 = arith.mulf %152, %160 : vector<8x128xf32>
    %169 = arith.addf %167, %168 : vector<8x128xf32>
    %170 = math.tanh %169 : vector<8x128xf32>
    %171 = arith.mulf %166, %170 : vector<8x128xf32>
    %c1_85 = arith.constant 1 : index
    %c0_86 = arith.constant 0 : index
    %c0_87 = arith.constant 0 : index
    %172 = vector.load %arg3[%c1_85, %c0_86, %c0_87] : memref<2x8x128xf32, #tpu.memory_space<vmem>>, vector<1x8x128xf32>
    %173 = vector.shape_cast %172 : vector<1x8x128xf32> to vector<8x128xf32>
    %174 = vector.shape_cast %171 : vector<8x128xf32> to vector<1x8x128xf32>
    tpu.vector_store %arg3[%c1_85, %c0_86, %c0_87], %174 {strides = array<i32>} : memref<2x8x128xf32, #tpu.memory_space<vmem>>, vector<1x8x128xf32>,
    %c1_88 = arith.constant 1 : index
    %c0_89 = arith.constant 0 : index
    %c0_90 = arith.constant 0 : index
    %175 = vector.load %arg4[%c1_88, %c0_89, %c0_90] : memref<2x8x128xf32, #tpu.memory_space<vmem>>, vector<1x8x128xf32>
    %176 = vector.shape_cast %175 : vector<1x8x128xf32> to vector<8x128xf32>
    %177 = vector.shape_cast %169 : vector<8x128xf32> to vector<1x8x128xf32>
    tpu.vector_store %arg4[%c1_88, %c0_89, %c0_90], %177 {strides = array<i32>} : memref<2x8x128xf32, #tpu.memory_space<vmem>>, vector<1x8x128xf32>,
    %c2_i32 = arith.constant 2 : i32
    %178 = arith.index_cast %c2_i32 : i32 to index
    %c0_91 = arith.constant 0 : index
    %c0_92 = arith.constant 0 : index
    %179 = vector.load %arg0[%178, %c0_91, %c0_92] : memref<8x8x128xf32, #tpu.memory_space<vmem>>, vector<1x8x128xf32>
    %180 = vector.shape_cast %179 : vector<1x8x128xf32> to vector<8x128xf32>
    %c0_93 = arith.constant 0 : index
    %c0_94 = arith.constant 0 : index
    %c0_95 = arith.constant 0 : index
    %181 = vector.load %arg3[%c0_93, %c0_94, %c0_95] : memref<2x8x128xf32, #tpu.memory_space<vmem>>, vector<1x8x128xf32>
    %182 = vector.shape_cast %181 : vector<1x8x128xf32> to vector<8x128xf32>
    %c0_96 = arith.constant 0 : index
    %c0_97 = arith.constant 0 : index
    %c0_98 = arith.constant 0 : index
    %183 = vector.load %arg4[%c0_96, %c0_97, %c0_98] : memref<2x8x128xf32, #tpu.memory_space<vmem>>, vector<1x8x128xf32>
    %184 = vector.shape_cast %183 : vector<1x8x128xf32> to vector<8x128xf32>
    %185 = tpu.concatenate %180, %182 in 1 : vector<8x128xf32>, vector<8x128xf32> -> vector<8x256xf32>
    %c0_99 = arith.constant 0 : index
    %c0_100 = arith.constant 0 : index
    %c0_101 = arith.constant 0 : index
    %186 = vector.load %arg1[%c0_99, %c0_100, %c0_101] : memref<2x256x512xf32, #tpu.memory_space<vmem>>, vector<1x256x512xf32>
    %187 = vector.shape_cast %186 : vector<1x256x512xf32> to vector<256x512xf32>
    %cst_102 = arith.constant dense<0.000000e+00> : vector<8x512xf32>
    %188 = tpu.matmul %185, %187, %cst_102 {dimension_numbers = #tpu.dot_dimension_numbers<[1], [0], [0], [1], [0, 0, 1, 1], [], []>} : vector<8x256xf32>, vector<256x512xf32>, vector<8x512xf32> -> vector<8x512xf32>
    %189 = arith.addf %188, %7 : vector<8x512xf32>
    %190 = vector.extract_strided_slice %189 {offsets = [0, 0], sizes = [8, 128], strides = [1, 1]} : vector<8x512xf32> to vector<8x128xf32>
    %191 = arith.negf %190 : vector<8x128xf32>
    %192 = math.exp %191 : vector<8x128xf32>
    %cst_103 = arith.constant 1.000000e+00 : f32
    %193 = vector.broadcast %cst_103 : f32 to vector<8x128xf32>
    %194 = arith.addf %193, %192 : vector<8x128xf32>
    %195 = arith.divf %193, %194 : vector<8x128xf32>
    %196 = vector.extract_strided_slice %189 {offsets = [0, 128], sizes = [8, 128], strides = [1, 1]} : vector<8x512xf32> to vector<8x128xf32>
    %197 = arith.negf %196 : vector<8x128xf32>
    %198 = math.exp %197 : vector<8x128xf32>
    %cst_104 = arith.constant 1.000000e+00 : f32
    %199 = vector.broadcast %cst_104 : f32 to vector<8x128xf32>
    %200 = arith.addf %199, %198 : vector<8x128xf32>
    %201 = arith.divf %199, %200 : vector<8x128xf32>
    %202 = vector.extract_strided_slice %189 {offsets = [0, 256], sizes = [8, 128], strides = [1, 1]} : vector<8x512xf32> to vector<8x128xf32>
    %203 = math.tanh %202 : vector<8x128xf32>
    %204 = vector.extract_strided_slice %189 {offsets = [0, 384], sizes = [8, 128], strides = [1, 1]} : vector<8x512xf32> to vector<8x128xf32>
    %205 = arith.negf %204 : vector<8x128xf32>
    %206 = math.exp %205 : vector<8x128xf32>
    %cst_105 = arith.constant 1.000000e+00 : f32
    %207 = vector.broadcast %cst_105 : f32 to vector<8x128xf32>
    %208 = arith.addf %207, %206 : vector<8x128xf32>
    %209 = arith.divf %207, %208 : vector<8x128xf32>
    %210 = arith.mulf %201, %184 : vector<8x128xf32>
    %211 = arith.mulf %195, %203 : vector<8x128xf32>
    %212 = arith.addf %210, %211 : vector<8x128xf32>
    %213 = math.tanh %212 : vector<8x128xf32>
    %214 = arith.mulf %209, %213 : vector<8x128xf32>
    %c0_106 = arith.constant 0 : index
    %c0_107 = arith.constant 0 : index
    %c0_108 = arith.constant 0 : index
    %215 = vector.load %arg3[%c0_106, %c0_107, %c0_108] : memref<2x8x128xf32, #tpu.memory_space<vmem>>, vector<1x8x128xf32>
    %216 = vector.shape_cast %215 : vector<1x8x128xf32> to vector<8x128xf32>
    %217 = vector.shape_cast %214 : vector<8x128xf32> to vector<1x8x128xf32>
    tpu.vector_store %arg3[%c0_106, %c0_107, %c0_108], %217 {strides = array<i32>} : memref<2x8x128xf32, #tpu.memory_space<vmem>>, vector<1x8x128xf32>,
    %c0_109 = arith.constant 0 : index
    %c0_110 = arith.constant 0 : index
    %c0_111 = arith.constant 0 : index
    %218 = vector.load %arg4[%c0_109, %c0_110, %c0_111] : memref<2x8x128xf32, #tpu.memory_space<vmem>>, vector<1x8x128xf32>
    %219 = vector.shape_cast %218 : vector<1x8x128xf32> to vector<8x128xf32>
    %220 = vector.shape_cast %212 : vector<8x128xf32> to vector<1x8x128xf32>
    tpu.vector_store %arg4[%c0_109, %c0_110, %c0_111], %220 {strides = array<i32>} : memref<2x8x128xf32, #tpu.memory_space<vmem>>, vector<1x8x128xf32>,
    %c1_112 = arith.constant 1 : index
    %c0_113 = arith.constant 0 : index
    %c0_114 = arith.constant 0 : index
    %221 = vector.load %arg3[%c1_112, %c0_113, %c0_114] : memref<2x8x128xf32, #tpu.memory_space<vmem>>, vector<1x8x128xf32>
    %222 = vector.shape_cast %221 : vector<1x8x128xf32> to vector<8x128xf32>
    %c1_115 = arith.constant 1 : index
    %c0_116 = arith.constant 0 : index
    %c0_117 = arith.constant 0 : index
    %223 = vector.load %arg4[%c1_115, %c0_116, %c0_117] : memref<2x8x128xf32, #tpu.memory_space<vmem>>, vector<1x8x128xf32>
    %224 = vector.shape_cast %223 : vector<1x8x128xf32> to vector<8x128xf32>
    %225 = tpu.concatenate %214, %222 in 1 : vector<8x128xf32>, vector<8x128xf32> -> vector<8x256xf32>
    %c1_118 = arith.constant 1 : index
    %c0_119 = arith.constant 0 : index
    %c0_120 = arith.constant 0 : index
    %226 = vector.load %arg1[%c1_118, %c0_119, %c0_120] : memref<2x256x512xf32, #tpu.memory_space<vmem>>, vector<1x256x512xf32>
    %227 = vector.shape_cast %226 : vector<1x256x512xf32> to vector<256x512xf32>
    %cst_121 = arith.constant dense<0.000000e+00> : vector<8x512xf32>
    %228 = tpu.matmul %225, %227, %cst_121 {dimension_numbers = #tpu.dot_dimension_numbers<[1], [0], [0], [1], [0, 0, 1, 1], [], []>} : vector<8x256xf32>, vector<256x512xf32>, vector<8x512xf32> -> vector<8x512xf32>
    %229 = arith.addf %228, %11 : vector<8x512xf32>
    %230 = vector.extract_strided_slice %229 {offsets = [0, 0], sizes = [8, 128], strides = [1, 1]} : vector<8x512xf32> to vector<8x128xf32>
    %231 = arith.negf %230 : vector<8x128xf32>
    %232 = math.exp %231 : vector<8x128xf32>
    %cst_122 = arith.constant 1.000000e+00 : f32
    %233 = vector.broadcast %cst_122 : f32 to vector<8x128xf32>
    %234 = arith.addf %233, %232 : vector<8x128xf32>
    %235 = arith.divf %233, %234 : vector<8x128xf32>
    %236 = vector.extract_strided_slice %229 {offsets = [0, 128], sizes = [8, 128], strides = [1, 1]} : vector<8x512xf32> to vector<8x128xf32>
    %237 = arith.negf %236 : vector<8x128xf32>
    %238 = math.exp %237 : vector<8x128xf32>
    %cst_123 = arith.constant 1.000000e+00 : f32
    %239 = vector.broadcast %cst_123 : f32 to vector<8x128xf32>
    %240 = arith.addf %239, %238 : vector<8x128xf32>
    %241 = arith.divf %239, %240 : vector<8x128xf32>
    %242 = vector.extract_strided_slice %229 {offsets = [0, 256], sizes = [8, 128], strides = [1, 1]} : vector<8x512xf32> to vector<8x128xf32>
    %243 = math.tanh %242 : vector<8x128xf32>
    %244 = vector.extract_strided_slice %229 {offsets = [0, 384], sizes = [8, 128], strides = [1, 1]} : vector<8x512xf32> to vector<8x128xf32>
    %245 = arith.negf %244 : vector<8x128xf32>
    %246 = math.exp %245 : vector<8x128xf32>
    %cst_124 = arith.constant 1.000000e+00 : f32
    %247 = vector.broadcast %cst_124 : f32 to vector<8x128xf32>
    %248 = arith.addf %247, %246 : vector<8x128xf32>
    %249 = arith.divf %247, %248 : vector<8x128xf32>
    %250 = arith.mulf %241, %224 : vector<8x128xf32>
    %251 = arith.mulf %235, %243 : vector<8x128xf32>
    %252 = arith.addf %250, %251 : vector<8x128xf32>
    %253 = math.tanh %252 : vector<8x128xf32>
    %254 = arith.mulf %249, %253 : vector<8x128xf32>
    %c1_125 = arith.constant 1 : index
    %c0_126 = arith.constant 0 : index
    %c0_127 = arith.constant 0 : index
    %255 = vector.load %arg3[%c1_125, %c0_126, %c0_127] : memref<2x8x128xf32, #tpu.memory_space<vmem>>, vector<1x8x128xf32>
    %256 = vector.shape_cast %255 : vector<1x8x128xf32> to vector<8x128xf32>
    %257 = vector.shape_cast %254 : vector<8x128xf32> to vector<1x8x128xf32>
    tpu.vector_store %arg3[%c1_125, %c0_126, %c0_127], %257 {strides = array<i32>} : memref<2x8x128xf32, #tpu.memory_space<vmem>>, vector<1x8x128xf32>,
    %c1_128 = arith.constant 1 : index
    %c0_129 = arith.constant 0 : index
    %c0_130 = arith.constant 0 : index
    %258 = vector.load %arg4[%c1_128, %c0_129, %c0_130] : memref<2x8x128xf32, #tpu.memory_space<vmem>>, vector<1x8x128xf32>
    %259 = vector.shape_cast %258 : vector<1x8x128xf32> to vector<8x128xf32>
    %260 = vector.shape_cast %252 : vector<8x128xf32> to vector<1x8x128xf32>
    tpu.vector_store %arg4[%c1_128, %c0_129, %c0_130], %260 {strides = array<i32>} : memref<2x8x128xf32, #tpu.memory_space<vmem>>, vector<1x8x128xf32>,
    %c3_i32 = arith.constant 3 : i32
    %261 = arith.index_cast %c3_i32 : i32 to index
    %c0_131 = arith.constant 0 : index
    %c0_132 = arith.constant 0 : index
    %262 = vector.load %arg0[%261, %c0_131, %c0_132] : memref<8x8x128xf32, #tpu.memory_space<vmem>>, vector<1x8x128xf32>
    %263 = vector.shape_cast %262 : vector<1x8x128xf32> to vector<8x128xf32>
    %c0_133 = arith.constant 0 : index
    %c0_134 = arith.constant 0 : index
    %c0_135 = arith.constant 0 : index
    %264 = vector.load %arg3[%c0_133, %c0_134, %c0_135] : memref<2x8x128xf32, #tpu.memory_space<vmem>>, vector<1x8x128xf32>
    %265 = vector.shape_cast %264 : vector<1x8x128xf32> to vector<8x128xf32>
    %c0_136 = arith.constant 0 : index
    %c0_137 = arith.constant 0 : index
    %c0_138 = arith.constant 0 : index
    %266 = vector.load %arg4[%c0_136, %c0_137, %c0_138] : memref<2x8x128xf32, #tpu.memory_space<vmem>>, vector<1x8x128xf32>
    %267 = vector.shape_cast %266 : vector<1x8x128xf32> to vector<8x128xf32>
    %268 = tpu.concatenate %263, %265 in 1 : vector<8x128xf32>, vector<8x128xf32> -> vector<8x256xf32>
    %c0_139 = arith.constant 0 : index
    %c0_140 = arith.constant 0 : index
    %c0_141 = arith.constant 0 : index
    %269 = vector.load %arg1[%c0_139, %c0_140, %c0_141] : memref<2x256x512xf32, #tpu.memory_space<vmem>>, vector<1x256x512xf32>
    %270 = vector.shape_cast %269 : vector<1x256x512xf32> to vector<256x512xf32>
    %cst_142 = arith.constant dense<0.000000e+00> : vector<8x512xf32>
    %271 = tpu.matmul %268, %270, %cst_142 {dimension_numbers = #tpu.dot_dimension_numbers<[1], [0], [0], [1], [0, 0, 1, 1], [], []>} : vector<8x256xf32>, vector<256x512xf32>, vector<8x512xf32> -> vector<8x512xf32>
    %272 = arith.addf %271, %7 : vector<8x512xf32>
    %273 = vector.extract_strided_slice %272 {offsets = [0, 0], sizes = [8, 128], strides = [1, 1]} : vector<8x512xf32> to vector<8x128xf32>
    %274 = arith.negf %273 : vector<8x128xf32>
    %275 = math.exp %274 : vector<8x128xf32>
    %cst_143 = arith.constant 1.000000e+00 : f32
    %276 = vector.broadcast %cst_143 : f32 to vector<8x128xf32>
    %277 = arith.addf %276, %275 : vector<8x128xf32>
    %278 = arith.divf %276, %277 : vector<8x128xf32>
    %279 = vector.extract_strided_slice %272 {offsets = [0, 128], sizes = [8, 128], strides = [1, 1]} : vector<8x512xf32> to vector<8x128xf32>
    %280 = arith.negf %279 : vector<8x128xf32>
    %281 = math.exp %280 : vector<8x128xf32>
    %cst_144 = arith.constant 1.000000e+00 : f32
    %282 = vector.broadcast %cst_144 : f32 to vector<8x128xf32>
    %283 = arith.addf %282, %281 : vector<8x128xf32>
    %284 = arith.divf %282, %283 : vector<8x128xf32>
    %285 = vector.extract_strided_slice %272 {offsets = [0, 256], sizes = [8, 128], strides = [1, 1]} : vector<8x512xf32> to vector<8x128xf32>
    %286 = math.tanh %285 : vector<8x128xf32>
    %287 = vector.extract_strided_slice %272 {offsets = [0, 384], sizes = [8, 128], strides = [1, 1]} : vector<8x512xf32> to vector<8x128xf32>
    %288 = arith.negf %287 : vector<8x128xf32>
    %289 = math.exp %288 : vector<8x128xf32>
    %cst_145 = arith.constant 1.000000e+00 : f32
    %290 = vector.broadcast %cst_145 : f32 to vector<8x128xf32>
    %291 = arith.addf %290, %289 : vector<8x128xf32>
    %292 = arith.divf %290, %291 : vector<8x128xf32>
    %293 = arith.mulf %284, %267 : vector<8x128xf32>
    %294 = arith.mulf %278, %286 : vector<8x128xf32>
    %295 = arith.addf %293, %294 : vector<8x128xf32>
    %296 = math.tanh %295 : vector<8x128xf32>
    %297 = arith.mulf %292, %296 : vector<8x128xf32>
    %c0_146 = arith.constant 0 : index
    %c0_147 = arith.constant 0 : index
    %c0_148 = arith.constant 0 : index
    %298 = vector.load %arg3[%c0_146, %c0_147, %c0_148] : memref<2x8x128xf32, #tpu.memory_space<vmem>>, vector<1x8x128xf32>
    %299 = vector.shape_cast %298 : vector<1x8x128xf32> to vector<8x128xf32>
    %300 = vector.shape_cast %297 : vector<8x128xf32> to vector<1x8x128xf32>
    tpu.vector_store %arg3[%c0_146, %c0_147, %c0_148], %300 {strides = array<i32>} : memref<2x8x128xf32, #tpu.memory_space<vmem>>, vector<1x8x128xf32>,
    %c0_149 = arith.constant 0 : index
    %c0_150 = arith.constant 0 : index
    %c0_151 = arith.constant 0 : index
    %301 = vector.load %arg4[%c0_149, %c0_150, %c0_151] : memref<2x8x128xf32, #tpu.memory_space<vmem>>, vector<1x8x128xf32>
    %302 = vector.shape_cast %301 : vector<1x8x128xf32> to vector<8x128xf32>
    %303 = vector.shape_cast %295 : vector<8x128xf32> to vector<1x8x128xf32>
    tpu.vector_store %arg4[%c0_149, %c0_150, %c0_151], %303 {strides = array<i32>} : memref<2x8x128xf32, #tpu.memory_space<vmem>>, vector<1x8x128xf32>,
    %c1_152 = arith.constant 1 : index
    %c0_153 = arith.constant 0 : index
    %c0_154 = arith.constant 0 : index
    %304 = vector.load %arg3[%c1_152, %c0_153, %c0_154] : memref<2x8x128xf32, #tpu.memory_space<vmem>>, vector<1x8x128xf32>
    %305 = vector.shape_cast %304 : vector<1x8x128xf32> to vector<8x128xf32>
    %c1_155 = arith.constant 1 : index
    %c0_156 = arith.constant 0 : index
    %c0_157 = arith.constant 0 : index
    %306 = vector.load %arg4[%c1_155, %c0_156, %c0_157] : memref<2x8x128xf32, #tpu.memory_space<vmem>>, vector<1x8x128xf32>
    %307 = vector.shape_cast %306 : vector<1x8x128xf32> to vector<8x128xf32>
    %308 = tpu.concatenate %297, %305 in 1 : vector<8x128xf32>, vector<8x128xf32> -> vector<8x256xf32>
    %c1_158 = arith.constant 1 : index
    %c0_159 = arith.constant 0 : index
    %c0_160 = arith.constant 0 : index
    %309 = vector.load %arg1[%c1_158, %c0_159, %c0_160] : memref<2x256x512xf32, #tpu.memory_space<vmem>>, vector<1x256x512xf32>
    %310 = vector.shape_cast %309 : vector<1x256x512xf32> to vector<256x512xf32>
    %cst_161 = arith.constant dense<0.000000e+00> : vector<8x512xf32>
    %311 = tpu.matmul %308, %310, %cst_161 {dimension_numbers = #tpu.dot_dimension_numbers<[1], [0], [0], [1], [0, 0, 1, 1], [], []>} : vector<8x256xf32>, vector<256x512xf32>, vector<8x512xf32> -> vector<8x512xf32>
    %312 = arith.addf %311, %11 : vector<8x512xf32>
    %313 = vector.extract_strided_slice %312 {offsets = [0, 0], sizes = [8, 128], strides = [1, 1]} : vector<8x512xf32> to vector<8x128xf32>
    %314 = arith.negf %313 : vector<8x128xf32>
    %315 = math.exp %314 : vector<8x128xf32>
    %cst_162 = arith.constant 1.000000e+00 : f32
    %316 = vector.broadcast %cst_162 : f32 to vector<8x128xf32>
    %317 = arith.addf %316, %315 : vector<8x128xf32>
    %318 = arith.divf %316, %317 : vector<8x128xf32>
    %319 = vector.extract_strided_slice %312 {offsets = [0, 128], sizes = [8, 128], strides = [1, 1]} : vector<8x512xf32> to vector<8x128xf32>
    %320 = arith.negf %319 : vector<8x128xf32>
    %321 = math.exp %320 : vector<8x128xf32>
    %cst_163 = arith.constant 1.000000e+00 : f32
    %322 = vector.broadcast %cst_163 : f32 to vector<8x128xf32>
    %323 = arith.addf %322, %321 : vector<8x128xf32>
    %324 = arith.divf %322, %323 : vector<8x128xf32>
    %325 = vector.extract_strided_slice %312 {offsets = [0, 256], sizes = [8, 128], strides = [1, 1]} : vector<8x512xf32> to vector<8x128xf32>
    %326 = math.tanh %325 : vector<8x128xf32>
    %327 = vector.extract_strided_slice %312 {offsets = [0, 384], sizes = [8, 128], strides = [1, 1]} : vector<8x512xf32> to vector<8x128xf32>
    %328 = arith.negf %327 : vector<8x128xf32>
    %329 = math.exp %328 : vector<8x128xf32>
    %cst_164 = arith.constant 1.000000e+00 : f32
    %330 = vector.broadcast %cst_164 : f32 to vector<8x128xf32>
    %331 = arith.addf %330, %329 : vector<8x128xf32>
    %332 = arith.divf %330, %331 : vector<8x128xf32>
    %333 = arith.mulf %324, %307 : vector<8x128xf32>
    %334 = arith.mulf %318, %326 : vector<8x128xf32>
    %335 = arith.addf %333, %334 : vector<8x128xf32>
    %336 = math.tanh %335 : vector<8x128xf32>
    %337 = arith.mulf %332, %336 : vector<8x128xf32>
    %c1_165 = arith.constant 1 : index
    %c0_166 = arith.constant 0 : index
    %c0_167 = arith.constant 0 : index
    %338 = vector.load %arg3[%c1_165, %c0_166, %c0_167] : memref<2x8x128xf32, #tpu.memory_space<vmem>>, vector<1x8x128xf32>
    %339 = vector.shape_cast %338 : vector<1x8x128xf32> to vector<8x128xf32>
    %340 = vector.shape_cast %337 : vector<8x128xf32> to vector<1x8x128xf32>
    tpu.vector_store %arg3[%c1_165, %c0_166, %c0_167], %340 {strides = array<i32>} : memref<2x8x128xf32, #tpu.memory_space<vmem>>, vector<1x8x128xf32>,
    %c1_168 = arith.constant 1 : index
    %c0_169 = arith.constant 0 : index
    %c0_170 = arith.constant 0 : index
    %341 = vector.load %arg4[%c1_168, %c0_169, %c0_170] : memref<2x8x128xf32, #tpu.memory_space<vmem>>, vector<1x8x128xf32>
    %342 = vector.shape_cast %341 : vector<1x8x128xf32> to vector<8x128xf32>
    %343 = vector.shape_cast %335 : vector<8x128xf32> to vector<1x8x128xf32>
    tpu.vector_store %arg4[%c1_168, %c0_169, %c0_170], %343 {strides = array<i32>} : memref<2x8x128xf32, #tpu.memory_space<vmem>>, vector<1x8x128xf32>,
    %c4_i32 = arith.constant 4 : i32
    %344 = arith.index_cast %c4_i32 : i32 to index
    %c0_171 = arith.constant 0 : index
    %c0_172 = arith.constant 0 : index
    %345 = vector.load %arg0[%344, %c0_171, %c0_172] : memref<8x8x128xf32, #tpu.memory_space<vmem>>, vector<1x8x128xf32>
    %346 = vector.shape_cast %345 : vector<1x8x128xf32> to vector<8x128xf32>
    %c0_173 = arith.constant 0 : index
    %c0_174 = arith.constant 0 : index
    %c0_175 = arith.constant 0 : index
    %347 = vector.load %arg3[%c0_173, %c0_174, %c0_175] : memref<2x8x128xf32, #tpu.memory_space<vmem>>, vector<1x8x128xf32>
    %348 = vector.shape_cast %347 : vector<1x8x128xf32> to vector<8x128xf32>
    %c0_176 = arith.constant 0 : index
    %c0_177 = arith.constant 0 : index
    %c0_178 = arith.constant 0 : index
    %349 = vector.load %arg4[%c0_176, %c0_177, %c0_178] : memref<2x8x128xf32, #tpu.memory_space<vmem>>, vector<1x8x128xf32>
    %350 = vector.shape_cast %349 : vector<1x8x128xf32> to vector<8x128xf32>
    %351 = tpu.concatenate %346, %348 in 1 : vector<8x128xf32>, vector<8x128xf32> -> vector<8x256xf32>
    %c0_179 = arith.constant 0 : index
    %c0_180 = arith.constant 0 : index
    %c0_181 = arith.constant 0 : index
    %352 = vector.load %arg1[%c0_179, %c0_180, %c0_181] : memref<2x256x512xf32, #tpu.memory_space<vmem>>, vector<1x256x512xf32>
    %353 = vector.shape_cast %352 : vector<1x256x512xf32> to vector<256x512xf32>
    %cst_182 = arith.constant dense<0.000000e+00> : vector<8x512xf32>
    %354 = tpu.matmul %351, %353, %cst_182 {dimension_numbers = #tpu.dot_dimension_numbers<[1], [0], [0], [1], [0, 0, 1, 1], [], []>} : vector<8x256xf32>, vector<256x512xf32>, vector<8x512xf32> -> vector<8x512xf32>
    %355 = arith.addf %354, %7 : vector<8x512xf32>
    %356 = vector.extract_strided_slice %355 {offsets = [0, 0], sizes = [8, 128], strides = [1, 1]} : vector<8x512xf32> to vector<8x128xf32>
    %357 = arith.negf %356 : vector<8x128xf32>
    %358 = math.exp %357 : vector<8x128xf32>
    %cst_183 = arith.constant 1.000000e+00 : f32
    %359 = vector.broadcast %cst_183 : f32 to vector<8x128xf32>
    %360 = arith.addf %359, %358 : vector<8x128xf32>
    %361 = arith.divf %359, %360 : vector<8x128xf32>
    %362 = vector.extract_strided_slice %355 {offsets = [0, 128], sizes = [8, 128], strides = [1, 1]} : vector<8x512xf32> to vector<8x128xf32>
    %363 = arith.negf %362 : vector<8x128xf32>
    %364 = math.exp %363 : vector<8x128xf32>
    %cst_184 = arith.constant 1.000000e+00 : f32
    %365 = vector.broadcast %cst_184 : f32 to vector<8x128xf32>
    %366 = arith.addf %365, %364 : vector<8x128xf32>
    %367 = arith.divf %365, %366 : vector<8x128xf32>
    %368 = vector.extract_strided_slice %355 {offsets = [0, 256], sizes = [8, 128], strides = [1, 1]} : vector<8x512xf32> to vector<8x128xf32>
    %369 = math.tanh %368 : vector<8x128xf32>
    %370 = vector.extract_strided_slice %355 {offsets = [0, 384], sizes = [8, 128], strides = [1, 1]} : vector<8x512xf32> to vector<8x128xf32>
    %371 = arith.negf %370 : vector<8x128xf32>
    %372 = math.exp %371 : vector<8x128xf32>
    %cst_185 = arith.constant 1.000000e+00 : f32
    %373 = vector.broadcast %cst_185 : f32 to vector<8x128xf32>
    %374 = arith.addf %373, %372 : vector<8x128xf32>
    %375 = arith.divf %373, %374 : vector<8x128xf32>
    %376 = arith.mulf %367, %350 : vector<8x128xf32>
    %377 = arith.mulf %361, %369 : vector<8x128xf32>
    %378 = arith.addf %376, %377 : vector<8x128xf32>
    %379 = math.tanh %378 : vector<8x128xf32>
    %380 = arith.mulf %375, %379 : vector<8x128xf32>
    %c0_186 = arith.constant 0 : index
    %c0_187 = arith.constant 0 : index
    %c0_188 = arith.constant 0 : index
    %381 = vector.load %arg3[%c0_186, %c0_187, %c0_188] : memref<2x8x128xf32, #tpu.memory_space<vmem>>, vector<1x8x128xf32>
    %382 = vector.shape_cast %381 : vector<1x8x128xf32> to vector<8x128xf32>
    %383 = vector.shape_cast %380 : vector<8x128xf32> to vector<1x8x128xf32>
    tpu.vector_store %arg3[%c0_186, %c0_187, %c0_188], %383 {strides = array<i32>} : memref<2x8x128xf32, #tpu.memory_space<vmem>>, vector<1x8x128xf32>,
    %c0_189 = arith.constant 0 : index
    %c0_190 = arith.constant 0 : index
    %c0_191 = arith.constant 0 : index
    %384 = vector.load %arg4[%c0_189, %c0_190, %c0_191] : memref<2x8x128xf32, #tpu.memory_space<vmem>>, vector<1x8x128xf32>
    %385 = vector.shape_cast %384 : vector<1x8x128xf32> to vector<8x128xf32>
    %386 = vector.shape_cast %378 : vector<8x128xf32> to vector<1x8x128xf32>
    tpu.vector_store %arg4[%c0_189, %c0_190, %c0_191], %386 {strides = array<i32>} : memref<2x8x128xf32, #tpu.memory_space<vmem>>, vector<1x8x128xf32>,
    %c1_192 = arith.constant 1 : index
    %c0_193 = arith.constant 0 : index
    %c0_194 = arith.constant 0 : index
    %387 = vector.load %arg3[%c1_192, %c0_193, %c0_194] : memref<2x8x128xf32, #tpu.memory_space<vmem>>, vector<1x8x128xf32>
    %388 = vector.shape_cast %387 : vector<1x8x128xf32> to vector<8x128xf32>
    %c1_195 = arith.constant 1 : index
    %c0_196 = arith.constant 0 : index
    %c0_197 = arith.constant 0 : index
    %389 = vector.load %arg4[%c1_195, %c0_196, %c0_197] : memref<2x8x128xf32, #tpu.memory_space<vmem>>, vector<1x8x128xf32>
    %390 = vector.shape_cast %389 : vector<1x8x128xf32> to vector<8x128xf32>
    %391 = tpu.concatenate %380, %388 in 1 : vector<8x128xf32>, vector<8x128xf32> -> vector<8x256xf32>
    %c1_198 = arith.constant 1 : index
    %c0_199 = arith.constant 0 : index
    %c0_200 = arith.constant 0 : index
    %392 = vector.load %arg1[%c1_198, %c0_199, %c0_200] : memref<2x256x512xf32, #tpu.memory_space<vmem>>, vector<1x256x512xf32>
    %393 = vector.shape_cast %392 : vector<1x256x512xf32> to vector<256x512xf32>
    %cst_201 = arith.constant dense<0.000000e+00> : vector<8x512xf32>
    %394 = tpu.matmul %391, %393, %cst_201 {dimension_numbers = #tpu.dot_dimension_numbers<[1], [0], [0], [1], [0, 0, 1, 1], [], []>} : vector<8x256xf32>, vector<256x512xf32>, vector<8x512xf32> -> vector<8x512xf32>
    %395 = arith.addf %394, %11 : vector<8x512xf32>
    %396 = vector.extract_strided_slice %395 {offsets = [0, 0], sizes = [8, 128], strides = [1, 1]} : vector<8x512xf32> to vector<8x128xf32>
    %397 = arith.negf %396 : vector<8x128xf32>
    %398 = math.exp %397 : vector<8x128xf32>
    %cst_202 = arith.constant 1.000000e+00 : f32
    %399 = vector.broadcast %cst_202 : f32 to vector<8x128xf32>
    %400 = arith.addf %399, %398 : vector<8x128xf32>
    %401 = arith.divf %399, %400 : vector<8x128xf32>
    %402 = vector.extract_strided_slice %395 {offsets = [0, 128], sizes = [8, 128], strides = [1, 1]} : vector<8x512xf32> to vector<8x128xf32>
    %403 = arith.negf %402 : vector<8x128xf32>
    %404 = math.exp %403 : vector<8x128xf32>
    %cst_203 = arith.constant 1.000000e+00 : f32
    %405 = vector.broadcast %cst_203 : f32 to vector<8x128xf32>
    %406 = arith.addf %405, %404 : vector<8x128xf32>
    %407 = arith.divf %405, %406 : vector<8x128xf32>
    %408 = vector.extract_strided_slice %395 {offsets = [0, 256], sizes = [8, 128], strides = [1, 1]} : vector<8x512xf32> to vector<8x128xf32>
    %409 = math.tanh %408 : vector<8x128xf32>
    %410 = vector.extract_strided_slice %395 {offsets = [0, 384], sizes = [8, 128], strides = [1, 1]} : vector<8x512xf32> to vector<8x128xf32>
    %411 = arith.negf %410 : vector<8x128xf32>
    %412 = math.exp %411 : vector<8x128xf32>
    %cst_204 = arith.constant 1.000000e+00 : f32
    %413 = vector.broadcast %cst_204 : f32 to vector<8x128xf32>
    %414 = arith.addf %413, %412 : vector<8x128xf32>
    %415 = arith.divf %413, %414 : vector<8x128xf32>
    %416 = arith.mulf %407, %390 : vector<8x128xf32>
    %417 = arith.mulf %401, %409 : vector<8x128xf32>
    %418 = arith.addf %416, %417 : vector<8x128xf32>
    %419 = math.tanh %418 : vector<8x128xf32>
    %420 = arith.mulf %415, %419 : vector<8x128xf32>
    %c1_205 = arith.constant 1 : index
    %c0_206 = arith.constant 0 : index
    %c0_207 = arith.constant 0 : index
    %421 = vector.load %arg3[%c1_205, %c0_206, %c0_207] : memref<2x8x128xf32, #tpu.memory_space<vmem>>, vector<1x8x128xf32>
    %422 = vector.shape_cast %421 : vector<1x8x128xf32> to vector<8x128xf32>
    %423 = vector.shape_cast %420 : vector<8x128xf32> to vector<1x8x128xf32>
    tpu.vector_store %arg3[%c1_205, %c0_206, %c0_207], %423 {strides = array<i32>} : memref<2x8x128xf32, #tpu.memory_space<vmem>>, vector<1x8x128xf32>,
    %c1_208 = arith.constant 1 : index
    %c0_209 = arith.constant 0 : index
    %c0_210 = arith.constant 0 : index
    %424 = vector.load %arg4[%c1_208, %c0_209, %c0_210] : memref<2x8x128xf32, #tpu.memory_space<vmem>>, vector<1x8x128xf32>
    %425 = vector.shape_cast %424 : vector<1x8x128xf32> to vector<8x128xf32>
    %426 = vector.shape_cast %418 : vector<8x128xf32> to vector<1x8x128xf32>
    tpu.vector_store %arg4[%c1_208, %c0_209, %c0_210], %426 {strides = array<i32>} : memref<2x8x128xf32, #tpu.memory_space<vmem>>, vector<1x8x128xf32>,
    %c5_i32 = arith.constant 5 : i32
    %427 = arith.index_cast %c5_i32 : i32 to index
    %c0_211 = arith.constant 0 : index
    %c0_212 = arith.constant 0 : index
    %428 = vector.load %arg0[%427, %c0_211, %c0_212] : memref<8x8x128xf32, #tpu.memory_space<vmem>>, vector<1x8x128xf32>
    %429 = vector.shape_cast %428 : vector<1x8x128xf32> to vector<8x128xf32>
    %c0_213 = arith.constant 0 : index
    %c0_214 = arith.constant 0 : index
    %c0_215 = arith.constant 0 : index
    %430 = vector.load %arg3[%c0_213, %c0_214, %c0_215] : memref<2x8x128xf32, #tpu.memory_space<vmem>>, vector<1x8x128xf32>
    %431 = vector.shape_cast %430 : vector<1x8x128xf32> to vector<8x128xf32>
    %c0_216 = arith.constant 0 : index
    %c0_217 = arith.constant 0 : index
    %c0_218 = arith.constant 0 : index
    %432 = vector.load %arg4[%c0_216, %c0_217, %c0_218] : memref<2x8x128xf32, #tpu.memory_space<vmem>>, vector<1x8x128xf32>
    %433 = vector.shape_cast %432 : vector<1x8x128xf32> to vector<8x128xf32>
    %434 = tpu.concatenate %429, %431 in 1 : vector<8x128xf32>, vector<8x128xf32> -> vector<8x256xf32>
    %c0_219 = arith.constant 0 : index
    %c0_220 = arith.constant 0 : index
    %c0_221 = arith.constant 0 : index
    %435 = vector.load %arg1[%c0_219, %c0_220, %c0_221] : memref<2x256x512xf32, #tpu.memory_space<vmem>>, vector<1x256x512xf32>
    %436 = vector.shape_cast %435 : vector<1x256x512xf32> to vector<256x512xf32>
    %cst_222 = arith.constant dense<0.000000e+00> : vector<8x512xf32>
    %437 = tpu.matmul %434, %436, %cst_222 {dimension_numbers = #tpu.dot_dimension_numbers<[1], [0], [0], [1], [0, 0, 1, 1], [], []>} : vector<8x256xf32>, vector<256x512xf32>, vector<8x512xf32> -> vector<8x512xf32>
    %438 = arith.addf %437, %7 : vector<8x512xf32>
    %439 = vector.extract_strided_slice %438 {offsets = [0, 0], sizes = [8, 128], strides = [1, 1]} : vector<8x512xf32> to vector<8x128xf32>
    %440 = arith.negf %439 : vector<8x128xf32>
    %441 = math.exp %440 : vector<8x128xf32>
    %cst_223 = arith.constant 1.000000e+00 : f32
    %442 = vector.broadcast %cst_223 : f32 to vector<8x128xf32>
    %443 = arith.addf %442, %441 : vector<8x128xf32>
    %444 = arith.divf %442, %443 : vector<8x128xf32>
    %445 = vector.extract_strided_slice %438 {offsets = [0, 128], sizes = [8, 128], strides = [1, 1]} : vector<8x512xf32> to vector<8x128xf32>
    %446 = arith.negf %445 : vector<8x128xf32>
    %447 = math.exp %446 : vector<8x128xf32>
    %cst_224 = arith.constant 1.000000e+00 : f32
    %448 = vector.broadcast %cst_224 : f32 to vector<8x128xf32>
    %449 = arith.addf %448, %447 : vector<8x128xf32>
    %450 = arith.divf %448, %449 : vector<8x128xf32>
    %451 = vector.extract_strided_slice %438 {offsets = [0, 256], sizes = [8, 128], strides = [1, 1]} : vector<8x512xf32> to vector<8x128xf32>
    %452 = math.tanh %451 : vector<8x128xf32>
    %453 = vector.extract_strided_slice %438 {offsets = [0, 384], sizes = [8, 128], strides = [1, 1]} : vector<8x512xf32> to vector<8x128xf32>
    %454 = arith.negf %453 : vector<8x128xf32>
    %455 = math.exp %454 : vector<8x128xf32>
    %cst_225 = arith.constant 1.000000e+00 : f32
    %456 = vector.broadcast %cst_225 : f32 to vector<8x128xf32>
    %457 = arith.addf %456, %455 : vector<8x128xf32>
    %458 = arith.divf %456, %457 : vector<8x128xf32>
    %459 = arith.mulf %450, %433 : vector<8x128xf32>
    %460 = arith.mulf %444, %452 : vector<8x128xf32>
    %461 = arith.addf %459, %460 : vector<8x128xf32>
    %462 = math.tanh %461 : vector<8x128xf32>
    %463 = arith.mulf %458, %462 : vector<8x128xf32>
    %c0_226 = arith.constant 0 : index
    %c0_227 = arith.constant 0 : index
    %c0_228 = arith.constant 0 : index
    %464 = vector.load %arg3[%c0_226, %c0_227, %c0_228] : memref<2x8x128xf32, #tpu.memory_space<vmem>>, vector<1x8x128xf32>
    %465 = vector.shape_cast %464 : vector<1x8x128xf32> to vector<8x128xf32>
    %466 = vector.shape_cast %463 : vector<8x128xf32> to vector<1x8x128xf32>
    tpu.vector_store %arg3[%c0_226, %c0_227, %c0_228], %466 {strides = array<i32>} : memref<2x8x128xf32, #tpu.memory_space<vmem>>, vector<1x8x128xf32>,
    %c0_229 = arith.constant 0 : index
    %c0_230 = arith.constant 0 : index
    %c0_231 = arith.constant 0 : index
    %467 = vector.load %arg4[%c0_229, %c0_230, %c0_231] : memref<2x8x128xf32, #tpu.memory_space<vmem>>, vector<1x8x128xf32>
    %468 = vector.shape_cast %467 : vector<1x8x128xf32> to vector<8x128xf32>
    %469 = vector.shape_cast %461 : vector<8x128xf32> to vector<1x8x128xf32>
    tpu.vector_store %arg4[%c0_229, %c0_230, %c0_231], %469 {strides = array<i32>} : memref<2x8x128xf32, #tpu.memory_space<vmem>>, vector<1x8x128xf32>,
    %c1_232 = arith.constant 1 : index
    %c0_233 = arith.constant 0 : index
    %c0_234 = arith.constant 0 : index
    %470 = vector.load %arg3[%c1_232, %c0_233, %c0_234] : memref<2x8x128xf32, #tpu.memory_space<vmem>>, vector<1x8x128xf32>
    %471 = vector.shape_cast %470 : vector<1x8x128xf32> to vector<8x128xf32>
    %c1_235 = arith.constant 1 : index
    %c0_236 = arith.constant 0 : index
    %c0_237 = arith.constant 0 : index
    %472 = vector.load %arg4[%c1_235, %c0_236, %c0_237] : memref<2x8x128xf32, #tpu.memory_space<vmem>>, vector<1x8x128xf32>
    %473 = vector.shape_cast %472 : vector<1x8x128xf32> to vector<8x128xf32>
    %474 = tpu.concatenate %463, %471 in 1 : vector<8x128xf32>, vector<8x128xf32> -> vector<8x256xf32>
    %c1_238 = arith.constant 1 : index
    %c0_239 = arith.constant 0 : index
    %c0_240 = arith.constant 0 : index
    %475 = vector.load %arg1[%c1_238, %c0_239, %c0_240] : memref<2x256x512xf32, #tpu.memory_space<vmem>>, vector<1x256x512xf32>
    %476 = vector.shape_cast %475 : vector<1x256x512xf32> to vector<256x512xf32>
    %cst_241 = arith.constant dense<0.000000e+00> : vector<8x512xf32>
    %477 = tpu.matmul %474, %476, %cst_241 {dimension_numbers = #tpu.dot_dimension_numbers<[1], [0], [0], [1], [0, 0, 1, 1], [], []>} : vector<8x256xf32>, vector<256x512xf32>, vector<8x512xf32> -> vector<8x512xf32>
    %478 = arith.addf %477, %11 : vector<8x512xf32>
    %479 = vector.extract_strided_slice %478 {offsets = [0, 0], sizes = [8, 128], strides = [1, 1]} : vector<8x512xf32> to vector<8x128xf32>
    %480 = arith.negf %479 : vector<8x128xf32>
    %481 = math.exp %480 : vector<8x128xf32>
    %cst_242 = arith.constant 1.000000e+00 : f32
    %482 = vector.broadcast %cst_242 : f32 to vector<8x128xf32>
    %483 = arith.addf %482, %481 : vector<8x128xf32>
    %484 = arith.divf %482, %483 : vector<8x128xf32>
    %485 = vector.extract_strided_slice %478 {offsets = [0, 128], sizes = [8, 128], strides = [1, 1]} : vector<8x512xf32> to vector<8x128xf32>
    %486 = arith.negf %485 : vector<8x128xf32>
    %487 = math.exp %486 : vector<8x128xf32>
    %cst_243 = arith.constant 1.000000e+00 : f32
    %488 = vector.broadcast %cst_243 : f32 to vector<8x128xf32>
    %489 = arith.addf %488, %487 : vector<8x128xf32>
    %490 = arith.divf %488, %489 : vector<8x128xf32>
    %491 = vector.extract_strided_slice %478 {offsets = [0, 256], sizes = [8, 128], strides = [1, 1]} : vector<8x512xf32> to vector<8x128xf32>
    %492 = math.tanh %491 : vector<8x128xf32>
    %493 = vector.extract_strided_slice %478 {offsets = [0, 384], sizes = [8, 128], strides = [1, 1]} : vector<8x512xf32> to vector<8x128xf32>
    %494 = arith.negf %493 : vector<8x128xf32>
    %495 = math.exp %494 : vector<8x128xf32>
    %cst_244 = arith.constant 1.000000e+00 : f32
    %496 = vector.broadcast %cst_244 : f32 to vector<8x128xf32>
    %497 = arith.addf %496, %495 : vector<8x128xf32>
    %498 = arith.divf %496, %497 : vector<8x128xf32>
    %499 = arith.mulf %490, %473 : vector<8x128xf32>
    %500 = arith.mulf %484, %492 : vector<8x128xf32>
    %501 = arith.addf %499, %500 : vector<8x128xf32>
    %502 = math.tanh %501 : vector<8x128xf32>
    %503 = arith.mulf %498, %502 : vector<8x128xf32>
    %c1_245 = arith.constant 1 : index
    %c0_246 = arith.constant 0 : index
    %c0_247 = arith.constant 0 : index
    %504 = vector.load %arg3[%c1_245, %c0_246, %c0_247] : memref<2x8x128xf32, #tpu.memory_space<vmem>>, vector<1x8x128xf32>
    %505 = vector.shape_cast %504 : vector<1x8x128xf32> to vector<8x128xf32>
    %506 = vector.shape_cast %503 : vector<8x128xf32> to vector<1x8x128xf32>
    tpu.vector_store %arg3[%c1_245, %c0_246, %c0_247], %506 {strides = array<i32>} : memref<2x8x128xf32, #tpu.memory_space<vmem>>, vector<1x8x128xf32>,
    %c1_248 = arith.constant 1 : index
    %c0_249 = arith.constant 0 : index
    %c0_250 = arith.constant 0 : index
    %507 = vector.load %arg4[%c1_248, %c0_249, %c0_250] : memref<2x8x128xf32, #tpu.memory_space<vmem>>, vector<1x8x128xf32>
    %508 = vector.shape_cast %507 : vector<1x8x128xf32> to vector<8x128xf32>
    %509 = vector.shape_cast %501 : vector<8x128xf32> to vector<1x8x128xf32>
    tpu.vector_store %arg4[%c1_248, %c0_249, %c0_250], %509 {strides = array<i32>} : memref<2x8x128xf32, #tpu.memory_space<vmem>>, vector<1x8x128xf32>,
    %c6_i32 = arith.constant 6 : i32
    %510 = arith.index_cast %c6_i32 : i32 to index
    %c0_251 = arith.constant 0 : index
    %c0_252 = arith.constant 0 : index
    %511 = vector.load %arg0[%510, %c0_251, %c0_252] : memref<8x8x128xf32, #tpu.memory_space<vmem>>, vector<1x8x128xf32>
    %512 = vector.shape_cast %511 : vector<1x8x128xf32> to vector<8x128xf32>
    %c0_253 = arith.constant 0 : index
    %c0_254 = arith.constant 0 : index
    %c0_255 = arith.constant 0 : index
    %513 = vector.load %arg3[%c0_253, %c0_254, %c0_255] : memref<2x8x128xf32, #tpu.memory_space<vmem>>, vector<1x8x128xf32>
    %514 = vector.shape_cast %513 : vector<1x8x128xf32> to vector<8x128xf32>
    %c0_256 = arith.constant 0 : index
    %c0_257 = arith.constant 0 : index
    %c0_258 = arith.constant 0 : index
    %515 = vector.load %arg4[%c0_256, %c0_257, %c0_258] : memref<2x8x128xf32, #tpu.memory_space<vmem>>, vector<1x8x128xf32>
    %516 = vector.shape_cast %515 : vector<1x8x128xf32> to vector<8x128xf32>
    %517 = tpu.concatenate %512, %514 in 1 : vector<8x128xf32>, vector<8x128xf32> -> vector<8x256xf32>
    %c0_259 = arith.constant 0 : index
    %c0_260 = arith.constant 0 : index
    %c0_261 = arith.constant 0 : index
    %518 = vector.load %arg1[%c0_259, %c0_260, %c0_261] : memref<2x256x512xf32, #tpu.memory_space<vmem>>, vector<1x256x512xf32>
    %519 = vector.shape_cast %518 : vector<1x256x512xf32> to vector<256x512xf32>
    %cst_262 = arith.constant dense<0.000000e+00> : vector<8x512xf32>
    %520 = tpu.matmul %517, %519, %cst_262 {dimension_numbers = #tpu.dot_dimension_numbers<[1], [0], [0], [1], [0, 0, 1, 1], [], []>} : vector<8x256xf32>, vector<256x512xf32>, vector<8x512xf32> -> vector<8x512xf32>
    %521 = arith.addf %520, %7 : vector<8x512xf32>
    %522 = vector.extract_strided_slice %521 {offsets = [0, 0], sizes = [8, 128], strides = [1, 1]} : vector<8x512xf32> to vector<8x128xf32>
    %523 = arith.negf %522 : vector<8x128xf32>
    %524 = math.exp %523 : vector<8x128xf32>
    %cst_263 = arith.constant 1.000000e+00 : f32
    %525 = vector.broadcast %cst_263 : f32 to vector<8x128xf32>
    %526 = arith.addf %525, %524 : vector<8x128xf32>
    %527 = arith.divf %525, %526 : vector<8x128xf32>
    %528 = vector.extract_strided_slice %521 {offsets = [0, 128], sizes = [8, 128], strides = [1, 1]} : vector<8x512xf32> to vector<8x128xf32>
    %529 = arith.negf %528 : vector<8x128xf32>
    %530 = math.exp %529 : vector<8x128xf32>
    %cst_264 = arith.constant 1.000000e+00 : f32
    %531 = vector.broadcast %cst_264 : f32 to vector<8x128xf32>
    %532 = arith.addf %531, %530 : vector<8x128xf32>
    %533 = arith.divf %531, %532 : vector<8x128xf32>
    %534 = vector.extract_strided_slice %521 {offsets = [0, 256], sizes = [8, 128], strides = [1, 1]} : vector<8x512xf32> to vector<8x128xf32>
    %535 = math.tanh %534 : vector<8x128xf32>
    %536 = vector.extract_strided_slice %521 {offsets = [0, 384], sizes = [8, 128], strides = [1, 1]} : vector<8x512xf32> to vector<8x128xf32>
    %537 = arith.negf %536 : vector<8x128xf32>
    %538 = math.exp %537 : vector<8x128xf32>
    %cst_265 = arith.constant 1.000000e+00 : f32
    %539 = vector.broadcast %cst_265 : f32 to vector<8x128xf32>
    %540 = arith.addf %539, %538 : vector<8x128xf32>
    %541 = arith.divf %539, %540 : vector<8x128xf32>
    %542 = arith.mulf %533, %516 : vector<8x128xf32>
    %543 = arith.mulf %527, %535 : vector<8x128xf32>
    %544 = arith.addf %542, %543 : vector<8x128xf32>
    %545 = math.tanh %544 : vector<8x128xf32>
    %546 = arith.mulf %541, %545 : vector<8x128xf32>
    %c0_266 = arith.constant 0 : index
    %c0_267 = arith.constant 0 : index
    %c0_268 = arith.constant 0 : index
    %547 = vector.load %arg3[%c0_266, %c0_267, %c0_268] : memref<2x8x128xf32, #tpu.memory_space<vmem>>, vector<1x8x128xf32>
    %548 = vector.shape_cast %547 : vector<1x8x128xf32> to vector<8x128xf32>
    %549 = vector.shape_cast %546 : vector<8x128xf32> to vector<1x8x128xf32>
    tpu.vector_store %arg3[%c0_266, %c0_267, %c0_268], %549 {strides = array<i32>} : memref<2x8x128xf32, #tpu.memory_space<vmem>>, vector<1x8x128xf32>,
    %c0_269 = arith.constant 0 : index
    %c0_270 = arith.constant 0 : index
    %c0_271 = arith.constant 0 : index
    %550 = vector.load %arg4[%c0_269, %c0_270, %c0_271] : memref<2x8x128xf32, #tpu.memory_space<vmem>>, vector<1x8x128xf32>
    %551 = vector.shape_cast %550 : vector<1x8x128xf32> to vector<8x128xf32>
    %552 = vector.shape_cast %544 : vector<8x128xf32> to vector<1x8x128xf32>
    tpu.vector_store %arg4[%c0_269, %c0_270, %c0_271], %552 {strides = array<i32>} : memref<2x8x128xf32, #tpu.memory_space<vmem>>, vector<1x8x128xf32>,
    %c1_272 = arith.constant 1 : index
    %c0_273 = arith.constant 0 : index
    %c0_274 = arith.constant 0 : index
    %553 = vector.load %arg3[%c1_272, %c0_273, %c0_274] : memref<2x8x128xf32, #tpu.memory_space<vmem>>, vector<1x8x128xf32>
    %554 = vector.shape_cast %553 : vector<1x8x128xf32> to vector<8x128xf32>
    %c1_275 = arith.constant 1 : index
    %c0_276 = arith.constant 0 : index
    %c0_277 = arith.constant 0 : index
    %555 = vector.load %arg4[%c1_275, %c0_276, %c0_277] : memref<2x8x128xf32, #tpu.memory_space<vmem>>, vector<1x8x128xf32>
    %556 = vector.shape_cast %555 : vector<1x8x128xf32> to vector<8x128xf32>
    %557 = tpu.concatenate %546, %554 in 1 : vector<8x128xf32>, vector<8x128xf32> -> vector<8x256xf32>
    %c1_278 = arith.constant 1 : index
    %c0_279 = arith.constant 0 : index
    %c0_280 = arith.constant 0 : index
    %558 = vector.load %arg1[%c1_278, %c0_279, %c0_280] : memref<2x256x512xf32, #tpu.memory_space<vmem>>, vector<1x256x512xf32>
    %559 = vector.shape_cast %558 : vector<1x256x512xf32> to vector<256x512xf32>
    %cst_281 = arith.constant dense<0.000000e+00> : vector<8x512xf32>
    %560 = tpu.matmul %557, %559, %cst_281 {dimension_numbers = #tpu.dot_dimension_numbers<[1], [0], [0], [1], [0, 0, 1, 1], [], []>} : vector<8x256xf32>, vector<256x512xf32>, vector<8x512xf32> -> vector<8x512xf32>
    %561 = arith.addf %560, %11 : vector<8x512xf32>
    %562 = vector.extract_strided_slice %561 {offsets = [0, 0], sizes = [8, 128], strides = [1, 1]} : vector<8x512xf32> to vector<8x128xf32>
    %563 = arith.negf %562 : vector<8x128xf32>
    %564 = math.exp %563 : vector<8x128xf32>
    %cst_282 = arith.constant 1.000000e+00 : f32
    %565 = vector.broadcast %cst_282 : f32 to vector<8x128xf32>
    %566 = arith.addf %565, %564 : vector<8x128xf32>
    %567 = arith.divf %565, %566 : vector<8x128xf32>
    %568 = vector.extract_strided_slice %561 {offsets = [0, 128], sizes = [8, 128], strides = [1, 1]} : vector<8x512xf32> to vector<8x128xf32>
    %569 = arith.negf %568 : vector<8x128xf32>
    %570 = math.exp %569 : vector<8x128xf32>
    %cst_283 = arith.constant 1.000000e+00 : f32
    %571 = vector.broadcast %cst_283 : f32 to vector<8x128xf32>
    %572 = arith.addf %571, %570 : vector<8x128xf32>
    %573 = arith.divf %571, %572 : vector<8x128xf32>
    %574 = vector.extract_strided_slice %561 {offsets = [0, 256], sizes = [8, 128], strides = [1, 1]} : vector<8x512xf32> to vector<8x128xf32>
    %575 = math.tanh %574 : vector<8x128xf32>
    %576 = vector.extract_strided_slice %561 {offsets = [0, 384], sizes = [8, 128], strides = [1, 1]} : vector<8x512xf32> to vector<8x128xf32>
    %577 = arith.negf %576 : vector<8x128xf32>
    %578 = math.exp %577 : vector<8x128xf32>
    %cst_284 = arith.constant 1.000000e+00 : f32
    %579 = vector.broadcast %cst_284 : f32 to vector<8x128xf32>
    %580 = arith.addf %579, %578 : vector<8x128xf32>
    %581 = arith.divf %579, %580 : vector<8x128xf32>
    %582 = arith.mulf %573, %556 : vector<8x128xf32>
    %583 = arith.mulf %567, %575 : vector<8x128xf32>
    %584 = arith.addf %582, %583 : vector<8x128xf32>
    %585 = math.tanh %584 : vector<8x128xf32>
    %586 = arith.mulf %581, %585 : vector<8x128xf32>
    %c1_285 = arith.constant 1 : index
    %c0_286 = arith.constant 0 : index
    %c0_287 = arith.constant 0 : index
    %587 = vector.load %arg3[%c1_285, %c0_286, %c0_287] : memref<2x8x128xf32, #tpu.memory_space<vmem>>, vector<1x8x128xf32>
    %588 = vector.shape_cast %587 : vector<1x8x128xf32> to vector<8x128xf32>
    %589 = vector.shape_cast %586 : vector<8x128xf32> to vector<1x8x128xf32>
    tpu.vector_store %arg3[%c1_285, %c0_286, %c0_287], %589 {strides = array<i32>} : memref<2x8x128xf32, #tpu.memory_space<vmem>>, vector<1x8x128xf32>,
    %c1_288 = arith.constant 1 : index
    %c0_289 = arith.constant 0 : index
    %c0_290 = arith.constant 0 : index
    %590 = vector.load %arg4[%c1_288, %c0_289, %c0_290] : memref<2x8x128xf32, #tpu.memory_space<vmem>>, vector<1x8x128xf32>
    %591 = vector.shape_cast %590 : vector<1x8x128xf32> to vector<8x128xf32>
    %592 = vector.shape_cast %584 : vector<8x128xf32> to vector<1x8x128xf32>
    tpu.vector_store %arg4[%c1_288, %c0_289, %c0_290], %592 {strides = array<i32>} : memref<2x8x128xf32, #tpu.memory_space<vmem>>, vector<1x8x128xf32>,
    %c7_i32 = arith.constant 7 : i32
    %593 = arith.index_cast %c7_i32 : i32 to index
    %c0_291 = arith.constant 0 : index
    %c0_292 = arith.constant 0 : index
    %594 = vector.load %arg0[%593, %c0_291, %c0_292] : memref<8x8x128xf32, #tpu.memory_space<vmem>>, vector<1x8x128xf32>
    %595 = vector.shape_cast %594 : vector<1x8x128xf32> to vector<8x128xf32>
    %c0_293 = arith.constant 0 : index
    %c0_294 = arith.constant 0 : index
    %c0_295 = arith.constant 0 : index
    %596 = vector.load %arg3[%c0_293, %c0_294, %c0_295] : memref<2x8x128xf32, #tpu.memory_space<vmem>>, vector<1x8x128xf32>
    %597 = vector.shape_cast %596 : vector<1x8x128xf32> to vector<8x128xf32>
    %c0_296 = arith.constant 0 : index
    %c0_297 = arith.constant 0 : index
    %c0_298 = arith.constant 0 : index
    %598 = vector.load %arg4[%c0_296, %c0_297, %c0_298] : memref<2x8x128xf32, #tpu.memory_space<vmem>>, vector<1x8x128xf32>
    %599 = vector.shape_cast %598 : vector<1x8x128xf32> to vector<8x128xf32>
    %600 = tpu.concatenate %595, %597 in 1 : vector<8x128xf32>, vector<8x128xf32> -> vector<8x256xf32>
    %c0_299 = arith.constant 0 : index
    %c0_300 = arith.constant 0 : index
    %c0_301 = arith.constant 0 : index
    %601 = vector.load %arg1[%c0_299, %c0_300, %c0_301] : memref<2x256x512xf32, #tpu.memory_space<vmem>>, vector<1x256x512xf32>
    %602 = vector.shape_cast %601 : vector<1x256x512xf32> to vector<256x512xf32>
    %cst_302 = arith.constant dense<0.000000e+00> : vector<8x512xf32>
    %603 = tpu.matmul %600, %602, %cst_302 {dimension_numbers = #tpu.dot_dimension_numbers<[1], [0], [0], [1], [0, 0, 1, 1], [], []>} : vector<8x256xf32>, vector<256x512xf32>, vector<8x512xf32> -> vector<8x512xf32>
    %604 = arith.addf %603, %7 : vector<8x512xf32>
    %605 = vector.extract_strided_slice %604 {offsets = [0, 0], sizes = [8, 128], strides = [1, 1]} : vector<8x512xf32> to vector<8x128xf32>
    %606 = arith.negf %605 : vector<8x128xf32>
    %607 = math.exp %606 : vector<8x128xf32>
    %cst_303 = arith.constant 1.000000e+00 : f32
    %608 = vector.broadcast %cst_303 : f32 to vector<8x128xf32>
    %609 = arith.addf %608, %607 : vector<8x128xf32>
    %610 = arith.divf %608, %609 : vector<8x128xf32>
    %611 = vector.extract_strided_slice %604 {offsets = [0, 128], sizes = [8, 128], strides = [1, 1]} : vector<8x512xf32> to vector<8x128xf32>
    %612 = arith.negf %611 : vector<8x128xf32>
    %613 = math.exp %612 : vector<8x128xf32>
    %cst_304 = arith.constant 1.000000e+00 : f32
    %614 = vector.broadcast %cst_304 : f32 to vector<8x128xf32>
    %615 = arith.addf %614, %613 : vector<8x128xf32>
    %616 = arith.divf %614, %615 : vector<8x128xf32>
    %617 = vector.extract_strided_slice %604 {offsets = [0, 256], sizes = [8, 128], strides = [1, 1]} : vector<8x512xf32> to vector<8x128xf32>
    %618 = math.tanh %617 : vector<8x128xf32>
    %619 = vector.extract_strided_slice %604 {offsets = [0, 384], sizes = [8, 128], strides = [1, 1]} : vector<8x512xf32> to vector<8x128xf32>
    %620 = arith.negf %619 : vector<8x128xf32>
    %621 = math.exp %620 : vector<8x128xf32>
    %cst_305 = arith.constant 1.000000e+00 : f32
    %622 = vector.broadcast %cst_305 : f32 to vector<8x128xf32>
    %623 = arith.addf %622, %621 : vector<8x128xf32>
    %624 = arith.divf %622, %623 : vector<8x128xf32>
    %625 = arith.mulf %616, %599 : vector<8x128xf32>
    %626 = arith.mulf %610, %618 : vector<8x128xf32>
    %627 = arith.addf %625, %626 : vector<8x128xf32>
    %628 = math.tanh %627 : vector<8x128xf32>
    %629 = arith.mulf %624, %628 : vector<8x128xf32>
    %c0_306 = arith.constant 0 : index
    %c0_307 = arith.constant 0 : index
    %c0_308 = arith.constant 0 : index
    %630 = vector.load %arg3[%c0_306, %c0_307, %c0_308] : memref<2x8x128xf32, #tpu.memory_space<vmem>>, vector<1x8x128xf32>
    %631 = vector.shape_cast %630 : vector<1x8x128xf32> to vector<8x128xf32>
    %632 = vector.shape_cast %629 : vector<8x128xf32> to vector<1x8x128xf32>
    tpu.vector_store %arg3[%c0_306, %c0_307, %c0_308], %632 {strides = array<i32>} : memref<2x8x128xf32, #tpu.memory_space<vmem>>, vector<1x8x128xf32>,
    %c0_309 = arith.constant 0 : index
    %c0_310 = arith.constant 0 : index
    %c0_311 = arith.constant 0 : index
    %633 = vector.load %arg4[%c0_309, %c0_310, %c0_311] : memref<2x8x128xf32, #tpu.memory_space<vmem>>, vector<1x8x128xf32>
    %634 = vector.shape_cast %633 : vector<1x8x128xf32> to vector<8x128xf32>
    %635 = vector.shape_cast %627 : vector<8x128xf32> to vector<1x8x128xf32>
    tpu.vector_store %arg4[%c0_309, %c0_310, %c0_311], %635 {strides = array<i32>} : memref<2x8x128xf32, #tpu.memory_space<vmem>>, vector<1x8x128xf32>,
    %c1_312 = arith.constant 1 : index
    %c0_313 = arith.constant 0 : index
    %c0_314 = arith.constant 0 : index
    %636 = vector.load %arg3[%c1_312, %c0_313, %c0_314] : memref<2x8x128xf32, #tpu.memory_space<vmem>>, vector<1x8x128xf32>
    %637 = vector.shape_cast %636 : vector<1x8x128xf32> to vector<8x128xf32>
    %c1_315 = arith.constant 1 : index
    %c0_316 = arith.constant 0 : index
    %c0_317 = arith.constant 0 : index
    %638 = vector.load %arg4[%c1_315, %c0_316, %c0_317] : memref<2x8x128xf32, #tpu.memory_space<vmem>>, vector<1x8x128xf32>
    %639 = vector.shape_cast %638 : vector<1x8x128xf32> to vector<8x128xf32>
    %640 = tpu.concatenate %629, %637 in 1 : vector<8x128xf32>, vector<8x128xf32> -> vector<8x256xf32>
    %c1_318 = arith.constant 1 : index
    %c0_319 = arith.constant 0 : index
    %c0_320 = arith.constant 0 : index
    %641 = vector.load %arg1[%c1_318, %c0_319, %c0_320] : memref<2x256x512xf32, #tpu.memory_space<vmem>>, vector<1x256x512xf32>
    %642 = vector.shape_cast %641 : vector<1x256x512xf32> to vector<256x512xf32>
    %cst_321 = arith.constant dense<0.000000e+00> : vector<8x512xf32>
    %643 = tpu.matmul %640, %642, %cst_321 {dimension_numbers = #tpu.dot_dimension_numbers<[1], [0], [0], [1], [0, 0, 1, 1], [], []>} : vector<8x256xf32>, vector<256x512xf32>, vector<8x512xf32> -> vector<8x512xf32>
    %644 = arith.addf %643, %11 : vector<8x512xf32>
    %645 = vector.extract_strided_slice %644 {offsets = [0, 0], sizes = [8, 128], strides = [1, 1]} : vector<8x512xf32> to vector<8x128xf32>
    %646 = arith.negf %645 : vector<8x128xf32>
    %647 = math.exp %646 : vector<8x128xf32>
    %cst_322 = arith.constant 1.000000e+00 : f32
    %648 = vector.broadcast %cst_322 : f32 to vector<8x128xf32>
    %649 = arith.addf %648, %647 : vector<8x128xf32>
    %650 = arith.divf %648, %649 : vector<8x128xf32>
    %651 = vector.extract_strided_slice %644 {offsets = [0, 128], sizes = [8, 128], strides = [1, 1]} : vector<8x512xf32> to vector<8x128xf32>
    %652 = arith.negf %651 : vector<8x128xf32>
    %653 = math.exp %652 : vector<8x128xf32>
    %cst_323 = arith.constant 1.000000e+00 : f32
    %654 = vector.broadcast %cst_323 : f32 to vector<8x128xf32>
    %655 = arith.addf %654, %653 : vector<8x128xf32>
    %656 = arith.divf %654, %655 : vector<8x128xf32>
    %657 = vector.extract_strided_slice %644 {offsets = [0, 256], sizes = [8, 128], strides = [1, 1]} : vector<8x512xf32> to vector<8x128xf32>
    %658 = math.tanh %657 : vector<8x128xf32>
    %659 = vector.extract_strided_slice %644 {offsets = [0, 384], sizes = [8, 128], strides = [1, 1]} : vector<8x512xf32> to vector<8x128xf32>
    %660 = arith.negf %659 : vector<8x128xf32>
    %661 = math.exp %660 : vector<8x128xf32>
    %cst_324 = arith.constant 1.000000e+00 : f32
    %662 = vector.broadcast %cst_324 : f32 to vector<8x128xf32>
    %663 = arith.addf %662, %661 : vector<8x128xf32>
    %664 = arith.divf %662, %663 : vector<8x128xf32>
    %665 = arith.mulf %656, %639 : vector<8x128xf32>
    %666 = arith.mulf %650, %658 : vector<8x128xf32>
    %667 = arith.addf %665, %666 : vector<8x128xf32>
    %668 = math.tanh %667 : vector<8x128xf32>
    %669 = arith.mulf %664, %668 : vector<8x128xf32>
    %c1_325 = arith.constant 1 : index
    %c0_326 = arith.constant 0 : index
    %c0_327 = arith.constant 0 : index
    %670 = vector.load %arg3[%c1_325, %c0_326, %c0_327] : memref<2x8x128xf32, #tpu.memory_space<vmem>>, vector<1x8x128xf32>
    %671 = vector.shape_cast %670 : vector<1x8x128xf32> to vector<8x128xf32>
    %672 = vector.shape_cast %669 : vector<8x128xf32> to vector<1x8x128xf32>
    tpu.vector_store %arg3[%c1_325, %c0_326, %c0_327], %672 {strides = array<i32>} : memref<2x8x128xf32, #tpu.memory_space<vmem>>, vector<1x8x128xf32>,
    %c1_328 = arith.constant 1 : index
    %c0_329 = arith.constant 0 : index
    %c0_330 = arith.constant 0 : index
    %673 = vector.load %arg4[%c1_328, %c0_329, %c0_330] : memref<2x8x128xf32, #tpu.memory_space<vmem>>, vector<1x8x128xf32>
    %674 = vector.shape_cast %673 : vector<1x8x128xf32> to vector<8x128xf32>
    %675 = vector.shape_cast %667 : vector<8x128xf32> to vector<1x8x128xf32>
    tpu.vector_store %arg4[%c1_328, %c0_329, %c0_330], %675 {strides = array<i32>} : memref<2x8x128xf32, #tpu.memory_space<vmem>>, vector<1x8x128xf32>,
    %c8_i32 = arith.constant 8 : i32
    return
  }
}

</mosaic_0001>

<bundles_post_ra>
// kernel: encoder_forward.1
= control target key start
LH: loop header
LB: loop body
LE: loop exit
PB: predicated region body
PF: predicated region fallthrough
CT: control target
= control target key end

     0   :  { %10 = vsyncpa [#allocation3], 0  ;;  %s7294_s15 = smov [#allocation2]   ;;  %s7565_s0 = inlined_call_operand.vmem [shape: f32[8,8,128], index: 0, kind: input, shape index: {}]   ;;  %s7566_s1 = inlined_call_operand.hbm [shape: f32[2,256,512], index: 1, kind: input, shape index: {}]   ;;  %s7567_s2 = inlined_call_operand.vmem [shape: f32[2,1,512], index: 2, kind: input, shape index: {}]   ;;  %s7568_s3 = inlined_call_operand.vmem [shape: f32[2,8,128], index: 3, kind: output, shape index: {0}]   ;;  %s7569_s4 = inlined_call_operand.vmem [shape: f32[2,8,128], index: 4, kind: output, shape index: {1}]  }
   0x1   :  { %s18_s16 = sshll.u32 %s7294_s15, 4  ;;  %s7270_s19 = scalar_lea.hbm %s7566_s1, 32768  ;;  %s19_s16 = int_to_ptr.vmem [resolvable:$true] %s18_s16 }
   0x2   :  { %p7271_p0 = scmp.ne.s32.totalorder %s7566_s1, %s7270_s19  ;;  %p7274_p1 = scmp.lt.u32.totalorder %s7270_s19, %s7566_s1 }
   0x4   :  { %p7276_p2 = pnand %p7274_p1, %p7271_p0 }
   0x6   :  { %7279 = shalt.err (!%p7276_p2)
}
   0x7   :  { %s7280_s24 = scalar_lea.vmem %s19_s16, 32768  ;;  %p7285_p4 = scmp.lt.s32.totalorder %s19_s16, %s19_s16 }
   0x8   :  { %p7281_p3 = scmp.ne.s32.totalorder %s19_s16, %s7280_s24  ;;  %p7286_p5 = scmp.lt.s32.totalorder %s7280_s24, %s7280_s24 }
   0xa   :  { %p7287_p6 = por %p7286_p5, %p7285_p4 }
   0xc   :  { %p7288_p7 = pnand %p7287_p6, %p7281_p3 }
   0xe   :  { %7291 = shalt.err (!%p7288_p7)
}
   0xf   :  { %s7295_s25 = smov 512   ;;  %s7296_s26 = smov 32  }
  0x10   :  { %24 = dma.hbm_to_vmem [thread:$0]  %s7566_s1, 32768, %s19_s16, [#allocation3], %s7295_s25, %s7295_s25, %s7296_s26  }
  0x11   :  { %7292 = dma.done.wait [#allocation3], 32768  }
  0x12   :  { %7293 = vsyncadd [#allocation3], 4294934528  ;;  %v7297_v0 = vmov 0.0   ;;  %v83_v1 = vld [vmem:[#allocation2 + $0x8] sm:$0xff]  ;;  %v82_v3 = vld [vmem:[#allocation2] sm:$0xff] }
  0x13   :  { %274 = vmatprep.mubr.f32.mxu0 %v7297_v0  ;;  %345 = vmatprep.mubr.f32.mxu1 %v7297_v0  ;;  %v87_v2 = vld [vmem:[#allocation2 + $0x28] sm:$0xff]  ;;  %v86_v5 = vld [vmem:[#allocation2 + $0x20] sm:$0xff]  ;;  %v85_v19 = vld [vmem:[#allocation2 + $0x18] sm:$0xff] }
  0x14   :  { %v4962_v4 = vpack.c.bf16 %v87_v2, %v83_v1  ;;  %v91_v6 = vld [vmem:[#allocation2 + $0x48] sm:$0xff]  ;;  %v4964_v8 = vpack.c.bf16 %v86_v5, %v82_v3  ;;  %v90_v10 = vld [vmem:[#allocation2 + $0x40] sm:$0xff]  ;;  %v89_v20 = vld [vmem:[#allocation2 + $0x38] sm:$0xff] }
  0x15   :  { %v95_v7 = vld [vmem:[#allocation2 + $0x68] sm:$0xff]  ;;  %v94_v11 = vld [vmem:[#allocation2 + $0x60] sm:$0xff]  ;;  %v5026_v22 = vpack.c.bf16 %v89_v20, %v85_v19  ;;  %v84_v23 = vld [vmem:[#allocation2 + $0x10] sm:$0xff] }
  0x16   :  { %v4966_v9 = vpack.c.bf16 %v95_v7, %v91_v6  ;;  %v99_v12 = vld [vmem:[#allocation2 + $0x88] sm:$0xff]  ;;  %4963 = vmatprep.subr.bf16.mxu0 %v4962_v4  ;;  %v4968_v14 = vpack.c.bf16 %v94_v11, %v90_v10  ;;  %v98_v15 = vld [vmem:[#allocation2 + $0x80] sm:$0xff]  ;;  %v88_v24 = vld [vmem:[#allocation2 + $0x30] sm:$0xff] }
  0x17   :  { %v103_v13 = vld [vmem:[#allocation2 + $0xa8] sm:$0xff]  ;;  %4965 = vmatpush1.bf16.msra.mxu0 %v4964_v8  ;;  %v102_v16 = vld [vmem:[#allocation2 + $0xa0] sm:$0xff]  ;;  %v5028_v25 = vpack.c.bf16 %v88_v24, %v84_v23  ;;  %5027 = vmatprep.subr.bf16.mxu1 %v5026_v22  ;;  %v93_v27 = vld [vmem:[#allocation2 + $0x58] sm:$0xff] }
  0x18   :  { %4967 = vmatprep.subr.bf16.mxu0 %v4966_v9  ;;  %v4970_v17 = vpack.c.bf16 %v103_v13, %v99_v12  ;;  %v107_v18 = vld [vmem:[#allocation2 + $0xc8] sm:$0xff]  ;;  %v4972_v26 = vpack.c.bf16 %v102_v16, %v98_v15  ;;  %v97_v28 = vld [vmem:[#allocation2 + $0x78] sm:$0xff]  ;;  %v92_v29 = vld [vmem:[#allocation2 + $0x50] sm:$0xff] }
  0x19   :  { %v111_v21 = vld [vmem:[#allocation2 + $0xe8] sm:$0xff]  ;;  %v106_v31 = vld [vmem:[#allocation2 + $0xc0] sm:$0xff]  ;;  %5029 = vmatpush1.bf16.msra.mxu1 %v5028_v25  ;;  %v5030_v33 = vpack.c.bf16 %v97_v28, %v93_v27  ;;  %v96_v34 = vld [vmem:[#allocation2 + $0x70] sm:$0xff] }
  0x1a   :  { %v4974_v30 = vpack.c.bf16 %v111_v21, %v107_v18  ;;  %v110_v32 = vld [vmem:[#allocation2 + $0xe0] sm:$0xff]  ;;  %v115_v35 = vld [vmem:[#allocation2 + $0x108] sm:$0xff]  ;;  %v5032_v37 = vpack.c.bf16 %v96_v34, %v92_v29  ;;  %v101_v38 = vld [vmem:[#allocation2 + $0x98] sm:$0xff] }
  0x1b   :  { %4969 = vmatpush1.bf16.msra.mxu0 %v4968_v14  ;;  %v119_v36 = vld [vmem:[#allocation2 + $0x128] sm:$0xff]  ;;  %5031 = vmatprep.subr.bf16.mxu1 %v5030_v33  ;;  %v105_v39 = vld [vmem:[#allocation2 + $0xb8] sm:$0xff]  ;;  %v100_v40 = vld [vmem:[#allocation2 + $0x90] sm:$0xff]  ;;  %v4976_v42 = vpack.c.bf16 %v110_v32, %v106_v31 }
  0x1c   :  { %4971 = vmatprep.subr.bf16.mxu0 %v4970_v17  ;;  %v104_v41 = vld [vmem:[#allocation2 + $0xb0] sm:$0xff]  ;;  %v114_v43 = vld [vmem:[#allocation2 + $0x100] sm:$0xff]  ;;  %v5034_v45 = vpack.c.bf16 %v105_v39, %v101_v38  ;;  %v4978_v46 = vpack.c.bf16 %v119_v36, %v115_v35  ;;  %v123_v47 = vld [vmem:[#allocation2 + $0x148] sm:$0xff] }
  0x1d   :  { %v118_v44 = vld [vmem:[#allocation2 + $0x120] sm:$0xff]  ;;  %5033 = vmatpush1.bf16.msra.mxu1 %v5032_v37  ;;  %v5036_v48 = vpack.c.bf16 %v104_v41, %v100_v40  ;;  %v109_v49 = vld [vmem:[#allocation2 + $0xd8] sm:$0xff]  ;;  %v127_v51 = vld [vmem:[#allocation2 + $0x168] sm:$0xff] }
  0x1e   :  { %v113_v50 = vld [vmem:[#allocation2 + $0xf8] sm:$0xff]  ;;  %5035 = vmatprep.subr.bf16.mxu1 %v5034_v45  ;;  %v108_v53 = vld [vmem:[#allocation2 + $0xd0] sm:$0xff]  ;;  %v4980_v55 = vpack.c.bf16 %v118_v44, %v114_v43  ;;  %v4982_v58 = vpack.c.bf16 %v127_v51, %v123_v47  ;;  %v122_v59 = vld [vmem:[#allocation2 + $0x140] sm:$0xff] }
  0x1f   :  { %4973 = vmatpush1.bf16.msra.mxu0 %v4972_v26  ;;  %v5038_v52 = vpack.c.bf16 %v113_v50, %v109_v49  ;;  %v112_v54 = vld [vmem:[#allocation2 + $0xf0] sm:$0xff]  ;;  %v117_v56 = vld [vmem:[#allocation2 + $0x118] sm:$0xff]  ;;  %v126_v60 = vld [vmem:[#allocation2 + $0x160] sm:$0xff] }
  0x20   :  { %4975 = vmatprep.subr.bf16.mxu0 %v4974_v30  ;;  %v121_v57 = vld [vmem:[#allocation2 + $0x138] sm:$0xff]  ;;  %v131_v61 = vld [vmem:[#allocation2 + $0x188] sm:$0xff]  ;;  %v5040_v62 = vpack.c.bf16 %v112_v54, %v108_v53  ;;  %v116_v2 = vld [vmem:[#allocation2 + $0x110] sm:$0xff]  ;;  %v4984_v6 = vpack.c.bf16 %v126_v60, %v122_v59 }
  0x21   :  { %5037 = vmatpush1.bf16.msra.mxu1 %v5036_v48  ;;  %v135_v63 = vld [vmem:[#allocation2 + $0x1a8] sm:$0xff]  ;;  %v5042_v1 = vpack.c.bf16 %v121_v57, %v117_v56  ;;  %v120_v3 = vld [vmem:[#allocation2 + $0x130] sm:$0xff]  ;;  %v125_v4 = vld [vmem:[#allocation2 + $0x158] sm:$0xff] }
  0x22   :  { %5039 = vmatprep.subr.bf16.mxu1 %v5038_v52  ;;  %v129_v5 = vld [vmem:[#allocation2 + $0x178] sm:$0xff]  ;;  %v4986_v7 = vpack.c.bf16 %v135_v63, %v131_v61  ;;  %v130_v8 = vld [vmem:[#allocation2 + $0x180] sm:$0xff]  ;;  %v139_v10 = vld [vmem:[#allocation2 + $0x1c8] sm:$0xff]  ;;  %v5044_v11 = vpack.c.bf16 %v120_v3, %v116_v2 }
  0x23   :  { %4977 = vmatpush1.bf16.msra.mxu0 %v4976_v42  ;;  %v134_v9 = vld [vmem:[#allocation2 + $0x1a0] sm:$0xff]  ;;  %v143_v12 = vld [vmem:[#allocation2 + $0x1e8] sm:$0xff]  ;;  %v5046_v13 = vpack.c.bf16 %v129_v5, %v125_v4  ;;  %v124_v14 = vld [vmem:[#allocation2 + $0x150] sm:$0xff] }
  0x24   :  { %4979 = vmatprep.subr.bf16.mxu0 %v4978_v46  ;;  %v128_v15 = vld [vmem:[#allocation2 + $0x170] sm:$0xff]  ;;  %v133_v16 = vld [vmem:[#allocation2 + $0x198] sm:$0xff]  ;;  %v4988_v18 = vpack.c.bf16 %v134_v9, %v130_v8  ;;  %v4990_v19 = vpack.c.bf16 %v143_v12, %v139_v10  ;;  %v138_v20 = vld [vmem:[#allocation2 + $0x1c0] sm:$0xff] }
  0x25   :  { %5041 = vmatpush1.bf16.msra.mxu1 %v5040_v62  ;;  %v137_v17 = vld [vmem:[#allocation2 + $0x1b8] sm:$0xff]  ;;  %v142_v21 = vld [vmem:[#allocation2 + $0x1e0] sm:$0xff]  ;;  %v147_v22 = vld [vmem:[#allocation2 + $0x208] sm:$0xff]  ;;  %v5048_v23 = vpack.c.bf16 %v128_v15, %v124_v14 }
  0x26   :  { %5043 = vmatprep.subr.bf16.mxu1 %v5042_v1  ;;  %v151_v24 = vld [vmem:[#allocation2 + $0x228] sm:$0xff]  ;;  %v5050_v25 = vpack.c.bf16 %v137_v17, %v133_v16  ;;  %v132_v26 = vld [vmem:[#allocation2 + $0x190] sm:$0xff]  ;;  %v141_v28 = vld [vmem:[#allocation2 + $0x1d8] sm:$0xff]  ;;  %v4992_v30 = vpack.c.bf16 %v142_v21, %v138_v20 }
  0x27   :  { %4981 = vmatpush1.bf16.msra.mxu0 %v4980_v55  ;;  %v136_v27 = vld [vmem:[#allocation2 + $0x1b0] sm:$0xff]  ;;  %v145_v29 = vld [vmem:[#allocation2 + $0x1f8] sm:$0xff]  ;;  %v4994_v31 = vpack.c.bf16 %v151_v24, %v147_v22  ;;  %v146_v32 = vld [vmem:[#allocation2 + $0x200] sm:$0xff] }
  0x28   :  { %4983 = vmatprep.subr.bf16.mxu0 %v4982_v58  ;;  %v150_v33 = vld [vmem:[#allocation2 + $0x220] sm:$0xff]  ;;  %v155_v34 = vld [vmem:[#allocation2 + $0x248] sm:$0xff]  ;;  %v5052_v35 = vpack.c.bf16 %v136_v27, %v132_v26  ;;  %v5054_v37 = vpack.c.bf16 %v145_v29, %v141_v28  ;;  %v140_v38 = vld [vmem:[#allocation2 + $0x1d0] sm:$0xff] }
  0x29   :  { %5045 = vmatpush1.bf16.msra.mxu1 %v5044_v11  ;;  %v159_v36 = vld [vmem:[#allocation2 + $0x268] sm:$0xff]  ;;  %v144_v39 = vld [vmem:[#allocation2 + $0x1f0] sm:$0xff]  ;;  %v149_v40 = vld [vmem:[#allocation2 + $0x218] sm:$0xff]  ;;  %v4996_v42 = vpack.c.bf16 %v150_v33, %v146_v32 }
  0x2a   :  { %5047 = vmatprep.subr.bf16.mxu1 %v5046_v13  ;;  %v153_v41 = vld [vmem:[#allocation2 + $0x238] sm:$0xff]  ;;  %v4998_v43 = vpack.c.bf16 %v159_v36, %v155_v34  ;;  %v154_v44 = vld [vmem:[#allocation2 + $0x240] sm:$0xff]  ;;  %v163_v46 = vld [vmem:[#allocation2 + $0x288] sm:$0xff]  ;;  %v5056_v47 = vpack.c.bf16 %v144_v39, %v140_v38 }
  0x2b   :  { %4985 = vmatpush1.bf16.msra.mxu0 %v4984_v6  ;;  %v158_v45 = vld [vmem:[#allocation2 + $0x260] sm:$0xff]  ;;  %v167_v48 = vld [vmem:[#allocation2 + $0x2a8] sm:$0xff]  ;;  %v5058_v49 = vpack.c.bf16 %v153_v41, %v149_v40  ;;  %v148_v50 = vld [vmem:[#allocation2 + $0x210] sm:$0xff] }
  0x2c   :  { %4987 = vmatprep.subr.bf16.mxu0 %v4986_v7  ;;  %v152_v51 = vld [vmem:[#allocation2 + $0x230] sm:$0xff]  ;;  %v157_v52 = vld [vmem:[#allocation2 + $0x258] sm:$0xff]  ;;  %v5000_v54 = vpack.c.bf16 %v158_v45, %v154_v44  ;;  %v5002_v55 = vpack.c.bf16 %v167_v48, %v163_v46  ;;  %v162_v56 = vld [vmem:[#allocation2 + $0x280] sm:$0xff] }
  0x2d   :  { %5049 = vmatpush1.bf16.msra.mxu1 %v5048_v23  ;;  %v161_v53 = vld [vmem:[#allocation2 + $0x278] sm:$0xff]  ;;  %v166_v57 = vld [vmem:[#allocation2 + $0x2a0] sm:$0xff]  ;;  %v171_v58 = vld [vmem:[#allocation2 + $0x2c8] sm:$0xff]  ;;  %v5060_v59 = vpack.c.bf16 %v152_v51, %v148_v50 }
  0x2e   :  { %5051 = vmatprep.subr.bf16.mxu1 %v5050_v25  ;;  %v175_v60 = vld [vmem:[#allocation2 + $0x2e8] sm:$0xff]  ;;  %v5062_v61 = vpack.c.bf16 %v161_v53, %v157_v52  ;;  %v156_v62 = vld [vmem:[#allocation2 + $0x250] sm:$0xff]  ;;  %v165_v1 = vld [vmem:[#allocation2 + $0x298] sm:$0xff]  ;;  %v5004_v3 = vpack.c.bf16 %v166_v57, %v162_v56 }
  0x2f   :  { %4989 = vmatpush1.bf16.msra.mxu0 %v4988_v18  ;;  %v160_v63 = vld [vmem:[#allocation2 + $0x270] sm:$0xff]  ;;  %v169_v2 = vld [vmem:[#allocation2 + $0x2b8] sm:$0xff]  ;;  %v5006_v4 = vpack.c.bf16 %v175_v60, %v171_v58  ;;  %v170_v5 = vld [vmem:[#allocation2 + $0x2c0] sm:$0xff] }
  0x30   :  { %4991 = vmatprep.subr.bf16.mxu0 %v4990_v19  ;;  %v174_v6 = vld [vmem:[#allocation2 + $0x2e0] sm:$0xff]  ;;  %v179_v7 = vld [vmem:[#allocation2 + $0x308] sm:$0xff]  ;;  %v5064_v8 = vpack.c.bf16 %v160_v63, %v156_v62  ;;  %v5066_v10 = vpack.c.bf16 %v169_v2, %v165_v1  ;;  %v164_v11 = vld [vmem:[#allocation2 + $0x290] sm:$0xff] }
  0x31   :  { %5053 = vmatpush1.bf16.msra.mxu1 %v5052_v35  ;;  %v183_v9 = vld [vmem:[#allocation2 + $0x328] sm:$0xff]  ;;  %v168_v12 = vld [vmem:[#allocation2 + $0x2b0] sm:$0xff]  ;;  %v173_v13 = vld [vmem:[#allocation2 + $0x2d8] sm:$0xff]  ;;  %v5008_v15 = vpack.c.bf16 %v174_v6, %v170_v5 }
  0x32   :  { %5055 = vmatprep.subr.bf16.mxu1 %v5054_v37  ;;  %v177_v14 = vld [vmem:[#allocation2 + $0x2f8] sm:$0xff]  ;;  %v5010_v16 = vpack.c.bf16 %v183_v9, %v179_v7  ;;  %v178_v17 = vld [vmem:[#allocation2 + $0x300] sm:$0xff]  ;;  %v187_v19 = vld [vmem:[#allocation2 + $0x348] sm:$0xff]  ;;  %v5068_v20 = vpack.c.bf16 %v168_v12, %v164_v11 }
  0x33   :  { %4993 = vmatpush1.bf16.msra.mxu0 %v4992_v30  ;;  %v182_v18 = vld [vmem:[#allocation2 + $0x320] sm:$0xff]  ;;  %v191_v21 = vld [vmem:[#allocation2 + $0x368] sm:$0xff]  ;;  %v5070_v22 = vpack.c.bf16 %v177_v14, %v173_v13  ;;  %v172_v23 = vld [vmem:[#allocation2 + $0x2d0] sm:$0xff] }
  0x34   :  { %4995 = vmatprep.subr.bf16.mxu0 %v4994_v31  ;;  %v176_v24 = vld [vmem:[#allocation2 + $0x2f0] sm:$0xff]  ;;  %v181_v25 = vld [vmem:[#allocation2 + $0x318] sm:$0xff]  ;;  %v5012_v27 = vpack.c.bf16 %v182_v18, %v178_v17  ;;  %v5014_v28 = vpack.c.bf16 %v191_v21, %v187_v19  ;;  %v186_v29 = vld [vmem:[#allocation2 + $0x340] sm:$0xff] }
  0x35   :  { %5057 = vmatpush1.bf16.msra.mxu1 %v5056_v47  ;;  %v185_v26 = vld [vmem:[#allocation2 + $0x338] sm:$0xff]  ;;  %v190_v30 = vld [vmem:[#allocation2 + $0x360] sm:$0xff]  ;;  %v195_v31 = vld [vmem:[#allocation2 + $0x388] sm:$0xff]  ;;  %v5072_v32 = vpack.c.bf16 %v176_v24, %v172_v23 }
  0x36   :  { %5059 = vmatprep.subr.bf16.mxu1 %v5058_v49  ;;  %v199_v33 = vld [vmem:[#allocation2 + $0x3a8] sm:$0xff]  ;;  %v5074_v34 = vpack.c.bf16 %v185_v26, %v181_v25  ;;  %v180_v35 = vld [vmem:[#allocation2 + $0x310] sm:$0xff]  ;;  %v189_v37 = vld [vmem:[#allocation2 + $0x358] sm:$0xff]  ;;  %v5016_v39 = vpack.c.bf16 %v190_v30, %v186_v29 }
  0x37   :  { %4997 = vmatpush1.bf16.msra.mxu0 %v4996_v42  ;;  %v184_v36 = vld [vmem:[#allocation2 + $0x330] sm:$0xff]  ;;  %v193_v38 = vld [vmem:[#allocation2 + $0x378] sm:$0xff]  ;;  %v5018_v40 = vpack.c.bf16 %v199_v33, %v195_v31  ;;  %v194_v41 = vld [vmem:[#allocation2 + $0x380] sm:$0xff] }
  0x38   :  { %4999 = vmatprep.subr.bf16.mxu0 %v4998_v43  ;;  %v198_v42 = vld [vmem:[#allocation2 + $0x3a0] sm:$0xff]  ;;  %v203_v43 = vld [vmem:[#allocation2 + $0x3c8] sm:$0xff]  ;;  %v5076_v44 = vpack.c.bf16 %v184_v36, %v180_v35  ;;  %v5078_v46 = vpack.c.bf16 %v193_v38, %v189_v37  ;;  %v188_v47 = vld [vmem:[#allocation2 + $0x350] sm:$0xff] }
  0x39   :  { %5061 = vmatpush1.bf16.msra.mxu1 %v5060_v59  ;;  %v207_v45 = vld [vmem:[#allocation2 + $0x3e8] sm:$0xff]  ;;  %v192_v48 = vld [vmem:[#allocation2 + $0x370] sm:$0xff]  ;;  %v197_v49 = vld [vmem:[#allocation2 + $0x398] sm:$0xff]  ;;  %v5020_v51 = vpack.c.bf16 %v198_v42, %v194_v41 }
  0x3a   :  { %5063 = vmatprep.subr.bf16.mxu1 %v5062_v61  ;;  %v201_v50 = vld [vmem:[#allocation2 + $0x3b8] sm:$0xff]  ;;  %v5022_v52 = vpack.c.bf16 %v207_v45, %v203_v43  ;;  %v202_v53 = vld [vmem:[#allocation2 + $0x3c0] sm:$0xff]  ;;  %v196_v56 = vld [vmem:[#allocation2 + $0x390] sm:$0xff] }
  0x3b   :  { %5001 = vmatpush1.bf16.msra.mxu0 %v5000_v54  ;;  %v206_v54 = vld [vmem:[#allocation2 + $0x3e0] sm:$0xff]  ;;  %v5082_v57 = vpack.c.bf16 %v201_v50, %v197_v49  ;;  %v200_v58 = vld [vmem:[#allocation2 + $0x3b0] sm:$0xff]  ;;  %v384_v59 = vld [vmem:[#allocation2 + $0x408] sm:$0xff] }
  0x3c   :  { %5003 = vmatprep.subr.bf16.mxu0 %v5002_v55  ;;  %v5080_v55 = vpack.c.bf16 %v192_v48, %v188_v47  ;;  %v388_v60 = vld [vmem:[#allocation2 + $0x428] sm:$0xff]  ;;  %v205_v61 = vld [vmem:[#allocation2 + $0x3d8] sm:$0xff]  ;;  %v5024_v63 = vpack.c.bf16 %v206_v54, %v202_v53  ;;  %v5084_v1 = vpack.c.bf16 %v200_v58, %v196_v56  ;;  %v204_v2 = vld [vmem:[#allocation2 + $0x3d0] sm:$0xff] }
  0x3d   :  { %5065 = vmatpush1.bf16.msra.mxu1 %v5064_v8  ;;  %v209_v62 = vld [vmem:[#allocation2 + $0x3f8] sm:$0xff]  ;;  %v387_v5 = vld [vmem:[#allocation2 + $0x420] sm:$0xff]  ;;  %v208_v7 = vld [vmem:[#allocation2 + $0x3f0] sm:$0xff] }
  0x3e   :  { %5067 = vmatprep.subr.bf16.mxu1 %v5066_v10  ;;  %v5086_v6 = vpack.c.bf16 %v209_v62, %v205_v61  ;;  %v392_v8 = vld [vmem:[#allocation2 + $0x448] sm:$0xff]  ;;  %v386_v10 = vld [vmem:[#allocation2 + $0x418] sm:$0xff]  ;;  %v79_v12 = vld [vmem:[%s7565_s0] sm:$0xff]  ;;  %v5088_v14 = vpack.c.bf16 %v208_v7, %v204_v2 }
  0x3f   :  { %5005 = vmatpush1.bf16.msra.mxu0 %v5004_v3  ;;  %v5090_v3 = vpack.c.bf16 %v388_v60, %v384_v59  ;;  %v396_v9 = vld [vmem:[#allocation2 + $0x468] sm:$0xff]  ;;  %v390_v11 = vld [vmem:[#allocation2 + $0x438] sm:$0xff]  ;;  %v391_v17 = vld [vmem:[#allocation2 + $0x440] sm:$0xff] }
  0x40   :  { %5007 = vmatprep.subr.bf16.mxu0 %v5006_v4  ;;  %v383_v4 = vld [vmem:[#allocation2 + $0x400] sm:$0xff]  ;;  %v5154_v19 = vpack.c.bf16 %v390_v11, %v386_v10  ;;  %v400_v21 = vld [vmem:[#allocation2 + $0x488] sm:$0xff]  ;;  %v394_v23 = vld [vmem:[#allocation2 + $0x458] sm:$0xff] }
  0x41   :  { %5069 = vmatpush1.bf16.msra.mxu1 %v5068_v20  ;;  %v5092_v13 = vpack.c.bf16 %v387_v5, %v383_v4  ;;  %v395_v18 = vld [vmem:[#allocation2 + $0x460] sm:$0xff]  ;;  %v389_v20 = vld [vmem:[#allocation2 + $0x430] sm:$0xff]  ;;  %v398_v24 = vld [vmem:[#allocation2 + $0x478] sm:$0xff] }
  0x42   :  { %5071 = vmatprep.subr.bf16.mxu1 %v5070_v22  ;;  %v404_v22 = vld [vmem:[#allocation2 + $0x4a8] sm:$0xff]  ;;  %v5096_v25 = vpack.c.bf16 %v395_v18, %v391_v17  ;;  %v399_v29 = vld [vmem:[#allocation2 + $0x480] sm:$0xff]  ;;  %v5158_v31 = vpack.c.bf16 %v398_v24, %v394_v23  ;;  %v402_v35 = vld [vmem:[#allocation2 + $0x498] sm:$0xff] }
  0x43   :  { %5009 = vmatpush1.bf16.msra.mxu0 %v5008_v15  ;;  %v385_v15 = vld [vmem:[#allocation2 + $0x410] sm:$0xff]  ;;  %v403_v30 = vld [vmem:[#allocation2 + $0x4a0] sm:$0xff]  ;;  %v408_v33 = vld [vmem:[#allocation2 + $0x4c8] sm:$0xff] }
  0x44   :  { %5011 = vmatprep.subr.bf16.mxu0 %v5010_v16  ;;  %v5094_v16 = vpack.c.bf16 %v396_v9, %v392_v8  ;;  %v5156_v26 = vpack.c.bf16 %v389_v20, %v385_v15  ;;  %v406_v36 = vld [vmem:[#allocation2 + $0x4b8] sm:$0xff]  ;;  %v5100_v37 = vpack.c.bf16 %v403_v30, %v399_v29  ;;  %v407_v41 = vld [vmem:[#allocation2 + $0x4c0] sm:$0xff]  ;;  %v416_v45 = vld [vmem:[#allocation2 + $0x508] sm:$0xff] }
  0x45   :  { %5073 = vmatpush1.bf16.msra.mxu1 %v5072_v32  ;;  %v397_v32 = vld [vmem:[#allocation2 + $0x470] sm:$0xff]  ;;  %v411_v42 = vld [vmem:[#allocation2 + $0x4e0] sm:$0xff]  ;;  %v5162_v43 = vpack.c.bf16 %v406_v36, %v402_v35  ;;  %v410_v47 = vld [vmem:[#allocation2 + $0x4d8] sm:$0xff] }
  0x46   :  { %5075 = vmatprep.subr.bf16.mxu1 %v5074_v34  ;;  %v412_v34 = vld [vmem:[#allocation2 + $0x4e8] sm:$0xff]  ;;  %v414_v48 = vld [vmem:[#allocation2 + $0x4f8] sm:$0xff]  ;;  %v5104_v49 = vpack.c.bf16 %v411_v42, %v407_v41  ;;  %v419_v53 = vld [vmem:[#allocation2 + $0x520] sm:$0xff] }
  0x47   :  { %5013 = vmatpush1.bf16.msra.mxu0 %v5012_v27  ;;  %v393_v27 = vld [vmem:[#allocation2 + $0x450] sm:$0xff]  ;;  %v5166_v54 = vpack.c.bf16 %v414_v48, %v410_v47  ;;  %v422_v58 = vld [vmem:[#allocation2 + $0x538] sm:$0xff]  ;;  %v428_v2 = vld [vmem:[#allocation2 + $0x568] sm:$0xff] }
  0x48   :  { %5015 = vmatprep.subr.bf16.mxu0 %v5014_v28  ;;  %v5098_v28 = vpack.c.bf16 %v404_v22, %v400_v21  ;;  %v5160_v38 = vpack.c.bf16 %v397_v32, %v393_v27  ;;  %v413_v56 = vld [vmem:[#allocation2 + $0x4f0] sm:$0xff]  ;;  %v423_v4 = vld [vmem:[#allocation2 + $0x540] sm:$0xff]  ;;  %v430_v8 = vld [vmem:[#allocation2 + $0x578] sm:$0xff] }
  0x49   :  { %5077 = vmatpush1.bf16.msra.mxu1 %v5076_v44  ;;  %v405_v44 = vld [vmem:[#allocation2 + $0x4b0] sm:$0xff]  ;;  %v427_v5 = vld [vmem:[#allocation2 + $0x560] sm:$0xff]  ;;  %v434_v18 = vld [vmem:[#allocation2 + $0x598] sm:$0xff] }
  0x4a   :  { %5079 = vmatprep.subr.bf16.mxu1 %v5078_v46  ;;  %v420_v46 = vld [vmem:[#allocation2 + $0x528] sm:$0xff]  ;;  %v417_v61 = vld [vmem:[#allocation2 + $0x510] sm:$0xff]  ;;  %v5112_v7 = vpack.c.bf16 %v427_v5, %v423_v4  ;;  %v435_v17 = vld [vmem:[#allocation2 + $0x5a0] sm:$0xff] }
  0x4b   :  { %5017 = vmatpush1.bf16.msra.mxu0 %v5016_v39  ;;  %v401_v39 = vld [vmem:[#allocation2 + $0x490] sm:$0xff]  ;;  %v438_v20 = vld [vmem:[#allocation2 + $0x5b8] sm:$0xff]  ;;  %v443_v29 = vld [vmem:[#allocation2 + $0x5e0] sm:$0xff] }
  0x4c   :  { %5019 = vmatprep.subr.bf16.mxu0 %v5018_v40  ;;  %v5102_v40 = vpack.c.bf16 %v412_v34, %v408_v33  ;;  %v5164_v50 = vpack.c.bf16 %v405_v44, %v401_v39  ;;  %v421_v62 = vld [vmem:[#allocation2 + $0x530] sm:$0xff]  ;;  %v5178_v23 = vpack.c.bf16 %v438_v20, %v434_v18  ;;  %v442_v30 = vld [vmem:[#allocation2 + $0x5d8] sm:$0xff]  ;;  %v451_v41 = vld [vmem:[#allocation2 + $0x620] sm:$0xff] }
  0x4d   :  { %5081 = vmatpush1.bf16.msra.mxu1 %v5080_v55  ;;  %v409_v55 = vld [vmem:[#allocation2 + $0x4d0] sm:$0xff]  ;;  %v446_v32 = vld [vmem:[#allocation2 + $0x5f8] sm:$0xff] }
  0x4e   :  { %5083 = vmatprep.subr.bf16.mxu1 %v5082_v57  ;;  %v418_v57 = vld [vmem:[#allocation2 + $0x518] sm:$0xff]  ;;  %v425_v9 = vld [vmem:[#allocation2 + $0x550] sm:$0xff]  ;;  %v5182_v35 = vpack.c.bf16 %v446_v32, %v442_v30 }
  0x4f   :  { %5021 = vmatpush1.bf16.msra.mxu0 %v5020_v51  ;;  %v5106_v51 = vpack.c.bf16 %v420_v46, %v416_v45  ;;  %v5170_v60 = vpack.c.bf16 %v422_v58, %v418_v57  ;;  %v429_v10 = vld [vmem:[#allocation2 + $0x570] sm:$0xff]  ;;  %v450_v42 = vld [vmem:[#allocation2 + $0x618] sm:$0xff] }
  0x50   :  { %5023 = vmatprep.subr.bf16.mxu0 %v5022_v52  ;;  %v415_v52 = vld [vmem:[#allocation2 + $0x500] sm:$0xff]  ;;  %v433_v21 = vld [vmem:[#allocation2 + $0x590] sm:$0xff]  ;;  %v454_v44 = vld [vmem:[#allocation2 + $0x638] sm:$0xff] }
  0x51   :  { %5085 = vmatpush1.bf16.msra.mxu1 %v5084_v1  ;;  %v5108_v59 = vpack.c.bf16 %v419_v53, %v415_v52  ;;  %v424_v1 = vld [vmem:[#allocation2 + $0x548] sm:$0xff]  ;;  %v437_v22 = vld [vmem:[#allocation2 + $0x5b0] sm:$0xff]  ;;  %v5186_v47 = vpack.c.bf16 %v454_v44, %v450_v42  ;;  %v455_v52 = vld [vmem:[#allocation2 + $0x640] sm:$0xff] }
  0x52   :  { %5087 = vmatprep.subr.bf16.mxu1 %v5086_v6  ;;  %v426_v6 = vld [vmem:[#allocation2 + $0x558] sm:$0xff]  ;;  %v5180_v24 = vpack.c.bf16 %v437_v22, %v433_v21  ;;  %v441_v33 = vld [vmem:[#allocation2 + $0x5d0] sm:$0xff]  ;;  %v459_v53 = vld [vmem:[#allocation2 + $0x660] sm:$0xff] }
  0x53   :  { %5025 = vmatpush1.bf16.msra.mxu0 %v5024_v63  ;;  %v5172_v63 = vpack.c.bf16 %v421_v62, %v417_v61  ;;  %v5174_v11 = vpack.c.bf16 %v430_v8, %v426_v6  ;;  %v445_v34 = vld [vmem:[#allocation2 + $0x5f0] sm:$0xff]  ;;  %v468_v61 = vld [vmem:[#allocation2 + $0x6a8] sm:$0xff]  ;;  %v470_v4 = vld [vmem:[#allocation2 + $0x6b8] sm:$0xff] }
  0x54   :  { %5091 = vmatprep.subr.bf16.mxu0 %v5090_v3  ;;  %v5110_v3 = vpack.c.bf16 %v428_v2, %v424_v1  ;;  %v5184_v36 = vpack.c.bf16 %v445_v34, %v441_v33  ;;  %v449_v45 = vld [vmem:[#allocation2 + $0x610] sm:$0xff]  ;;  %v467_v1 = vld [vmem:[#allocation2 + $0x6a0] sm:$0xff]  ;;  %v466_v2 = vld [vmem:[#allocation2 + $0x698] sm:$0xff] }
  0x55   :  { %5089 = vmatpush1.bf16.msra.mxu1 %v5088_v14  ;;  %v436_v14 = vld [vmem:[#allocation2 + $0x5a8] sm:$0xff]  ;;  %v453_v46 = vld [vmem:[#allocation2 + $0x630] sm:$0xff] }
  0x56   :  { %275 = vmatmul.mubr.f32.vlgmr.msra.gmra.mrb[0].mxu0 %v79_v12  ;;  %5155 = vmatprep.subr.bf16.mxu1 %v5154_v19  ;;  %v5188_v48 = vpack.c.bf16 %v453_v46, %v449_v45  ;;  %v457_v57 = vld [vmem:[#allocation2 + $0x650] sm:$0xff]  ;;  %v480_v21 = vld [vmem:[#allocation2 + $0x708] sm:$0xff] }
  0x57   :  { %5093 = vmatpush1.bf16.msra.mxu0 %v5092_v13  ;;  %575 = vmatprep.mubr.f32.mxu0 %v7297_v0  ;;  %v432_v13 = vld [vmem:[#allocation2 + $0x588] sm:$0xff]  ;;  %v461_v58 = vld [vmem:[#allocation2 + $0x670] sm:$0xff] }
  0x58   :  { %5095 = vmatprep.subr.bf16.mxu0 %v5094_v16  ;;  %346 = vmatmul.mubr.f32.vlgmr.msra.gmra.mrb[0].mxu1 %v79_v12  ;;  %v5176_v12 = vpack.c.bf16 %v429_v10, %v425_v9  ;;  %v5114_v15 = vpack.c.bf16 %v436_v14, %v432_v13  ;;  %v431_v16 = vld [vmem:[#allocation2 + $0x580] sm:$0xff]  ;;  %v465_v5 = vld [vmem:[#allocation2 + $0x690] sm:$0xff]  ;;  %v472_v9 = vld [vmem:[#allocation2 + $0x6c8] sm:$0xff] }
  0x59   :  { %5157 = vmatpush1.bf16.msra.mxu1 %v5156_v26  ;;  %646 = vmatprep.mubr.f32.mxu1 %v7297_v0  ;;  %v5168_v0 = vpack.c.bf16 %v413_v56, %v409_v55  ;;  %v5116_v19 = vpack.c.bf16 %v435_v17, %v431_v16  ;;  %v444_v26 = vld [vmem:[#allocation2 + $0x5e8] sm:$0xff]  ;;  %v5128_v55 = vpack.c.bf16 %v459_v53, %v455_v52  ;;  %v462_v56 = vld [vmem:[#allocation2 + $0x678] sm:$0xff]  ;;  %v469_v6 = vld [vmem:[#allocation2 + $0x6b0] sm:$0xff] }
  0x5a   :  { %5159 = vmatprep.subr.bf16.mxu1 %v5158_v31  ;;  %v5196_v8 = vpack.c.bf16 %v469_v6, %v465_v5  ;;  %v476_v10 = vld [vmem:[#allocation2 + $0x6e8] sm:$0xff]  ;;  %v475_v13 = vld [vmem:[#allocation2 + $0x6e0] sm:$0xff]  ;;  %v474_v14 = vld [vmem:[#allocation2 + $0x6d8] sm:$0xff] }
  0x5b   :  { %5097 = vmatpush1.bf16.msra.mxu0 %v5096_v25  ;;  %v440_v25 = vld [vmem:[#allocation2 + $0x5c8] sm:$0xff]  ;;  %v478_v16 = vld [vmem:[#allocation2 + $0x6f8] sm:$0xff]  ;;  %v473_v17 = vld [vmem:[#allocation2 + $0x6d0] sm:$0xff] }
  0x5c   :  { %5099 = vmatprep.subr.bf16.mxu0 %v5098_v28  ;;  %v5118_v27 = vpack.c.bf16 %v444_v26, %v440_v25  ;;  %v439_v28 = vld [vmem:[#allocation2 + $0x5c0] sm:$0xff]  ;;  %v477_v18 = vld [vmem:[#allocation2 + $0x6f0] sm:$0xff]  ;;  %v484_v22 = vld [vmem:[#allocation2 + $0x728] sm:$0xff] }
  0x5d   :  { %5161 = vmatpush1.bf16.msra.mxu1 %v5160_v38  ;;  %v5120_v31 = vpack.c.bf16 %v443_v29, %v439_v28  ;;  %v452_v38 = vld [vmem:[#allocation2 + $0x628] sm:$0xff]  ;;  %v5200_v20 = vpack.c.bf16 %v477_v18, %v473_v17  ;;  %v483_v25 = vld [vmem:[#allocation2 + $0x720] sm:$0xff]  ;;  %v482_v26 = vld [vmem:[#allocation2 + $0x718] sm:$0xff] }
  0x5e   :  { %5163 = vmatprep.subr.bf16.mxu1 %v5162_v43  ;;  %v486_v28 = vld [vmem:[#allocation2 + $0x738] sm:$0xff]  ;;  %v481_v29 = vld [vmem:[#allocation2 + $0x710] sm:$0xff]  ;;  %v488_v33 = vld [vmem:[#allocation2 + $0x748] sm:$0xff] }
  0x5f   :  { %5101 = vmatpush1.bf16.msra.mxu0 %v5100_v37  ;;  %v448_v37 = vld [vmem:[#allocation2 + $0x608] sm:$0xff]  ;;  %v485_v30 = vld [vmem:[#allocation2 + $0x730] sm:$0xff] }
  0x60   :  { %5103 = vmatprep.subr.bf16.mxu0 %v5102_v40  ;;  %v5122_v39 = vpack.c.bf16 %v452_v38, %v448_v37  ;;  %v447_v40 = vld [vmem:[#allocation2 + $0x600] sm:$0xff]  ;;  %v5204_v32 = vpack.c.bf16 %v485_v30, %v481_v29  ;;  %v492_v34 = vld [vmem:[#allocation2 + $0x768] sm:$0xff]  ;;  %v490_v38 = vld [vmem:[#allocation2 + $0x758] sm:$0xff] }
  0x61   :  { %5165 = vmatpush1.bf16.msra.mxu1 %v5164_v50  ;;  %v5124_v43 = vpack.c.bf16 %v451_v41, %v447_v40  ;;  %v460_v50 = vld [vmem:[#allocation2 + $0x668] sm:$0xff]  ;;  %v491_v37 = vld [vmem:[#allocation2 + $0x760] sm:$0xff]  ;;  %v494_v40 = vld [vmem:[#allocation2 + $0x778] sm:$0xff] }
  0x62   :  { %5167 = vmatprep.subr.bf16.mxu1 %v5166_v54  ;;  %v458_v54 = vld [vmem:[#allocation2 + $0x658] sm:$0xff]  ;;  %v489_v41 = vld [vmem:[#allocation2 + $0x750] sm:$0xff]  ;;  %v496_v45 = vld [vmem:[#allocation2 + $0x788] sm:$0xff] }
  0x63   :  { %5105 = vmatpush1.bf16.msra.mxu0 %v5104_v49  ;;  %v456_v49 = vld [vmem:[#allocation2 + $0x648] sm:$0xff]  ;;  %v493_v42 = vld [vmem:[#allocation2 + $0x770] sm:$0xff] }
  0x64   :  { %5107 = vmatprep.subr.bf16.mxu0 %v5106_v51  ;;  %v5126_v51 = vpack.c.bf16 %v460_v50, %v456_v49  ;;  %v5208_v44 = vpack.c.bf16 %v493_v42, %v489_v41  ;;  %v500_v46 = vld [vmem:[#allocation2 + $0x7a8] sm:$0xff]  ;;  %v499_v49 = vld [vmem:[#allocation2 + $0x7a0] sm:$0xff]  ;;  %v498_v50 = vld [vmem:[#allocation2 + $0x798] sm:$0xff] }
  0x65   :  { %5169 = vmatpush1.bf16.msra.mxu1 %v5168_v0  ;;  %v5192_v0 = vpack.c.bf16 %v461_v58, %v457_v57  ;;  %v508_v58 = vld [vmem:[#allocation2 + $0x7e8] sm:$0xff] }
  0x66   :  { %5171 = vmatprep.subr.bf16.mxu1 %v5170_v60  ;;  %v464_v60 = vld [vmem:[#allocation2 + $0x688] sm:$0xff] }
  0x67   :  { %5109 = vmatpush1.bf16.msra.mxu0 %v5108_v59  ;;  %v5190_v59 = vpack.c.bf16 %v462_v56, %v458_v54  ;;  %v5130_v62 = vpack.c.bf16 %v468_v61, %v464_v60  ;;  %v497_v54 = vld [vmem:[#allocation2 + $0x790] sm:$0xff]  ;;  %v504_v56 = vld [vmem:[#allocation2 + $0x7c8] sm:$0xff]  ;;  %v506_v61 = vld [vmem:[#allocation2 + $0x7d8] sm:$0xff] }
  0x68   :  { %5111 = vmatprep.subr.bf16.mxu0 %v5110_v3  ;;  %v5150_v60 = vpack.c.bf16 %v508_v58, %v504_v56  ;;  %v688_v5 = vld [vmem:[#allocation2 + $0x28] sm:$0xff]  ;;  %v691_v58 = vld [vmem:[#allocation2 + $0x40] sm:$0xff] }
  0x69   :  { %5173 = vmatpush1.bf16.msra.mxu1 %v5172_v63  ;;  %v463_v63 = vld [vmem:[#allocation2 + $0x680] sm:$0xff] }
  0x6a   :  { %5175 = vmatprep.subr.bf16.mxu1 %v5174_v11  ;;  %v5132_v3 = vpack.c.bf16 %v467_v1, %v463_v63  ;;  %v5134_v11 = vpack.c.bf16 %v476_v10, %v472_v9  ;;  %v505_v63 = vld [vmem:[#allocation2 + $0x7d0] sm:$0xff]  ;;  %v690_v9 = vld [vmem:[#allocation2 + $0x38] sm:$0xff] }
  0x6b   :  { %5113 = vmatpush1.bf16.msra.mxu0 %v5112_v7  ;;  %v5194_v7 = vpack.c.bf16 %v470_v4, %v466_v2  ;;  %v684_v4 = vld [vmem:[#allocation2 + $0x8] sm:$0xff] }
  0x6c   :  { %5115 = vmatprep.subr.bf16.mxu0 %v5114_v15  ;;  %v5218_v6 = vpack.c.bf16 %v688_v5, %v684_v4  ;;  %v706_v4 = vld [vmem:[#allocation2 + $0xb8] sm:$0xff] }
  0x6d   :  { %5177 = vmatpush1.bf16.msra.mxu1 %v5176_v12  ;;  %v471_v12 = vld [vmem:[#allocation2 + $0x6c0] sm:$0xff] }
  0x6e   :  { %5179 = vmatprep.subr.bf16.mxu1 %v5178_v23  ;;  %v5136_v15 = vpack.c.bf16 %v475_v13, %v471_v12  ;;  %v5138_v23 = vpack.c.bf16 %v484_v22, %v480_v21 }
  0x6f   :  { %5117 = vmatpush1.bf16.msra.mxu0 %v5116_v19  ;;  %v5198_v19 = vpack.c.bf16 %v478_v16, %v474_v14  ;;  %v34_v14 = vld [vmem:[%s7567_s2] sm:$0xf] }
  0x70   :  { %5119 = vmatprep.subr.bf16.mxu0 %v5118_v27 }
  0x71   :  { %5181 = vmatpush1.bf16.msra.mxu1 %v5180_v24  ;;  %v479_v24 = vld [vmem:[#allocation2 + $0x700] sm:$0xff] }
  0x72   :  { %5183 = vmatprep.subr.bf16.mxu1 %v5182_v35  ;;  %v5140_v27 = vpack.c.bf16 %v483_v25, %v479_v24  ;;  %v5142_v35 = vpack.c.bf16 %v492_v34, %v488_v33 }
  0x73   :  { %5121 = vmatpush1.bf16.msra.mxu0 %v5120_v31  ;;  %v5202_v31 = vpack.c.bf16 %v486_v28, %v482_v26 }
  0x74   :  { %5123 = vmatprep.subr.bf16.mxu0 %v5122_v39 }
  0x75   :  { %5185 = vmatpush1.bf16.msra.mxu1 %v5184_v36  ;;  %v487_v36 = vld [vmem:[#allocation2 + $0x740] sm:$0xff] }
  0x76   :  { %5187 = vmatprep.subr.bf16.mxu1 %v5186_v47  ;;  %v5144_v39 = vpack.c.bf16 %v491_v37, %v487_v36  ;;  %v495_v47 = vld [vmem:[#allocation2 + $0x780] sm:$0xff] }
  0x77   :  { %5125 = vmatpush1.bf16.msra.mxu0 %v5124_v43  ;;  %v5206_v43 = vpack.c.bf16 %v494_v40, %v490_v38  ;;  %v5148_v52 = vpack.c.bf16 %v499_v49, %v495_v47  ;;  %v696_v49 = vld [vmem:[#allocation2 + $0x68] sm:$0xff] }
  0x78   :  { %5127 = vmatprep.subr.bf16.mxu0 %v5126_v51  ;;  %v502_v51 = vld [vmem:[#allocation2 + $0x7b8] sm:$0xff] }
  0x79   :  { %5189 = vmatpush1.bf16.msra.mxu1 %v5188_v48  ;;  %v5146_v48 = vpack.c.bf16 %v500_v46, %v496_v45  ;;  %v5210_v53 = vpack.c.bf16 %v502_v51, %v498_v50  ;;  %v683_v45 = vld [vmem:[#allocation2] sm:$0xff]  ;;  %v685_v50 = vld [vmem:[#allocation2 + $0x10] sm:$0xff] }
  0x7a   :  { %5191 = vmatprep.subr.bf16.mxu1 %v5190_v59  ;;  %v503_v59 = vld [vmem:[#allocation2 + $0x7c0] sm:$0xff]  ;;  %v689_v51 = vld [vmem:[#allocation2 + $0x30] sm:$0xff] }
  0x7b   :  { %5129 = vmatpush1.bf16.msra.mxu0 %v5128_v55  ;;  %v501_v55 = vld [vmem:[#allocation2 + $0x7b0] sm:$0xff]  ;;  %v687_v46 = vld [vmem:[#allocation2 + $0x20] sm:$0xff] }
  0x7c   :  { %5131 = vmatprep.subr.bf16.mxu0 %v5130_v62  ;;  %v5212_v57 = vpack.c.bf16 %v501_v55, %v497_v54  ;;  %v510_v62 = vld [vmem:[#allocation2 + $0x7f8] sm:$0xff] }
  0x7d   :  { %5193 = vmatpush1.bf16.msra.mxu1 %v5192_v0  ;;  %v507_v0 = vld [vmem:[#allocation2 + $0x7e0] sm:$0xff]  ;;  %v5214_v2 = vpack.c.bf16 %v510_v62, %v506_v61  ;;  %v694_v54 = vld [vmem:[#allocation2 + $0x58] sm:$0xff]  ;;  %v5284_v61 = vpack.c.bf16 %v689_v51, %v685_v50 }
  0x7e   :  { %5195 = vmatprep.subr.bf16.mxu1 %v5194_v7  ;;  %v5152_v1 = vpack.c.bf16 %v507_v0, %v503_v59  ;;  %v698_v55 = vld [vmem:[#allocation2 + $0x78] sm:$0xff]  ;;  %v695_v59 = vld [vmem:[#allocation2 + $0x60] sm:$0xff]  ;;  %v700_v0 = vld [vmem:[#allocation2 + $0x88] sm:$0xff] }
  0x7f   :  { %5133 = vmatpush1.bf16.msra.mxu0 %v5132_v3  ;;  %v509_v3 = vld [vmem:[#allocation2 + $0x7f0] sm:$0xff]  ;;  %v5286_v62 = vpack.c.bf16 %v698_v55, %v694_v54  ;;  %v723_v51 = vld [vmem:[#allocation2 + $0x140] sm:$0xff]  ;;  %v736_v54 = vld [vmem:[#allocation2 + $0x1a8] sm:$0xff] }
  0x80   :  { %5135 = vmatprep.subr.bf16.mxu0 %v5134_v11  ;;  %v5216_v7 = vpack.c.bf16 %v509_v3, %v505_v63  ;;  %v36_v11 = vlaneseq  ;;  %v693_v63 = vld [vmem:[#allocation2 + $0x50] sm:$0xff]  ;;  %v702_v3 = vld [vmem:[#allocation2 + $0x98] sm:$0xff] }
  0x81   :  { %5197 = vmatpush1.bf16.msra.mxu1 %v5196_v8  ;;  %v686_v8 = vld [vmem:[#allocation2 + $0x18] sm:$0xff] }
  0x82   :  { %5199 = vmatprep.subr.bf16.mxu1 %v5198_v19  ;;  %v5282_v10 = vpack.c.bf16 %v690_v9, %v686_v8  ;;  %v7342_v12 = vshrl.u32 %v36_v11, 7  ;;  %v708_v8 = vld [vmem:[#allocation2 + $0xc8] sm:$0xff]  ;;  %v5290_v11 = vpack.c.bf16 %v706_v4, %v702_v3 }
  0x83   :  { %5137 = vmatpush1.bf16.msra.mxu0 %v5136_v15  ;;  %v712_v9 = vld [vmem:[#allocation2 + $0xe8] sm:$0xff] }
  0x84   :  { %5139 = vmatprep.subr.bf16.mxu0 %v5138_v23  ;;  %v38_v13 = vsub.s32 0, %v7342_v12  ;;  %v42_v15 = vsub.s32 1, %v7342_v12  ;;  %v50_v18 = vsub.s32 3, %v7342_v12  ;;  %v46_v26 = vsub.s32 2, %v7342_v12 }
  0x85   :  { %5201 = vmatpush1.bf16.msra.mxu1 %v5200_v20 }
  0x86   :  { %5203 = vmatprep.subr.bf16.mxu1 %v5202_v31  ;;  %v7351_v16 = vrot.slane %v34_v14, %v38_v13  ;;  %v7355_v17 = vrot.slane %v34_v14, %v42_v15  ;;  %v7362_v24 = vrot.slane %v34_v14, %v50_v18  ;;  %v7368_v30 = vrot.slane %v34_v14, %v46_v26  ;;  %v701_v14 = vld [vmem:[#allocation2 + $0x90] sm:$0xff] }
  0x87   :  { %5141 = vmatpush1.bf16.msra.mxu0 %v5140_v27 }
  0x88   :  { %5143 = vmatprep.subr.bf16.mxu0 %v5142_v35 }
  0x89   :  { %5205 = vmatpush1.bf16.msra.mxu1 %v5204_v32 }
  0x8a   :  { %5207 = vmatprep.subr.bf16.mxu1 %v5206_v43 }
  0x8b   :  { %5145 = vmatpush1.bf16.msra.mxu0 %v5144_v39 }
  0x8c   :  { %5147 = vmatprep.subr.bf16.mxu0 %v5146_v48  ;;  %v692_v48 = vld [vmem:[#allocation2 + $0x48] sm:$0xff] }
  0x8d   :  { %5209 = vmatpush1.bf16.msra.mxu1 %v5208_v44 }
  0x8e   :  { %5211 = vmatprep.subr.bf16.mxu1 %v5210_v53  ;;  %v5220_v53 = vpack.c.bf16 %v687_v46, %v683_v45  ;;  %v717_v45 = vld [vmem:[#allocation2 + $0x110] sm:$0xff] }
  0x8f   :  { %5149 = vmatpush1.bf16.msra.mxu0 %v5148_v52  ;;  %v721_v46 = vld [vmem:[#allocation2 + $0x130] sm:$0xff] }
  0x90   :  { %5151 = vmatprep.subr.bf16.mxu0 %v5150_v60  ;;  %v704_v60 = vld [vmem:[#allocation2 + $0xa8] sm:$0xff]  ;;  %v5300_v55 = vpack.c.bf16 %v721_v46, %v717_v45  ;;  %v759_v45 = vld [vmem:[#allocation2 + $0x260] sm:$0xff] }
  0x91   :  { %5213 = vmatpush1.bf16.msra.mxu1 %v5212_v57  ;;  %v5222_v57 = vpack.c.bf16 %v696_v49, %v692_v48  ;;  %v5226_v5 = vpack.c.bf16 %v704_v60, %v700_v0  ;;  %v726_v48 = vld [vmem:[#allocation2 + $0x158] sm:$0xff]  ;;  %v764_v46 = vld [vmem:[#allocation2 + $0x288] sm:$0xff] }
  0x92   :  { %5215 = vmatprep.subr.bf16.mxu1 %v5214_v2  ;;  %v5224_v2 = vpack.c.bf16 %v695_v59, %v691_v58  ;;  %v730_v49 = vld [vmem:[#allocation2 + $0x178] sm:$0xff]  ;;  %v729_v58 = vld [vmem:[#allocation2 + $0x170] sm:$0xff] }
  0x93   :  { %5153 = vmatpush1.bf16.msra.mxu0 %v5152_v1  ;;  %v697_v1 = vld [vmem:[#allocation2 + $0x70] sm:$0xff]  ;;  %v734_v0 = vld [vmem:[#allocation2 + $0x198] sm:$0xff] }
  0x94   :  { %5219 = vmatprep.subr.bf16.mxu0 %v5218_v6  ;;  %v699_v6 = vld [vmem:[#allocation2 + $0x80] sm:$0xff]  ;;  %v738_v60 = vld [vmem:[#allocation2 + $0x1b8] sm:$0xff] }
  0x95   :  { %5217 = vmatpush1.bf16.msra.mxu1 %v5216_v7  ;;  %v703_v7 = vld [vmem:[#allocation2 + $0xa0] sm:$0xff]  ;;  %v5306_v4 = vpack.c.bf16 %v738_v60, %v734_v0 }
  0x96   :  { %5283 = vmatprep.subr.bf16.mxu1 %v5282_v10  ;;  %v5288_v10 = vpack.c.bf16 %v697_v1, %v693_v63  ;;  %v735_v63 = vld [vmem:[#allocation2 + $0x1a0] sm:$0xff]  ;;  %v740_v1 = vld [vmem:[#allocation2 + $0x1c8] sm:$0xff] }
 0x129   :  { %v276_v19 = vpop.f32.mrb[0].mxu0 }
 0x12a   :  { %v277_v20 = vadd.f32 %v276_v19, %v7351_v16  ;;  %v278_v21 = vpop.f32.mrb[1].mxu0  ;;  %v705_v19 = vld [vmem:[#allocation2 + $0xb0] sm:$0xff] }
 0x12b   :  { %v279_v22 = vadd.f32 %v278_v21, %v7355_v17  ;;  %v347_v27 = vpop.f32.mrb[0].mxu1  ;;  %v710_v21 = vld [vmem:[#allocation2 + $0xd8] sm:$0xff] }
 0x12c   :  { %v4875_v23 = vmul.f32 -1.442695, %v277_v20  ;;  %v349_v28 = vpop.f32.mrb[1].mxu1  ;;  %v348_v32 = vadd.f32 %v347_v27, %v7368_v30  ;;  %v5228_v20 = vpack.c.bf16 %v703_v7, %v699_v6  ;;  %v711_v27 = vld [vmem:[#allocation2 + $0xe0] sm:$0xff]  ;;  %v737_v6 = vld [vmem:[#allocation2 + $0x1b0] sm:$0xff] }
 0x12d   :  { %v4876_v25 = vmul.f32 -1.442695, %v279_v22  ;;  %v350_v29 = vadd.f32 %v349_v28, %v7362_v24  ;;  %v714_v22 = vld [vmem:[#allocation2 + $0xf8] sm:$0xff]  ;;  %v716_v28 = vld [vmem:[#allocation2 + $0x108] sm:$0xff] }
 0x12e   :  { %7014 = vpow2.f32 %v4875_v23  ;;  %v5230_v23 = vpack.c.bf16 %v712_v9, %v708_v8  ;;  %v742_v8 = vld [vmem:[#allocation2 + $0x1d8] sm:$0xff] }
 0x12f   :  { %7016 = vpow2.f32 %v4876_v25  ;;  %v4877_v31 = vmul.f32 -1.442695, %v350_v29  ;;  %v707_v25 = vld [vmem:[#allocation2 + $0xc0] sm:$0xff]  ;;  %v720_v29 = vld [vmem:[#allocation2 + $0x128] sm:$0xff]  ;;  %v746_v9 = vld [vmem:[#allocation2 + $0x1f8] sm:$0xff] }
 0x131   :  { %7018 = vpow2.f32 %v4877_v31  ;;  %v5292_v31 = vpack.c.bf16 %v705_v19, %v701_v14  ;;  %v743_v14 = vld [vmem:[#allocation2 + $0x1e0] sm:$0xff]  ;;  %v748_v19 = vld [vmem:[#allocation2 + $0x208] sm:$0xff] }
 0x132   :  { %7020 = vtanh.f32 %v348_v32  ;;  %v5294_v32 = vpack.c.bf16 %v714_v22, %v710_v21  ;;  %v5310_v22 = vpack.c.bf16 %v746_v9, %v742_v8 }
 0x138   :  { %v7015_v33 = vpop.eup %7014 }
 0x139   :  { %v7017_v34 = vpop.eup %7016  ;;  %v355_v35 = vadd.f32 1.0, %v7015_v33  ;;  %v709_v33 = vld [vmem:[#allocation2 + $0xd0] sm:$0xff] }
 0x13a   :  { %v361_v36 = vadd.f32 1.0, %v7017_v34  ;;  %v713_v34 = vld [vmem:[#allocation2 + $0xf0] sm:$0xff] }
 0x13b   :  { %7022 = vrcp.f32 %v355_v35  ;;  %v7019_v37 = vpop.eup %7018  ;;  %v5232_v35 = vpack.c.bf16 %v711_v27, %v707_v25  ;;  %v745_v25 = vld [vmem:[#allocation2 + $0x1f0] sm:$0xff] }
 0x13c   :  { %7024 = vrcp.f32 %v361_v36  ;;  %v7021_v38 = vpop.eup %7020  ;;  %v368_v40 = vadd.f32 1.0, %v7019_v37  ;;  %v718_v36 = vld [vmem:[#allocation2 + $0x118] sm:$0xff] }
 0x13d   :  { %v722_v37 = vld [vmem:[#allocation2 + $0x138] sm:$0xff] }
 0x13e   :  { %7026 = vrcp.f32 %v368_v40  ;;  %v719_v40 = vld [vmem:[#allocation2 + $0x120] sm:$0xff] }
 0x145   :  { %v7023_v39 = vpop.eup %7022 }
 0x146   :  { %v7025_v41 = vpop.eup %7024  ;;  %v372_v42 = vmul.f32 %v7023_v39, %v7021_v38  ;;  %v5234_v38 = vpack.c.bf16 %v720_v29, %v716_v28  ;;  %v715_v39 = vld [vmem:[#allocation2 + $0x100] sm:$0xff]  ;;  %v750_v28 = vld [vmem:[#allocation2 + $0x218] sm:$0xff] }
 0x147   :  { %v371_v43 = vmul.f32 0.0, %v7025_v41  ;;  %v724_v41 = vld [vmem:[#allocation2 + $0x148] sm:$0xff]  ;;  %v754_v29 = vld [vmem:[#allocation2 + $0x238] sm:$0xff] }
 0x148   :  { %v7027_v47 = vpop.eup %7026 }
 0x149   :  { %v373_v44 = vadd.f32 %v372_v42, %v371_v43  ;;  %v728_v42 = vld [vmem:[#allocation2 + $0x168] sm:$0xff]  ;;  %v5296_v43 = vpack.c.bf16 %v713_v34, %v709_v33  ;;  %v751_v33 = vld [vmem:[#allocation2 + $0x220] sm:$0xff] }
 0x14a   :  { %v5238_v50 = vpack.c.bf16 %v728_v42, %v724_v41  ;;  %v756_v34 = vld [vmem:[#allocation2 + $0x248] sm:$0xff]  ;;  %v758_v41 = vld [vmem:[#allocation2 + $0x258] sm:$0xff] }
 0x14b   :  { %7028 = vtanh.f32 %v373_v44  ;;  %377 = vst [vmem:[%s7569_s4] sm:$0xff] %v373_v44  ;;  %v5298_v44 = vpack.c.bf16 %v722_v37, %v718_v36  ;;  %v5314_v37 = vpack.c.bf16 %v754_v29, %v750_v28  ;;  %v762_v42 = vld [vmem:[#allocation2 + $0x278] sm:$0xff] }
 0x155   :  { %v7029_v52 = vpop.eup %7028 }
 0x156   :  { %v375_v56 = vmul.f32 %v7029_v52, %v7027_v47  ;;  %v5236_v47 = vpack.c.bf16 %v719_v40, %v715_v39  ;;  %v727_v52 = vld [vmem:[#allocation2 + $0x160] sm:$0xff]  ;;  %v753_v39 = vld [vmem:[#allocation2 + $0x230] sm:$0xff] }
 0x157   :  { %v5240_v59 = vpack.c.bf16 %v727_v52, %v723_v51  ;;  %v761_v51 = vld [vmem:[#allocation2 + $0x270] sm:$0xff] }
 0x158   :  { %576 = vmatmul.mubr.f32.vlgmr.msra.gmra.mrb[2].mxu0 %v375_v56  ;;  %647 = vmatmul.mubr.f32.vlgmr.msra.gmra.mrb[2].mxu1 %v375_v56 }
 0x159   :  { %5221 = vmatpush1.bf16.msra.mxu0 %v5220_v53  ;;  %875 = vmatprep.mubr.f32.mxu0 %v375_v56  ;;  %v732_v53 = vld [vmem:[#allocation2 + $0x188] sm:$0xff] }
 0x15a   :  { %5223 = vmatprep.subr.bf16.mxu0 %v5222_v57  ;;  %946 = vmatprep.mubr.f32.mxu1 %v375_v56  ;;  %v5302_v56 = vpack.c.bf16 %v730_v49, %v726_v48  ;;  %v725_v57 = vld [vmem:[#allocation2 + $0x150] sm:$0xff]  ;;  %v5318_v49 = vpack.c.bf16 %v762_v42, %v758_v41 }
 0x15b   :  { %5285 = vmatpush1.bf16.msra.mxu1 %v5284_v61  ;;  %v5242_v61 = vpack.c.bf16 %v736_v54, %v732_v53  ;;  %v5304_v3 = vpack.c.bf16 %v729_v58, %v725_v57  ;;  %v766_v53 = vld [vmem:[#allocation2 + $0x298] sm:$0xff]  ;;  %v767_v57 = vld [vmem:[#allocation2 + $0x2a0] sm:$0xff]  ;;  %v772_v58 = vld [vmem:[#allocation2 + $0x2c8] sm:$0xff] }
 0x15c   :  { %5287 = vmatprep.subr.bf16.mxu1 %v5286_v62  ;;  %v731_v62 = vld [vmem:[#allocation2 + $0x180] sm:$0xff]  ;;  %v770_v54 = vld [vmem:[#allocation2 + $0x2b8] sm:$0xff] }
 0x15d   :  { %5225 = vmatpush1.bf16.msra.mxu0 %v5224_v2  ;;  %v744_v2 = vld [vmem:[#allocation2 + $0x1e8] sm:$0xff]  ;;  %v5244_v7 = vpack.c.bf16 %v735_v63, %v731_v62  ;;  %v5322_v60 = vpack.c.bf16 %v770_v54, %v766_v53  ;;  %v769_v62 = vld [vmem:[#allocation2 + $0x2b0] sm:$0xff] }
 0x15e   :  { %5227 = vmatprep.subr.bf16.mxu0 %v5226_v5  ;;  %v733_v5 = vld [vmem:[#allocation2 + $0x190] sm:$0xff] }
 0x15f   :  { %5289 = vmatpush1.bf16.msra.mxu1 %v5288_v10  ;;  %v5246_v10 = vpack.c.bf16 %v744_v2, %v740_v1  ;;  %v5308_v21 = vpack.c.bf16 %v737_v6, %v733_v5  ;;  %v774_v1 = vld [vmem:[#allocation2 + $0x2d8] sm:$0xff]  ;;  %v775_v5 = vld [vmem:[#allocation2 + $0x2e0] sm:$0xff]  ;;  %v780_v6 = vld [vmem:[#allocation2 + $0x308] sm:$0xff] }
 0x160   :  { %5291 = vmatprep.subr.bf16.mxu1 %v5290_v11  ;;  %v739_v11 = vld [vmem:[#allocation2 + $0x1c0] sm:$0xff]  ;;  %v778_v2 = vld [vmem:[#allocation2 + $0x2f8] sm:$0xff] }
 0x161   :  { %5229 = vmatpush1.bf16.msra.mxu0 %v5228_v20  ;;  %v752_v20 = vld [vmem:[#allocation2 + $0x228] sm:$0xff]  ;;  %v5248_v27 = vpack.c.bf16 %v743_v14, %v739_v11  ;;  %v5326_v9 = vpack.c.bf16 %v778_v2, %v774_v1  ;;  %v777_v11 = vld [vmem:[#allocation2 + $0x2f0] sm:$0xff] }
 0x162   :  { %5231 = vmatprep.subr.bf16.mxu0 %v5230_v23  ;;  %v741_v23 = vld [vmem:[#allocation2 + $0x1d0] sm:$0xff] }
 0x163   :  { %5293 = vmatpush1.bf16.msra.mxu1 %v5292_v31  ;;  %v5250_v31 = vpack.c.bf16 %v752_v20, %v748_v19  ;;  %v5312_v36 = vpack.c.bf16 %v745_v25, %v741_v23  ;;  %v782_v19 = vld [vmem:[#allocation2 + $0x318] sm:$0xff]  ;;  %v783_v23 = vld [vmem:[#allocation2 + $0x320] sm:$0xff]  ;;  %v788_v25 = vld [vmem:[#allocation2 + $0x348] sm:$0xff] }
 0x164   :  { %5295 = vmatprep.subr.bf16.mxu1 %v5294_v32  ;;  %v747_v32 = vld [vmem:[#allocation2 + $0x200] sm:$0xff]  ;;  %v786_v20 = vld [vmem:[#allocation2 + $0x338] sm:$0xff]  ;;  %v805_v1 = vld [vmem:[#allocation2 + $0x3d0] sm:$0xff] }
 0x165   :  { %5233 = vmatpush1.bf16.msra.mxu0 %v5232_v35  ;;  %v760_v35 = vld [vmem:[#allocation2 + $0x268] sm:$0xff]  ;;  %v5252_v40 = vpack.c.bf16 %v751_v33, %v747_v32  ;;  %v5330_v29 = vpack.c.bf16 %v786_v20, %v782_v19  ;;  %v785_v32 = vld [vmem:[#allocation2 + $0x330] sm:$0xff]  ;;  %v988_v19 = vld [vmem:[#allocation2 + $0x438] sm:$0xff] }
 0x166   :  { %5235 = vmatprep.subr.bf16.mxu0 %v5234_v38  ;;  %v749_v38 = vld [vmem:[#allocation2 + $0x210] sm:$0xff] }
 0x167   :  { %5297 = vmatpush1.bf16.msra.mxu1 %v5296_v43  ;;  %v5254_v43 = vpack.c.bf16 %v760_v35, %v756_v34  ;;  %v5316_v48 = vpack.c.bf16 %v753_v39, %v749_v38  ;;  %v790_v34 = vld [vmem:[#allocation2 + $0x358] sm:$0xff]  ;;  %v791_v38 = vld [vmem:[#allocation2 + $0x360] sm:$0xff]  ;;  %v796_v39 = vld [vmem:[#allocation2 + $0x388] sm:$0xff] }
 0x168   :  { %5299 = vmatprep.subr.bf16.mxu1 %v5298_v44  ;;  %v755_v44 = vld [vmem:[#allocation2 + $0x240] sm:$0xff]  ;;  %v794_v35 = vld [vmem:[#allocation2 + $0x378] sm:$0xff]  ;;  %v809_v2 = vld [vmem:[#allocation2 + $0x3f0] sm:$0xff] }
 0x169   :  { %5237 = vmatpush1.bf16.msra.mxu0 %v5236_v47  ;;  %v768_v47 = vld [vmem:[#allocation2 + $0x2a8] sm:$0xff]  ;;  %v5256_v52 = vpack.c.bf16 %v759_v45, %v755_v44  ;;  %v5334_v42 = vpack.c.bf16 %v794_v35, %v790_v34  ;;  %v793_v44 = vld [vmem:[#allocation2 + $0x370] sm:$0xff] }
 0x16a   :  { %5239 = vmatprep.subr.bf16.mxu0 %v5238_v50  ;;  %v757_v50 = vld [vmem:[#allocation2 + $0x250] sm:$0xff] }
 0x16b   :  { %5301 = vmatpush1.bf16.msra.mxu1 %v5300_v55  ;;  %v5258_v55 = vpack.c.bf16 %v768_v47, %v764_v46  ;;  %v5320_v0 = vpack.c.bf16 %v761_v51, %v757_v50  ;;  %v798_v46 = vld [vmem:[#allocation2 + $0x398] sm:$0xff]  ;;  %v799_v50 = vld [vmem:[#allocation2 + $0x3a0] sm:$0xff]  ;;  %v804_v51 = vld [vmem:[#allocation2 + $0x3c8] sm:$0xff] }
 0x16c   :  { %5303 = vmatprep.subr.bf16.mxu1 %v5302_v56  ;;  %v763_v56 = vld [vmem:[#allocation2 + $0x280] sm:$0xff]  ;;  %v802_v47 = vld [vmem:[#allocation2 + $0x3b8] sm:$0xff]  ;;  %v983_v20 = vld [vmem:[#allocation2 + $0x410] sm:$0xff] }
 0x16d   :  { %5241 = vmatpush1.bf16.msra.mxu0 %v5240_v59  ;;  %v776_v59 = vld [vmem:[#allocation2 + $0x2e8] sm:$0xff]  ;;  %v5260_v63 = vpack.c.bf16 %v767_v57, %v763_v56  ;;  %v5338_v54 = vpack.c.bf16 %v802_v47, %v798_v46  ;;  %v801_v56 = vld [vmem:[#allocation2 + $0x3b0] sm:$0xff] }
 0x16e   :  { %5243 = vmatprep.subr.bf16.mxu0 %v5242_v61  ;;  %v765_v61 = vld [vmem:[#allocation2 + $0x290] sm:$0xff] }
 0x16f   :  { %5305 = vmatpush1.bf16.msra.mxu1 %v5304_v3  ;;  %v5262_v3 = vpack.c.bf16 %v776_v59, %v772_v58  ;;  %v5324_v8 = vpack.c.bf16 %v769_v62, %v765_v61  ;;  %v806_v58 = vld [vmem:[#allocation2 + $0x3d8] sm:$0xff]  ;;  %v807_v61 = vld [vmem:[#allocation2 + $0x3e0] sm:$0xff]  ;;  %v999_v46 = vld [vmem:[#allocation2 + $0x490] sm:$0xff] }
 0x170   :  { %5307 = vmatprep.subr.bf16.mxu1 %v5306_v4  ;;  %v771_v4 = vld [vmem:[#allocation2 + $0x2c0] sm:$0xff]  ;;  %v810_v59 = vld [vmem:[#allocation2 + $0x3f8] sm:$0xff] }
 0x171   :  { %5245 = vmatpush1.bf16.msra.mxu0 %v5244_v7  ;;  %v784_v7 = vld [vmem:[#allocation2 + $0x328] sm:$0xff]  ;;  %v5264_v14 = vpack.c.bf16 %v775_v5, %v771_v4  ;;  %v5344_v4 = vpack.c.bf16 %v809_v2, %v805_v1  ;;  %v1020_v1 = vld [vmem:[#allocation2 + $0x538] sm:$0xff] }
 0x172   :  { %5247 = vmatprep.subr.bf16.mxu0 %v5246_v10  ;;  %v773_v10 = vld [vmem:[#allocation2 + $0x2d0] sm:$0xff]  ;;  %v4885_v5 = vld [vmem:[%s7565_s0 + $0x8] sm:$0xff] }
 0x173   :  { %5309 = vmatpush1.bf16.msra.mxu1 %v5308_v21  ;;  %v5266_v21 = vpack.c.bf16 %v784_v7, %v780_v6  ;;  %v5328_v28 = vpack.c.bf16 %v777_v11, %v773_v10  ;;  %v982_v6 = vld [vmem:[#allocation2 + $0x408] sm:$0xff]  ;;  %v985_v10 = vld [vmem:[#allocation2 + $0x420] sm:$0xff]  ;;  %v984_v11 = vld [vmem:[#allocation2 + $0x418] sm:$0xff] }
 0x174   :  { %5311 = vmatprep.subr.bf16.mxu1 %v5310_v22  ;;  %v779_v22 = vld [vmem:[#allocation2 + $0x300] sm:$0xff]  ;;  %v986_v7 = vld [vmem:[#allocation2 + $0x428] sm:$0xff] }
 0x175   :  { %5249 = vmatpush1.bf16.msra.mxu0 %v5248_v27  ;;  %v792_v27 = vld [vmem:[#allocation2 + $0x368] sm:$0xff]  ;;  %v5268_v33 = vpack.c.bf16 %v783_v23, %v779_v22  ;;  %v5410_v22 = vpack.c.bf16 %v988_v19, %v984_v11 }
 0x176   :  { %5251 = vmatprep.subr.bf16.mxu0 %v5250_v31  ;;  %v781_v31 = vld [vmem:[#allocation2 + $0x310] sm:$0xff]  ;;  %v1022_v11 = vld [vmem:[#allocation2 + $0x548] sm:$0xff] }
 0x177   :  { %5313 = vmatpush1.bf16.msra.mxu1 %v5312_v36  ;;  %v5270_v36 = vpack.c.bf16 %v792_v27, %v788_v25  ;;  %v5332_v41 = vpack.c.bf16 %v785_v32, %v781_v31  ;;  %v990_v25 = vld [vmem:[#allocation2 + $0x448] sm:$0xff]  ;;  %v993_v31 = vld [vmem:[#allocation2 + $0x460] sm:$0xff]  ;;  %v992_v32 = vld [vmem:[#allocation2 + $0x458] sm:$0xff] }
 0x178   :  { %5315 = vmatprep.subr.bf16.mxu1 %v5314_v37  ;;  %v787_v37 = vld [vmem:[#allocation2 + $0x340] sm:$0xff]  ;;  %v994_v27 = vld [vmem:[#allocation2 + $0x468] sm:$0xff] }
 0x179   :  { %5253 = vmatpush1.bf16.msra.mxu0 %v5252_v40  ;;  %v800_v40 = vld [vmem:[#allocation2 + $0x3a8] sm:$0xff]  ;;  %v5272_v45 = vpack.c.bf16 %v791_v38, %v787_v37  ;;  %v995_v37 = vld [vmem:[#allocation2 + $0x470] sm:$0xff] }
 0x17a   :  { %5255 = vmatprep.subr.bf16.mxu0 %v5254_v43  ;;  %v789_v43 = vld [vmem:[#allocation2 + $0x350] sm:$0xff]  ;;  %v998_v38 = vld [vmem:[#allocation2 + $0x488] sm:$0xff] }
 0x17b   :  { %5317 = vmatpush1.bf16.msra.mxu1 %v5316_v48  ;;  %v5274_v48 = vpack.c.bf16 %v800_v40, %v796_v39  ;;  %v5336_v53 = vpack.c.bf16 %v793_v44, %v789_v43  ;;  %v1002_v40 = vld [vmem:[#allocation2 + $0x4a8] sm:$0xff]  ;;  %v1000_v44 = vld [vmem:[#allocation2 + $0x498] sm:$0xff] }
 0x17c   :  { %5319 = vmatprep.subr.bf16.mxu1 %v5318_v49  ;;  %v795_v49 = vld [vmem:[#allocation2 + $0x380] sm:$0xff]  ;;  %v5354_v43 = vpack.c.bf16 %v1002_v40, %v998_v38  ;;  %v1031_v40 = vld [vmem:[#allocation2 + $0x590] sm:$0xff] }
 0x17d   :  { %5257 = vmatpush1.bf16.msra.mxu0 %v5256_v52  ;;  %v808_v52 = vld [vmem:[#allocation2 + $0x3e8] sm:$0xff]  ;;  %v5276_v57 = vpack.c.bf16 %v799_v50, %v795_v49  ;;  %v1003_v49 = vld [vmem:[#allocation2 + $0x4b0] sm:$0xff] }
 0x17e   :  { %5259 = vmatprep.subr.bf16.mxu0 %v5258_v55  ;;  %v797_v55 = vld [vmem:[#allocation2 + $0x390] sm:$0xff]  ;;  %v1006_v50 = vld [vmem:[#allocation2 + $0x4c8] sm:$0xff] }
 0x17f   :  { %5321 = vmatpush1.bf16.msra.mxu1 %v5320_v0  ;;  %v5278_v0 = vpack.c.bf16 %v808_v52, %v804_v51  ;;  %v5340_v62 = vpack.c.bf16 %v801_v56, %v797_v55  ;;  %v1010_v51 = vld [vmem:[#allocation2 + $0x4e8] sm:$0xff]  ;;  %v1008_v55 = vld [vmem:[#allocation2 + $0x4d8] sm:$0xff]  ;;  %v5420_v56 = vpack.c.bf16 %v1003_v49, %v999_v46 }
 0x180   :  { %5323 = vmatprep.subr.bf16.mxu1 %v5322_v60  ;;  %v803_v60 = vld [vmem:[#allocation2 + $0x3c0] sm:$0xff]  ;;  %v5358_v52 = vpack.c.bf16 %v1010_v51, %v1006_v50  ;;  %v1040_v49 = vld [vmem:[#allocation2 + $0x5d8] sm:$0xff] }
 0x181   :  { %5261 = vmatpush1.bf16.msra.mxu0 %v5260_v63  ;;  %v5342_v63 = vpack.c.bf16 %v810_v59, %v806_v58  ;;  %v1007_v58 = vld [vmem:[#allocation2 + $0x4d0] sm:$0xff]  ;;  %v1044_v51 = vld [vmem:[#allocation2 + $0x5f8] sm:$0xff] }
 0x182   :  { %5263 = vmatprep.subr.bf16.mxu0 %v5262_v3  ;;  %v5280_v3 = vpack.c.bf16 %v807_v61, %v803_v60  ;;  %v1014_v60 = vld [vmem:[#allocation2 + $0x508] sm:$0xff] }
 0x183   :  { %5325 = vmatpush1.bf16.msra.mxu1 %v5324_v8  ;;  %v5346_v8 = vpack.c.bf16 %v986_v7, %v982_v6  ;;  %v1018_v61 = vld [vmem:[#allocation2 + $0x528] sm:$0xff] }
 0x184   :  { %5327 = vmatprep.subr.bf16.mxu1 %v5326_v9  ;;  %v981_v9 = vld [vmem:[#allocation2 + $0x400] sm:$0xff]  ;;  %v5362_v2 = vpack.c.bf16 %v1018_v61, %v1014_v60  ;;  %v1048_v60 = vld [vmem:[#allocation2 + $0x618] sm:$0xff] }
 0x185   :  { %5265 = vmatpush1.bf16.msra.mxu0 %v5264_v14  ;;  %v5348_v14 = vpack.c.bf16 %v985_v10, %v981_v9  ;;  %v1019_v9 = vld [vmem:[#allocation2 + $0x530] sm:$0xff] }
 0x186   :  { %5267 = vmatprep.subr.bf16.mxu0 %v5266_v21  ;;  %v987_v21 = vld [vmem:[#allocation2 + $0x430] sm:$0xff] }
 0x187   :  { %5329 = vmatpush1.bf16.msra.mxu1 %v5328_v28  ;;  %v5412_v23 = vpack.c.bf16 %v987_v21, %v983_v20  ;;  %v989_v28 = vld [vmem:[#allocation2 + $0x440] sm:$0xff] }
 0x188   :  { %5331 = vmatprep.subr.bf16.mxu1 %v5330_v29  ;;  %v5350_v29 = vpack.c.bf16 %v994_v27, %v990_v25  ;;  %v5352_v34 = vpack.c.bf16 %v993_v31, %v989_v28  ;;  %v1021_v20 = vld [vmem:[#allocation2 + $0x540] sm:$0xff]  ;;  %v1028_v25 = vld [vmem:[#allocation2 + $0x578] sm:$0xff]  ;;  %v1023_v27 = vld [vmem:[#allocation2 + $0x550] sm:$0xff] }
 0x189   :  { %5269 = vmatpush1.bf16.msra.mxu0 %v5268_v33  ;;  %v996_v33 = vld [vmem:[#allocation2 + $0x478] sm:$0xff]  ;;  %v1025_v21 = vld [vmem:[#allocation2 + $0x560] sm:$0xff]  ;;  %v1027_v28 = vld [vmem:[#allocation2 + $0x570] sm:$0xff] }
 0x18a   :  { %5271 = vmatprep.subr.bf16.mxu0 %v5270_v36  ;;  %v5414_v35 = vpack.c.bf16 %v996_v33, %v992_v32  ;;  %v991_v36 = vld [vmem:[#allocation2 + $0x450] sm:$0xff]  ;;  %v5432_v31 = vpack.c.bf16 %v1027_v28, %v1023_v27  ;;  %v1030_v32 = vld [vmem:[#allocation2 + $0x588] sm:$0xff]  ;;  %v1061_v27 = vld [vmem:[#allocation2 + $0x680] sm:$0xff] }
 0x18b   :  { %5333 = vmatpush1.bf16.msra.mxu1 %v5332_v41  ;;  %v5416_v39 = vpack.c.bf16 %v995_v37, %v991_v36  ;;  %v997_v41 = vld [vmem:[#allocation2 + $0x480] sm:$0xff]  ;;  %v1034_v33 = vld [vmem:[#allocation2 + $0x5a8] sm:$0xff]  ;;  %v1032_v37 = vld [vmem:[#allocation2 + $0x598] sm:$0xff] }
 0x18c   :  { %5335 = vmatprep.subr.bf16.mxu1 %v5334_v42  ;;  %v1001_v42 = vld [vmem:[#allocation2 + $0x4a0] sm:$0xff] }
 0x18d   :  { %5273 = vmatpush1.bf16.msra.mxu0 %v5272_v45  ;;  %v1004_v45 = vld [vmem:[#allocation2 + $0x4b8] sm:$0xff]  ;;  %v5356_v47 = vpack.c.bf16 %v1001_v42, %v997_v41  ;;  %v1033_v36 = vld [vmem:[#allocation2 + $0x5a0] sm:$0xff]  ;;  %v1035_v41 = vld [vmem:[#allocation2 + $0x5b0] sm:$0xff] }
 0x18e   :  { %5275 = vmatprep.subr.bf16.mxu0 %v5274_v48  ;;  %v5418_v48 = vpack.c.bf16 %v1004_v45, %v1000_v44  ;;  %v1038_v44 = vld [vmem:[#allocation2 + $0x5c8] sm:$0xff]  ;;  %v1065_v28 = vld [vmem:[#allocation2 + $0x6a0] sm:$0xff] }
 0x18f   :  { %5337 = vmatpush1.bf16.msra.mxu1 %v5336_v53  ;;  %v1005_v53 = vld [vmem:[#allocation2 + $0x4c0] sm:$0xff]  ;;  %v1042_v45 = vld [vmem:[#allocation2 + $0x5e8] sm:$0xff] }
 0x190   :  { %5339 = vmatprep.subr.bf16.mxu1 %v5338_v54  ;;  %v1009_v54 = vld [vmem:[#allocation2 + $0x4e0] sm:$0xff]  ;;  %v5374_v46 = vpack.c.bf16 %v1042_v45, %v1038_v44  ;;  %v1076_v44 = vld [vmem:[#allocation2 + $0x6f8] sm:$0xff]  ;;  %v1071_v45 = vld [vmem:[#allocation2 + $0x6d0] sm:$0xff] }
 0x191   :  { %5277 = vmatpush1.bf16.msra.mxu0 %v5276_v57  ;;  %v1012_v57 = vld [vmem:[#allocation2 + $0x4f8] sm:$0xff] }
 0x192   :  { %5279 = vmatprep.subr.bf16.mxu0 %v5278_v0  ;;  %v5422_v59 = vpack.c.bf16 %v1012_v57, %v1008_v55  ;;  %v1011_v0 = vld [vmem:[#allocation2 + $0x4f0] sm:$0xff]  ;;  %v1050_v57 = vld [vmem:[#allocation2 + $0x628] sm:$0xff] }
 0x193   :  { %5341 = vmatpush1.bf16.msra.mxu1 %v5340_v62  ;;  %v5360_v62 = vpack.c.bf16 %v1009_v54, %v1005_v53  ;;  %v1043_v53 = vld [vmem:[#allocation2 + $0x5f0] sm:$0xff]  ;;  %v5438_v54 = vpack.c.bf16 %v1044_v51, %v1040_v49  ;;  %v1078_v49 = vld [vmem:[#allocation2 + $0x708] sm:$0xff] }
 0x194   :  { %5343 = vmatprep.subr.bf16.mxu1 %v5342_v63  ;;  %v1016_v63 = vld [vmem:[#allocation2 + $0x518] sm:$0xff] }
 0x195   :  { %5281 = vmatpush1.bf16.msra.mxu0 %v5280_v3  ;;  %v1013_v3 = vld [vmem:[#allocation2 + $0x500] sm:$0xff]  ;;  %v5426_v6 = vpack.c.bf16 %v1020_v1, %v1016_v63  ;;  %v1047_v63 = vld [vmem:[#allocation2 + $0x610] sm:$0xff] }
 0x196   :  { %5347 = vmatprep.subr.bf16.mxu0 %v5346_v8  ;;  %v1015_v8 = vld [vmem:[#allocation2 + $0x510] sm:$0xff] }
 0x197   :  { %5345 = vmatpush1.bf16.msra.mxu1 %v5344_v4  ;;  %v1017_v4 = vld [vmem:[#allocation2 + $0x520] sm:$0xff]  ;;  %v5428_v10 = vpack.c.bf16 %v1019_v9, %v1015_v8  ;;  %v1051_v1 = vld [vmem:[#allocation2 + $0x630] sm:$0xff]  ;;  %v1056_v9 = vld [vmem:[#allocation2 + $0x658] sm:$0xff] }
 0x198   :  { %876 = vmatmul.mubr.f32.vlgmr.msra.gmra.mrb[4].mxu0 %v4885_v5  ;;  %5411 = vmatprep.subr.bf16.mxu1 %v5410_v22  ;;  %v5364_v7 = vpack.c.bf16 %v1017_v4, %v1013_v3  ;;  %v1024_v22 = vld [vmem:[#allocation2 + $0x558] sm:$0xff]  ;;  %v5444_v3 = vpack.c.bf16 %v1051_v1, %v1047_v63  ;;  %v1054_v4 = vld [vmem:[#allocation2 + $0x648] sm:$0xff]  ;;  %v1057_v8 = vld [vmem:[#allocation2 + $0x660] sm:$0xff] }
 0x199   :  { %5349 = vmatpush1.bf16.msra.mxu0 %v5348_v14  ;;  %v1026_v14 = vld [vmem:[#allocation2 + $0x568] sm:$0xff]  ;;  %v1085_v63 = vld [vmem:[#allocation2 + $0x740] sm:$0xff] }
 0x19a   :  { %947 = vmatmul.mubr.f32.vlgmr.msra.gmra.mrb[4].mxu1 %v4885_v5  ;;  %5351 = vmatprep.subr.bf16.mxu0 %v5350_v29  ;;  %v5424_v5 = vpack.c.bf16 %v1011_v0, %v1007_v58  ;;  %v5366_v19 = vpack.c.bf16 %v1026_v14, %v1022_v11  ;;  %v5430_v29 = vpack.c.bf16 %v1028_v25, %v1024_v22  ;;  %v1049_v0 = vld [vmem:[#allocation2 + $0x620] sm:$0xff]  ;;  %v1060_v11 = vld [vmem:[#allocation2 + $0x678] sm:$0xff]  ;;  %v1055_v14 = vld [vmem:[#allocation2 + $0x650] sm:$0xff] }
 0x19b   :  { %5413 = vmatpush1.bf16.msra.mxu1 %v5412_v23  ;;  %v5368_v23 = vpack.c.bf16 %v1025_v21, %v1021_v20  ;;  %v5446_v20 = vpack.c.bf16 %v1060_v11, %v1056_v9  ;;  %v1062_v22 = vld [vmem:[#allocation2 + $0x688] sm:$0xff]  ;;  %v1089_v1 = vld [vmem:[#allocation2 + $0x760] sm:$0xff] }
 0x19c   :  { %5415 = vmatprep.subr.bf16.mxu1 %v5414_v35  ;;  %v1029_v35 = vld [vmem:[#allocation2 + $0x580] sm:$0xff]  ;;  %v1094_v9 = vld [vmem:[#allocation2 + $0x788] sm:$0xff] }
 0x19d   :  { %5353 = vmatpush1.bf16.msra.mxu0 %v5352_v34  ;;  %v5370_v34 = vpack.c.bf16 %v1034_v33, %v1030_v32  ;;  %v5372_v38 = vpack.c.bf16 %v1033_v36, %v1029_v35  ;;  %v1068_v32 = vld [vmem:[#allocation2 + $0x6b8] sm:$0xff]  ;;  %v1063_v33 = vld [vmem:[#allocation2 + $0x690] sm:$0xff]  ;;  %v1093_v11 = vld [vmem:[#allocation2 + $0x780] sm:$0xff] }
 0x19e   :  { %5355 = vmatprep.subr.bf16.mxu0 %v5354_v43  ;;  %v5436_v43 = vpack.c.bf16 %v1035_v41, %v1031_v40  ;;  %v1069_v40 = vld [vmem:[#allocation2 + $0x6c0] sm:$0xff] }
 0x19f   :  { %5417 = vmatpush1.bf16.msra.mxu1 %v5416_v39  ;;  %v1036_v39 = vld [vmem:[#allocation2 + $0x5b8] sm:$0xff]  ;;  %v1073_v41 = vld [vmem:[#allocation2 + $0x6e0] sm:$0xff] }
 0x1a0   :  { %5419 = vmatprep.subr.bf16.mxu1 %v5418_v48  ;;  %v5434_v42 = vpack.c.bf16 %v1036_v39, %v1032_v37  ;;  %v1041_v48 = vld [vmem:[#allocation2 + $0x5e0] sm:$0xff]  ;;  %v1070_v37 = vld [vmem:[#allocation2 + $0x6c8] sm:$0xff] }
 0x1a1   :  { %5357 = vmatpush1.bf16.msra.mxu0 %v5356_v47  ;;  %v1037_v47 = vld [vmem:[#allocation2 + $0x5c0] sm:$0xff] }
 0x1a2   :  { %5359 = vmatprep.subr.bf16.mxu0 %v5358_v52  ;;  %v5376_v50 = vpack.c.bf16 %v1041_v48, %v1037_v47  ;;  %v1039_v52 = vld [vmem:[#allocation2 + $0x5d0] sm:$0xff] }
 0x1a3   :  { %5421 = vmatpush1.bf16.msra.mxu1 %v5420_v56  ;;  %v5440_v55 = vpack.c.bf16 %v1043_v53, %v1039_v52  ;;  %v1046_v56 = vld [vmem:[#allocation2 + $0x608] sm:$0xff]  ;;  %v1077_v52 = vld [vmem:[#allocation2 + $0x700] sm:$0xff] }
 0x1a4   :  { %5423 = vmatprep.subr.bf16.mxu1 %v5422_v59  ;;  %v5378_v58 = vpack.c.bf16 %v1050_v57, %v1046_v56  ;;  %v1045_v59 = vld [vmem:[#allocation2 + $0x600] sm:$0xff]  ;;  %v1084_v56 = vld [vmem:[#allocation2 + $0x738] sm:$0xff]  ;;  %v1079_v57 = vld [vmem:[#allocation2 + $0x710] sm:$0xff] }
 0x1a5   :  { %5361 = vmatpush1.bf16.msra.mxu0 %v5360_v62  ;;  %v5380_v61 = vpack.c.bf16 %v1049_v0, %v1045_v59  ;;  %v1052_v62 = vld [vmem:[#allocation2 + $0x638] sm:$0xff]  ;;  %v1081_v53 = vld [vmem:[#allocation2 + $0x720] sm:$0xff] }
 0x1a6   :  { %5363 = vmatprep.subr.bf16.mxu0 %v5362_v2  ;;  %v5442_v2 = vpack.c.bf16 %v1052_v62, %v1048_v60  ;;  %v1086_v60 = vld [vmem:[#allocation2 + $0x748] sm:$0xff] }
 0x1a7   :  { %5425 = vmatpush1.bf16.msra.mxu1 %v5424_v5  ;;  %v1058_v5 = vld [vmem:[#allocation2 + $0x668] sm:$0xff] }
 0x1a8   :  { %5427 = vmatprep.subr.bf16.mxu1 %v5426_v6  ;;  %v5382_v6 = vpack.c.bf16 %v1058_v5, %v1054_v4  ;;  %v1092_v4 = vld [vmem:[#allocation2 + $0x778] sm:$0xff]  ;;  %v1087_v5 = vld [vmem:[#allocation2 + $0x750] sm:$0xff] }
 0x1a9   :  { %5365 = vmatpush1.bf16.msra.mxu0 %v5364_v7  ;;  %v1053_v7 = vld [vmem:[#allocation2 + $0x640] sm:$0xff] }
 0x1aa   :  { %5367 = vmatprep.subr.bf16.mxu0 %v5366_v19  ;;  %v1059_v19 = vld [vmem:[#allocation2 + $0x670] sm:$0xff] }
 0x1ab   :  { %5429 = vmatpush1.bf16.msra.mxu1 %v5428_v10  ;;  %v5384_v10 = vpack.c.bf16 %v1057_v8, %v1053_v7  ;;  %v5448_v21 = vpack.c.bf16 %v1059_v19, %v1055_v14  ;;  %v1097_v19 = vld [vmem:[#allocation2 + $0x7a0] sm:$0xff] }
 0x1ac   :  { %5431 = vmatprep.subr.bf16.mxu1 %v5430_v29  ;;  %v1064_v29 = vld [vmem:[#allocation2 + $0x698] sm:$0xff] }
 0x1ad   :  { %5369 = vmatpush1.bf16.msra.mxu0 %v5368_v23  ;;  %v1066_v23 = vld [vmem:[#allocation2 + $0x6a8] sm:$0xff]  ;;  %v5450_v35 = vpack.c.bf16 %v1068_v32, %v1064_v29  ;;  %v1101_v32 = vld [vmem:[#allocation2 + $0x7c0] sm:$0xff] }
 0x1ae   :  { %5371 = vmatprep.subr.bf16.mxu0 %v5370_v34  ;;  %v5386_v25 = vpack.c.bf16 %v1066_v23, %v1062_v22  ;;  %v1067_v34 = vld [vmem:[#allocation2 + $0x6b0] sm:$0xff]  ;;  %v5404_v22 = vpack.c.bf16 %v1097_v19, %v1093_v11 }
 0x1af   :  { %5433 = vmatpush1.bf16.msra.mxu1 %v5432_v31  ;;  %v5388_v31 = vpack.c.bf16 %v1065_v28, %v1061_v27  ;;  %v5452_v36 = vpack.c.bf16 %v1067_v34, %v1063_v33  ;;  %v1099_v27 = vld [vmem:[#allocation2 + $0x7b0] sm:$0xff]  ;;  %v1102_v28 = vld [vmem:[#allocation2 + $0x7c8] sm:$0xff]  ;;  %v1105_v33 = vld [vmem:[#allocation2 + $0x7e0] sm:$0xff] }
 0x1b0   :  { %5435 = vmatprep.subr.bf16.mxu1 %v5434_v42  ;;  %v1072_v42 = vld [vmem:[#allocation2 + $0x6d8] sm:$0xff] }
 0x1b1   :  { %5373 = vmatpush1.bf16.msra.mxu0 %v5372_v38  ;;  %v1074_v38 = vld [vmem:[#allocation2 + $0x6e8] sm:$0xff]  ;;  %v5454_v47 = vpack.c.bf16 %v1076_v44, %v1072_v42 }
 0x1b2   :  { %5375 = vmatprep.subr.bf16.mxu0 %v5374_v46  ;;  %v5390_v39 = vpack.c.bf16 %v1074_v38, %v1070_v37  ;;  %v1075_v46 = vld [vmem:[#allocation2 + $0x6f0] sm:$0xff]  ;;  %v5408_v38 = vpack.c.bf16 %v1105_v33, %v1101_v32  ;;  %v1286_v42 = vld [vmem:[#allocation2 + $0x28] sm:$0xff] }
 0x1b3   :  { %5437 = vmatpush1.bf16.msra.mxu1 %v5436_v43  ;;  %v5392_v43 = vpack.c.bf16 %v1073_v41, %v1069_v40  ;;  %v5456_v48 = vpack.c.bf16 %v1075_v46, %v1071_v45  ;;  %v1103_v37 = vld [vmem:[#allocation2 + $0x7d0] sm:$0xff]  ;;  %v1282_v41 = vld [vmem:[#allocation2 + $0x8] sm:$0xff]  ;;  %v4874_v45 = vld [vmem:[%s7567_s2 + $0x4] sm:$0xf] }
 0x1b4   :  { %5439 = vmatprep.subr.bf16.mxu1 %v5438_v54  ;;  %v1080_v54 = vld [vmem:[#allocation2 + $0x718] sm:$0xff]  ;;  %v1107_v40 = vld [vmem:[#allocation2 + $0x7f0] sm:$0xff] }
 0x1b5   :  { %5377 = vmatpush1.bf16.msra.mxu0 %v5376_v50  ;;  %v1082_v50 = vld [vmem:[#allocation2 + $0x728] sm:$0xff]  ;;  %v5458_v59 = vpack.c.bf16 %v1084_v56, %v1080_v54  ;;  %v5472_v44 = vpack.c.bf16 %v1107_v40, %v1103_v37  ;;  %v1284_v46 = vld [vmem:[#allocation2 + $0x18] sm:$0xff] }
 0x1b6   :  { %5379 = vmatprep.subr.bf16.mxu0 %v5378_v58  ;;  %v5394_v51 = vpack.c.bf16 %v1082_v50, %v1078_v49  ;;  %v1083_v58 = vld [vmem:[#allocation2 + $0x730] sm:$0xff]  ;;  %v7382_v49 = vrot.slane %v4874_v45, %v38_v13  ;;  %v7386_v50 = vrot.slane %v4874_v45, %v42_v15  ;;  %v7397_v15 = vrot.slane %v4874_v45, %v46_v26 }
 0x1b7   :  { %5441 = vmatpush1.bf16.msra.mxu1 %v5440_v55  ;;  %v5396_v55 = vpack.c.bf16 %v1081_v53, %v1077_v52  ;;  %v5460_v0 = vpack.c.bf16 %v1083_v58, %v1079_v57 }
 0x1b8   :  { %5443 = vmatprep.subr.bf16.mxu1 %v5442_v2  ;;  %v1088_v2 = vld [vmem:[#allocation2 + $0x758] sm:$0xff] }
 0x1b9   :  { %5381 = vmatpush1.bf16.msra.mxu0 %v5380_v61  ;;  %v1090_v61 = vld [vmem:[#allocation2 + $0x768] sm:$0xff]  ;;  %v5462_v7 = vpack.c.bf16 %v1092_v4, %v1088_v2 }
 0x1ba   :  { %5383 = vmatprep.subr.bf16.mxu0 %v5382_v6  ;;  %v5398_v62 = vpack.c.bf16 %v1090_v61, %v1086_v60  ;;  %v1091_v6 = vld [vmem:[#allocation2 + $0x770] sm:$0xff] }
 0x1bb   :  { %5445 = vmatpush1.bf16.msra.mxu1 %v5444_v3  ;;  %v5400_v3 = vpack.c.bf16 %v1089_v1, %v1085_v63  ;;  %v5464_v8 = vpack.c.bf16 %v1091_v6, %v1087_v5 }
 0x1bc   :  { %5447 = vmatprep.subr.bf16.mxu1 %v5446_v20  ;;  %v1096_v20 = vld [vmem:[#allocation2 + $0x798] sm:$0xff] }
 0x1bd   :  { %5385 = vmatpush1.bf16.msra.mxu0 %v5384_v10  ;;  %v1098_v10 = vld [vmem:[#allocation2 + $0x7a8] sm:$0xff] }
 0x1be   :  { %5387 = vmatprep.subr.bf16.mxu0 %v5386_v25  ;;  %v5402_v14 = vpack.c.bf16 %v1098_v10, %v1094_v9  ;;  %v1095_v25 = vld [vmem:[#allocation2 + $0x790] sm:$0xff] }
 0x1bf   :  { %5449 = vmatpush1.bf16.msra.mxu1 %v5448_v21  ;;  %v1100_v21 = vld [vmem:[#allocation2 + $0x7b8] sm:$0xff]  ;;  %v5468_v29 = vpack.c.bf16 %v1099_v27, %v1095_v25 }
 0x1c0   :  { %5451 = vmatprep.subr.bf16.mxu1 %v5450_v35  ;;  %v5466_v23 = vpack.c.bf16 %v1100_v21, %v1096_v20  ;;  %v1104_v35 = vld [vmem:[#allocation2 + $0x7d8] sm:$0xff] }
 0x1c1   :  { %5389 = vmatpush1.bf16.msra.mxu0 %v5388_v31  ;;  %v1106_v31 = vld [vmem:[#allocation2 + $0x7e8] sm:$0xff] }
 0x1c2   :  { %5391 = vmatprep.subr.bf16.mxu0 %v5390_v39  ;;  %v5406_v34 = vpack.c.bf16 %v1106_v31, %v1102_v28 }
 0x1c3   :  { %5453 = vmatpush1.bf16.msra.mxu1 %v5452_v36  ;;  %v1108_v36 = vld [vmem:[#allocation2 + $0x7f8] sm:$0xff] }
 0x1c4   :  { %5455 = vmatprep.subr.bf16.mxu1 %v5454_v47  ;;  %v5470_v39 = vpack.c.bf16 %v1108_v36, %v1104_v35  ;;  %v1288_v47 = vld [vmem:[#allocation2 + $0x38] sm:$0xff] }
 0x1c5   :  { %5393 = vmatpush1.bf16.msra.mxu0 %v5392_v43  ;;  %v5474_v43 = vpack.c.bf16 %v1286_v42, %v1282_v41 }
 0x1c6   :  { %5395 = vmatprep.subr.bf16.mxu0 %v5394_v51 }
 0x1c7   :  { %5457 = vmatpush1.bf16.msra.mxu1 %v5456_v48  ;;  %v5538_v48 = vpack.c.bf16 %v1288_v47, %v1284_v46  ;;  %v1290_v46 = vld [vmem:[#allocation2 + $0x48] sm:$0xff] }
 0x1c8   :  { %5459 = vmatprep.subr.bf16.mxu1 %v5458_v59  ;;  %v7392_v59 = vrot.slane %v4874_v45, %v50_v18  ;;  %v1294_v47 = vld [vmem:[#allocation2 + $0x68] sm:$0xff] }
 0x1c9   :  { %5397 = vmatpush1.bf16.msra.mxu0 %v5396_v55 }
 0x1ca   :  { %5399 = vmatprep.subr.bf16.mxu0 %v5398_v62 }
 0x1cb   :  { %5461 = vmatpush1.bf16.msra.mxu1 %v5460_v0 }
 0x1cc   :  { %5463 = vmatprep.subr.bf16.mxu1 %v5462_v7 }
 0x1cd   :  { %5401 = vmatpush1.bf16.msra.mxu0 %v5400_v3 }
 0x1ce   :  { %5403 = vmatprep.subr.bf16.mxu0 %v5402_v14 }
 0x1cf   :  { %5465 = vmatpush1.bf16.msra.mxu1 %v5464_v8 }
 0x1d0   :  { %5467 = vmatprep.subr.bf16.mxu1 %v5466_v23 }
 0x1d1   :  { %5405 = vmatpush1.bf16.msra.mxu0 %v5404_v22 }
 0x1d2   :  { %5407 = vmatprep.subr.bf16.mxu0 %v5406_v34 }
 0x1d3   :  { %5469 = vmatpush1.bf16.msra.mxu1 %v5468_v29 }
 0x1d4   :  { %5471 = vmatprep.subr.bf16.mxu1 %v5470_v39  ;;  %v682_v39 = vld [vmem:[%s7569_s4] sm:$0xff] }
 0x1d5   :  { %5409 = vmatpush1.bf16.msra.mxu0 %v5408_v38 }
 0x1d6   :  { %5475 = vmatprep.subr.bf16.mxu0 %v5474_v43  ;;  %v1281_v43 = vld [vmem:[#allocation2] sm:$0xff] }
 0x1d7   :  { %5473 = vmatpush1.bf16.msra.mxu1 %v5472_v44  ;;  %v1285_v44 = vld [vmem:[#allocation2 + $0x20] sm:$0xff] }
 0x1d8   :  { %5539 = vmatprep.subr.bf16.mxu1 %v5538_v48  ;;  %v1283_v48 = vld [vmem:[#allocation2 + $0x10] sm:$0xff] }
 0x22b   :  { %v577_v51 = vpop.f32.mrb[2].mxu0  ;;  %v648_v52 = vpop.f32.mrb[2].mxu1 }
 0x22c   :  { %v578_v53 = vadd.f32 %v577_v51, %v7382_v49  ;;  %v579_v54 = vpop.f32.mrb[3].mxu0  ;;  %v650_v55 = vpop.f32.mrb[3].mxu1  ;;  %v649_v60 = vadd.f32 %v648_v52, %v7397_v15  ;;  %v1287_v51 = vld [vmem:[#allocation2 + $0x30] sm:$0xff] }
 0x22d   :  { %v580_v56 = vadd.f32 %v579_v54, %v7386_v50  ;;  %v651_v13 = vadd.f32 %v650_v55, %v7392_v59  ;;  %v1292_v54 = vld [vmem:[#allocation2 + $0x58] sm:$0xff] }
 0x22e   :  { %v4880_v57 = vmul.f32 -1.442695, %v578_v53  ;;  %v5476_v53 = vpack.c.bf16 %v1285_v44, %v1281_v43  ;;  %v1296_v55 = vld [vmem:[#allocation2 + $0x78] sm:$0xff]  ;;  %v1319_v43 = vld [vmem:[#allocation2 + $0x130] sm:$0xff] }
 0x22f   :  { %v4881_v58 = vmul.f32 -1.442695, %v580_v56  ;;  %v4882_v0 = vmul.f32 -1.442695, %v651_v13  ;;  %v1293_v13 = vld [vmem:[#allocation2 + $0x60] sm:$0xff] }
 0x230   :  { %7030 = vpow2.f32 %v4880_v57  ;;  %v5478_v57 = vpack.c.bf16 %v1294_v47, %v1290_v46  ;;  %v1328_v46 = vld [vmem:[#allocation2 + $0x178] sm:$0xff] }
 0x231   :  { %7032 = vpow2.f32 %v4881_v58  ;;  %v1289_v58 = vld [vmem:[#allocation2 + $0x40] sm:$0xff] }
 0x232   :  { %7034 = vpow2.f32 %v4882_v0  ;;  %v1298_v0 = vld [vmem:[#allocation2 + $0x88] sm:$0xff] }
 0x233   :  { %7036 = vtanh.f32 %v649_v60  ;;  %v1302_v60 = vld [vmem:[#allocation2 + $0xa8] sm:$0xff] }
 0x23a   :  { %v7031_v61 = vpop.eup %7030 }
 0x23b   :  { %v7033_v62 = vpop.eup %7032  ;;  %v656_v63 = vadd.f32 1.0, %v7031_v61  ;;  %v5540_v61 = vpack.c.bf16 %v1287_v51, %v1283_v48  ;;  %v1321_v48 = vld [vmem:[#allocation2 + $0x140] sm:$0xff] }
 0x23c   :  { %v662_v1 = vadd.f32 1.0, %v7033_v62  ;;  %v7035_v18 = vpop.eup %7034  ;;  %v5542_v62 = vpack.c.bf16 %v1296_v55, %v1292_v54  ;;  %v1325_v51 = vld [vmem:[#allocation2 + $0x160] sm:$0xff] }
 0x23d   :  { %7038 = vrcp.f32 %v656_v63  ;;  %v7037_v2 = vpop.eup %7036  ;;  %v669_v6 = vadd.f32 1.0, %v7035_v18  ;;  %v1291_v63 = vld [vmem:[#allocation2 + $0x50] sm:$0xff]  ;;  %v5480_v18 = vpack.c.bf16 %v1293_v13, %v1289_v58  ;;  %v5496_v58 = vpack.c.bf16 %v1325_v51, %v1321_v48  ;;  %v1332_v13 = vld [vmem:[#allocation2 + $0x198] sm:$0xff] }
 0x23e   :  { %7040 = vrcp.f32 %v662_v1  ;;  %v1295_v1 = vld [vmem:[#allocation2 + $0x70] sm:$0xff]  ;;  %v1364_v51 = vld [vmem:[#allocation2 + $0x298] sm:$0xff] }
 0x23f   :  { %7042 = vrcp.f32 %v669_v6  ;;  %v1301_v6 = vld [vmem:[#allocation2 + $0xa0] sm:$0xff] }
 0x247   :  { %v7039_v3 = vpop.eup %7038 }
 0x248   :  { %v7041_v4 = vpop.eup %7040  ;;  %v673_v5 = vmul.f32 %v7039_v3, %v7037_v2  ;;  %v1300_v2 = vld [vmem:[#allocation2 + $0x98] sm:$0xff] }
 0x249   :  { %v672_v12 = vmul.f32 0.0, %v7041_v4  ;;  %v7043_v7 = vpop.eup %7042  ;;  %v1304_v3 = vld [vmem:[#allocation2 + $0xb8] sm:$0xff]  ;;  %v5482_v4 = vpack.c.bf16 %v1302_v60, %v1298_v0 }
 0x24a   :  { %v1336_v0 = vld [vmem:[#allocation2 + $0x1b8] sm:$0xff] }
 0x24b   :  { %v674_v26 = vadd.f32 %v673_v5, %v672_v12  ;;  %v1297_v5 = vld [vmem:[#allocation2 + $0x80] sm:$0xff]  ;;  %v1306_v12 = vld [vmem:[#allocation2 + $0xc8] sm:$0xff] }
 0x24d   :  { %7044 = vtanh.f32 %v674_v26  ;;  %4884 = vst [vmem:[%s7569_s4 + $0x8] sm:$0xff] %v674_v26  ;;  %v1310_v26 = vld [vmem:[#allocation2 + $0xe8] sm:$0xff] }
 0x257   :  { %v7045_v8 = vpop.eup %7044 }
 0x258   :  { %v676_v9 = vmul.f32 %v7045_v8, %v7043_v7  ;;  %v5544_v7 = vpack.c.bf16 %v1295_v1, %v1291_v63  ;;  %v5546_v8 = vpack.c.bf16 %v1304_v3, %v1300_v2  ;;  %v1338_v63 = vld [vmem:[#allocation2 + $0x1c8] sm:$0xff]  ;;  %v5562_v2 = vpack.c.bf16 %v1336_v0, %v1332_v13  ;;  %v1331_v3 = vld [vmem:[#allocation2 + $0x190] sm:$0xff] }
 0x259   :  { %v1342_v1 = vld [vmem:[#allocation2 + $0x1e8] sm:$0xff]  ;;  %v1363_v0 = vld [vmem:[#allocation2 + $0x290] sm:$0xff] }
 0x25a   :  { %1173 = vmatprep.mubr.f32.mxu0 %v676_v9  ;;  %1244 = vmatprep.mubr.f32.mxu1 %v676_v9  ;;  %v1299_v9 = vld [vmem:[#allocation2 + $0x90] sm:$0xff] }
 0x26b   :  { %v877_v10 = vpop.f32.mrb[4].mxu0 }
 0x26c   :  { %v878_v11 = vadd.f32 %v877_v10, %v7351_v16  ;;  %v879_v14 = vpop.f32.mrb[5].mxu0  ;;  %v1303_v10 = vld [vmem:[#allocation2 + $0xb0] sm:$0xff] }
 0x26d   :  { %v880_v19 = vadd.f32 %v879_v14, %v7355_v17  ;;  %v948_v20 = vpop.f32.mrb[4].mxu1  ;;  %v1308_v14 = vld [vmem:[#allocation2 + $0xd8] sm:$0xff] }
 0x26e   :  { %v4886_v21 = vmul.f32 -1.442695, %v878_v11  ;;  %v950_v22 = vpop.f32.mrb[5].mxu1  ;;  %v949_v28 = vadd.f32 %v948_v20, %v7368_v30  ;;  %v5484_v11 = vpack.c.bf16 %v1301_v6, %v1297_v5  ;;  %v5486_v20 = vpack.c.bf16 %v1310_v26, %v1306_v12  ;;  %v1340_v6 = vld [vmem:[#allocation2 + $0x1d8] sm:$0xff] }
 0x26f   :  { %v4887_v23 = vmul.f32 -1.442695, %v880_v19  ;;  %v951_v25 = vadd.f32 %v950_v22, %v7362_v24  ;;  %v1312_v19 = vld [vmem:[#allocation2 + $0xf8] sm:$0xff]  ;;  %v1309_v22 = vld [vmem:[#allocation2 + $0xe0] sm:$0xff]  ;;  %v5502_v26 = vpack.c.bf16 %v1342_v1, %v1338_v63 }
 0x270   :  { %7046 = vpow2.f32 %v4886_v21  ;;  %v1305_v21 = vld [vmem:[#allocation2 + $0xc0] sm:$0xff]  ;;  %v1344_v12 = vld [vmem:[#allocation2 + $0x1f8] sm:$0xff] }
 0x271   :  { %7048 = vpow2.f32 %v4887_v23  ;;  %v4888_v27 = vmul.f32 -1.442695, %v951_v25  ;;  %v1314_v23 = vld [vmem:[#allocation2 + $0x108] sm:$0xff]  ;;  %v1376_v63 = vld [vmem:[#allocation2 + $0x2f8] sm:$0xff] }
 0x272   :  { %v1318_v25 = vld [vmem:[#allocation2 + $0x128] sm:$0xff] }
 0x273   :  { %7050 = vpow2.f32 %v4888_v27  ;;  %v5548_v27 = vpack.c.bf16 %v1303_v10, %v1299_v9  ;;  %v1346_v9 = vld [vmem:[#allocation2 + $0x208] sm:$0xff] }
 0x274   :  { %7052 = vtanh.f32 %v949_v28  ;;  %v5550_v28 = vpack.c.bf16 %v1312_v19, %v1308_v14  ;;  %v1350_v10 = vld [vmem:[#allocation2 + $0x228] sm:$0xff]  ;;  %v5566_v14 = vpack.c.bf16 %v1344_v12, %v1340_v6  ;;  %v1339_v19 = vld [vmem:[#allocation2 + $0x1d0] sm:$0xff] }
 0x275   :  { %v1371_v12 = vld [vmem:[#allocation2 + $0x2d0] sm:$0xff] }
 0x27a   :  { %v7047_v29 = vpop.eup %7046 }
 0x27b   :  { %v7049_v31 = vpop.eup %7048  ;;  %v956_v32 = vadd.f32 1.0, %v7047_v29  ;;  %v1307_v29 = vld [vmem:[#allocation2 + $0xd0] sm:$0xff] }
 0x27c   :  { %v962_v33 = vadd.f32 1.0, %v7049_v31  ;;  %v1311_v31 = vld [vmem:[#allocation2 + $0xf0] sm:$0xff] }
 0x27d   :  { %7054 = vrcp.f32 %v956_v32  ;;  %v7051_v34 = vpop.eup %7050  ;;  %v5488_v32 = vpack.c.bf16 %v1309_v22, %v1305_v21  ;;  %v1348_v22 = vld [vmem:[#allocation2 + $0x218] sm:$0xff] }
 0x27e   :  { %7056 = vrcp.f32 %v962_v33  ;;  %v7053_v35 = vpop.eup %7052  ;;  %v969_v37 = vadd.f32 1.0, %v7051_v34  ;;  %v1316_v33 = vld [vmem:[#allocation2 + $0x118] sm:$0xff] }
 0x27f   :  { %v1320_v34 = vld [vmem:[#allocation2 + $0x138] sm:$0xff] }
 0x280   :  { %7058 = vrcp.f32 %v969_v37  ;;  %v1317_v37 = vld [vmem:[#allocation2 + $0x120] sm:$0xff] }
 0x287   :  { %v7055_v36 = vpop.eup %7054 }
 0x288   :  { %v7057_v38 = vpop.eup %7056  ;;  %v973_v40 = vmul.f32 %v7055_v36, %v7053_v35  ;;  %v5490_v35 = vpack.c.bf16 %v1318_v25, %v1314_v23  ;;  %v1313_v36 = vld [vmem:[#allocation2 + $0x100] sm:$0xff]  ;;  %v1352_v23 = vld [vmem:[#allocation2 + $0x238] sm:$0xff]  ;;  %v5506_v25 = vpack.c.bf16 %v1350_v10, %v1346_v9 }
 0x289   :  { %v972_v41 = vmul.f32 %v7057_v38, %v682_v39  ;;  %v1322_v38 = vld [vmem:[#allocation2 + $0x148] sm:$0xff]  ;;  %v5492_v44 = vpack.c.bf16 %v1317_v37, %v1313_v36  ;;  %v1356_v37 = vld [vmem:[#allocation2 + $0x258] sm:$0xff] }
 0x28a   :  { %v7059_v45 = vpop.eup %7058  ;;  %v1326_v39 = vld [vmem:[#allocation2 + $0x168] sm:$0xff]  ;;  %v1384_v9 = vld [vmem:[#allocation2 + $0x338] sm:$0xff] }
 0x28b   :  { %v974_v42 = vadd.f32 %v973_v40, %v972_v41  ;;  %v5552_v40 = vpack.c.bf16 %v1311_v31, %v1307_v29  ;;  %v5554_v41 = vpack.c.bf16 %v1320_v34, %v1316_v33  ;;  %v5494_v47 = vpack.c.bf16 %v1326_v39, %v1322_v38  ;;  %v1354_v29 = vld [vmem:[#allocation2 + $0x248] sm:$0xff]  ;;  %v1347_v34 = vld [vmem:[#allocation2 + $0x210] sm:$0xff]  ;;  %v1360_v38 = vld [vmem:[#allocation2 + $0x278] sm:$0xff] }
 0x28c   :  { %v1358_v31 = vld [vmem:[#allocation2 + $0x268] sm:$0xff]  ;;  %v5570_v33 = vpack.c.bf16 %v1352_v23, %v1348_v22  ;;  %v1379_v23 = vld [vmem:[#allocation2 + $0x310] sm:$0xff] }
 0x28d   :  { %7060 = vtanh.f32 %v974_v42  ;;  %978 = vst [vmem:[%s7569_s4] sm:$0xff] %v974_v42  ;;  %v1315_v42 = vld [vmem:[#allocation2 + $0x110] sm:$0xff]  ;;  %v5510_v39 = vpack.c.bf16 %v1358_v31, %v1354_v29  ;;  %v1392_v29 = vld [vmem:[#allocation2 + $0x378] sm:$0xff] }
 0x28e   :  { %v5556_v54 = vpack.c.bf16 %v1319_v43, %v1315_v42  ;;  %v1362_v42 = vld [vmem:[#allocation2 + $0x288] sm:$0xff] }
 0x28f   :  { %v1366_v43 = vld [vmem:[#allocation2 + $0x2a8] sm:$0xff] }
 0x297   :  { %v7061_v52 = vpop.eup %7060 }
 0x298   :  { %v976_v56 = vmul.f32 %v7061_v52, %v7059_v45  ;;  %v1324_v45 = vld [vmem:[#allocation2 + $0x158] sm:$0xff]  ;;  %v1330_v52 = vld [vmem:[#allocation2 + $0x188] sm:$0xff] }
 0x299   :  { %v5558_v55 = vpack.c.bf16 %v1328_v46, %v1324_v45  ;;  %v5574_v45 = vpack.c.bf16 %v1360_v38, %v1356_v37  ;;  %v1355_v46 = vld [vmem:[#allocation2 + $0x250] sm:$0xff] }
 0x29a   :  { %1174 = vmatmul.mubr.f32.vlgmr.msra.gmra.mrb[6].mxu0 %v976_v56  ;;  %1245 = vmatmul.mubr.f32.vlgmr.msra.gmra.mrb[6].mxu1 %v976_v56  ;;  %v1387_v38 = vld [vmem:[#allocation2 + $0x350] sm:$0xff] }
 0x29b   :  { %5477 = vmatpush1.bf16.msra.mxu0 %v5476_v53  ;;  %1473 = vmatprep.mubr.f32.mxu0 %v976_v56  ;;  %v1334_v53 = vld [vmem:[#allocation2 + $0x1a8] sm:$0xff] }
 0x29c   :  { %5479 = vmatprep.subr.bf16.mxu0 %v5478_v57  ;;  %1544 = vmatprep.mubr.f32.mxu1 %v976_v56  ;;  %v1323_v56 = vld [vmem:[#allocation2 + $0x150] sm:$0xff]  ;;  %v5498_v60 = vpack.c.bf16 %v1334_v53, %v1330_v52  ;;  %v1368_v52 = vld [vmem:[#allocation2 + $0x2b8] sm:$0xff]  ;;  %v5514_v53 = vpack.c.bf16 %v1366_v43, %v1362_v42 }
 0x29d   :  { %5541 = vmatpush1.bf16.msra.mxu1 %v5540_v61  ;;  %v1327_v57 = vld [vmem:[#allocation2 + $0x170] sm:$0xff]  ;;  %v1329_v61 = vld [vmem:[#allocation2 + $0x180] sm:$0xff]  ;;  %v5578_v13 = vpack.c.bf16 %v1368_v52, %v1364_v51  ;;  %v1400_v42 = vld [vmem:[#allocation2 + $0x3b8] sm:$0xff] }
 0x29e   :  { %5543 = vmatprep.subr.bf16.mxu1 %v5542_v62  ;;  %v1333_v62 = vld [vmem:[#allocation2 + $0x1a0] sm:$0xff]  ;;  %v1395_v52 = vld [vmem:[#allocation2 + $0x390] sm:$0xff] }
 0x29f   :  { %5481 = vmatpush1.bf16.msra.mxu0 %v5480_v18  ;;  %v5560_v18 = vpack.c.bf16 %v1327_v57, %v1323_v56  ;;  %v5500_v5 = vpack.c.bf16 %v1333_v62, %v1329_v61  ;;  %v1370_v56 = vld [vmem:[#allocation2 + $0x2c8] sm:$0xff]  ;;  %v1372_v62 = vld [vmem:[#allocation2 + $0x2d8] sm:$0xff] }
 0x2a0   :  { %5483 = vmatprep.subr.bf16.mxu0 %v5482_v4  ;;  %v1335_v4 = vld [vmem:[#allocation2 + $0x1b0] sm:$0xff]  ;;  %v1374_v57 = vld [vmem:[#allocation2 + $0x2e8] sm:$0xff]  ;;  %v5582_v6 = vpack.c.bf16 %v1376_v63, %v1372_v62 }
 0x2a1   :  { %5545 = vmatpush1.bf16.msra.mxu1 %v5544_v7  ;;  %v1337_v7 = vld [vmem:[#allocation2 + $0x1c0] sm:$0xff]  ;;  %v5518_v1 = vpack.c.bf16 %v1374_v57, %v1370_v56  ;;  %v1408_v56 = vld [vmem:[#allocation2 + $0x3f8] sm:$0xff]  ;;  %v1407_v62 = vld [vmem:[#allocation2 + $0x3f0] sm:$0xff] }
 0x2a2   :  { %5547 = vmatprep.subr.bf16.mxu1 %v5546_v8  ;;  %v1341_v8 = vld [vmem:[#allocation2 + $0x1e0] sm:$0xff] }
 0x2a3   :  { %5485 = vmatpush1.bf16.msra.mxu0 %v5484_v11  ;;  %v5564_v11 = vpack.c.bf16 %v1335_v4, %v1331_v3  ;;  %v5504_v21 = vpack.c.bf16 %v1341_v8, %v1337_v7  ;;  %v1378_v3 = vld [vmem:[#allocation2 + $0x308] sm:$0xff]  ;;  %v1380_v8 = vld [vmem:[#allocation2 + $0x318] sm:$0xff] }
 0x2a4   :  { %5487 = vmatprep.subr.bf16.mxu0 %v5486_v20  ;;  %v1343_v20 = vld [vmem:[#allocation2 + $0x1f0] sm:$0xff]  ;;  %v1382_v4 = vld [vmem:[#allocation2 + $0x328] sm:$0xff]  ;;  %v5586_v22 = vpack.c.bf16 %v1384_v9, %v1380_v8 }
 0x2a5   :  { %5549 = vmatpush1.bf16.msra.mxu1 %v5548_v27  ;;  %v1345_v27 = vld [vmem:[#allocation2 + $0x200] sm:$0xff]  ;;  %v5522_v10 = vpack.c.bf16 %v1382_v4, %v1378_v3  ;;  %v1584_v3 = vld [vmem:[#allocation2 + $0x428] sm:$0xff]  ;;  %v1581_v8 = vld [vmem:[#allocation2 + $0x410] sm:$0xff] }
 0x2a6   :  { %5551 = vmatprep.subr.bf16.mxu1 %v5550_v28  ;;  %v1349_v28 = vld [vmem:[#allocation2 + $0x220] sm:$0xff]  ;;  %v1585_v9 = vld [vmem:[#allocation2 + $0x430] sm:$0xff] }
 0x2a7   :  { %5489 = vmatpush1.bf16.msra.mxu0 %v5488_v32  ;;  %v5568_v32 = vpack.c.bf16 %v1343_v20, %v1339_v19  ;;  %v5508_v36 = vpack.c.bf16 %v1349_v28, %v1345_v27  ;;  %v1386_v19 = vld [vmem:[#allocation2 + $0x348] sm:$0xff]  ;;  %v1388_v28 = vld [vmem:[#allocation2 + $0x358] sm:$0xff] }
 0x2a8   :  { %5491 = vmatprep.subr.bf16.mxu0 %v5490_v35  ;;  %v1351_v35 = vld [vmem:[#allocation2 + $0x230] sm:$0xff]  ;;  %v1390_v20 = vld [vmem:[#allocation2 + $0x368] sm:$0xff]  ;;  %v5590_v37 = vpack.c.bf16 %v1392_v29, %v1388_v28 }
 0x2a9   :  { %5553 = vmatpush1.bf16.msra.mxu1 %v5552_v40  ;;  %v1353_v40 = vld [vmem:[#allocation2 + $0x240] sm:$0xff]  ;;  %v5526_v31 = vpack.c.bf16 %v1390_v20, %v1386_v19  ;;  %v1592_v19 = vld [vmem:[#allocation2 + $0x468] sm:$0xff]  ;;  %v1589_v29 = vld [vmem:[#allocation2 + $0x450] sm:$0xff] }
 0x2aa   :  { %5555 = vmatprep.subr.bf16.mxu1 %v5554_v41  ;;  %v1357_v41 = vld [vmem:[#allocation2 + $0x260] sm:$0xff] }
 0x2ab   :  { %5493 = vmatpush1.bf16.msra.mxu0 %v5492_v44  ;;  %v5572_v44 = vpack.c.bf16 %v1351_v35, %v1347_v34  ;;  %v5512_v48 = vpack.c.bf16 %v1357_v41, %v1353_v40  ;;  %v1394_v34 = vld [vmem:[#allocation2 + $0x388] sm:$0xff]  ;;  %v1396_v41 = vld [vmem:[#allocation2 + $0x398] sm:$0xff]  ;;  %v1587_v20 = vld [vmem:[#allocation2 + $0x440] sm:$0xff] }
 0x2ac   :  { %5495 = vmatprep.subr.bf16.mxu0 %v5494_v47  ;;  %v1359_v47 = vld [vmem:[#allocation2 + $0x270] sm:$0xff]  ;;  %v1398_v35 = vld [vmem:[#allocation2 + $0x3a8] sm:$0xff]  ;;  %v5594_v51 = vpack.c.bf16 %v1400_v42, %v1396_v41 }
 0x2ad   :  { %5557 = vmatpush1.bf16.msra.mxu1 %v5556_v54  ;;  %v1361_v54 = vld [vmem:[#allocation2 + $0x280] sm:$0xff]  ;;  %v5530_v43 = vpack.c.bf16 %v1398_v35, %v1394_v34  ;;  %v1600_v34 = vld [vmem:[#allocation2 + $0x4a8] sm:$0xff] }
 0x2ae   :  { %5559 = vmatprep.subr.bf16.mxu1 %v5558_v55  ;;  %v1365_v55 = vld [vmem:[#allocation2 + $0x2a0] sm:$0xff] }
 0x2af   :  { %5497 = vmatpush1.bf16.msra.mxu0 %v5496_v58  ;;  %v5576_v58 = vpack.c.bf16 %v1359_v47, %v1355_v46  ;;  %v5516_v61 = vpack.c.bf16 %v1365_v55, %v1361_v54  ;;  %v1402_v46 = vld [vmem:[#allocation2 + $0x3c8] sm:$0xff]  ;;  %v1404_v55 = vld [vmem:[#allocation2 + $0x3d8] sm:$0xff]  ;;  %v1595_v35 = vld [vmem:[#allocation2 + $0x480] sm:$0xff] }
 0x2b0   :  { %5499 = vmatprep.subr.bf16.mxu0 %v5498_v60  ;;  %v1367_v60 = vld [vmem:[#allocation2 + $0x2b0] sm:$0xff]  ;;  %v1406_v47 = vld [vmem:[#allocation2 + $0x3e8] sm:$0xff] }
 0x2b1   :  { %5561 = vmatpush1.bf16.msra.mxu1 %v5560_v18  ;;  %v1369_v18 = vld [vmem:[#allocation2 + $0x2c0] sm:$0xff]  ;;  %v5534_v57 = vpack.c.bf16 %v1406_v47, %v1402_v46 }
 0x2b2   :  { %5563 = vmatprep.subr.bf16.mxu1 %v5562_v2  ;;  %v1373_v2 = vld [vmem:[#allocation2 + $0x2e0] sm:$0xff] }
 0x2b3   :  { %5501 = vmatpush1.bf16.msra.mxu0 %v5500_v5  ;;  %v5580_v5 = vpack.c.bf16 %v1367_v60, %v1363_v0  ;;  %v5520_v7 = vpack.c.bf16 %v1373_v2, %v1369_v18  ;;  %v5598_v60 = vpack.c.bf16 %v1408_v56, %v1404_v55  ;;  %v4896_v18 = vld [vmem:[%s7565_s0 + $0x10] sm:$0xff]  ;;  %v1580_v2 = vld [vmem:[#allocation2 + $0x408] sm:$0xff]  ;;  %v1603_v47 = vld [vmem:[#allocation2 + $0x4c0] sm:$0xff] }
 0x2b4   :  { %5503 = vmatprep.subr.bf16.mxu0 %v5502_v26  ;;  %v1375_v26 = vld [vmem:[#allocation2 + $0x2f0] sm:$0xff]  ;;  %v5602_v4 = vpack.c.bf16 %v1584_v3, %v1580_v2 }
 0x2b5   :  { %5565 = vmatpush1.bf16.msra.mxu1 %v5564_v11  ;;  %v1377_v11 = vld [vmem:[#allocation2 + $0x300] sm:$0xff]  ;;  %v1609_v56 = vld [vmem:[#allocation2 + $0x4f0] sm:$0xff] }
 0x2b6   :  { %5567 = vmatprep.subr.bf16.mxu1 %v5566_v14  ;;  %v1381_v14 = vld [vmem:[#allocation2 + $0x320] sm:$0xff]  ;;  %v1613_v3 = vld [vmem:[#allocation2 + $0x510] sm:$0xff] }
 0x2b7   :  { %5505 = vmatpush1.bf16.msra.mxu0 %v5504_v21  ;;  %v5584_v21 = vpack.c.bf16 %v1375_v26, %v1371_v12  ;;  %v5524_v27 = vpack.c.bf16 %v1381_v14, %v1377_v11  ;;  %v1582_v12 = vld [vmem:[#allocation2 + $0x418] sm:$0xff]  ;;  %v5668_v11 = vpack.c.bf16 %v1585_v9, %v1581_v8  ;;  %v1588_v14 = vld [vmem:[#allocation2 + $0x448] sm:$0xff]  ;;  %v1623_v8 = vld [vmem:[#allocation2 + $0x560] sm:$0xff] }
 0x2b8   :  { %5507 = vmatprep.subr.bf16.mxu0 %v5506_v25  ;;  %v1383_v25 = vld [vmem:[#allocation2 + $0x330] sm:$0xff]  ;;  %v1622_v9 = vld [vmem:[#allocation2 + $0x558] sm:$0xff] }
 0x2b9   :  { %5569 = vmatpush1.bf16.msra.mxu1 %v5568_v32  ;;  %v1385_v32 = vld [vmem:[#allocation2 + $0x340] sm:$0xff] }
 0x2ba   :  { %5571 = vmatprep.subr.bf16.mxu1 %v5570_v33  ;;  %v1389_v33 = vld [vmem:[#allocation2 + $0x360] sm:$0xff] }
 0x2bb   :  { %5509 = vmatpush1.bf16.msra.mxu0 %v5508_v36  ;;  %v5588_v36 = vpack.c.bf16 %v1383_v25, %v1379_v23  ;;  %v5528_v40 = vpack.c.bf16 %v1389_v33, %v1385_v32  ;;  %v1590_v23 = vld [vmem:[#allocation2 + $0x458] sm:$0xff]  ;;  %v1596_v32 = vld [vmem:[#allocation2 + $0x488] sm:$0xff] }
 0x2bc   :  { %5511 = vmatprep.subr.bf16.mxu0 %v5510_v39  ;;  %v1391_v39 = vld [vmem:[#allocation2 + $0x370] sm:$0xff]  ;;  %v1594_v25 = vld [vmem:[#allocation2 + $0x478] sm:$0xff] }
 0x2bd   :  { %5573 = vmatpush1.bf16.msra.mxu1 %v5572_v44  ;;  %v1393_v44 = vld [vmem:[#allocation2 + $0x380] sm:$0xff]  ;;  %v5670_v28 = vpack.c.bf16 %v1594_v25, %v1590_v23  ;;  %v1632_v23 = vld [vmem:[#allocation2 + $0x5a8] sm:$0xff] }
 0x2be   :  { %5575 = vmatprep.subr.bf16.mxu1 %v5574_v45  ;;  %v1397_v45 = vld [vmem:[#allocation2 + $0x3a0] sm:$0xff] }
 0x2bf   :  { %5513 = vmatpush1.bf16.msra.mxu0 %v5512_v48  ;;  %v5592_v48 = vpack.c.bf16 %v1391_v39, %v1387_v38  ;;  %v5532_v54 = vpack.c.bf16 %v1397_v45, %v1393_v44  ;;  %v1598_v38 = vld [vmem:[#allocation2 + $0x498] sm:$0xff]  ;;  %v1604_v44 = vld [vmem:[#allocation2 + $0x4c8] sm:$0xff] }
 0x2c0   :  { %5515 = vmatprep.subr.bf16.mxu0 %v5514_v53  ;;  %v1399_v53 = vld [vmem:[#allocation2 + $0x3b0] sm:$0xff]  ;;  %v1602_v39 = vld [vmem:[#allocation2 + $0x4b8] sm:$0xff]  ;;  %v1608_v45 = vld [vmem:[#allocation2 + $0x4e8] sm:$0xff] }
 0x2c1   :  { %5577 = vmatpush1.bf16.msra.mxu1 %v5576_v58  ;;  %v1401_v58 = vld [vmem:[#allocation2 + $0x3c0] sm:$0xff]  ;;  %v5596_v0 = vpack.c.bf16 %v1399_v53, %v1395_v52  ;;  %v5674_v42 = vpack.c.bf16 %v1602_v39, %v1598_v38  ;;  %v5614_v46 = vpack.c.bf16 %v1608_v45, %v1604_v44  ;;  %v1610_v53 = vld [vmem:[#allocation2 + $0x4f8] sm:$0xff]  ;;  %v1640_v38 = vld [vmem:[#allocation2 + $0x5e8] sm:$0xff] }
 0x2c2   :  { %5579 = vmatprep.subr.bf16.mxu1 %v5578_v13  ;;  %v1405_v13 = vld [vmem:[#allocation2 + $0x3e0] sm:$0xff]  ;;  %v1642_v44 = vld [vmem:[#allocation2 + $0x5f8] sm:$0xff]  ;;  %v1637_v45 = vld [vmem:[#allocation2 + $0x5d0] sm:$0xff] }
 0x2c3   :  { %5517 = vmatpush1.bf16.msra.mxu0 %v5516_v61  ;;  %v1403_v61 = vld [vmem:[#allocation2 + $0x3d0] sm:$0xff]  ;;  %v5536_v63 = vpack.c.bf16 %v1405_v13, %v1401_v58  ;;  %v1616_v58 = vld [vmem:[#allocation2 + $0x528] sm:$0xff] }
 0x2c4   :  { %5519 = vmatprep.subr.bf16.mxu0 %v5518_v1  ;;  %v5600_v1 = vpack.c.bf16 %v1407_v62, %v1403_v61  ;;  %v1611_v62 = vld [vmem:[#allocation2 + $0x500] sm:$0xff] }
 0x2c5   :  { %5581 = vmatpush1.bf16.msra.mxu1 %v5580_v5  ;;  %v1579_v5 = vld [vmem:[#allocation2 + $0x400] sm:$0xff] }
 0x2c6   :  { %5583 = vmatprep.subr.bf16.mxu1 %v5582_v6  ;;  %v1583_v6 = vld [vmem:[#allocation2 + $0x420] sm:$0xff] }
 0x2c7   :  { %5521 = vmatpush1.bf16.msra.mxu0 %v5520_v7  ;;  %v5604_v26 = vpack.c.bf16 %v1583_v6, %v1579_v5  ;;  %v1586_v7 = vld [vmem:[#allocation2 + $0x438] sm:$0xff]  ;;  %v1620_v6 = vld [vmem:[#allocation2 + $0x548] sm:$0xff] }
 0x2c8   :  { %5523 = vmatprep.subr.bf16.mxu0 %v5522_v10  ;;  %v5666_v10 = vpack.c.bf16 %v1586_v7, %v1582_v12  ;;  %v1624_v12 = vld [vmem:[#allocation2 + $0x568] sm:$0xff]  ;;  %v1619_v7 = vld [vmem:[#allocation2 + $0x540] sm:$0xff] }
 0x2c9   :  { %5585 = vmatpush1.bf16.msra.mxu1 %v5584_v21  ;;  %v5606_v21 = vpack.c.bf16 %v1592_v19, %v1588_v14  ;;  %v1621_v14 = vld [vmem:[#allocation2 + $0x550] sm:$0xff] }
 0x2ca   :  { %5587 = vmatprep.subr.bf16.mxu1 %v5586_v22  ;;  %v1591_v22 = vld [vmem:[#allocation2 + $0x460] sm:$0xff]  ;;  %v1625_v19 = vld [vmem:[#allocation2 + $0x570] sm:$0xff] }
 0x2cb   :  { %5525 = vmatpush1.bf16.msra.mxu0 %v5524_v27  ;;  %v5608_v27 = vpack.c.bf16 %v1591_v22, %v1587_v20  ;;  %v1628_v22 = vld [vmem:[#allocation2 + $0x588] sm:$0xff] }
 0x2cc   :  { %5527 = vmatprep.subr.bf16.mxu0 %v5526_v31  ;;  %v1593_v31 = vld [vmem:[#allocation2 + $0x470] sm:$0xff]  ;;  %v5626_v25 = vpack.c.bf16 %v1632_v23, %v1628_v22 }
 0x2cd   :  { %5589 = vmatpush1.bf16.msra.mxu1 %v5588_v36  ;;  %v5672_v33 = vpack.c.bf16 %v1593_v31, %v1589_v29  ;;  %v1599_v36 = vld [vmem:[#allocation2 + $0x4a0] sm:$0xff]  ;;  %v1630_v29 = vld [vmem:[#allocation2 + $0x598] sm:$0xff]  ;;  %v1661_v22 = vld [vmem:[#allocation2 + $0x690] sm:$0xff] }
 0x2ce   :  { %5591 = vmatprep.subr.bf16.mxu1 %v5590_v37  ;;  %v5610_v37 = vpack.c.bf16 %v1600_v34, %v1596_v32  ;;  %v5612_v41 = vpack.c.bf16 %v1599_v36, %v1595_v35  ;;  %v1634_v32 = vld [vmem:[#allocation2 + $0x5b8] sm:$0xff]  ;;  %v1633_v34 = vld [vmem:[#allocation2 + $0x5b0] sm:$0xff] }
 0x2cf   :  { %5529 = vmatpush1.bf16.msra.mxu0 %v5528_v40  ;;  %v1597_v40 = vld [vmem:[#allocation2 + $0x490] sm:$0xff]  ;;  %v5690_v35 = vpack.c.bf16 %v1634_v32, %v1630_v29  ;;  %v1672_v29 = vld [vmem:[#allocation2 + $0x6e8] sm:$0xff]  ;;  %v1667_v32 = vld [vmem:[#allocation2 + $0x6c0] sm:$0xff] }
 0x2d0   :  { %5531 = vmatprep.subr.bf16.mxu0 %v5530_v43  ;;  %v1601_v43 = vld [vmem:[#allocation2 + $0x4b0] sm:$0xff] }
 0x2d1   :  { %5593 = vmatpush1.bf16.msra.mxu1 %v5592_v48  ;;  %v1607_v48 = vld [vmem:[#allocation2 + $0x4e0] sm:$0xff]  ;;  %v5676_v52 = vpack.c.bf16 %v1601_v43, %v1597_v40  ;;  %v1665_v23 = vld [vmem:[#allocation2 + $0x6b0] sm:$0xff] }
 0x2d2   :  { %5595 = vmatprep.subr.bf16.mxu1 %v5594_v51  ;;  %v1606_v51 = vld [vmem:[#allocation2 + $0x4d8] sm:$0xff]  ;;  %v5616_v13 = vpack.c.bf16 %v1607_v48, %v1603_v47  ;;  %v1635_v40 = vld [vmem:[#allocation2 + $0x5c0] sm:$0xff] }
 0x2d3   :  { %5533 = vmatpush1.bf16.msra.mxu0 %v5532_v54  ;;  %v1605_v54 = vld [vmem:[#allocation2 + $0x4d0] sm:$0xff]  ;;  %v5678_v55 = vpack.c.bf16 %v1610_v53, %v1606_v51  ;;  %v1644_v51 = vld [vmem:[#allocation2 + $0x608] sm:$0xff] }
 0x2d4   :  { %5535 = vmatprep.subr.bf16.mxu0 %v5534_v57  ;;  %v1612_v57 = vld [vmem:[#allocation2 + $0x508] sm:$0xff] }
 0x2d5   :  { %5597 = vmatpush1.bf16.msra.mxu1 %v5596_v0  ;;  %v1614_v0 = vld [vmem:[#allocation2 + $0x518] sm:$0xff]  ;;  %v5618_v61 = vpack.c.bf16 %v1616_v58, %v1612_v57 }
 0x2d6   :  { %5599 = vmatprep.subr.bf16.mxu1 %v5598_v60  ;;  %v1618_v60 = vld [vmem:[#allocation2 + $0x538] sm:$0xff] }
 0x2d7   :  { %5537 = vmatpush1.bf16.msra.mxu0 %v5536_v63  ;;  %v1615_v63 = vld [vmem:[#allocation2 + $0x520] sm:$0xff]  ;;  %v1650_v58 = vld [vmem:[#allocation2 + $0x638] sm:$0xff] }
 0x2d8   :  { %5603 = vmatprep.subr.bf16.mxu0 %v5602_v4  ;;  %v5620_v2 = vpack.c.bf16 %v1615_v63, %v1611_v62  ;;  %v1617_v4 = vld [vmem:[#allocation2 + $0x530] sm:$0xff]  ;;  %v1652_v62 = vld [vmem:[#allocation2 + $0x648] sm:$0xff] }
 0x2d9   :  { %5601 = vmatpush1.bf16.msra.mxu1 %v5600_v1  ;;  %v5680_v1 = vpack.c.bf16 %v1609_v56, %v1605_v54  ;;  %v5684_v5 = vpack.c.bf16 %v1617_v4, %v1613_v3  ;;  %v1643_v54 = vld [vmem:[#allocation2 + $0x600] sm:$0xff]  ;;  %v1646_v56 = vld [vmem:[#allocation2 + $0x618] sm:$0xff]  ;;  %v1656_v63 = vld [vmem:[#allocation2 + $0x668] sm:$0xff] }
 0x2da   :  { %1474 = vmatmul.mubr.f32.vlgmr.msra.gmra.mrb[8].mxu0 %v4896_v18  ;;  %5667 = vmatprep.subr.bf16.mxu1 %v5666_v10  ;;  %v5624_v10 = vpack.c.bf16 %v1623_v8, %v1619_v7  ;;  %v1654_v3 = vld [vmem:[#allocation2 + $0x658] sm:$0xff]  ;;  %v1660_v8 = vld [vmem:[#allocation2 + $0x688] sm:$0xff] }
 0x2db   :  { %5605 = vmatpush1.bf16.msra.mxu0 %v5604_v26  ;;  %v5622_v26 = vpack.c.bf16 %v1624_v12, %v1620_v6  ;;  %v1653_v6 = vld [vmem:[#allocation2 + $0x650] sm:$0xff] }
 0x2dc   :  { %1545 = vmatmul.mubr.f32.vlgmr.msra.gmra.mrb[8].mxu1 %v4896_v18  ;;  %5607 = vmatprep.subr.bf16.mxu0 %v5606_v21  ;;  %v5682_v18 = vpack.c.bf16 %v1618_v60, %v1614_v0  ;;  %v5688_v21 = vpack.c.bf16 %v1625_v19, %v1621_v14  ;;  %v1649_v0 = vld [vmem:[#allocation2 + $0x630] sm:$0xff]  ;;  %v5698_v60 = vpack.c.bf16 %v1650_v58, %v1646_v56  ;;  %v1663_v14 = vld [vmem:[#allocation2 + $0x6a0] sm:$0xff]  ;;  %v1662_v19 = vld [vmem:[#allocation2 + $0x698] sm:$0xff] }
 0x2dd   :  { %5669 = vmatpush1.bf16.msra.mxu1 %v5668_v11  ;;  %v1626_v11 = vld [vmem:[#allocation2 + $0x578] sm:$0xff]  ;;  %v1657_v12 = vld [vmem:[#allocation2 + $0x670] sm:$0xff]  ;;  %v1688_v56 = vld [vmem:[#allocation2 + $0x768] sm:$0xff] }
 0x2de   :  { %5671 = vmatprep.subr.bf16.mxu1 %v5670_v28  ;;  %v5686_v20 = vpack.c.bf16 %v1626_v11, %v1622_v9  ;;  %v1631_v28 = vld [vmem:[#allocation2 + $0x5a0] sm:$0xff]  ;;  %v5704_v7 = vpack.c.bf16 %v1657_v12, %v1653_v6  ;;  %v1664_v9 = vld [vmem:[#allocation2 + $0x6a8] sm:$0xff]  ;;  %v1694_v12 = vld [vmem:[#allocation2 + $0x798] sm:$0xff] }
 0x2df   :  { %5609 = vmatpush1.bf16.msra.mxu0 %v5608_v27  ;;  %v1627_v27 = vld [vmem:[#allocation2 + $0x580] sm:$0xff] }
 0x2e0   :  { %5611 = vmatprep.subr.bf16.mxu0 %v5610_v37  ;;  %v5628_v31 = vpack.c.bf16 %v1631_v28, %v1627_v27  ;;  %v1636_v37 = vld [vmem:[#allocation2 + $0x5c8] sm:$0xff]  ;;  %v1659_v11 = vld [vmem:[#allocation2 + $0x680] sm:$0xff]  ;;  %v5708_v27 = vpack.c.bf16 %v1665_v23, %v1661_v22  ;;  %v1702_v23 = vld [vmem:[#allocation2 + $0x7d8] sm:$0xff] }
 0x2e1   :  { %5673 = vmatpush1.bf16.msra.mxu1 %v5672_v33  ;;  %v1629_v33 = vld [vmem:[#allocation2 + $0x590] sm:$0xff]  ;;  %v5630_v39 = vpack.c.bf16 %v1640_v38, %v1636_v37  ;;  %v1668_v28 = vld [vmem:[#allocation2 + $0x6c8] sm:$0xff]  ;;  %v1683_v58 = vld [vmem:[#allocation2 + $0x740] sm:$0xff] }
 0x2e2   :  { %5675 = vmatprep.subr.bf16.mxu1 %v5674_v42  ;;  %v5692_v36 = vpack.c.bf16 %v1633_v34, %v1629_v33  ;;  %v1638_v42 = vld [vmem:[#allocation2 + $0x5d8] sm:$0xff]  ;;  %v1671_v33 = vld [vmem:[#allocation2 + $0x6e0] sm:$0xff]  ;;  %v1669_v37 = vld [vmem:[#allocation2 + $0x6d0] sm:$0xff] }
 0x2e3   :  { %5613 = vmatpush1.bf16.msra.mxu0 %v5612_v41  ;;  %v1639_v41 = vld [vmem:[#allocation2 + $0x5e0] sm:$0xff]  ;;  %v5694_v47 = vpack.c.bf16 %v1642_v44, %v1638_v42  ;;  %v1670_v34 = vld [vmem:[#allocation2 + $0x6d8] sm:$0xff]  ;;  %v1673_v38 = vld [vmem:[#allocation2 + $0x6f0] sm:$0xff] }
 0x2e4   :  { %5615 = vmatprep.subr.bf16.mxu0 %v5614_v46  ;;  %v5632_v43 = vpack.c.bf16 %v1639_v41, %v1635_v40  ;;  %v1641_v46 = vld [vmem:[#allocation2 + $0x5f0] sm:$0xff]  ;;  %v5712_v40 = vpack.c.bf16 %v1673_v38, %v1669_v37  ;;  %v1676_v41 = vld [vmem:[#allocation2 + $0x708] sm:$0xff]  ;;  %v1675_v44 = vld [vmem:[#allocation2 + $0x700] sm:$0xff] }
 0x2e5   :  { %5677 = vmatpush1.bf16.msra.mxu1 %v5676_v52  ;;  %v5696_v48 = vpack.c.bf16 %v1641_v46, %v1637_v45  ;;  %v1648_v52 = vld [vmem:[#allocation2 + $0x628] sm:$0xff]  ;;  %v1679_v45 = vld [vmem:[#allocation2 + $0x720] sm:$0xff]  ;;  %v1678_v46 = vld [vmem:[#allocation2 + $0x718] sm:$0xff] }
 0x2e6   :  { %5679 = vmatprep.subr.bf16.mxu1 %v5678_v55  ;;  %v5634_v53 = vpack.c.bf16 %v1648_v52, %v1644_v51  ;;  %v1647_v55 = vld [vmem:[#allocation2 + $0x620] sm:$0xff]  ;;  %v1680_v42 = vld [vmem:[#allocation2 + $0x728] sm:$0xff]  ;;  %v1677_v51 = vld [vmem:[#allocation2 + $0x710] sm:$0xff] }
 0x2e7   :  { %5617 = vmatpush1.bf16.msra.mxu0 %v5616_v13  ;;  %v5636_v57 = vpack.c.bf16 %v1647_v55, %v1643_v54  ;;  %v1645_v13 = vld [vmem:[#allocation2 + $0x610] sm:$0xff]  ;;  %v1684_v55 = vld [vmem:[#allocation2 + $0x748] sm:$0xff]  ;;  %v1695_v6 = vld [vmem:[#allocation2 + $0x7a0] sm:$0xff] }
 0x2e8   :  { %5619 = vmatprep.subr.bf16.mxu0 %v5618_v61  ;;  %v5700_v61 = vpack.c.bf16 %v1649_v0, %v1645_v13  ;;  %v1681_v52 = vld [vmem:[#allocation2 + $0x730] sm:$0xff]  ;;  %v1687_v13 = vld [vmem:[#allocation2 + $0x760] sm:$0xff]  ;;  %v1686_v0 = vld [vmem:[#allocation2 + $0x758] sm:$0xff] }
 0x2e9   :  { %5681 = vmatpush1.bf16.msra.mxu1 %v5680_v1  ;;  %v5638_v1 = vpack.c.bf16 %v1656_v63, %v1652_v62  ;;  %v5716_v54 = vpack.c.bf16 %v1681_v52, %v1677_v51  ;;  %v1685_v62 = vld [vmem:[#allocation2 + $0x750] sm:$0xff]  ;;  %v1886_v37 = vld [vmem:[#allocation2 + $0x38] sm:$0xff] }
 0x2ea   :  { %5683 = vmatprep.subr.bf16.mxu1 %v5682_v18  ;;  %v1651_v18 = vld [vmem:[#allocation2 + $0x640] sm:$0xff]  ;;  %v1689_v63 = vld [vmem:[#allocation2 + $0x770] sm:$0xff] }
 0x2eb   :  { %5621 = vmatpush1.bf16.msra.mxu0 %v5620_v2  ;;  %v1655_v2 = vld [vmem:[#allocation2 + $0x660] sm:$0xff] }
 0x2ec   :  { %5623 = vmatprep.subr.bf16.mxu0 %v5622_v26  ;;  %v5640_v4 = vpack.c.bf16 %v1655_v2, %v1651_v18  ;;  %v5720_v18 = vpack.c.bf16 %v1689_v63, %v1685_v62  ;;  %v1692_v2 = vld [vmem:[#allocation2 + $0x788] sm:$0xff] }
 0x2ed   :  { %5685 = vmatpush1.bf16.msra.mxu1 %v5684_v5  ;;  %v1658_v5 = vld [vmem:[#allocation2 + $0x678] sm:$0xff] }
 0x2ee   :  { %5687 = vmatprep.subr.bf16.mxu1 %v5686_v20  ;;  %v5702_v26 = vpack.c.bf16 %v1658_v5, %v1654_v3  ;;  %v5644_v20 = vpack.c.bf16 %v1663_v14, %v1659_v11  ;;  %v1696_v3 = vld [vmem:[#allocation2 + $0x7a8] sm:$0xff] }
 0x2ef   :  { %5625 = vmatpush1.bf16.msra.mxu0 %v5624_v10  ;;  %v5642_v10 = vpack.c.bf16 %v1664_v9, %v1660_v8  ;;  %v5658_v5 = vpack.c.bf16 %v1696_v3, %v1692_v2  ;;  %v1693_v9 = vld [vmem:[#allocation2 + $0x790] sm:$0xff]  ;;  %v1700_v11 = vld [vmem:[#allocation2 + $0x7c8] sm:$0xff] }
 0x2f0   :  { %5627 = vmatprep.subr.bf16.mxu0 %v5626_v25 }
 0x2f1   :  { %5689 = vmatpush1.bf16.msra.mxu1 %v5688_v21  ;;  %v1666_v21 = vld [vmem:[#allocation2 + $0x6b8] sm:$0xff] }
 0x2f2   :  { %5691 = vmatprep.subr.bf16.mxu1 %v5690_v35  ;;  %v5706_v25 = vpack.c.bf16 %v1666_v21, %v1662_v19  ;;  %v5648_v35 = vpack.c.bf16 %v1671_v33, %v1667_v32  ;;  %v1704_v19 = vld [vmem:[#allocation2 + $0x7e8] sm:$0xff]  ;;  %v1703_v21 = vld [vmem:[#allocation2 + $0x7e0] sm:$0xff] }
 0x2f3   :  { %5629 = vmatpush1.bf16.msra.mxu0 %v5628_v31  ;;  %v5646_v31 = vpack.c.bf16 %v1672_v29, %v1668_v28  ;;  %v5662_v22 = vpack.c.bf16 %v1704_v19, %v1700_v11  ;;  %v1880_v32 = vld [vmem:[#allocation2 + $0x8] sm:$0xff] }
 0x2f4   :  { %5631 = vmatprep.subr.bf16.mxu0 %v5630_v39  ;;  %v1884_v33 = vld [vmem:[#allocation2 + $0x28] sm:$0xff] }
 0x2f5   :  { %5693 = vmatpush1.bf16.msra.mxu1 %v5692_v36  ;;  %v1674_v36 = vld [vmem:[#allocation2 + $0x6f8] sm:$0xff] }
 0x2f6   :  { %5695 = vmatprep.subr.bf16.mxu1 %v5694_v47  ;;  %v5710_v39 = vpack.c.bf16 %v1674_v36, %v1670_v34  ;;  %v5652_v47 = vpack.c.bf16 %v1679_v45, %v1675_v44  ;;  %v5730_v34 = vpack.c.bf16 %v1884_v33, %v1880_v32  ;;  %v1882_v36 = vld [vmem:[#allocation2 + $0x18] sm:$0xff] }
 0x2f7   :  { %5633 = vmatpush1.bf16.msra.mxu0 %v5632_v43  ;;  %v5650_v43 = vpack.c.bf16 %v1680_v42, %v1676_v41  ;;  %v5794_v38 = vpack.c.bf16 %v1886_v37, %v1882_v36  ;;  %v1888_v37 = vld [vmem:[#allocation2 + $0x48] sm:$0xff] }
 0x2f8   :  { %5635 = vmatprep.subr.bf16.mxu0 %v5634_v53 }
 0x2f9   :  { %5697 = vmatpush1.bf16.msra.mxu1 %v5696_v48  ;;  %v1682_v48 = vld [vmem:[#allocation2 + $0x738] sm:$0xff] }
 0x2fa   :  { %5699 = vmatprep.subr.bf16.mxu1 %v5698_v60  ;;  %v5714_v53 = vpack.c.bf16 %v1682_v48, %v1678_v46  ;;  %v5656_v60 = vpack.c.bf16 %v1687_v13, %v1683_v58 }
 0x2fb   :  { %5637 = vmatpush1.bf16.msra.mxu0 %v5636_v57  ;;  %v5654_v57 = vpack.c.bf16 %v1688_v56, %v1684_v55 }
 0x2fc   :  { %5639 = vmatprep.subr.bf16.mxu0 %v5638_v1 }
 0x2fd   :  { %5701 = vmatpush1.bf16.msra.mxu1 %v5700_v61  ;;  %v1690_v61 = vld [vmem:[#allocation2 + $0x778] sm:$0xff] }
 0x2fe   :  { %5703 = vmatprep.subr.bf16.mxu1 %v5702_v26  ;;  %v5718_v1 = vpack.c.bf16 %v1690_v61, %v1686_v0  ;;  %v1698_v26 = vld [vmem:[#allocation2 + $0x7b8] sm:$0xff] }
 0x2ff   :  { %5641 = vmatpush1.bf16.msra.mxu0 %v5640_v4  ;;  %v1691_v4 = vld [vmem:[#allocation2 + $0x780] sm:$0xff]  ;;  %v5722_v8 = vpack.c.bf16 %v1698_v26, %v1694_v12 }
 0x300   :  { %5643 = vmatprep.subr.bf16.mxu0 %v5642_v10  ;;  %v1697_v10 = vld [vmem:[#allocation2 + $0x7b0] sm:$0xff] }
 0x301   :  { %5705 = vmatpush1.bf16.msra.mxu1 %v5704_v7  ;;  %v5660_v7 = vpack.c.bf16 %v1695_v6, %v1691_v4  ;;  %v5724_v14 = vpack.c.bf16 %v1697_v10, %v1693_v9 }
 0x302   :  { %5707 = vmatprep.subr.bf16.mxu1 %v5706_v25  ;;  %v1706_v25 = vld [vmem:[#allocation2 + $0x7f8] sm:$0xff] }
 0x303   :  { %5645 = vmatpush1.bf16.msra.mxu0 %v5644_v20  ;;  %v1699_v20 = vld [vmem:[#allocation2 + $0x7c0] sm:$0xff]  ;;  %v5726_v29 = vpack.c.bf16 %v1706_v25, %v1702_v23 }
 0x304   :  { %5647 = vmatprep.subr.bf16.mxu0 %v5646_v31  ;;  %v5664_v28 = vpack.c.bf16 %v1703_v21, %v1699_v20  ;;  %v1705_v31 = vld [vmem:[#allocation2 + $0x7f0] sm:$0xff] }
 0x305   :  { %5709 = vmatpush1.bf16.msra.mxu1 %v5708_v27  ;;  %v1701_v27 = vld [vmem:[#allocation2 + $0x7d0] sm:$0xff] }
 0x306   :  { %5711 = vmatprep.subr.bf16.mxu1 %v5710_v39 }
 0x307   :  { %5649 = vmatpush1.bf16.msra.mxu0 %v5648_v35  ;;  %v5728_v35 = vpack.c.bf16 %v1705_v31, %v1701_v27 }
 0x308   :  { %5651 = vmatprep.subr.bf16.mxu0 %v5650_v43 }
 0x309   :  { %5713 = vmatpush1.bf16.msra.mxu1 %v5712_v40 }
 0x30a   :  { %5715 = vmatprep.subr.bf16.mxu1 %v5714_v53 }
 0x30b   :  { %5653 = vmatpush1.bf16.msra.mxu0 %v5652_v47 }
 0x30c   :  { %5655 = vmatprep.subr.bf16.mxu0 %v5654_v57 }
 0x30d   :  { %5717 = vmatpush1.bf16.msra.mxu1 %v5716_v54 }
 0x30e   :  { %5719 = vmatprep.subr.bf16.mxu1 %v5718_v1 }
 0x30f   :  { %5657 = vmatpush1.bf16.msra.mxu0 %v5656_v60  ;;  %v4890_v60 = vld [vmem:[%s7569_s4 + $0x8] sm:$0xff] }
 0x310   :  { %5659 = vmatprep.subr.bf16.mxu0 %v5658_v5 }
 0x311   :  { %5721 = vmatpush1.bf16.msra.mxu1 %v5720_v18 }
 0x312   :  { %5723 = vmatprep.subr.bf16.mxu1 %v5722_v8 }
 0x313   :  { %5661 = vmatpush1.bf16.msra.mxu0 %v5660_v7 }
 0x314   :  { %5663 = vmatprep.subr.bf16.mxu0 %v5662_v22 }
 0x315   :  { %5725 = vmatpush1.bf16.msra.mxu1 %v5724_v14 }
 0x316   :  { %5727 = vmatprep.subr.bf16.mxu1 %v5726_v29  ;;  %v1280_v29 = vld [vmem:[%s7569_s4] sm:$0xff] }
 0x317   :  { %5665 = vmatpush1.bf16.msra.mxu0 %v5664_v28 }
 0x318   :  { %5731 = vmatprep.subr.bf16.mxu0 %v5730_v34  ;;  %v1879_v34 = vld [vmem:[#allocation2] sm:$0xff] }
 0x319   :  { %5729 = vmatpush1.bf16.msra.mxu1 %v5728_v35  ;;  %v1883_v35 = vld [vmem:[#allocation2 + $0x20] sm:$0xff] }
 0x31a   :  { %5795 = vmatprep.subr.bf16.mxu1 %v5794_v38  ;;  %v1892_v38 = vld [vmem:[#allocation2 + $0x68] sm:$0xff] }
 0x36d   :  { %v1175_v39 = vpop.f32.mrb[6].mxu0  ;;  %v1246_v40 = vpop.f32.mrb[6].mxu1 }
 0x36e   :  { %v1176_v41 = vadd.f32 %v1175_v39, %v7382_v49  ;;  %v1177_v42 = vpop.f32.mrb[7].mxu0  ;;  %v1248_v43 = vpop.f32.mrb[7].mxu1  ;;  %v1247_v51 = vadd.f32 %v1246_v40, %v7397_v15  ;;  %v1881_v39 = vld [vmem:[#allocation2 + $0x10] sm:$0xff] }
 0x36f   :  { %v1178_v44 = vadd.f32 %v1177_v42, %v7386_v50  ;;  %v1249_v47 = vadd.f32 %v1248_v43, %v7392_v59  ;;  %v1885_v40 = vld [vmem:[#allocation2 + $0x30] sm:$0xff]  ;;  %v5732_v42 = vpack.c.bf16 %v1883_v35, %v1879_v34  ;;  %v1890_v43 = vld [vmem:[#allocation2 + $0x58] sm:$0xff] }
 0x370   :  { %v4891_v45 = vmul.f32 -1.442695, %v1176_v41  ;;  %v1917_v34 = vld [vmem:[#allocation2 + $0x130] sm:$0xff] }
 0x371   :  { %v4892_v46 = vmul.f32 -1.442695, %v1178_v44  ;;  %v4893_v48 = vmul.f32 -1.442695, %v1249_v47  ;;  %v1894_v44 = vld [vmem:[#allocation2 + $0x78] sm:$0xff]  ;;  %v1887_v47 = vld [vmem:[#allocation2 + $0x40] sm:$0xff] }
 0x372   :  { %7062 = vpow2.f32 %v4891_v45 }
 0x373   :  { %7064 = vpow2.f32 %v4892_v46  ;;  %v5734_v46 = vpack.c.bf16 %v1892_v38, %v1888_v37  ;;  %v1926_v37 = vld [vmem:[#allocation2 + $0x178] sm:$0xff] }
 0x374   :  { %7066 = vpow2.f32 %v4893_v48  ;;  %v1891_v48 = vld [vmem:[#allocation2 + $0x60] sm:$0xff] }
 0x375   :  { %7068 = vtanh.f32 %v1247_v51  ;;  %v1896_v51 = vld [vmem:[#allocation2 + $0x88] sm:$0xff] }
 0x37c   :  { %v7063_v52 = vpop.eup %7062 }
 0x37d   :  { %v7065_v53 = vpop.eup %7064  ;;  %v1254_v54 = vadd.f32 1.0, %v7063_v52  ;;  %v1900_v52 = vld [vmem:[#allocation2 + $0xa8] sm:$0xff] }
 0x37e   :  { %v1260_v55 = vadd.f32 1.0, %v7065_v53  ;;  %v7067_v56 = vpop.eup %7066  ;;  %v5796_v53 = vpack.c.bf16 %v1885_v40, %v1881_v39  ;;  %v1919_v39 = vld [vmem:[#allocation2 + $0x140] sm:$0xff] }
 0x37f   :  { %7070 = vrcp.f32 %v1254_v54  ;;  %v7069_v57 = vpop.eup %7068  ;;  %v1267_v61 = vadd.f32 1.0, %v7067_v56  ;;  %v5798_v54 = vpack.c.bf16 %v1894_v44, %v1890_v43  ;;  %v1893_v56 = vld [vmem:[#allocation2 + $0x70] sm:$0xff]  ;;  %v1923_v40 = vld [vmem:[#allocation2 + $0x160] sm:$0xff] }
 0x380   :  { %7072 = vrcp.f32 %v1260_v55  ;;  %v1889_v55 = vld [vmem:[#allocation2 + $0x50] sm:$0xff] }
 0x381   :  { %7074 = vrcp.f32 %v1267_v61  ;;  %v1899_v61 = vld [vmem:[#allocation2 + $0xa0] sm:$0xff] }
 0x389   :  { %v7071_v58 = vpop.eup %7070 }
 0x38a   :  { %v7073_v13 = vpop.eup %7072  ;;  %v1271_v0 = vmul.f32 %v7071_v58, %v7069_v57  ;;  %v5736_v57 = vpack.c.bf16 %v1891_v48, %v1887_v47  ;;  %v1898_v58 = vld [vmem:[#allocation2 + $0x98] sm:$0xff]  ;;  %v5752_v47 = vpack.c.bf16 %v1923_v40, %v1919_v39 }
 0x38b   :  { %v1270_v62 = vmul.f32 %v7073_v13, %v4890_v60  ;;  %v7075_v1 = vpop.eup %7074  ;;  %v1902_v13 = vld [vmem:[#allocation2 + $0xb8] sm:$0xff]  ;;  %v1895_v60 = vld [vmem:[#allocation2 + $0x80] sm:$0xff] }
 0x38c   :  { %v1930_v48 = vld [vmem:[#allocation2 + $0x198] sm:$0xff] }
 0x38d   :  { %v1272_v63 = vadd.f32 %v1271_v0, %v1270_v62  ;;  %v5738_v0 = vpack.c.bf16 %v1900_v52, %v1896_v51  ;;  %v1904_v62 = vld [vmem:[#allocation2 + $0xc8] sm:$0xff]  ;;  %v1934_v51 = vld [vmem:[#allocation2 + $0x1b8] sm:$0xff] }
 0x38e   :  { %v1962_v40 = vld [vmem:[#allocation2 + $0x298] sm:$0xff] }
 0x38f   :  { %7076 = vtanh.f32 %v1272_v63  ;;  %4895 = vst [vmem:[%s7569_s4 + $0x8] sm:$0xff] %v1272_v63  ;;  %v1908_v63 = vld [vmem:[#allocation2 + $0xe8] sm:$0xff] }
 0x399   :  { %v7077_v18 = vpop.eup %7076 }
 0x39a   :  { %v1274_v2 = vmul.f32 %v7077_v18, %v7075_v1  ;;  %v5800_v1 = vpack.c.bf16 %v1893_v56, %v1889_v55  ;;  %v5802_v18 = vpack.c.bf16 %v1902_v13, %v1898_v58  ;;  %v1936_v55 = vld [vmem:[#allocation2 + $0x1c8] sm:$0xff]  ;;  %v5818_v58 = vpack.c.bf16 %v1934_v51, %v1930_v48  ;;  %v1929_v13 = vld [vmem:[#allocation2 + $0x190] sm:$0xff] }
 0x39b   :  { %v1940_v56 = vld [vmem:[#allocation2 + $0x1e8] sm:$0xff]  ;;  %v1961_v51 = vld [vmem:[#allocation2 + $0x290] sm:$0xff] }
 0x39c   :  { %1771 = vmatprep.mubr.f32.mxu0 %v1274_v2  ;;  %1842 = vmatprep.mubr.f32.mxu1 %v1274_v2  ;;  %v1897_v2 = vld [vmem:[#allocation2 + $0x90] sm:$0xff] }
 0x3ad   :  { %v1475_v3 = vpop.f32.mrb[8].mxu0 }
 0x3ae   :  { %v1476_v4 = vadd.f32 %v1475_v3, %v7351_v16  ;;  %v1477_v5 = vpop.f32.mrb[9].mxu0  ;;  %v1901_v3 = vld [vmem:[#allocation2 + $0xb0] sm:$0xff] }
 0x3af   :  { %v1478_v6 = vadd.f32 %v1477_v5, %v7355_v17  ;;  %v1546_v12 = vpop.f32.mrb[8].mxu1  ;;  %v1906_v5 = vld [vmem:[#allocation2 + $0xd8] sm:$0xff] }
 0x3b0   :  { %v4897_v26 = vmul.f32 -1.442695, %v1476_v4  ;;  %v1548_v7 = vpop.f32.mrb[9].mxu1  ;;  %v1547_v11 = vadd.f32 %v1546_v12, %v7368_v30  ;;  %v5740_v4 = vpack.c.bf16 %v1899_v61, %v1895_v60  ;;  %v5742_v12 = vpack.c.bf16 %v1908_v63, %v1904_v62  ;;  %v1938_v61 = vld [vmem:[#allocation2 + $0x1d8] sm:$0xff] }
 0x3b1   :  { %v4898_v8 = vmul.f32 -1.442695, %v1478_v6  ;;  %v1549_v9 = vadd.f32 %v1548_v7, %v7362_v24  ;;  %v1910_v6 = vld [vmem:[#allocation2 + $0xf8] sm:$0xff]  ;;  %v1907_v7 = vld [vmem:[#allocation2 + $0xe0] sm:$0xff]  ;;  %v5758_v63 = vpack.c.bf16 %v1940_v56, %v1936_v55 }
 0x3b2   :  { %7078 = vpow2.f32 %v4897_v26  ;;  %v1903_v26 = vld [vmem:[#allocation2 + $0xc0] sm:$0xff]  ;;  %v1942_v62 = vld [vmem:[#allocation2 + $0x1f8] sm:$0xff] }
 0x3b3   :  { %7080 = vpow2.f32 %v4898_v8  ;;  %v4899_v10 = vmul.f32 -1.442695, %v1549_v9  ;;  %v1912_v8 = vld [vmem:[#allocation2 + $0x108] sm:$0xff]  ;;  %v1974_v55 = vld [vmem:[#allocation2 + $0x2f8] sm:$0xff] }
 0x3b4   :  { %v1916_v9 = vld [vmem:[#allocation2 + $0x128] sm:$0xff] }
 0x3b5   :  { %7082 = vpow2.f32 %v4899_v10  ;;  %v5804_v10 = vpack.c.bf16 %v1901_v3, %v1897_v2  ;;  %v1944_v2 = vld [vmem:[#allocation2 + $0x208] sm:$0xff] }
 0x3b6   :  { %7084 = vtanh.f32 %v1547_v11  ;;  %v5806_v11 = vpack.c.bf16 %v1910_v6, %v1906_v5  ;;  %v1948_v3 = vld [vmem:[#allocation2 + $0x228] sm:$0xff]  ;;  %v5822_v5 = vpack.c.bf16 %v1942_v62, %v1938_v61  ;;  %v1937_v6 = vld [vmem:[#allocation2 + $0x1d0] sm:$0xff] }
 0x3b7   :  { %v1969_v62 = vld [vmem:[#allocation2 + $0x2d0] sm:$0xff] }
 0x3bc   :  { %v7079_v14 = vpop.eup %7078 }
 0x3bd   :  { %v7081_v19 = vpop.eup %7080  ;;  %v1554_v20 = vadd.f32 1.0, %v7079_v14  ;;  %v1905_v14 = vld [vmem:[#allocation2 + $0xd0] sm:$0xff] }
 0x3be   :  { %v1560_v21 = vadd.f32 1.0, %v7081_v19  ;;  %v1909_v19 = vld [vmem:[#allocation2 + $0xf0] sm:$0xff] }
 0x3bf   :  { %7086 = vrcp.f32 %v1554_v20  ;;  %v7083_v22 = vpop.eup %7082  ;;  %v5744_v20 = vpack.c.bf16 %v1907_v7, %v1903_v26  ;;  %v1946_v7 = vld [vmem:[#allocation2 + $0x218] sm:$0xff] }
 0x3c0   :  { %7088 = vrcp.f32 %v1560_v21  ;;  %v7085_v23 = vpop.eup %7084  ;;  %v1567_v27 = vadd.f32 1.0, %v7083_v22  ;;  %v1914_v21 = vld [vmem:[#allocation2 + $0x118] sm:$0xff] }
 0x3c1   :  { %v1918_v22 = vld [vmem:[#allocation2 + $0x138] sm:$0xff] }
 0x3c2   :  { %7090 = vrcp.f32 %v1567_v27  ;;  %v1915_v27 = vld [vmem:[#allocation2 + $0x120] sm:$0xff] }
 0x3c9   :  { %v7087_v25 = vpop.eup %7086 }
 0x3ca   :  { %v7089_v28 = vpop.eup %7088  ;;  %v1571_v31 = vmul.f32 %v7087_v25, %v7085_v23  ;;  %v5746_v23 = vpack.c.bf16 %v1916_v9, %v1912_v8  ;;  %v1911_v25 = vld [vmem:[#allocation2 + $0x100] sm:$0xff]  ;;  %v1950_v8 = vld [vmem:[#allocation2 + $0x238] sm:$0xff]  ;;  %v5762_v9 = vpack.c.bf16 %v1948_v3, %v1944_v2 }
 0x3cb   :  { %v1570_v32 = vmul.f32 %v7089_v28, %v1280_v29  ;;  %v1920_v28 = vld [vmem:[#allocation2 + $0x148] sm:$0xff]  ;;  %v5748_v35 = vpack.c.bf16 %v1915_v27, %v1911_v25  ;;  %v1954_v27 = vld [vmem:[#allocation2 + $0x258] sm:$0xff] }
 0x3cc   :  { %v7091_v36 = vpop.eup %7090  ;;  %v1924_v29 = vld [vmem:[#allocation2 + $0x168] sm:$0xff]  ;;  %v1982_v2 = vld [vmem:[#allocation2 + $0x338] sm:$0xff] }
 0x3cd   :  { %v1572_v33 = vadd.f32 %v1571_v31, %v1570_v32  ;;  %v5808_v31 = vpack.c.bf16 %v1909_v19, %v1905_v14  ;;  %v5810_v32 = vpack.c.bf16 %v1918_v22, %v1914_v21  ;;  %v5750_v38 = vpack.c.bf16 %v1924_v29, %v1920_v28  ;;  %v1952_v14 = vld [vmem:[#allocation2 + $0x248] sm:$0xff]  ;;  %v1945_v22 = vld [vmem:[#allocation2 + $0x210] sm:$0xff]  ;;  %v1958_v28 = vld [vmem:[#allocation2 + $0x278] sm:$0xff] }
 0x3ce   :  { %v1956_v19 = vld [vmem:[#allocation2 + $0x268] sm:$0xff]  ;;  %v5826_v21 = vpack.c.bf16 %v1950_v8, %v1946_v7  ;;  %v1977_v8 = vld [vmem:[#allocation2 + $0x310] sm:$0xff] }
 0x3cf   :  { %7092 = vtanh.f32 %v1572_v33  ;;  %1576 = vst [vmem:[%s7569_s4] sm:$0xff] %v1572_v33  ;;  %v1913_v33 = vld [vmem:[#allocation2 + $0x110] sm:$0xff]  ;;  %v5766_v29 = vpack.c.bf16 %v1956_v19, %v1952_v14  ;;  %v1990_v14 = vld [vmem:[#allocation2 + $0x378] sm:$0xff] }
 0x3d0   :  { %v5812_v43 = vpack.c.bf16 %v1917_v34, %v1913_v33  ;;  %v1960_v33 = vld [vmem:[#allocation2 + $0x288] sm:$0xff] }
 0x3d1   :  { %v1964_v34 = vld [vmem:[#allocation2 + $0x2a8] sm:$0xff] }
 0x3d9   :  { %v7093_v41 = vpop.eup %7092 }
 0x3da   :  { %v1574_v45 = vmul.f32 %v7093_v41, %v7091_v36  ;;  %v1922_v36 = vld [vmem:[#allocation2 + $0x158] sm:$0xff]  ;;  %v1928_v41 = vld [vmem:[#allocation2 + $0x188] sm:$0xff] }
 0x3db   :  { %v5814_v44 = vpack.c.bf16 %v1926_v37, %v1922_v36  ;;  %v5830_v36 = vpack.c.bf16 %v1958_v28, %v1954_v27  ;;  %v1953_v37 = vld [vmem:[#allocation2 + $0x250] sm:$0xff] }
 0x3dc   :  { %1772 = vmatmul.mubr.f32.vlgmr.msra.gmra.mrb[10].mxu0 %v1574_v45  ;;  %1843 = vmatmul.mubr.f32.vlgmr.msra.gmra.mrb[10].mxu1 %v1574_v45  ;;  %v1985_v28 = vld [vmem:[#allocation2 + $0x350] sm:$0xff] }
 0x3dd   :  { %5733 = vmatpush1.bf16.msra.mxu0 %v5732_v42  ;;  %2071 = vmatprep.mubr.f32.mxu0 %v1574_v45  ;;  %v1932_v42 = vld [vmem:[#allocation2 + $0x1a8] sm:$0xff] }
 0x3de   :  { %5735 = vmatprep.subr.bf16.mxu0 %v5734_v46  ;;  %2142 = vmatprep.mubr.f32.mxu1 %v1574_v45  ;;  %v1921_v45 = vld [vmem:[#allocation2 + $0x150] sm:$0xff]  ;;  %v5754_v52 = vpack.c.bf16 %v1932_v42, %v1928_v41  ;;  %v1966_v41 = vld [vmem:[#allocation2 + $0x2b8] sm:$0xff]  ;;  %v5770_v42 = vpack.c.bf16 %v1964_v34, %v1960_v33 }
 0x3df   :  { %5797 = vmatpush1.bf16.msra.mxu1 %v5796_v53  ;;  %v1925_v46 = vld [vmem:[#allocation2 + $0x170] sm:$0xff]  ;;  %v1927_v53 = vld [vmem:[#allocation2 + $0x180] sm:$0xff]  ;;  %v5834_v48 = vpack.c.bf16 %v1966_v41, %v1962_v40  ;;  %v1998_v33 = vld [vmem:[#allocation2 + $0x3b8] sm:$0xff] }
 0x3e0   :  { %5799 = vmatprep.subr.bf16.mxu1 %v5798_v54  ;;  %v1931_v54 = vld [vmem:[#allocation2 + $0x1a0] sm:$0xff]  ;;  %v1993_v41 = vld [vmem:[#allocation2 + $0x390] sm:$0xff] }
 0x3e1   :  { %5737 = vmatpush1.bf16.msra.mxu0 %v5736_v57  ;;  %v5816_v57 = vpack.c.bf16 %v1925_v46, %v1921_v45  ;;  %v5756_v60 = vpack.c.bf16 %v1931_v54, %v1927_v53  ;;  %v1968_v45 = vld [vmem:[#allocation2 + $0x2c8] sm:$0xff]  ;;  %v1970_v54 = vld [vmem:[#allocation2 + $0x2d8] sm:$0xff] }
 0x3e2   :  { %5739 = vmatprep.subr.bf16.mxu0 %v5738_v0  ;;  %v1933_v0 = vld [vmem:[#allocation2 + $0x1b0] sm:$0xff]  ;;  %v1972_v46 = vld [vmem:[#allocation2 + $0x2e8] sm:$0xff]  ;;  %v5838_v61 = vpack.c.bf16 %v1974_v55, %v1970_v54 }
 0x3e3   :  { %5801 = vmatpush1.bf16.msra.mxu1 %v5800_v1  ;;  %v1935_v1 = vld [vmem:[#allocation2 + $0x1c0] sm:$0xff]  ;;  %v5774_v56 = vpack.c.bf16 %v1972_v46, %v1968_v45  ;;  %v2006_v45 = vld [vmem:[#allocation2 + $0x3f8] sm:$0xff]  ;;  %v2005_v54 = vld [vmem:[#allocation2 + $0x3f0] sm:$0xff] }
 0x3e4   :  { %5803 = vmatprep.subr.bf16.mxu1 %v5802_v18  ;;  %v1939_v18 = vld [vmem:[#allocation2 + $0x1e0] sm:$0xff] }
 0x3e5   :  { %5741 = vmatpush1.bf16.msra.mxu0 %v5740_v4  ;;  %v5820_v4 = vpack.c.bf16 %v1933_v0, %v1929_v13  ;;  %v5760_v26 = vpack.c.bf16 %v1939_v18, %v1935_v1  ;;  %v1976_v13 = vld [vmem:[#allocation2 + $0x308] sm:$0xff]  ;;  %v1978_v18 = vld [vmem:[#allocation2 + $0x318] sm:$0xff] }
 0x3e6   :  { %5743 = vmatprep.subr.bf16.mxu0 %v5742_v12  ;;  %v1941_v12 = vld [vmem:[#allocation2 + $0x1f0] sm:$0xff]  ;;  %v1980_v0 = vld [vmem:[#allocation2 + $0x328] sm:$0xff]  ;;  %v5842_v7 = vpack.c.bf16 %v1982_v2, %v1978_v18 }
 0x3e7   :  { %5805 = vmatpush1.bf16.msra.mxu1 %v5804_v10  ;;  %v1943_v10 = vld [vmem:[#allocation2 + $0x200] sm:$0xff]  ;;  %v5778_v3 = vpack.c.bf16 %v1980_v0, %v1976_v13  ;;  %v2182_v13 = vld [vmem:[#allocation2 + $0x428] sm:$0xff]  ;;  %v2179_v18 = vld [vmem:[#allocation2 + $0x410] sm:$0xff] }
 0x3e8   :  { %5807 = vmatprep.subr.bf16.mxu1 %v5806_v11  ;;  %v1947_v11 = vld [vmem:[#allocation2 + $0x220] sm:$0xff]  ;;  %v2183_v2 = vld [vmem:[#allocation2 + $0x430] sm:$0xff] }
 0x3e9   :  { %5745 = vmatpush1.bf16.msra.mxu0 %v5744_v20  ;;  %v5824_v20 = vpack.c.bf16 %v1941_v12, %v1937_v6  ;;  %v5764_v25 = vpack.c.bf16 %v1947_v11, %v1943_v10  ;;  %v1984_v6 = vld [vmem:[#allocation2 + $0x348] sm:$0xff]  ;;  %v1986_v11 = vld [vmem:[#allocation2 + $0x358] sm:$0xff] }
 0x3ea   :  { %5747 = vmatprep.subr.bf16.mxu0 %v5746_v23  ;;  %v1949_v23 = vld [vmem:[#allocation2 + $0x230] sm:$0xff]  ;;  %v1988_v12 = vld [vmem:[#allocation2 + $0x368] sm:$0xff]  ;;  %v5846_v27 = vpack.c.bf16 %v1990_v14, %v1986_v11 }
 0x3eb   :  { %5809 = vmatpush1.bf16.msra.mxu1 %v5808_v31  ;;  %v1951_v31 = vld [vmem:[#allocation2 + $0x240] sm:$0xff]  ;;  %v5782_v19 = vpack.c.bf16 %v1988_v12, %v1984_v6  ;;  %v2190_v6 = vld [vmem:[#allocation2 + $0x468] sm:$0xff]  ;;  %v2187_v14 = vld [vmem:[#allocation2 + $0x450] sm:$0xff] }
 0x3ec   :  { %5811 = vmatprep.subr.bf16.mxu1 %v5810_v32  ;;  %v1955_v32 = vld [vmem:[#allocation2 + $0x260] sm:$0xff] }
 0x3ed   :  { %5749 = vmatpush1.bf16.msra.mxu0 %v5748_v35  ;;  %v5828_v35 = vpack.c.bf16 %v1949_v23, %v1945_v22  ;;  %v5768_v39 = vpack.c.bf16 %v1955_v32, %v1951_v31  ;;  %v1992_v22 = vld [vmem:[#allocation2 + $0x388] sm:$0xff]  ;;  %v1994_v32 = vld [vmem:[#allocation2 + $0x398] sm:$0xff]  ;;  %v2185_v12 = vld [vmem:[#allocation2 + $0x440] sm:$0xff] }
 0x3ee   :  { %5751 = vmatprep.subr.bf16.mxu0 %v5750_v38  ;;  %v1957_v38 = vld [vmem:[#allocation2 + $0x270] sm:$0xff]  ;;  %v1996_v23 = vld [vmem:[#allocation2 + $0x3a8] sm:$0xff]  ;;  %v5850_v40 = vpack.c.bf16 %v1998_v33, %v1994_v32 }
 0x3ef   :  { %5813 = vmatpush1.bf16.msra.mxu1 %v5812_v43  ;;  %v1959_v43 = vld [vmem:[#allocation2 + $0x280] sm:$0xff]  ;;  %v5786_v34 = vpack.c.bf16 %v1996_v23, %v1992_v22  ;;  %v2198_v22 = vld [vmem:[#allocation2 + $0x4a8] sm:$0xff] }
 0x3f0   :  { %5815 = vmatprep.subr.bf16.mxu1 %v5814_v44  ;;  %v1963_v44 = vld [vmem:[#allocation2 + $0x2a0] sm:$0xff] }
 0x3f1   :  { %5753 = vmatpush1.bf16.msra.mxu0 %v5752_v47  ;;  %v5832_v47 = vpack.c.bf16 %v1957_v38, %v1953_v37  ;;  %v5772_v53 = vpack.c.bf16 %v1963_v44, %v1959_v43  ;;  %v2000_v37 = vld [vmem:[#allocation2 + $0x3c8] sm:$0xff]  ;;  %v2002_v44 = vld [vmem:[#allocation2 + $0x3d8] sm:$0xff]  ;;  %v2193_v23 = vld [vmem:[#allocation2 + $0x480] sm:$0xff] }
 0x3f2   :  { %5755 = vmatprep.subr.bf16.mxu0 %v5754_v52  ;;  %v1965_v52 = vld [vmem:[#allocation2 + $0x2b0] sm:$0xff]  ;;  %v2004_v38 = vld [vmem:[#allocation2 + $0x3e8] sm:$0xff] }
 0x3f3   :  { %5817 = vmatpush1.bf16.msra.mxu1 %v5816_v57  ;;  %v1967_v57 = vld [vmem:[#allocation2 + $0x2c0] sm:$0xff]  ;;  %v5790_v46 = vpack.c.bf16 %v2004_v38, %v2000_v37 }
 0x3f4   :  { %5819 = vmatprep.subr.bf16.mxu1 %v5818_v58  ;;  %v1971_v58 = vld [vmem:[#allocation2 + $0x2e0] sm:$0xff] }
 0x3f5   :  { %5757 = vmatpush1.bf16.msra.mxu0 %v5756_v60  ;;  %v5836_v60 = vpack.c.bf16 %v1965_v52, %v1961_v51  ;;  %v5776_v1 = vpack.c.bf16 %v1971_v58, %v1967_v57  ;;  %v5854_v52 = vpack.c.bf16 %v2006_v45, %v2002_v44  ;;  %v4907_v57 = vld [vmem:[%s7565_s0 + $0x18] sm:$0xff]  ;;  %v2178_v58 = vld [vmem:[#allocation2 + $0x408] sm:$0xff]  ;;  %v2201_v38 = vld [vmem:[#allocation2 + $0x4c0] sm:$0xff] }
 0x3f6   :  { %5759 = vmatprep.subr.bf16.mxu0 %v5758_v63  ;;  %v1973_v63 = vld [vmem:[#allocation2 + $0x2f0] sm:$0xff]  ;;  %v5858_v0 = vpack.c.bf16 %v2182_v13, %v2178_v58 }
 0x3f7   :  { %5821 = vmatpush1.bf16.msra.mxu1 %v5820_v4  ;;  %v1975_v4 = vld [vmem:[#allocation2 + $0x300] sm:$0xff]  ;;  %v2207_v45 = vld [vmem:[#allocation2 + $0x4f0] sm:$0xff] }
 0x3f8   :  { %5823 = vmatprep.subr.bf16.mxu1 %v5822_v5  ;;  %v1979_v5 = vld [vmem:[#allocation2 + $0x320] sm:$0xff]  ;;  %v2211_v13 = vld [vmem:[#allocation2 + $0x510] sm:$0xff] }
 0x3f9   :  { %5761 = vmatpush1.bf16.msra.mxu0 %v5760_v26  ;;  %v5840_v26 = vpack.c.bf16 %v1973_v63, %v1969_v62  ;;  %v5780_v10 = vpack.c.bf16 %v1979_v5, %v1975_v4  ;;  %v2180_v62 = vld [vmem:[#allocation2 + $0x418] sm:$0xff]  ;;  %v5924_v4 = vpack.c.bf16 %v2183_v2, %v2179_v18  ;;  %v2186_v5 = vld [vmem:[#allocation2 + $0x448] sm:$0xff]  ;;  %v2221_v18 = vld [vmem:[#allocation2 + $0x560] sm:$0xff] }
 0x3fa   :  { %5763 = vmatprep.subr.bf16.mxu0 %v5762_v9  ;;  %v1981_v9 = vld [vmem:[#allocation2 + $0x330] sm:$0xff]  ;;  %v2220_v2 = vld [vmem:[#allocation2 + $0x558] sm:$0xff] }
 0x3fb   :  { %5825 = vmatpush1.bf16.msra.mxu1 %v5824_v20  ;;  %v1983_v20 = vld [vmem:[#allocation2 + $0x340] sm:$0xff] }
 0x3fc   :  { %5827 = vmatprep.subr.bf16.mxu1 %v5826_v21  ;;  %v1987_v21 = vld [vmem:[#allocation2 + $0x360] sm:$0xff] }
 0x3fd   :  { %5765 = vmatpush1.bf16.msra.mxu0 %v5764_v25  ;;  %v5844_v25 = vpack.c.bf16 %v1981_v9, %v1977_v8  ;;  %v5784_v31 = vpack.c.bf16 %v1987_v21, %v1983_v20  ;;  %v2188_v8 = vld [vmem:[#allocation2 + $0x458] sm:$0xff]  ;;  %v2194_v20 = vld [vmem:[#allocation2 + $0x488] sm:$0xff] }
 0x3fe   :  { %5767 = vmatprep.subr.bf16.mxu0 %v5766_v29  ;;  %v1989_v29 = vld [vmem:[#allocation2 + $0x370] sm:$0xff]  ;;  %v2192_v9 = vld [vmem:[#allocation2 + $0x478] sm:$0xff] }
 0x3ff   :  { %5829 = vmatpush1.bf16.msra.mxu1 %v5828_v35  ;;  %v1991_v35 = vld [vmem:[#allocation2 + $0x380] sm:$0xff]  ;;  %v5926_v11 = vpack.c.bf16 %v2192_v9, %v2188_v8  ;;  %v2230_v8 = vld [vmem:[#allocation2 + $0x5a8] sm:$0xff] }
 0x400   :  { %5831 = vmatprep.subr.bf16.mxu1 %v5830_v36  ;;  %v1995_v36 = vld [vmem:[#allocation2 + $0x3a0] sm:$0xff] }
 0x401   :  { %5769 = vmatpush1.bf16.msra.mxu0 %v5768_v39  ;;  %v5848_v39 = vpack.c.bf16 %v1989_v29, %v1985_v28  ;;  %v5788_v43 = vpack.c.bf16 %v1995_v36, %v1991_v35  ;;  %v2196_v28 = vld [vmem:[#allocation2 + $0x498] sm:$0xff]  ;;  %v2202_v35 = vld [vmem:[#allocation2 + $0x4c8] sm:$0xff] }
 0x402   :  { %5771 = vmatprep.subr.bf16.mxu0 %v5770_v42  ;;  %v1997_v42 = vld [vmem:[#allocation2 + $0x3b0] sm:$0xff]  ;;  %v2200_v29 = vld [vmem:[#allocation2 + $0x4b8] sm:$0xff]  ;;  %v2206_v36 = vld [vmem:[#allocation2 + $0x4e8] sm:$0xff] }
 0x403   :  { %5833 = vmatpush1.bf16.msra.mxu1 %v5832_v47  ;;  %v1999_v47 = vld [vmem:[#allocation2 + $0x3c0] sm:$0xff]  ;;  %v5852_v51 = vpack.c.bf16 %v1997_v42, %v1993_v41  ;;  %v5930_v33 = vpack.c.bf16 %v2200_v29, %v2196_v28  ;;  %v5870_v37 = vpack.c.bf16 %v2206_v36, %v2202_v35  ;;  %v2208_v42 = vld [vmem:[#allocation2 + $0x4f8] sm:$0xff]  ;;  %v2238_v28 = vld [vmem:[#allocation2 + $0x5e8] sm:$0xff] }
 0x404   :  { %5835 = vmatprep.subr.bf16.mxu1 %v5834_v48  ;;  %v2003_v48 = vld [vmem:[#allocation2 + $0x3e0] sm:$0xff]  ;;  %v2240_v35 = vld [vmem:[#allocation2 + $0x5f8] sm:$0xff]  ;;  %v2235_v36 = vld [vmem:[#allocation2 + $0x5d0] sm:$0xff] }
 0x405   :  { %5773 = vmatpush1.bf16.msra.mxu0 %v5772_v53  ;;  %v2001_v53 = vld [vmem:[#allocation2 + $0x3d0] sm:$0xff]  ;;  %v5792_v55 = vpack.c.bf16 %v2003_v48, %v1999_v47  ;;  %v2214_v47 = vld [vmem:[#allocation2 + $0x528] sm:$0xff] }
 0x406   :  { %5775 = vmatprep.subr.bf16.mxu0 %v5774_v56  ;;  %v5856_v56 = vpack.c.bf16 %v2005_v54, %v2001_v53  ;;  %v2209_v54 = vld [vmem:[#allocation2 + $0x500] sm:$0xff] }
 0x407   :  { %5837 = vmatpush1.bf16.msra.mxu1 %v5836_v60  ;;  %v2177_v60 = vld [vmem:[#allocation2 + $0x400] sm:$0xff] }
 0x408   :  { %5839 = vmatprep.subr.bf16.mxu1 %v5838_v61  ;;  %v2181_v61 = vld [vmem:[#allocation2 + $0x420] sm:$0xff] }
 0x409   :  { %5777 = vmatpush1.bf16.msra.mxu0 %v5776_v1  ;;  %v5860_v63 = vpack.c.bf16 %v2181_v61, %v2177_v60  ;;  %v2184_v1 = vld [vmem:[#allocation2 + $0x438] sm:$0xff]  ;;  %v2218_v61 = vld [vmem:[#allocation2 + $0x548] sm:$0xff] }
 0x40a   :  { %5779 = vmatprep.subr.bf16.mxu0 %v5778_v3  ;;  %v5922_v3 = vpack.c.bf16 %v2184_v1, %v2180_v62  ;;  %v2222_v62 = vld [vmem:[#allocation2 + $0x568] sm:$0xff]  ;;  %v2217_v1 = vld [vmem:[#allocation2 + $0x540] sm:$0xff] }
 0x40b   :  { %5841 = vmatpush1.bf16.msra.mxu1 %v5840_v26  ;;  %v5862_v26 = vpack.c.bf16 %v2190_v6, %v2186_v5  ;;  %v2219_v5 = vld [vmem:[#allocation2 + $0x550] sm:$0xff] }
 0x40c   :  { %5843 = vmatprep.subr.bf16.mxu1 %v5842_v7  ;;  %v2189_v7 = vld [vmem:[#allocation2 + $0x460] sm:$0xff]  ;;  %v2223_v6 = vld [vmem:[#allocation2 + $0x570] sm:$0xff] }
 0x40d   :  { %5781 = vmatpush1.bf16.msra.mxu0 %v5780_v10  ;;  %v5864_v10 = vpack.c.bf16 %v2189_v7, %v2185_v12  ;;  %v2226_v7 = vld [vmem:[#allocation2 + $0x588] sm:$0xff] }
 0x40e   :  { %5783 = vmatprep.subr.bf16.mxu0 %v5782_v19  ;;  %v2191_v19 = vld [vmem:[#allocation2 + $0x470] sm:$0xff]  ;;  %v5882_v9 = vpack.c.bf16 %v2230_v8, %v2226_v7 }
 0x40f   :  { %5845 = vmatpush1.bf16.msra.mxu1 %v5844_v25  ;;  %v5928_v21 = vpack.c.bf16 %v2191_v19, %v2187_v14  ;;  %v2197_v25 = vld [vmem:[#allocation2 + $0x4a0] sm:$0xff]  ;;  %v2228_v14 = vld [vmem:[#allocation2 + $0x598] sm:$0xff]  ;;  %v2259_v7 = vld [vmem:[#allocation2 + $0x690] sm:$0xff] }
 0x410   :  { %5847 = vmatprep.subr.bf16.mxu1 %v5846_v27  ;;  %v5866_v27 = vpack.c.bf16 %v2198_v22, %v2194_v20  ;;  %v5868_v32 = vpack.c.bf16 %v2197_v25, %v2193_v23  ;;  %v2232_v20 = vld [vmem:[#allocation2 + $0x5b8] sm:$0xff]  ;;  %v2231_v22 = vld [vmem:[#allocation2 + $0x5b0] sm:$0xff] }
 0x411   :  { %5785 = vmatpush1.bf16.msra.mxu0 %v5784_v31  ;;  %v2195_v31 = vld [vmem:[#allocation2 + $0x490] sm:$0xff]  ;;  %v5946_v23 = vpack.c.bf16 %v2232_v20, %v2228_v14  ;;  %v2270_v14 = vld [vmem:[#allocation2 + $0x6e8] sm:$0xff]  ;;  %v2265_v20 = vld [vmem:[#allocation2 + $0x6c0] sm:$0xff] }
 0x412   :  { %5787 = vmatprep.subr.bf16.mxu0 %v5786_v34  ;;  %v2199_v34 = vld [vmem:[#allocation2 + $0x4b0] sm:$0xff] }
 0x413   :  { %5849 = vmatpush1.bf16.msra.mxu1 %v5848_v39  ;;  %v2205_v39 = vld [vmem:[#allocation2 + $0x4e0] sm:$0xff]  ;;  %v5932_v41 = vpack.c.bf16 %v2199_v34, %v2195_v31  ;;  %v2263_v8 = vld [vmem:[#allocation2 + $0x6b0] sm:$0xff] }
 0x414   :  { %5851 = vmatprep.subr.bf16.mxu1 %v5850_v40  ;;  %v2204_v40 = vld [vmem:[#allocation2 + $0x4d8] sm:$0xff]  ;;  %v5872_v48 = vpack.c.bf16 %v2205_v39, %v2201_v38  ;;  %v2233_v31 = vld [vmem:[#allocation2 + $0x5c0] sm:$0xff] }
 0x415   :  { %5789 = vmatpush1.bf16.msra.mxu0 %v5788_v43  ;;  %v2203_v43 = vld [vmem:[#allocation2 + $0x4d0] sm:$0xff]  ;;  %v5934_v44 = vpack.c.bf16 %v2208_v42, %v2204_v40  ;;  %v2242_v40 = vld [vmem:[#allocation2 + $0x608] sm:$0xff] }
 0x416   :  { %5791 = vmatprep.subr.bf16.mxu0 %v5790_v46  ;;  %v2210_v46 = vld [vmem:[#allocation2 + $0x508] sm:$0xff] }
 0x417   :  { %5853 = vmatpush1.bf16.msra.mxu1 %v5852_v51  ;;  %v2212_v51 = vld [vmem:[#allocation2 + $0x518] sm:$0xff]  ;;  %v5874_v53 = vpack.c.bf16 %v2214_v47, %v2210_v46 }
 0x418   :  { %5855 = vmatprep.subr.bf16.mxu1 %v5854_v52  ;;  %v2216_v52 = vld [vmem:[#allocation2 + $0x538] sm:$0xff] }
 0x419   :  { %5793 = vmatpush1.bf16.msra.mxu0 %v5792_v55  ;;  %v2213_v55 = vld [vmem:[#allocation2 + $0x520] sm:$0xff]  ;;  %v2248_v47 = vld [vmem:[#allocation2 + $0x638] sm:$0xff] }
 0x41a   :  { %5859 = vmatprep.subr.bf16.mxu0 %v5858_v0  ;;  %v5876_v58 = vpack.c.bf16 %v2213_v55, %v2209_v54  ;;  %v2215_v0 = vld [vmem:[#allocation2 + $0x530] sm:$0xff]  ;;  %v2250_v54 = vld [vmem:[#allocation2 + $0x648] sm:$0xff] }
 0x41b   :  { %5857 = vmatpush1.bf16.msra.mxu1 %v5856_v56  ;;  %v5936_v56 = vpack.c.bf16 %v2207_v45, %v2203_v43  ;;  %v5940_v60 = vpack.c.bf16 %v2215_v0, %v2211_v13  ;;  %v2241_v43 = vld [vmem:[#allocation2 + $0x600] sm:$0xff]  ;;  %v2244_v45 = vld [vmem:[#allocation2 + $0x618] sm:$0xff]  ;;  %v2254_v55 = vld [vmem:[#allocation2 + $0x668] sm:$0xff] }
 0x41c   :  { %2072 = vmatmul.mubr.f32.vlgmr.msra.gmra.mrb[12].mxu0 %v4907_v57  ;;  %5923 = vmatprep.subr.bf16.mxu1 %v5922_v3  ;;  %v5880_v3 = vpack.c.bf16 %v2221_v18, %v2217_v1  ;;  %v2252_v13 = vld [vmem:[#allocation2 + $0x658] sm:$0xff]  ;;  %v2258_v18 = vld [vmem:[#allocation2 + $0x688] sm:$0xff] }
 0x41d   :  { %5861 = vmatpush1.bf16.msra.mxu0 %v5860_v63  ;;  %v5878_v63 = vpack.c.bf16 %v2222_v62, %v2218_v61  ;;  %v2251_v61 = vld [vmem:[#allocation2 + $0x650] sm:$0xff] }
 0x41e   :  { %2143 = vmatmul.mubr.f32.vlgmr.msra.gmra.mrb[12].mxu1 %v4907_v57  ;;  %5863 = vmatprep.subr.bf16.mxu0 %v5862_v26  ;;  %v5938_v57 = vpack.c.bf16 %v2216_v52, %v2212_v51  ;;  %v5944_v26 = vpack.c.bf16 %v2223_v6, %v2219_v5  ;;  %v2247_v51 = vld [vmem:[#allocation2 + $0x630] sm:$0xff]  ;;  %v5954_v52 = vpack.c.bf16 %v2248_v47, %v2244_v45  ;;  %v2261_v5 = vld [vmem:[#allocation2 + $0x6a0] sm:$0xff]  ;;  %v2260_v6 = vld [vmem:[#allocation2 + $0x698] sm:$0xff] }
 0x41f   :  { %5925 = vmatpush1.bf16.msra.mxu1 %v5924_v4  ;;  %v2224_v4 = vld [vmem:[#allocation2 + $0x578] sm:$0xff]  ;;  %v2255_v62 = vld [vmem:[#allocation2 + $0x670] sm:$0xff]  ;;  %v2286_v45 = vld [vmem:[#allocation2 + $0x768] sm:$0xff] }
 0x420   :  { %5927 = vmatprep.subr.bf16.mxu1 %v5926_v11  ;;  %v5942_v12 = vpack.c.bf16 %v2224_v4, %v2220_v2  ;;  %v2229_v11 = vld [vmem:[#allocation2 + $0x5a0] sm:$0xff]  ;;  %v5960_v1 = vpack.c.bf16 %v2255_v62, %v2251_v61  ;;  %v2262_v2 = vld [vmem:[#allocation2 + $0x6a8] sm:$0xff]  ;;  %v2292_v62 = vld [vmem:[#allocation2 + $0x798] sm:$0xff] }
 0x421   :  { %5865 = vmatpush1.bf16.msra.mxu0 %v5864_v10  ;;  %v2225_v10 = vld [vmem:[#allocation2 + $0x580] sm:$0xff] }
 0x422   :  { %5867 = vmatprep.subr.bf16.mxu0 %v5866_v27  ;;  %v5884_v19 = vpack.c.bf16 %v2229_v11, %v2225_v10  ;;  %v2234_v27 = vld [vmem:[#allocation2 + $0x5c8] sm:$0xff]  ;;  %v2257_v4 = vld [vmem:[#allocation2 + $0x680] sm:$0xff]  ;;  %v5964_v10 = vpack.c.bf16 %v2263_v8, %v2259_v7  ;;  %v2300_v8 = vld [vmem:[#allocation2 + $0x7d8] sm:$0xff] }
 0x423   :  { %5929 = vmatpush1.bf16.msra.mxu1 %v5928_v21  ;;  %v2227_v21 = vld [vmem:[#allocation2 + $0x590] sm:$0xff]  ;;  %v5886_v29 = vpack.c.bf16 %v2238_v28, %v2234_v27  ;;  %v2266_v11 = vld [vmem:[#allocation2 + $0x6c8] sm:$0xff]  ;;  %v2281_v47 = vld [vmem:[#allocation2 + $0x740] sm:$0xff] }
 0x424   :  { %5931 = vmatprep.subr.bf16.mxu1 %v5930_v33  ;;  %v5948_v25 = vpack.c.bf16 %v2231_v22, %v2227_v21  ;;  %v2236_v33 = vld [vmem:[#allocation2 + $0x5d8] sm:$0xff]  ;;  %v2269_v21 = vld [vmem:[#allocation2 + $0x6e0] sm:$0xff]  ;;  %v2267_v27 = vld [vmem:[#allocation2 + $0x6d0] sm:$0xff] }
 0x425   :  { %5869 = vmatpush1.bf16.msra.mxu0 %v5868_v32  ;;  %v2237_v32 = vld [vmem:[#allocation2 + $0x5e0] sm:$0xff]  ;;  %v5950_v38 = vpack.c.bf16 %v2240_v35, %v2236_v33  ;;  %v2268_v22 = vld [vmem:[#allocation2 + $0x6d8] sm:$0xff]  ;;  %v2271_v28 = vld [vmem:[#allocation2 + $0x6f0] sm:$0xff] }
 0x426   :  { %5871 = vmatprep.subr.bf16.mxu0 %v5870_v37  ;;  %v5888_v34 = vpack.c.bf16 %v2237_v32, %v2233_v31  ;;  %v2239_v37 = vld [vmem:[#allocation2 + $0x5f0] sm:$0xff]  ;;  %v5968_v31 = vpack.c.bf16 %v2271_v28, %v2267_v27  ;;  %v2274_v32 = vld [vmem:[#allocation2 + $0x708] sm:$0xff]  ;;  %v2273_v35 = vld [vmem:[#allocation2 + $0x700] sm:$0xff] }
 0x427   :  { %5933 = vmatpush1.bf16.msra.mxu1 %v5932_v41  ;;  %v5952_v39 = vpack.c.bf16 %v2239_v37, %v2235_v36  ;;  %v2246_v41 = vld [vmem:[#allocation2 + $0x628] sm:$0xff]  ;;  %v2277_v36 = vld [vmem:[#allocation2 + $0x720] sm:$0xff]  ;;  %v2276_v37 = vld [vmem:[#allocation2 + $0x718] sm:$0xff] }
 0x428   :  { %5935 = vmatprep.subr.bf16.mxu1 %v5934_v44  ;;  %v5890_v42 = vpack.c.bf16 %v2246_v41, %v2242_v40  ;;  %v2245_v44 = vld [vmem:[#allocation2 + $0x620] sm:$0xff]  ;;  %v2278_v33 = vld [vmem:[#allocation2 + $0x728] sm:$0xff]  ;;  %v2275_v40 = vld [vmem:[#allocation2 + $0x710] sm:$0xff] }
 0x429   :  { %5873 = vmatpush1.bf16.msra.mxu0 %v5872_v48  ;;  %v5892_v46 = vpack.c.bf16 %v2245_v44, %v2241_v43  ;;  %v2243_v48 = vld [vmem:[#allocation2 + $0x610] sm:$0xff]  ;;  %v2282_v44 = vld [vmem:[#allocation2 + $0x748] sm:$0xff]  ;;  %v2293_v61 = vld [vmem:[#allocation2 + $0x7a0] sm:$0xff] }
 0x42a   :  { %5875 = vmatprep.subr.bf16.mxu0 %v5874_v53  ;;  %v5956_v53 = vpack.c.bf16 %v2247_v51, %v2243_v48  ;;  %v2279_v41 = vld [vmem:[#allocation2 + $0x730] sm:$0xff]  ;;  %v2285_v48 = vld [vmem:[#allocation2 + $0x760] sm:$0xff]  ;;  %v2284_v51 = vld [vmem:[#allocation2 + $0x758] sm:$0xff] }
 0x42b   :  { %5937 = vmatpush1.bf16.msra.mxu1 %v5936_v56  ;;  %v5894_v56 = vpack.c.bf16 %v2254_v55, %v2250_v54  ;;  %v5972_v43 = vpack.c.bf16 %v2279_v41, %v2275_v40  ;;  %v2283_v54 = vld [vmem:[#allocation2 + $0x750] sm:$0xff]  ;;  %v2484_v27 = vld [vmem:[#allocation2 + $0x38] sm:$0xff] }
 0x42c   :  { %5939 = vmatprep.subr.bf16.mxu1 %v5938_v57  ;;  %v2249_v57 = vld [vmem:[#allocation2 + $0x640] sm:$0xff]  ;;  %v2287_v55 = vld [vmem:[#allocation2 + $0x770] sm:$0xff] }
 0x42d   :  { %5877 = vmatpush1.bf16.msra.mxu0 %v5876_v58  ;;  %v2253_v58 = vld [vmem:[#allocation2 + $0x660] sm:$0xff] }
 0x42e   :  { %5879 = vmatprep.subr.bf16.mxu0 %v5878_v63  ;;  %v5896_v0 = vpack.c.bf16 %v2253_v58, %v2249_v57  ;;  %v5976_v57 = vpack.c.bf16 %v2287_v55, %v2283_v54  ;;  %v2290_v58 = vld [vmem:[#allocation2 + $0x788] sm:$0xff] }
 0x42f   :  { %5941 = vmatpush1.bf16.msra.mxu1 %v5940_v60  ;;  %v2256_v60 = vld [vmem:[#allocation2 + $0x678] sm:$0xff] }
 0x430   :  { %5943 = vmatprep.subr.bf16.mxu1 %v5942_v12  ;;  %v5958_v63 = vpack.c.bf16 %v2256_v60, %v2252_v13  ;;  %v5900_v12 = vpack.c.bf16 %v2261_v5, %v2257_v4  ;;  %v2294_v13 = vld [vmem:[#allocation2 + $0x7a8] sm:$0xff] }
 0x431   :  { %5881 = vmatpush1.bf16.msra.mxu0 %v5880_v3  ;;  %v5898_v3 = vpack.c.bf16 %v2262_v2, %v2258_v18  ;;  %v5914_v60 = vpack.c.bf16 %v2294_v13, %v2290_v58  ;;  %v2291_v2 = vld [vmem:[#allocation2 + $0x790] sm:$0xff]  ;;  %v2298_v4 = vld [vmem:[#allocation2 + $0x7c8] sm:$0xff] }
 0x432   :  { %5883 = vmatprep.subr.bf16.mxu0 %v5882_v9 }
 0x433   :  { %5945 = vmatpush1.bf16.msra.mxu1 %v5944_v26  ;;  %v2264_v26 = vld [vmem:[#allocation2 + $0x6b8] sm:$0xff] }
 0x434   :  { %5947 = vmatprep.subr.bf16.mxu1 %v5946_v23  ;;  %v5962_v9 = vpack.c.bf16 %v2264_v26, %v2260_v6  ;;  %v5904_v23 = vpack.c.bf16 %v2269_v21, %v2265_v20  ;;  %v2302_v6 = vld [vmem:[#allocation2 + $0x7e8] sm:$0xff]  ;;  %v2301_v26 = vld [vmem:[#allocation2 + $0x7e0] sm:$0xff] }
 0x435   :  { %5885 = vmatpush1.bf16.msra.mxu0 %v5884_v19  ;;  %v5902_v19 = vpack.c.bf16 %v2270_v14, %v2266_v11  ;;  %v5918_v7 = vpack.c.bf16 %v2302_v6, %v2298_v4  ;;  %v2478_v20 = vld [vmem:[#allocation2 + $0x8] sm:$0xff] }
 0x436   :  { %5887 = vmatprep.subr.bf16.mxu0 %v5886_v29  ;;  %v2482_v21 = vld [vmem:[#allocation2 + $0x28] sm:$0xff] }
 0x437   :  { %5949 = vmatpush1.bf16.msra.mxu1 %v5948_v25  ;;  %v2272_v25 = vld [vmem:[#allocation2 + $0x6f8] sm:$0xff] }
 0x438   :  { %5951 = vmatprep.subr.bf16.mxu1 %v5950_v38  ;;  %v5966_v29 = vpack.c.bf16 %v2272_v25, %v2268_v22  ;;  %v5908_v38 = vpack.c.bf16 %v2277_v36, %v2273_v35  ;;  %v5986_v22 = vpack.c.bf16 %v2482_v21, %v2478_v20  ;;  %v2480_v25 = vld [vmem:[#allocation2 + $0x18] sm:$0xff] }
 0x439   :  { %5889 = vmatpush1.bf16.msra.mxu0 %v5888_v34  ;;  %v5906_v34 = vpack.c.bf16 %v2278_v33, %v2274_v32  ;;  %v6050_v28 = vpack.c.bf16 %v2484_v27, %v2480_v25  ;;  %v2486_v27 = vld [vmem:[#allocation2 + $0x48] sm:$0xff] }
 0x43a   :  { %5891 = vmatprep.subr.bf16.mxu0 %v5890_v42 }
 0x43b   :  { %5953 = vmatpush1.bf16.msra.mxu1 %v5952_v39  ;;  %v2280_v39 = vld [vmem:[#allocation2 + $0x738] sm:$0xff] }
 0x43c   :  { %5955 = vmatprep.subr.bf16.mxu1 %v5954_v52  ;;  %v5970_v42 = vpack.c.bf16 %v2280_v39, %v2276_v37  ;;  %v5912_v52 = vpack.c.bf16 %v2285_v48, %v2281_v47 }
 0x43d   :  { %5893 = vmatpush1.bf16.msra.mxu0 %v5892_v46  ;;  %v5910_v46 = vpack.c.bf16 %v2286_v45, %v2282_v44 }
 0x43e   :  { %5895 = vmatprep.subr.bf16.mxu0 %v5894_v56 }
 0x43f   :  { %5957 = vmatpush1.bf16.msra.mxu1 %v5956_v53  ;;  %v2288_v53 = vld [vmem:[#allocation2 + $0x778] sm:$0xff] }
 0x440   :  { %5959 = vmatprep.subr.bf16.mxu1 %v5958_v63  ;;  %v5974_v56 = vpack.c.bf16 %v2288_v53, %v2284_v51  ;;  %v2296_v63 = vld [vmem:[#allocation2 + $0x7b8] sm:$0xff] }
 0x441   :  { %5897 = vmatpush1.bf16.msra.mxu0 %v5896_v0  ;;  %v2289_v0 = vld [vmem:[#allocation2 + $0x780] sm:$0xff]  ;;  %v5978_v18 = vpack.c.bf16 %v2296_v63, %v2292_v62 }
 0x442   :  { %5899 = vmatprep.subr.bf16.mxu0 %v5898_v3  ;;  %v2295_v3 = vld [vmem:[#allocation2 + $0x7b0] sm:$0xff] }
 0x443   :  { %5961 = vmatpush1.bf16.msra.mxu1 %v5960_v1  ;;  %v5916_v1 = vpack.c.bf16 %v2293_v61, %v2289_v0  ;;  %v5980_v5 = vpack.c.bf16 %v2295_v3, %v2291_v2 }
 0x444   :  { %5963 = vmatprep.subr.bf16.mxu1 %v5962_v9  ;;  %v2304_v9 = vld [vmem:[#allocation2 + $0x7f8] sm:$0xff] }
 0x445   :  { %5901 = vmatpush1.bf16.msra.mxu0 %v5900_v12  ;;  %v2297_v12 = vld [vmem:[#allocation2 + $0x7c0] sm:$0xff]  ;;  %v5982_v14 = vpack.c.bf16 %v2304_v9, %v2300_v8 }
 0x446   :  { %5903 = vmatprep.subr.bf16.mxu0 %v5902_v19  ;;  %v5920_v11 = vpack.c.bf16 %v2301_v26, %v2297_v12  ;;  %v2303_v19 = vld [vmem:[#allocation2 + $0x7f0] sm:$0xff] }
 0x447   :  { %5965 = vmatpush1.bf16.msra.mxu1 %v5964_v10  ;;  %v2299_v10 = vld [vmem:[#allocation2 + $0x7d0] sm:$0xff] }
 0x448   :  { %5967 = vmatprep.subr.bf16.mxu1 %v5966_v29 }
 0x449   :  { %5905 = vmatpush1.bf16.msra.mxu0 %v5904_v23  ;;  %v5984_v23 = vpack.c.bf16 %v2303_v19, %v2299_v10 }
 0x44a   :  { %5907 = vmatprep.subr.bf16.mxu0 %v5906_v34 }
 0x44b   :  { %5969 = vmatpush1.bf16.msra.mxu1 %v5968_v31 }
 0x44c   :  { %5971 = vmatprep.subr.bf16.mxu1 %v5970_v42 }
 0x44d   :  { %5909 = vmatpush1.bf16.msra.mxu0 %v5908_v38 }
 0x44e   :  { %5911 = vmatprep.subr.bf16.mxu0 %v5910_v46 }
 0x44f   :  { %5973 = vmatpush1.bf16.msra.mxu1 %v5972_v43 }
 0x450   :  { %5975 = vmatprep.subr.bf16.mxu1 %v5974_v56 }
 0x451   :  { %5913 = vmatpush1.bf16.msra.mxu0 %v5912_v52  ;;  %v4901_v52 = vld [vmem:[%s7569_s4 + $0x8] sm:$0xff] }
 0x452   :  { %5915 = vmatprep.subr.bf16.mxu0 %v5914_v60 }
 0x453   :  { %5977 = vmatpush1.bf16.msra.mxu1 %v5976_v57 }
 0x454   :  { %5979 = vmatprep.subr.bf16.mxu1 %v5978_v18 }
 0x455   :  { %5917 = vmatpush1.bf16.msra.mxu0 %v5916_v1 }
 0x456   :  { %5919 = vmatprep.subr.bf16.mxu0 %v5918_v7 }
 0x457   :  { %5981 = vmatpush1.bf16.msra.mxu1 %v5980_v5 }
 0x458   :  { %5983 = vmatprep.subr.bf16.mxu1 %v5982_v14  ;;  %v1878_v14 = vld [vmem:[%s7569_s4] sm:$0xff] }
 0x459   :  { %5921 = vmatpush1.bf16.msra.mxu0 %v5920_v11 }
 0x45a   :  { %5987 = vmatprep.subr.bf16.mxu0 %v5986_v22  ;;  %v2477_v22 = vld [vmem:[#allocation2] sm:$0xff] }
 0x45b   :  { %5985 = vmatpush1.bf16.msra.mxu1 %v5984_v23  ;;  %v2481_v23 = vld [vmem:[#allocation2 + $0x20] sm:$0xff] }
 0x45c   :  { %6051 = vmatprep.subr.bf16.mxu1 %v6050_v28  ;;  %v2490_v28 = vld [vmem:[#allocation2 + $0x68] sm:$0xff] }
 0x4af   :  { %v1773_v29 = vpop.f32.mrb[10].mxu0  ;;  %v1844_v31 = vpop.f32.mrb[10].mxu1 }
 0x4b0   :  { %v1774_v32 = vadd.f32 %v1773_v29, %v7382_v49  ;;  %v1775_v33 = vpop.f32.mrb[11].mxu0  ;;  %v1846_v34 = vpop.f32.mrb[11].mxu1  ;;  %v1845_v40 = vadd.f32 %v1844_v31, %v7397_v15  ;;  %v2479_v29 = vld [vmem:[#allocation2 + $0x10] sm:$0xff] }
 0x4b1   :  { %v1776_v35 = vadd.f32 %v1775_v33, %v7386_v50  ;;  %v1847_v38 = vadd.f32 %v1846_v34, %v7392_v59  ;;  %v2483_v31 = vld [vmem:[#allocation2 + $0x30] sm:$0xff]  ;;  %v5988_v33 = vpack.c.bf16 %v2481_v23, %v2477_v22  ;;  %v2488_v34 = vld [vmem:[#allocation2 + $0x58] sm:$0xff] }
 0x4b2   :  { %v4902_v36 = vmul.f32 -1.442695, %v1774_v32  ;;  %v2515_v22 = vld [vmem:[#allocation2 + $0x130] sm:$0xff] }
 0x4b3   :  { %v4903_v37 = vmul.f32 -1.442695, %v1776_v35  ;;  %v4904_v39 = vmul.f32 -1.442695, %v1847_v38  ;;  %v2492_v35 = vld [vmem:[#allocation2 + $0x78] sm:$0xff]  ;;  %v2485_v38 = vld [vmem:[#allocation2 + $0x40] sm:$0xff] }
 0x4b4   :  { %7094 = vpow2.f32 %v4902_v36 }
 0x4b5   :  { %7096 = vpow2.f32 %v4903_v37  ;;  %v5990_v37 = vpack.c.bf16 %v2490_v28, %v2486_v27  ;;  %v2524_v27 = vld [vmem:[#allocation2 + $0x178] sm:$0xff] }
 0x4b6   :  { %7098 = vpow2.f32 %v4904_v39  ;;  %v2489_v39 = vld [vmem:[#allocation2 + $0x60] sm:$0xff] }
 0x4b7   :  { %7100 = vtanh.f32 %v1845_v40  ;;  %v2494_v40 = vld [vmem:[#allocation2 + $0x88] sm:$0xff] }
 0x4be   :  { %v7095_v41 = vpop.eup %7094 }
 0x4bf   :  { %v7097_v42 = vpop.eup %7096  ;;  %v1852_v43 = vadd.f32 1.0, %v7095_v41  ;;  %v2498_v41 = vld [vmem:[#allocation2 + $0xa8] sm:$0xff] }
 0x4c0   :  { %v1858_v44 = vadd.f32 1.0, %v7097_v42  ;;  %v7099_v45 = vpop.eup %7098  ;;  %v6052_v42 = vpack.c.bf16 %v2483_v31, %v2479_v29  ;;  %v2517_v29 = vld [vmem:[#allocation2 + $0x140] sm:$0xff] }
 0x4c1   :  { %7102 = vrcp.f32 %v1852_v43  ;;  %v7101_v46 = vpop.eup %7100  ;;  %v1865_v53 = vadd.f32 1.0, %v7099_v45  ;;  %v6054_v43 = vpack.c.bf16 %v2492_v35, %v2488_v34  ;;  %v2491_v45 = vld [vmem:[#allocation2 + $0x70] sm:$0xff]  ;;  %v2521_v31 = vld [vmem:[#allocation2 + $0x160] sm:$0xff] }
 0x4c2   :  { %7104 = vrcp.f32 %v1858_v44  ;;  %v2487_v44 = vld [vmem:[#allocation2 + $0x50] sm:$0xff] }
 0x4c3   :  { %7106 = vrcp.f32 %v1865_v53  ;;  %v2497_v53 = vld [vmem:[#allocation2 + $0xa0] sm:$0xff] }
 0x4cb   :  { %v7103_v47 = vpop.eup %7102 }
 0x4cc   :  { %v7105_v48 = vpop.eup %7104  ;;  %v1869_v51 = vmul.f32 %v7103_v47, %v7101_v46  ;;  %v5992_v46 = vpack.c.bf16 %v2489_v39, %v2485_v38  ;;  %v2496_v47 = vld [vmem:[#allocation2 + $0x98] sm:$0xff]  ;;  %v6008_v38 = vpack.c.bf16 %v2521_v31, %v2517_v29 }
 0x4cd   :  { %v1868_v54 = vmul.f32 %v7105_v48, %v4901_v52  ;;  %v7107_v56 = vpop.eup %7106  ;;  %v2500_v48 = vld [vmem:[#allocation2 + $0xb8] sm:$0xff]  ;;  %v2493_v52 = vld [vmem:[#allocation2 + $0x80] sm:$0xff] }
 0x4ce   :  { %v2528_v39 = vld [vmem:[#allocation2 + $0x198] sm:$0xff] }
 0x4cf   :  { %v1870_v55 = vadd.f32 %v1869_v51, %v1868_v54  ;;  %v5994_v51 = vpack.c.bf16 %v2498_v41, %v2494_v40  ;;  %v2502_v54 = vld [vmem:[#allocation2 + $0xc8] sm:$0xff]  ;;  %v2532_v40 = vld [vmem:[#allocation2 + $0x1b8] sm:$0xff] }
 0x4d0   :  { %v2560_v31 = vld [vmem:[#allocation2 + $0x298] sm:$0xff] }
 0x4d1   :  { %7108 = vtanh.f32 %v1870_v55  ;;  %4906 = vst [vmem:[%s7569_s4 + $0x8] sm:$0xff] %v1870_v55  ;;  %v2506_v55 = vld [vmem:[#allocation2 + $0xe8] sm:$0xff] }
 0x4db   :  { %v7109_v57 = vpop.eup %7108 }
 0x4dc   :  { %v1872_v58 = vmul.f32 %v7109_v57, %v7107_v56  ;;  %v6056_v56 = vpack.c.bf16 %v2491_v45, %v2487_v44  ;;  %v6058_v57 = vpack.c.bf16 %v2500_v48, %v2496_v47  ;;  %v2534_v44 = vld [vmem:[#allocation2 + $0x1c8] sm:$0xff]  ;;  %v6074_v47 = vpack.c.bf16 %v2532_v40, %v2528_v39  ;;  %v2527_v48 = vld [vmem:[#allocation2 + $0x190] sm:$0xff] }
 0x4dd   :  { %v2538_v45 = vld [vmem:[#allocation2 + $0x1e8] sm:$0xff]  ;;  %v2559_v40 = vld [vmem:[#allocation2 + $0x290] sm:$0xff] }
 0x4de   :  { %2369 = vmatprep.mubr.f32.mxu0 %v1872_v58  ;;  %2440 = vmatprep.mubr.f32.mxu1 %v1872_v58  ;;  %v2495_v58 = vld [vmem:[#allocation2 + $0x90] sm:$0xff] }
 0x4ef   :  { %v2073_v13 = vpop.f32.mrb[12].mxu0 }
 0x4f0   :  { %v2074_v0 = vadd.f32 %v2073_v13, %v7351_v16  ;;  %v2075_v60 = vpop.f32.mrb[13].mxu0  ;;  %v2499_v13 = vld [vmem:[#allocation2 + $0xb0] sm:$0xff] }
 0x4f1   :  { %v2076_v61 = vadd.f32 %v2075_v60, %v7355_v17  ;;  %v2144_v62 = vpop.f32.mrb[12].mxu1  ;;  %v2504_v60 = vld [vmem:[#allocation2 + $0xd8] sm:$0xff] }
 0x4f2   :  { %v4908_v63 = vmul.f32 -1.442695, %v2074_v0  ;;  %v2146_v1 = vpop.f32.mrb[13].mxu1  ;;  %v2145_v4 = vadd.f32 %v2144_v62, %v7368_v30  ;;  %v5996_v0 = vpack.c.bf16 %v2497_v53, %v2493_v52  ;;  %v5998_v62 = vpack.c.bf16 %v2506_v55, %v2502_v54  ;;  %v2536_v53 = vld [vmem:[#allocation2 + $0x1d8] sm:$0xff] }
 0x4f3   :  { %v4909_v18 = vmul.f32 -1.442695, %v2076_v61  ;;  %v2147_v2 = vadd.f32 %v2146_v1, %v7362_v24  ;;  %v2508_v61 = vld [vmem:[#allocation2 + $0xf8] sm:$0xff]  ;;  %v2505_v1 = vld [vmem:[#allocation2 + $0xe0] sm:$0xff]  ;;  %v6014_v55 = vpack.c.bf16 %v2538_v45, %v2534_v44 }
 0x4f4   :  { %7110 = vpow2.f32 %v4908_v63  ;;  %v2501_v63 = vld [vmem:[#allocation2 + $0xc0] sm:$0xff]  ;;  %v2540_v54 = vld [vmem:[#allocation2 + $0x1f8] sm:$0xff] }
 0x4f5   :  { %7112 = vpow2.f32 %v4909_v18  ;;  %v4910_v3 = vmul.f32 -1.442695, %v2147_v2  ;;  %v2510_v18 = vld [vmem:[#allocation2 + $0x108] sm:$0xff]  ;;  %v2572_v44 = vld [vmem:[#allocation2 + $0x2f8] sm:$0xff] }
 0x4f6   :  { %v2514_v2 = vld [vmem:[#allocation2 + $0x128] sm:$0xff] }
 0x4f7   :  { %7114 = vpow2.f32 %v4910_v3  ;;  %v6060_v3 = vpack.c.bf16 %v2499_v13, %v2495_v58  ;;  %v2542_v58 = vld [vmem:[#allocation2 + $0x208] sm:$0xff] }
 0x4f8   :  { %7116 = vtanh.f32 %v2145_v4  ;;  %v6062_v4 = vpack.c.bf16 %v2508_v61, %v2504_v60  ;;  %v2546_v13 = vld [vmem:[#allocation2 + $0x228] sm:$0xff]  ;;  %v6078_v60 = vpack.c.bf16 %v2540_v54, %v2536_v53  ;;  %v2535_v61 = vld [vmem:[#allocation2 + $0x1d0] sm:$0xff] }
 0x4f9   :  { %v2567_v54 = vld [vmem:[#allocation2 + $0x2d0] sm:$0xff] }
 0x4fe   :  { %v7111_v5 = vpop.eup %7110 }
 0x4ff   :  { %v7113_v6 = vpop.eup %7112  ;;  %v2152_v12 = vadd.f32 1.0, %v7111_v5  ;;  %v2503_v5 = vld [vmem:[#allocation2 + $0xd0] sm:$0xff] }
 0x500   :  { %v2158_v26 = vadd.f32 1.0, %v7113_v6  ;;  %v2507_v6 = vld [vmem:[#allocation2 + $0xf0] sm:$0xff] }
 0x501   :  { %7118 = vrcp.f32 %v2152_v12  ;;  %v7115_v7 = vpop.eup %7114  ;;  %v6000_v12 = vpack.c.bf16 %v2505_v1, %v2501_v63  ;;  %v2544_v1 = vld [vmem:[#allocation2 + $0x218] sm:$0xff] }
 0x502   :  { %7120 = vrcp.f32 %v2158_v26  ;;  %v7117_v8 = vpop.eup %7116  ;;  %v2165_v10 = vadd.f32 1.0, %v7115_v7  ;;  %v2512_v26 = vld [vmem:[#allocation2 + $0x118] sm:$0xff] }
 0x503   :  { %v2516_v7 = vld [vmem:[#allocation2 + $0x138] sm:$0xff] }
 0x504   :  { %7122 = vrcp.f32 %v2165_v10  ;;  %v2513_v10 = vld [vmem:[#allocation2 + $0x120] sm:$0xff] }
 0x50b   :  { %v7119_v9 = vpop.eup %7118 }
 0x50c   :  { %v7121_v11 = vpop.eup %7120  ;;  %v2169_v19 = vmul.f32 %v7119_v9, %v7117_v8  ;;  %v6002_v8 = vpack.c.bf16 %v2514_v2, %v2510_v18  ;;  %v2509_v9 = vld [vmem:[#allocation2 + $0x100] sm:$0xff]  ;;  %v2548_v18 = vld [vmem:[#allocation2 + $0x238] sm:$0xff]  ;;  %v6018_v2 = vpack.c.bf16 %v2546_v13, %v2542_v58 }
 0x50d   :  { %v2168_v20 = vmul.f32 %v7121_v11, %v1878_v14  ;;  %v2518_v11 = vld [vmem:[#allocation2 + $0x148] sm:$0xff]  ;;  %v6004_v23 = vpack.c.bf16 %v2513_v10, %v2509_v9  ;;  %v2552_v10 = vld [vmem:[#allocation2 + $0x258] sm:$0xff] }
 0x50e   :  { %v7123_v25 = vpop.eup %7122  ;;  %v2522_v14 = vld [vmem:[#allocation2 + $0x168] sm:$0xff]  ;;  %v2580_v58 = vld [vmem:[#allocation2 + $0x338] sm:$0xff] }
 0x50f   :  { %v2170_v21 = vadd.f32 %v2169_v19, %v2168_v20  ;;  %v6064_v19 = vpack.c.bf16 %v2507_v6, %v2503_v5  ;;  %v6066_v20 = vpack.c.bf16 %v2516_v7, %v2512_v26  ;;  %v6006_v28 = vpack.c.bf16 %v2522_v14, %v2518_v11  ;;  %v2550_v5 = vld [vmem:[#allocation2 + $0x248] sm:$0xff]  ;;  %v2543_v7 = vld [vmem:[#allocation2 + $0x210] sm:$0xff]  ;;  %v2556_v11 = vld [vmem:[#allocation2 + $0x278] sm:$0xff] }
 0x510   :  { %v2554_v6 = vld [vmem:[#allocation2 + $0x268] sm:$0xff]  ;;  %v6082_v26 = vpack.c.bf16 %v2548_v18, %v2544_v1  ;;  %v2575_v18 = vld [vmem:[#allocation2 + $0x310] sm:$0xff] }
 0x511   :  { %7124 = vtanh.f32 %v2170_v21  ;;  %2174 = vst [vmem:[%s7569_s4] sm:$0xff] %v2170_v21  ;;  %v2511_v21 = vld [vmem:[#allocation2 + $0x110] sm:$0xff]  ;;  %v6022_v14 = vpack.c.bf16 %v2554_v6, %v2550_v5  ;;  %v2588_v5 = vld [vmem:[#allocation2 + $0x378] sm:$0xff] }
 0x512   :  { %v6068_v34 = vpack.c.bf16 %v2515_v22, %v2511_v21  ;;  %v2558_v21 = vld [vmem:[#allocation2 + $0x288] sm:$0xff] }
 0x513   :  { %v2562_v22 = vld [vmem:[#allocation2 + $0x2a8] sm:$0xff] }
 0x51b   :  { %v7125_v32 = vpop.eup %7124 }
 0x51c   :  { %v2172_v36 = vmul.f32 %v7125_v32, %v7123_v25  ;;  %v2520_v25 = vld [vmem:[#allocation2 + $0x158] sm:$0xff]  ;;  %v2526_v32 = vld [vmem:[#allocation2 + $0x188] sm:$0xff] }
 0x51d   :  { %v6070_v35 = vpack.c.bf16 %v2524_v27, %v2520_v25  ;;  %v6086_v25 = vpack.c.bf16 %v2556_v11, %v2552_v10  ;;  %v2551_v27 = vld [vmem:[#allocation2 + $0x250] sm:$0xff] }
 0x51e   :  { %2370 = vmatmul.mubr.f32.vlgmr.msra.gmra.mrb[14].mxu0 %v2172_v36  ;;  %2441 = vmatmul.mubr.f32.vlgmr.msra.gmra.mrb[14].mxu1 %v2172_v36  ;;  %v2583_v11 = vld [vmem:[#allocation2 + $0x350] sm:$0xff] }
 0x51f   :  { %5989 = vmatpush1.bf16.msra.mxu0 %v5988_v33  ;;  %2669 = vmatprep.mubr.f32.mxu0 %v2172_v36  ;;  %v2530_v33 = vld [vmem:[#allocation2 + $0x1a8] sm:$0xff] }
 0x520   :  { %5991 = vmatprep.subr.bf16.mxu0 %v5990_v37  ;;  %2740 = vmatprep.mubr.f32.mxu1 %v2172_v36  ;;  %v2519_v36 = vld [vmem:[#allocation2 + $0x150] sm:$0xff]  ;;  %v6010_v41 = vpack.c.bf16 %v2530_v33, %v2526_v32  ;;  %v2564_v32 = vld [vmem:[#allocation2 + $0x2b8] sm:$0xff]  ;;  %v6026_v33 = vpack.c.bf16 %v2562_v22, %v2558_v21 }
 0x521   :  { %6053 = vmatpush1.bf16.msra.mxu1 %v6052_v42  ;;  %v2523_v37 = vld [vmem:[#allocation2 + $0x170] sm:$0xff]  ;;  %v2525_v42 = vld [vmem:[#allocation2 + $0x180] sm:$0xff]  ;;  %v6090_v39 = vpack.c.bf16 %v2564_v32, %v2560_v31  ;;  %v2596_v21 = vld [vmem:[#allocation2 + $0x3b8] sm:$0xff] }
 0x522   :  { %6055 = vmatprep.subr.bf16.mxu1 %v6054_v43  ;;  %v2529_v43 = vld [vmem:[#allocation2 + $0x1a0] sm:$0xff]  ;;  %v2591_v32 = vld [vmem:[#allocation2 + $0x390] sm:$0xff] }
 0x523   :  { %5993 = vmatpush1.bf16.msra.mxu0 %v5992_v46  ;;  %v6072_v46 = vpack.c.bf16 %v2523_v37, %v2519_v36  ;;  %v6012_v52 = vpack.c.bf16 %v2529_v43, %v2525_v42  ;;  %v2566_v36 = vld [vmem:[#allocation2 + $0x2c8] sm:$0xff]  ;;  %v2568_v43 = vld [vmem:[#allocation2 + $0x2d8] sm:$0xff] }
 0x524   :  { %5995 = vmatprep.subr.bf16.mxu0 %v5994_v51  ;;  %v2531_v51 = vld [vmem:[#allocation2 + $0x1b0] sm:$0xff]  ;;  %v2570_v37 = vld [vmem:[#allocation2 + $0x2e8] sm:$0xff]  ;;  %v6094_v53 = vpack.c.bf16 %v2572_v44, %v2568_v43 }
 0x525   :  { %6057 = vmatpush1.bf16.msra.mxu1 %v6056_v56  ;;  %v2533_v56 = vld [vmem:[#allocation2 + $0x1c0] sm:$0xff]  ;;  %v6030_v45 = vpack.c.bf16 %v2570_v37, %v2566_v36  ;;  %v2604_v36 = vld [vmem:[#allocation2 + $0x3f8] sm:$0xff]  ;;  %v2603_v43 = vld [vmem:[#allocation2 + $0x3f0] sm:$0xff] }
 0x526   :  { %6059 = vmatprep.subr.bf16.mxu1 %v6058_v57  ;;  %v2537_v57 = vld [vmem:[#allocation2 + $0x1e0] sm:$0xff] }
 0x527   :  { %5997 = vmatpush1.bf16.msra.mxu0 %v5996_v0  ;;  %v6076_v0 = vpack.c.bf16 %v2531_v51, %v2527_v48  ;;  %v6016_v63 = vpack.c.bf16 %v2537_v57, %v2533_v56  ;;  %v2574_v48 = vld [vmem:[#allocation2 + $0x308] sm:$0xff]  ;;  %v2576_v57 = vld [vmem:[#allocation2 + $0x318] sm:$0xff] }
 0x528   :  { %5999 = vmatprep.subr.bf16.mxu0 %v5998_v62  ;;  %v2539_v62 = vld [vmem:[#allocation2 + $0x1f0] sm:$0xff]  ;;  %v2578_v51 = vld [vmem:[#allocation2 + $0x328] sm:$0xff]  ;;  %v6098_v1 = vpack.c.bf16 %v2580_v58, %v2576_v57 }
 0x529   :  { %6061 = vmatpush1.bf16.msra.mxu1 %v6060_v3  ;;  %v2541_v3 = vld [vmem:[#allocation2 + $0x200] sm:$0xff]  ;;  %v6034_v13 = vpack.c.bf16 %v2578_v51, %v2574_v48  ;;  %v2780_v48 = vld [vmem:[#allocation2 + $0x428] sm:$0xff]  ;;  %v2777_v57 = vld [vmem:[#allocation2 + $0x410] sm:$0xff] }
 0x52a   :  { %6063 = vmatprep.subr.bf16.mxu1 %v6062_v4  ;;  %v2545_v4 = vld [vmem:[#allocation2 + $0x220] sm:$0xff]  ;;  %v2781_v58 = vld [vmem:[#allocation2 + $0x430] sm:$0xff] }
 0x52b   :  { %6001 = vmatpush1.bf16.msra.mxu0 %v6000_v12  ;;  %v6080_v12 = vpack.c.bf16 %v2539_v62, %v2535_v61  ;;  %v6020_v9 = vpack.c.bf16 %v2545_v4, %v2541_v3  ;;  %v2582_v61 = vld [vmem:[#allocation2 + $0x348] sm:$0xff]  ;;  %v2584_v4 = vld [vmem:[#allocation2 + $0x358] sm:$0xff] }
 0x52c   :  { %6003 = vmatprep.subr.bf16.mxu0 %v6002_v8  ;;  %v2547_v8 = vld [vmem:[#allocation2 + $0x230] sm:$0xff]  ;;  %v2586_v62 = vld [vmem:[#allocation2 + $0x368] sm:$0xff]  ;;  %v6102_v10 = vpack.c.bf16 %v2588_v5, %v2584_v4 }
 0x52d   :  { %6065 = vmatpush1.bf16.msra.mxu1 %v6064_v19  ;;  %v2549_v19 = vld [vmem:[#allocation2 + $0x240] sm:$0xff]  ;;  %v6038_v6 = vpack.c.bf16 %v2586_v62, %v2582_v61  ;;  %v2788_v61 = vld [vmem:[#allocation2 + $0x468] sm:$0xff]  ;;  %v2785_v5 = vld [vmem:[#allocation2 + $0x450] sm:$0xff] }
 0x52e   :  { %6067 = vmatprep.subr.bf16.mxu1 %v6066_v20  ;;  %v2553_v20 = vld [vmem:[#allocation2 + $0x260] sm:$0xff] }
 0x52f   :  { %6005 = vmatpush1.bf16.msra.mxu0 %v6004_v23  ;;  %v6084_v23 = vpack.c.bf16 %v2547_v8, %v2543_v7  ;;  %v6024_v29 = vpack.c.bf16 %v2553_v20, %v2549_v19  ;;  %v2590_v7 = vld [vmem:[#allocation2 + $0x388] sm:$0xff]  ;;  %v2592_v20 = vld [vmem:[#allocation2 + $0x398] sm:$0xff]  ;;  %v2783_v62 = vld [vmem:[#allocation2 + $0x440] sm:$0xff] }
 0x530   :  { %6007 = vmatprep.subr.bf16.mxu0 %v6006_v28  ;;  %v2555_v28 = vld [vmem:[#allocation2 + $0x270] sm:$0xff]  ;;  %v2594_v8 = vld [vmem:[#allocation2 + $0x3a8] sm:$0xff]  ;;  %v6106_v31 = vpack.c.bf16 %v2596_v21, %v2592_v20 }
 0x531   :  { %6069 = vmatpush1.bf16.msra.mxu1 %v6068_v34  ;;  %v2557_v34 = vld [vmem:[#allocation2 + $0x280] sm:$0xff]  ;;  %v6042_v22 = vpack.c.bf16 %v2594_v8, %v2590_v7  ;;  %v2796_v7 = vld [vmem:[#allocation2 + $0x4a8] sm:$0xff] }
 0x532   :  { %6071 = vmatprep.subr.bf16.mxu1 %v6070_v35  ;;  %v2561_v35 = vld [vmem:[#allocation2 + $0x2a0] sm:$0xff] }
 0x533   :  { %6009 = vmatpush1.bf16.msra.mxu0 %v6008_v38  ;;  %v6088_v38 = vpack.c.bf16 %v2555_v28, %v2551_v27  ;;  %v6028_v42 = vpack.c.bf16 %v2561_v35, %v2557_v34  ;;  %v2598_v27 = vld [vmem:[#allocation2 + $0x3c8] sm:$0xff]  ;;  %v2600_v35 = vld [vmem:[#allocation2 + $0x3d8] sm:$0xff]  ;;  %v2791_v8 = vld [vmem:[#allocation2 + $0x480] sm:$0xff] }
 0x534   :  { %6011 = vmatprep.subr.bf16.mxu0 %v6010_v41  ;;  %v2563_v41 = vld [vmem:[#allocation2 + $0x2b0] sm:$0xff]  ;;  %v2602_v28 = vld [vmem:[#allocation2 + $0x3e8] sm:$0xff] }
 0x535   :  { %6073 = vmatpush1.bf16.msra.mxu1 %v6072_v46  ;;  %v2565_v46 = vld [vmem:[#allocation2 + $0x2c0] sm:$0xff]  ;;  %v6046_v37 = vpack.c.bf16 %v2602_v28, %v2598_v27 }
 0x536   :  { %6075 = vmatprep.subr.bf16.mxu1 %v6074_v47  ;;  %v2569_v47 = vld [vmem:[#allocation2 + $0x2e0] sm:$0xff] }
 0x537   :  { %6013 = vmatpush1.bf16.msra.mxu0 %v6012_v52  ;;  %v6092_v52 = vpack.c.bf16 %v2563_v41, %v2559_v40  ;;  %v6032_v56 = vpack.c.bf16 %v2569_v47, %v2565_v46  ;;  %v6110_v41 = vpack.c.bf16 %v2604_v36, %v2600_v35  ;;  %v4918_v46 = vld [vmem:[%s7565_s0 + $0x20] sm:$0xff]  ;;  %v2776_v47 = vld [vmem:[#allocation2 + $0x408] sm:$0xff]  ;;  %v2805_v36 = vld [vmem:[#allocation2 + $0x4f0] sm:$0xff] }
 0x538   :  { %6015 = vmatprep.subr.bf16.mxu0 %v6014_v55  ;;  %v2571_v55 = vld [vmem:[#allocation2 + $0x2f0] sm:$0xff]  ;;  %v6114_v51 = vpack.c.bf16 %v2780_v48, %v2776_v47  ;;  %v2799_v28 = vld [vmem:[#allocation2 + $0x4c0] sm:$0xff] }
 0x539   :  { %6077 = vmatpush1.bf16.msra.mxu1 %v6076_v0  ;;  %v2573_v0 = vld [vmem:[#allocation2 + $0x300] sm:$0xff]  ;;  %v2809_v48 = vld [vmem:[#allocation2 + $0x510] sm:$0xff] }
 0x53a   :  { %6079 = vmatprep.subr.bf16.mxu1 %v6078_v60  ;;  %v2577_v60 = vld [vmem:[#allocation2 + $0x320] sm:$0xff] }
 0x53b   :  { %6017 = vmatpush1.bf16.msra.mxu0 %v6016_v63  ;;  %v6096_v63 = vpack.c.bf16 %v2571_v55, %v2567_v54  ;;  %v6036_v3 = vpack.c.bf16 %v2577_v60, %v2573_v0  ;;  %v2778_v54 = vld [vmem:[#allocation2 + $0x418] sm:$0xff]  ;;  %v6180_v0 = vpack.c.bf16 %v2781_v58, %v2777_v57  ;;  %v2784_v60 = vld [vmem:[#allocation2 + $0x448] sm:$0xff]  ;;  %v2819_v57 = vld [vmem:[#allocation2 + $0x560] sm:$0xff] }
 0x53c   :  { %6019 = vmatprep.subr.bf16.mxu0 %v6018_v2  ;;  %v2579_v2 = vld [vmem:[#allocation2 + $0x330] sm:$0xff]  ;;  %v2818_v58 = vld [vmem:[#allocation2 + $0x558] sm:$0xff] }
 0x53d   :  { %6081 = vmatpush1.bf16.msra.mxu1 %v6080_v12  ;;  %v2581_v12 = vld [vmem:[#allocation2 + $0x340] sm:$0xff] }
 0x53e   :  { %6083 = vmatprep.subr.bf16.mxu1 %v6082_v26  ;;  %v2585_v26 = vld [vmem:[#allocation2 + $0x360] sm:$0xff] }
 0x53f   :  { %6021 = vmatpush1.bf16.msra.mxu0 %v6020_v9  ;;  %v6100_v9 = vpack.c.bf16 %v2579_v2, %v2575_v18  ;;  %v6040_v19 = vpack.c.bf16 %v2585_v26, %v2581_v12  ;;  %v2786_v18 = vld [vmem:[#allocation2 + $0x458] sm:$0xff]  ;;  %v2792_v12 = vld [vmem:[#allocation2 + $0x488] sm:$0xff] }
 0x540   :  { %6023 = vmatprep.subr.bf16.mxu0 %v6022_v14  ;;  %v2587_v14 = vld [vmem:[#allocation2 + $0x370] sm:$0xff]  ;;  %v2790_v2 = vld [vmem:[#allocation2 + $0x478] sm:$0xff] }
 0x541   :  { %6085 = vmatpush1.bf16.msra.mxu1 %v6084_v23  ;;  %v2589_v23 = vld [vmem:[#allocation2 + $0x380] sm:$0xff]  ;;  %v6182_v4 = vpack.c.bf16 %v2790_v2, %v2786_v18  ;;  %v2828_v18 = vld [vmem:[#allocation2 + $0x5a8] sm:$0xff] }
 0x542   :  { %6087 = vmatprep.subr.bf16.mxu1 %v6086_v25  ;;  %v2593_v25 = vld [vmem:[#allocation2 + $0x3a0] sm:$0xff] }
 0x543   :  { %6025 = vmatpush1.bf16.msra.mxu0 %v6024_v29  ;;  %v6104_v29 = vpack.c.bf16 %v2587_v14, %v2583_v11  ;;  %v6044_v34 = vpack.c.bf16 %v2593_v25, %v2589_v23  ;;  %v2794_v11 = vld [vmem:[#allocation2 + $0x498] sm:$0xff]  ;;  %v2800_v23 = vld [vmem:[#allocation2 + $0x4c8] sm:$0xff] }
 0x544   :  { %6027 = vmatprep.subr.bf16.mxu0 %v6026_v33  ;;  %v2595_v33 = vld [vmem:[#allocation2 + $0x3b0] sm:$0xff]  ;;  %v2798_v14 = vld [vmem:[#allocation2 + $0x4b8] sm:$0xff]  ;;  %v2804_v25 = vld [vmem:[#allocation2 + $0x4e8] sm:$0xff] }
 0x545   :  { %6089 = vmatpush1.bf16.msra.mxu1 %v6088_v38  ;;  %v2597_v38 = vld [vmem:[#allocation2 + $0x3c0] sm:$0xff]  ;;  %v6108_v40 = vpack.c.bf16 %v2595_v33, %v2591_v32  ;;  %v6186_v21 = vpack.c.bf16 %v2798_v14, %v2794_v11  ;;  %v6126_v27 = vpack.c.bf16 %v2804_v25, %v2800_v23  ;;  %v2806_v33 = vld [vmem:[#allocation2 + $0x4f8] sm:$0xff]  ;;  %v2836_v11 = vld [vmem:[#allocation2 + $0x5e8] sm:$0xff] }
 0x546   :  { %6091 = vmatprep.subr.bf16.mxu1 %v6090_v39  ;;  %v2601_v39 = vld [vmem:[#allocation2 + $0x3e0] sm:$0xff]  ;;  %v2838_v23 = vld [vmem:[#allocation2 + $0x5f8] sm:$0xff]  ;;  %v2833_v25 = vld [vmem:[#allocation2 + $0x5d0] sm:$0xff] }
 0x547   :  { %6029 = vmatpush1.bf16.msra.mxu0 %v6028_v42  ;;  %v2599_v42 = vld [vmem:[#allocation2 + $0x3d0] sm:$0xff]  ;;  %v6048_v44 = vpack.c.bf16 %v2601_v39, %v2597_v38  ;;  %v2812_v38 = vld [vmem:[#allocation2 + $0x528] sm:$0xff] }
 0x548   :  { %6031 = vmatprep.subr.bf16.mxu0 %v6030_v45  ;;  %v6112_v45 = vpack.c.bf16 %v2603_v43, %v2599_v42  ;;  %v2807_v43 = vld [vmem:[#allocation2 + $0x500] sm:$0xff] }
 0x549   :  { %6093 = vmatpush1.bf16.msra.mxu1 %v6092_v52  ;;  %v2775_v52 = vld [vmem:[#allocation2 + $0x400] sm:$0xff] }
 0x54a   :  { %6095 = vmatprep.subr.bf16.mxu1 %v6094_v53  ;;  %v2779_v53 = vld [vmem:[#allocation2 + $0x420] sm:$0xff] }
 0x54b   :  { %6033 = vmatpush1.bf16.msra.mxu0 %v6032_v56  ;;  %v6116_v55 = vpack.c.bf16 %v2779_v53, %v2775_v52  ;;  %v2782_v56 = vld [vmem:[#allocation2 + $0x438] sm:$0xff]  ;;  %v2816_v53 = vld [vmem:[#allocation2 + $0x548] sm:$0xff] }
 0x54c   :  { %6035 = vmatprep.subr.bf16.mxu0 %v6034_v13  ;;  %v6178_v13 = vpack.c.bf16 %v2782_v56, %v2778_v54  ;;  %v2820_v54 = vld [vmem:[#allocation2 + $0x568] sm:$0xff]  ;;  %v2815_v56 = vld [vmem:[#allocation2 + $0x540] sm:$0xff] }
 0x54d   :  { %6097 = vmatpush1.bf16.msra.mxu1 %v6096_v63  ;;  %v6118_v63 = vpack.c.bf16 %v2788_v61, %v2784_v60  ;;  %v2817_v60 = vld [vmem:[#allocation2 + $0x550] sm:$0xff] }
 0x54e   :  { %6099 = vmatprep.subr.bf16.mxu1 %v6098_v1  ;;  %v2787_v1 = vld [vmem:[#allocation2 + $0x460] sm:$0xff]  ;;  %v2821_v61 = vld [vmem:[#allocation2 + $0x570] sm:$0xff] }
 0x54f   :  { %6037 = vmatpush1.bf16.msra.mxu0 %v6036_v3  ;;  %v6120_v3 = vpack.c.bf16 %v2787_v1, %v2783_v62  ;;  %v2824_v1 = vld [vmem:[#allocation2 + $0x588] sm:$0xff] }
 0x550   :  { %6039 = vmatprep.subr.bf16.mxu0 %v6038_v6  ;;  %v2789_v6 = vld [vmem:[#allocation2 + $0x470] sm:$0xff]  ;;  %v6138_v2 = vpack.c.bf16 %v2828_v18, %v2824_v1 }
 0x551   :  { %6101 = vmatpush1.bf16.msra.mxu1 %v6100_v9  ;;  %v6184_v26 = vpack.c.bf16 %v2789_v6, %v2785_v5  ;;  %v2795_v9 = vld [vmem:[#allocation2 + $0x4a0] sm:$0xff]  ;;  %v2826_v5 = vld [vmem:[#allocation2 + $0x598] sm:$0xff]  ;;  %v2857_v1 = vld [vmem:[#allocation2 + $0x690] sm:$0xff] }
 0x552   :  { %6103 = vmatprep.subr.bf16.mxu1 %v6102_v10  ;;  %v6122_v10 = vpack.c.bf16 %v2796_v7, %v2792_v12  ;;  %v6124_v20 = vpack.c.bf16 %v2795_v9, %v2791_v8  ;;  %v2830_v12 = vld [vmem:[#allocation2 + $0x5b8] sm:$0xff]  ;;  %v2829_v7 = vld [vmem:[#allocation2 + $0x5b0] sm:$0xff] }
 0x553   :  { %6041 = vmatpush1.bf16.msra.mxu0 %v6040_v19  ;;  %v2793_v19 = vld [vmem:[#allocation2 + $0x490] sm:$0xff]  ;;  %v6202_v8 = vpack.c.bf16 %v2830_v12, %v2826_v5  ;;  %v2868_v5 = vld [vmem:[#allocation2 + $0x6e8] sm:$0xff]  ;;  %v2863_v12 = vld [vmem:[#allocation2 + $0x6c0] sm:$0xff] }
 0x554   :  { %6043 = vmatprep.subr.bf16.mxu0 %v6042_v22  ;;  %v2797_v22 = vld [vmem:[#allocation2 + $0x4b0] sm:$0xff] }
 0x555   :  { %6105 = vmatpush1.bf16.msra.mxu1 %v6104_v29  ;;  %v2803_v29 = vld [vmem:[#allocation2 + $0x4e0] sm:$0xff]  ;;  %v6188_v32 = vpack.c.bf16 %v2797_v22, %v2793_v19  ;;  %v2861_v18 = vld [vmem:[#allocation2 + $0x6b0] sm:$0xff] }
 0x556   :  { %6107 = vmatprep.subr.bf16.mxu1 %v6106_v31  ;;  %v2802_v31 = vld [vmem:[#allocation2 + $0x4d8] sm:$0xff]  ;;  %v6128_v39 = vpack.c.bf16 %v2803_v29, %v2799_v28  ;;  %v2831_v19 = vld [vmem:[#allocation2 + $0x5c0] sm:$0xff] }
 0x557   :  { %6045 = vmatpush1.bf16.msra.mxu0 %v6044_v34  ;;  %v2801_v34 = vld [vmem:[#allocation2 + $0x4d0] sm:$0xff]  ;;  %v6190_v35 = vpack.c.bf16 %v2806_v33, %v2802_v31  ;;  %v2840_v31 = vld [vmem:[#allocation2 + $0x608] sm:$0xff] }
 0x558   :  { %6047 = vmatprep.subr.bf16.mxu0 %v6046_v37  ;;  %v2808_v37 = vld [vmem:[#allocation2 + $0x508] sm:$0xff] }
 0x559   :  { %6109 = vmatpush1.bf16.msra.mxu1 %v6108_v40  ;;  %v2810_v40 = vld [vmem:[#allocation2 + $0x518] sm:$0xff]  ;;  %v6130_v42 = vpack.c.bf16 %v2812_v38, %v2808_v37 }
 0x55a   :  { %6111 = vmatprep.subr.bf16.mxu1 %v6110_v41  ;;  %v2814_v41 = vld [vmem:[#allocation2 + $0x538] sm:$0xff] }
 0x55b   :  { %6049 = vmatpush1.bf16.msra.mxu0 %v6048_v44  ;;  %v2811_v44 = vld [vmem:[#allocation2 + $0x520] sm:$0xff]  ;;  %v2846_v38 = vld [vmem:[#allocation2 + $0x638] sm:$0xff] }
 0x55c   :  { %6115 = vmatprep.subr.bf16.mxu0 %v6114_v51  ;;  %v6132_v47 = vpack.c.bf16 %v2811_v44, %v2807_v43  ;;  %v2813_v51 = vld [vmem:[#allocation2 + $0x530] sm:$0xff]  ;;  %v2848_v43 = vld [vmem:[#allocation2 + $0x648] sm:$0xff] }
 0x55d   :  { %6113 = vmatpush1.bf16.msra.mxu1 %v6112_v45  ;;  %v6192_v45 = vpack.c.bf16 %v2805_v36, %v2801_v34  ;;  %v6196_v52 = vpack.c.bf16 %v2813_v51, %v2809_v48  ;;  %v2839_v34 = vld [vmem:[#allocation2 + $0x600] sm:$0xff]  ;;  %v2842_v36 = vld [vmem:[#allocation2 + $0x618] sm:$0xff]  ;;  %v2852_v44 = vld [vmem:[#allocation2 + $0x668] sm:$0xff] }
 0x55e   :  { %2670 = vmatmul.mubr.f32.vlgmr.msra.gmra.mrb[16].mxu0 %v4918_v46  ;;  %6179 = vmatprep.subr.bf16.mxu1 %v6178_v13  ;;  %v6136_v13 = vpack.c.bf16 %v2819_v57, %v2815_v56  ;;  %v2850_v48 = vld [vmem:[#allocation2 + $0x658] sm:$0xff]  ;;  %v2856_v57 = vld [vmem:[#allocation2 + $0x688] sm:$0xff] }
 0x55f   :  { %6117 = vmatpush1.bf16.msra.mxu0 %v6116_v55  ;;  %v6134_v55 = vpack.c.bf16 %v2820_v54, %v2816_v53  ;;  %v2849_v53 = vld [vmem:[#allocation2 + $0x650] sm:$0xff] }
 0x560   :  { %2741 = vmatmul.mubr.f32.vlgmr.msra.gmra.mrb[16].mxu1 %v4918_v46  ;;  %6119 = vmatprep.subr.bf16.mxu0 %v6118_v63  ;;  %v6194_v46 = vpack.c.bf16 %v2814_v41, %v2810_v40  ;;  %v6200_v63 = vpack.c.bf16 %v2821_v61, %v2817_v60  ;;  %v2845_v40 = vld [vmem:[#allocation2 + $0x630] sm:$0xff]  ;;  %v6210_v41 = vpack.c.bf16 %v2846_v38, %v2842_v36  ;;  %v2859_v60 = vld [vmem:[#allocation2 + $0x6a0] sm:$0xff]  ;;  %v2858_v61 = vld [vmem:[#allocation2 + $0x698] sm:$0xff] }
 0x561   :  { %6181 = vmatpush1.bf16.msra.mxu1 %v6180_v0  ;;  %v2822_v0 = vld [vmem:[#allocation2 + $0x578] sm:$0xff]  ;;  %v2853_v54 = vld [vmem:[#allocation2 + $0x670] sm:$0xff]  ;;  %v2884_v36 = vld [vmem:[#allocation2 + $0x768] sm:$0xff] }
 0x562   :  { %6183 = vmatprep.subr.bf16.mxu1 %v6182_v4  ;;  %v6198_v62 = vpack.c.bf16 %v2822_v0, %v2818_v58  ;;  %v2827_v4 = vld [vmem:[#allocation2 + $0x5a0] sm:$0xff]  ;;  %v6216_v56 = vpack.c.bf16 %v2853_v54, %v2849_v53  ;;  %v2860_v58 = vld [vmem:[#allocation2 + $0x6a8] sm:$0xff]  ;;  %v2890_v54 = vld [vmem:[#allocation2 + $0x798] sm:$0xff] }
 0x563   :  { %6121 = vmatpush1.bf16.msra.mxu0 %v6120_v3  ;;  %v2823_v3 = vld [vmem:[#allocation2 + $0x580] sm:$0xff] }
 0x564   :  { %6123 = vmatprep.subr.bf16.mxu0 %v6122_v10  ;;  %v6140_v6 = vpack.c.bf16 %v2827_v4, %v2823_v3  ;;  %v2832_v10 = vld [vmem:[#allocation2 + $0x5c8] sm:$0xff]  ;;  %v2855_v0 = vld [vmem:[#allocation2 + $0x680] sm:$0xff]  ;;  %v6220_v3 = vpack.c.bf16 %v2861_v18, %v2857_v1  ;;  %v2898_v18 = vld [vmem:[#allocation2 + $0x7d8] sm:$0xff] }
 0x565   :  { %6185 = vmatpush1.bf16.msra.mxu1 %v6184_v26  ;;  %v2825_v26 = vld [vmem:[#allocation2 + $0x590] sm:$0xff]  ;;  %v6142_v14 = vpack.c.bf16 %v2836_v11, %v2832_v10  ;;  %v2864_v4 = vld [vmem:[#allocation2 + $0x6c8] sm:$0xff]  ;;  %v2879_v38 = vld [vmem:[#allocation2 + $0x740] sm:$0xff] }
 0x566   :  { %6187 = vmatprep.subr.bf16.mxu1 %v6186_v21  ;;  %v6204_v9 = vpack.c.bf16 %v2829_v7, %v2825_v26  ;;  %v2834_v21 = vld [vmem:[#allocation2 + $0x5d8] sm:$0xff]  ;;  %v2867_v26 = vld [vmem:[#allocation2 + $0x6e0] sm:$0xff]  ;;  %v2865_v10 = vld [vmem:[#allocation2 + $0x6d0] sm:$0xff] }
 0x567   :  { %6125 = vmatpush1.bf16.msra.mxu0 %v6124_v20  ;;  %v2835_v20 = vld [vmem:[#allocation2 + $0x5e0] sm:$0xff]  ;;  %v6206_v28 = vpack.c.bf16 %v2838_v23, %v2834_v21  ;;  %v2866_v7 = vld [vmem:[#allocation2 + $0x6d8] sm:$0xff]  ;;  %v2869_v11 = vld [vmem:[#allocation2 + $0x6f0] sm:$0xff] }
 0x568   :  { %6127 = vmatprep.subr.bf16.mxu0 %v6126_v27  ;;  %v6144_v22 = vpack.c.bf16 %v2835_v20, %v2831_v19  ;;  %v2837_v27 = vld [vmem:[#allocation2 + $0x5f0] sm:$0xff]  ;;  %v6224_v19 = vpack.c.bf16 %v2869_v11, %v2865_v10  ;;  %v2872_v20 = vld [vmem:[#allocation2 + $0x708] sm:$0xff]  ;;  %v2871_v23 = vld [vmem:[#allocation2 + $0x700] sm:$0xff] }
 0x569   :  { %6189 = vmatpush1.bf16.msra.mxu1 %v6188_v32  ;;  %v6208_v29 = vpack.c.bf16 %v2837_v27, %v2833_v25  ;;  %v2844_v32 = vld [vmem:[#allocation2 + $0x628] sm:$0xff]  ;;  %v2875_v25 = vld [vmem:[#allocation2 + $0x720] sm:$0xff]  ;;  %v2874_v27 = vld [vmem:[#allocation2 + $0x718] sm:$0xff] }
 0x56a   :  { %6191 = vmatprep.subr.bf16.mxu1 %v6190_v35  ;;  %v6146_v33 = vpack.c.bf16 %v2844_v32, %v2840_v31  ;;  %v2843_v35 = vld [vmem:[#allocation2 + $0x620] sm:$0xff]  ;;  %v2876_v21 = vld [vmem:[#allocation2 + $0x728] sm:$0xff]  ;;  %v2873_v31 = vld [vmem:[#allocation2 + $0x710] sm:$0xff] }
 0x56b   :  { %6129 = vmatpush1.bf16.msra.mxu0 %v6128_v39  ;;  %v6148_v37 = vpack.c.bf16 %v2843_v35, %v2839_v34  ;;  %v2841_v39 = vld [vmem:[#allocation2 + $0x610] sm:$0xff]  ;;  %v2880_v35 = vld [vmem:[#allocation2 + $0x748] sm:$0xff]  ;;  %v2891_v53 = vld [vmem:[#allocation2 + $0x7a0] sm:$0xff] }
 0x56c   :  { %6131 = vmatprep.subr.bf16.mxu0 %v6130_v42  ;;  %v6212_v42 = vpack.c.bf16 %v2845_v40, %v2841_v39  ;;  %v2877_v32 = vld [vmem:[#allocation2 + $0x730] sm:$0xff]  ;;  %v2883_v39 = vld [vmem:[#allocation2 + $0x760] sm:$0xff]  ;;  %v2882_v40 = vld [vmem:[#allocation2 + $0x758] sm:$0xff] }
 0x56d   :  { %6193 = vmatpush1.bf16.msra.mxu1 %v6192_v45  ;;  %v6150_v45 = vpack.c.bf16 %v2852_v44, %v2848_v43  ;;  %v6228_v34 = vpack.c.bf16 %v2877_v32, %v2873_v31  ;;  %v2881_v43 = vld [vmem:[#allocation2 + $0x750] sm:$0xff]  ;;  %v3082_v10 = vld [vmem:[#allocation2 + $0x38] sm:$0xff] }
 0x56e   :  { %6195 = vmatprep.subr.bf16.mxu1 %v6194_v46  ;;  %v2847_v46 = vld [vmem:[#allocation2 + $0x640] sm:$0xff]  ;;  %v2885_v44 = vld [vmem:[#allocation2 + $0x770] sm:$0xff] }
 0x56f   :  { %6133 = vmatpush1.bf16.msra.mxu0 %v6132_v47  ;;  %v2851_v47 = vld [vmem:[#allocation2 + $0x660] sm:$0xff] }
 0x570   :  { %6135 = vmatprep.subr.bf16.mxu0 %v6134_v55  ;;  %v6152_v51 = vpack.c.bf16 %v2851_v47, %v2847_v46  ;;  %v6232_v46 = vpack.c.bf16 %v2885_v44, %v2881_v43  ;;  %v2888_v47 = vld [vmem:[#allocation2 + $0x788] sm:$0xff] }
 0x571   :  { %6197 = vmatpush1.bf16.msra.mxu1 %v6196_v52  ;;  %v2854_v52 = vld [vmem:[#allocation2 + $0x678] sm:$0xff] }
 0x572   :  { %6199 = vmatprep.subr.bf16.mxu1 %v6198_v62  ;;  %v6214_v55 = vpack.c.bf16 %v2854_v52, %v2850_v48  ;;  %v6156_v62 = vpack.c.bf16 %v2859_v60, %v2855_v0  ;;  %v2892_v48 = vld [vmem:[#allocation2 + $0x7a8] sm:$0xff] }
 0x573   :  { %6137 = vmatpush1.bf16.msra.mxu0 %v6136_v13  ;;  %v6154_v13 = vpack.c.bf16 %v2860_v58, %v2856_v57  ;;  %v6170_v52 = vpack.c.bf16 %v2892_v48, %v2888_v47  ;;  %v2889_v58 = vld [vmem:[#allocation2 + $0x790] sm:$0xff]  ;;  %v2896_v0 = vld [vmem:[#allocation2 + $0x7c8] sm:$0xff] }
 0x574   :  { %6139 = vmatprep.subr.bf16.mxu0 %v6138_v2 }
 0x575   :  { %6201 = vmatpush1.bf16.msra.mxu1 %v6200_v63  ;;  %v2862_v63 = vld [vmem:[#allocation2 + $0x6b8] sm:$0xff] }
 0x576   :  { %6203 = vmatprep.subr.bf16.mxu1 %v6202_v8  ;;  %v6218_v2 = vpack.c.bf16 %v2862_v63, %v2858_v61  ;;  %v6160_v8 = vpack.c.bf16 %v2867_v26, %v2863_v12  ;;  %v2900_v61 = vld [vmem:[#allocation2 + $0x7e8] sm:$0xff]  ;;  %v2899_v63 = vld [vmem:[#allocation2 + $0x7e0] sm:$0xff] }
 0x577   :  { %6141 = vmatpush1.bf16.msra.mxu0 %v6140_v6  ;;  %v6158_v6 = vpack.c.bf16 %v2868_v5, %v2864_v4  ;;  %v6174_v1 = vpack.c.bf16 %v2900_v61, %v2896_v0  ;;  %v3076_v12 = vld [vmem:[#allocation2 + $0x8] sm:$0xff] }
 0x578   :  { %6143 = vmatprep.subr.bf16.mxu0 %v6142_v14  ;;  %v3080_v26 = vld [vmem:[#allocation2 + $0x28] sm:$0xff] }
 0x579   :  { %6205 = vmatpush1.bf16.msra.mxu1 %v6204_v9  ;;  %v2870_v9 = vld [vmem:[#allocation2 + $0x6f8] sm:$0xff] }
 0x57a   :  { %6207 = vmatprep.subr.bf16.mxu1 %v6206_v28  ;;  %v6222_v14 = vpack.c.bf16 %v2870_v9, %v2866_v7  ;;  %v6164_v28 = vpack.c.bf16 %v2875_v25, %v2871_v23  ;;  %v6242_v7 = vpack.c.bf16 %v3080_v26, %v3076_v12  ;;  %v3078_v9 = vld [vmem:[#allocation2 + $0x18] sm:$0xff] }
 0x57b   :  { %6145 = vmatpush1.bf16.msra.mxu0 %v6144_v22  ;;  %v6162_v22 = vpack.c.bf16 %v2876_v21, %v2872_v20  ;;  %v6306_v11 = vpack.c.bf16 %v3082_v10, %v3078_v9  ;;  %v3084_v10 = vld [vmem:[#allocation2 + $0x48] sm:$0xff] }
 0x57c   :  { %6147 = vmatprep.subr.bf16.mxu0 %v6146_v33 }
 0x57d   :  { %6209 = vmatpush1.bf16.msra.mxu1 %v6208_v29  ;;  %v2878_v29 = vld [vmem:[#allocation2 + $0x738] sm:$0xff] }
 0x57e   :  { %6211 = vmatprep.subr.bf16.mxu1 %v6210_v41  ;;  %v6226_v33 = vpack.c.bf16 %v2878_v29, %v2874_v27  ;;  %v6168_v41 = vpack.c.bf16 %v2883_v39, %v2879_v38 }
 0x57f   :  { %6149 = vmatpush1.bf16.msra.mxu0 %v6148_v37  ;;  %v6166_v37 = vpack.c.bf16 %v2884_v36, %v2880_v35 }
 0x580   :  { %6151 = vmatprep.subr.bf16.mxu0 %v6150_v45 }
 0x581   :  { %6213 = vmatpush1.bf16.msra.mxu1 %v6212_v42  ;;  %v2886_v42 = vld [vmem:[#allocation2 + $0x778] sm:$0xff] }
 0x582   :  { %6215 = vmatprep.subr.bf16.mxu1 %v6214_v55  ;;  %v6230_v45 = vpack.c.bf16 %v2886_v42, %v2882_v40  ;;  %v2894_v55 = vld [vmem:[#allocation2 + $0x7b8] sm:$0xff] }
 0x583   :  { %6153 = vmatpush1.bf16.msra.mxu0 %v6152_v51  ;;  %v2887_v51 = vld [vmem:[#allocation2 + $0x780] sm:$0xff]  ;;  %v6234_v57 = vpack.c.bf16 %v2894_v55, %v2890_v54 }
 0x584   :  { %6155 = vmatprep.subr.bf16.mxu0 %v6154_v13  ;;  %v2893_v13 = vld [vmem:[#allocation2 + $0x7b0] sm:$0xff] }
 0x585   :  { %6217 = vmatpush1.bf16.msra.mxu1 %v6216_v56  ;;  %v6172_v56 = vpack.c.bf16 %v2891_v53, %v2887_v51  ;;  %v6236_v60 = vpack.c.bf16 %v2893_v13, %v2889_v58 }
 0x586   :  { %6219 = vmatprep.subr.bf16.mxu1 %v6218_v2  ;;  %v2902_v2 = vld [vmem:[#allocation2 + $0x7f8] sm:$0xff] }
 0x587   :  { %6157 = vmatpush1.bf16.msra.mxu0 %v6156_v62  ;;  %v2895_v62 = vld [vmem:[#allocation2 + $0x7c0] sm:$0xff]  ;;  %v6238_v5 = vpack.c.bf16 %v2902_v2, %v2898_v18 }
 0x588   :  { %6159 = vmatprep.subr.bf16.mxu0 %v6158_v6  ;;  %v6176_v4 = vpack.c.bf16 %v2899_v63, %v2895_v62  ;;  %v2901_v6 = vld [vmem:[#allocation2 + $0x7f0] sm:$0xff] }
 0x589   :  { %6221 = vmatpush1.bf16.msra.mxu1 %v6220_v3  ;;  %v2897_v3 = vld [vmem:[#allocation2 + $0x7d0] sm:$0xff] }
 0x58a   :  { %6223 = vmatprep.subr.bf16.mxu1 %v6222_v14 }
 0x58b   :  { %6161 = vmatpush1.bf16.msra.mxu0 %v6160_v8  ;;  %v6240_v8 = vpack.c.bf16 %v2901_v6, %v2897_v3 }
 0x58c   :  { %6163 = vmatprep.subr.bf16.mxu0 %v6162_v22 }
 0x58d   :  { %6225 = vmatpush1.bf16.msra.mxu1 %v6224_v19 }
 0x58e   :  { %6227 = vmatprep.subr.bf16.mxu1 %v6226_v33 }
 0x58f   :  { %6165 = vmatpush1.bf16.msra.mxu0 %v6164_v28 }
 0x590   :  { %6167 = vmatprep.subr.bf16.mxu0 %v6166_v37 }
 0x591   :  { %6229 = vmatpush1.bf16.msra.mxu1 %v6228_v34 }
 0x592   :  { %6231 = vmatprep.subr.bf16.mxu1 %v6230_v45 }
 0x593   :  { %6169 = vmatpush1.bf16.msra.mxu0 %v6168_v41  ;;  %v4912_v41 = vld [vmem:[%s7569_s4 + $0x8] sm:$0xff] }
 0x594   :  { %6171 = vmatprep.subr.bf16.mxu0 %v6170_v52 }
 0x595   :  { %6233 = vmatpush1.bf16.msra.mxu1 %v6232_v46 }
 0x596   :  { %6235 = vmatprep.subr.bf16.mxu1 %v6234_v57 }
 0x597   :  { %6173 = vmatpush1.bf16.msra.mxu0 %v6172_v56 }
 0x598   :  { %6175 = vmatprep.subr.bf16.mxu0 %v6174_v1 }
 0x599   :  { %6237 = vmatpush1.bf16.msra.mxu1 %v6236_v60 }
 0x59a   :  { %6239 = vmatprep.subr.bf16.mxu1 %v6238_v5  ;;  %v2476_v5 = vld [vmem:[%s7569_s4] sm:$0xff] }
 0x59b   :  { %6177 = vmatpush1.bf16.msra.mxu0 %v6176_v4 }
 0x59c   :  { %6243 = vmatprep.subr.bf16.mxu0 %v6242_v7  ;;  %v3075_v7 = vld [vmem:[#allocation2] sm:$0xff] }
 0x59d   :  { %6241 = vmatpush1.bf16.msra.mxu1 %v6240_v8  ;;  %v3079_v8 = vld [vmem:[#allocation2 + $0x20] sm:$0xff] }
 0x59e   :  { %6307 = vmatprep.subr.bf16.mxu1 %v6306_v11  ;;  %v3088_v11 = vld [vmem:[#allocation2 + $0x68] sm:$0xff] }
 0x5f1   :  { %v2371_v14 = vpop.f32.mrb[14].mxu0  ;;  %v2442_v19 = vpop.f32.mrb[14].mxu1 }
 0x5f2   :  { %v2372_v20 = vadd.f32 %v2371_v14, %v7382_v49  ;;  %v2373_v21 = vpop.f32.mrb[15].mxu0  ;;  %v2444_v22 = vpop.f32.mrb[15].mxu1  ;;  %v2443_v31 = vadd.f32 %v2442_v19, %v7397_v15  ;;  %v3077_v14 = vld [vmem:[#allocation2 + $0x10] sm:$0xff] }
 0x5f3   :  { %v2374_v23 = vadd.f32 %v2373_v21, %v7386_v50  ;;  %v2445_v28 = vadd.f32 %v2444_v22, %v7392_v59  ;;  %v3081_v19 = vld [vmem:[#allocation2 + $0x30] sm:$0xff]  ;;  %v6244_v21 = vpack.c.bf16 %v3079_v8, %v3075_v7  ;;  %v3086_v22 = vld [vmem:[#allocation2 + $0x58] sm:$0xff] }
 0x5f4   :  { %v4913_v25 = vmul.f32 -1.442695, %v2372_v20  ;;  %v3113_v7 = vld [vmem:[#allocation2 + $0x130] sm:$0xff] }
 0x5f5   :  { %v4914_v27 = vmul.f32 -1.442695, %v2374_v23  ;;  %v4915_v29 = vmul.f32 -1.442695, %v2445_v28  ;;  %v3090_v23 = vld [vmem:[#allocation2 + $0x78] sm:$0xff]  ;;  %v3083_v28 = vld [vmem:[#allocation2 + $0x40] sm:$0xff] }
 0x5f6   :  { %7126 = vpow2.f32 %v4913_v25 }
 0x5f7   :  { %7128 = vpow2.f32 %v4914_v27  ;;  %v6246_v27 = vpack.c.bf16 %v3088_v11, %v3084_v10  ;;  %v3122_v10 = vld [vmem:[#allocation2 + $0x178] sm:$0xff] }
 0x5f8   :  { %7130 = vpow2.f32 %v4915_v29  ;;  %v3087_v29 = vld [vmem:[#allocation2 + $0x60] sm:$0xff] }
 0x5f9   :  { %7132 = vtanh.f32 %v2443_v31  ;;  %v3092_v31 = vld [vmem:[#allocation2 + $0x88] sm:$0xff] }
 0x600   :  { %v7127_v32 = vpop.eup %7126 }
 0x601   :  { %v7129_v33 = vpop.eup %7128  ;;  %v2450_v34 = vadd.f32 1.0, %v7127_v32  ;;  %v3096_v32 = vld [vmem:[#allocation2 + $0xa8] sm:$0xff] }
 0x602   :  { %v2456_v35 = vadd.f32 1.0, %v7129_v33  ;;  %v7131_v36 = vpop.eup %7130  ;;  %v6308_v33 = vpack.c.bf16 %v3081_v19, %v3077_v14  ;;  %v3115_v14 = vld [vmem:[#allocation2 + $0x140] sm:$0xff] }
 0x603   :  { %7134 = vrcp.f32 %v2450_v34  ;;  %v7133_v37 = vpop.eup %7132  ;;  %v2463_v42 = vadd.f32 1.0, %v7131_v36  ;;  %v6310_v34 = vpack.c.bf16 %v3090_v23, %v3086_v22  ;;  %v3089_v36 = vld [vmem:[#allocation2 + $0x70] sm:$0xff]  ;;  %v3119_v19 = vld [vmem:[#allocation2 + $0x160] sm:$0xff] }
 0x604   :  { %7136 = vrcp.f32 %v2456_v35  ;;  %v3085_v35 = vld [vmem:[#allocation2 + $0x50] sm:$0xff] }
 0x605   :  { %7138 = vrcp.f32 %v2463_v42  ;;  %v3095_v42 = vld [vmem:[#allocation2 + $0xa0] sm:$0xff] }
 0x60d   :  { %v7135_v38 = vpop.eup %7134 }
 0x60e   :  { %v7137_v39 = vpop.eup %7136  ;;  %v2467_v40 = vmul.f32 %v7135_v38, %v7133_v37  ;;  %v6248_v37 = vpack.c.bf16 %v3087_v29, %v3083_v28  ;;  %v3094_v38 = vld [vmem:[#allocation2 + $0x98] sm:$0xff]  ;;  %v6264_v28 = vpack.c.bf16 %v3119_v19, %v3115_v14 }
 0x60f   :  { %v2466_v43 = vmul.f32 %v7137_v39, %v4912_v41  ;;  %v7139_v45 = vpop.eup %7138  ;;  %v3098_v39 = vld [vmem:[#allocation2 + $0xb8] sm:$0xff]  ;;  %v3091_v41 = vld [vmem:[#allocation2 + $0x80] sm:$0xff] }
 0x610   :  { %v3126_v29 = vld [vmem:[#allocation2 + $0x198] sm:$0xff] }
 0x611   :  { %v2468_v44 = vadd.f32 %v2467_v40, %v2466_v43  ;;  %v6250_v40 = vpack.c.bf16 %v3096_v32, %v3092_v31  ;;  %v3100_v43 = vld [vmem:[#allocation2 + $0xc8] sm:$0xff]  ;;  %v3130_v31 = vld [vmem:[#allocation2 + $0x1b8] sm:$0xff] }
 0x612   :  { %v3158_v19 = vld [vmem:[#allocation2 + $0x298] sm:$0xff] }
 0x613   :  { %7140 = vtanh.f32 %v2468_v44  ;;  %4917 = vst [vmem:[%s7569_s4 + $0x8] sm:$0xff] %v2468_v44  ;;  %v3104_v44 = vld [vmem:[#allocation2 + $0xe8] sm:$0xff] }
 0x61d   :  { %v7141_v46 = vpop.eup %7140 }
 0x61e   :  { %v2470_v47 = vmul.f32 %v7141_v46, %v7139_v45  ;;  %v6312_v45 = vpack.c.bf16 %v3089_v36, %v3085_v35  ;;  %v6314_v46 = vpack.c.bf16 %v3098_v39, %v3094_v38  ;;  %v3132_v35 = vld [vmem:[#allocation2 + $0x1c8] sm:$0xff]  ;;  %v6330_v38 = vpack.c.bf16 %v3130_v31, %v3126_v29  ;;  %v3125_v39 = vld [vmem:[#allocation2 + $0x190] sm:$0xff] }
 0x61f   :  { %v3136_v36 = vld [vmem:[#allocation2 + $0x1e8] sm:$0xff]  ;;  %v3157_v31 = vld [vmem:[#allocation2 + $0x290] sm:$0xff] }
 0x620   :  { %2967 = vmatprep.mubr.f32.mxu0 %v2470_v47  ;;  %3038 = vmatprep.mubr.f32.mxu1 %v2470_v47  ;;  %v3093_v47 = vld [vmem:[#allocation2 + $0x90] sm:$0xff] }
 0x631   :  { %v2671_v48 = vpop.f32.mrb[16].mxu0 }
 0x632   :  { %v2672_v51 = vadd.f32 %v2671_v48, %v7351_v16  ;;  %v2673_v52 = vpop.f32.mrb[17].mxu0  ;;  %v3097_v48 = vld [vmem:[#allocation2 + $0xb0] sm:$0xff] }
 0x633   :  { %v2674_v53 = vadd.f32 %v2673_v52, %v7355_v17  ;;  %v2742_v54 = vpop.f32.mrb[16].mxu1  ;;  %v3102_v52 = vld [vmem:[#allocation2 + $0xd8] sm:$0xff] }
 0x634   :  { %v4919_v55 = vmul.f32 -1.442695, %v2672_v51  ;;  %v2744_v56 = vpop.f32.mrb[17].mxu1  ;;  %v2743_v0 = vadd.f32 %v2742_v54, %v7368_v30  ;;  %v6252_v51 = vpack.c.bf16 %v3095_v42, %v3091_v41  ;;  %v6254_v54 = vpack.c.bf16 %v3104_v44, %v3100_v43  ;;  %v3134_v42 = vld [vmem:[#allocation2 + $0x1d8] sm:$0xff] }
 0x635   :  { %v4920_v57 = vmul.f32 -1.442695, %v2674_v53  ;;  %v2745_v58 = vadd.f32 %v2744_v56, %v7362_v24  ;;  %v3106_v53 = vld [vmem:[#allocation2 + $0xf8] sm:$0xff]  ;;  %v3103_v56 = vld [vmem:[#allocation2 + $0xe0] sm:$0xff]  ;;  %v6270_v44 = vpack.c.bf16 %v3136_v36, %v3132_v35 }
 0x636   :  { %7142 = vpow2.f32 %v4919_v55  ;;  %v3099_v55 = vld [vmem:[#allocation2 + $0xc0] sm:$0xff]  ;;  %v3138_v43 = vld [vmem:[#allocation2 + $0x1f8] sm:$0xff] }
 0x637   :  { %7144 = vpow2.f32 %v4920_v57  ;;  %v4921_v13 = vmul.f32 -1.442695, %v2745_v58  ;;  %v3108_v57 = vld [vmem:[#allocation2 + $0x108] sm:$0xff]  ;;  %v3170_v35 = vld [vmem:[#allocation2 + $0x2f8] sm:$0xff] }
 0x638   :  { %v3112_v58 = vld [vmem:[#allocation2 + $0x128] sm:$0xff] }
 0x639   :  { %7146 = vpow2.f32 %v4921_v13  ;;  %v6316_v13 = vpack.c.bf16 %v3097_v48, %v3093_v47  ;;  %v3140_v47 = vld [vmem:[#allocation2 + $0x208] sm:$0xff] }
 0x63a   :  { %7148 = vtanh.f32 %v2743_v0  ;;  %v6318_v0 = vpack.c.bf16 %v3106_v53, %v3102_v52  ;;  %v3144_v48 = vld [vmem:[#allocation2 + $0x228] sm:$0xff]  ;;  %v6334_v52 = vpack.c.bf16 %v3138_v43, %v3134_v42  ;;  %v3133_v53 = vld [vmem:[#allocation2 + $0x1d0] sm:$0xff] }
 0x63b   :  { %v3165_v43 = vld [vmem:[#allocation2 + $0x2d0] sm:$0xff] }
 0x640   :  { %v7143_v60 = vpop.eup %7142 }
 0x641   :  { %v7145_v61 = vpop.eup %7144  ;;  %v2750_v62 = vadd.f32 1.0, %v7143_v60  ;;  %v3101_v60 = vld [vmem:[#allocation2 + $0xd0] sm:$0xff] }
 0x642   :  { %v2756_v63 = vadd.f32 1.0, %v7145_v61  ;;  %v3105_v61 = vld [vmem:[#allocation2 + $0xf0] sm:$0xff] }
 0x643   :  { %7150 = vrcp.f32 %v2750_v62  ;;  %v7147_v1 = vpop.eup %7146  ;;  %v6256_v62 = vpack.c.bf16 %v3103_v56, %v3099_v55  ;;  %v3142_v56 = vld [vmem:[#allocation2 + $0x218] sm:$0xff] }
 0x644   :  { %7152 = vrcp.f32 %v2756_v63  ;;  %v7149_v18 = vpop.eup %7148  ;;  %v2763_v3 = vadd.f32 1.0, %v7147_v1  ;;  %v3110_v63 = vld [vmem:[#allocation2 + $0x118] sm:$0xff] }
 0x645   :  { %v3114_v1 = vld [vmem:[#allocation2 + $0x138] sm:$0xff] }
 0x646   :  { %7154 = vrcp.f32 %v2763_v3  ;;  %v3111_v3 = vld [vmem:[#allocation2 + $0x120] sm:$0xff] }
 0x64d   :  { %v7151_v2 = vpop.eup %7150 }
 0x64e   :  { %v7153_v4 = vpop.eup %7152  ;;  %v2767_v6 = vmul.f32 %v7151_v2, %v7149_v18  ;;  %v6258_v18 = vpack.c.bf16 %v3112_v58, %v3108_v57  ;;  %v3107_v2 = vld [vmem:[#allocation2 + $0x100] sm:$0xff]  ;;  %v3146_v57 = vld [vmem:[#allocation2 + $0x238] sm:$0xff]  ;;  %v6274_v58 = vpack.c.bf16 %v3144_v48, %v3140_v47 }
 0x64f   :  { %v2766_v12 = vmul.f32 %v7153_v4, %v2476_v5  ;;  %v3116_v4 = vld [vmem:[#allocation2 + $0x148] sm:$0xff]  ;;  %v6260_v8 = vpack.c.bf16 %v3111_v3, %v3107_v2  ;;  %v3150_v3 = vld [vmem:[#allocation2 + $0x258] sm:$0xff] }
 0x650   :  { %v7155_v9 = vpop.eup %7154  ;;  %v3120_v5 = vld [vmem:[#allocation2 + $0x168] sm:$0xff]  ;;  %v3178_v47 = vld [vmem:[#allocation2 + $0x338] sm:$0xff] }
 0x651   :  { %v2768_v26 = vadd.f32 %v2767_v6, %v2766_v12  ;;  %v6320_v6 = vpack.c.bf16 %v3105_v61, %v3101_v60  ;;  %v6322_v12 = vpack.c.bf16 %v3114_v1, %v3110_v63  ;;  %v6262_v11 = vpack.c.bf16 %v3120_v5, %v3116_v4  ;;  %v3148_v60 = vld [vmem:[#allocation2 + $0x248] sm:$0xff]  ;;  %v3141_v1 = vld [vmem:[#allocation2 + $0x210] sm:$0xff]  ;;  %v3154_v4 = vld [vmem:[#allocation2 + $0x278] sm:$0xff] }
 0x652   :  { %v3152_v61 = vld [vmem:[#allocation2 + $0x268] sm:$0xff]  ;;  %v6338_v63 = vpack.c.bf16 %v3146_v57, %v3142_v56  ;;  %v3173_v57 = vld [vmem:[#allocation2 + $0x310] sm:$0xff] }
 0x653   :  { %7156 = vtanh.f32 %v2768_v26  ;;  %2772 = vst [vmem:[%s7569_s4] sm:$0xff] %v2768_v26  ;;  %v3109_v26 = vld [vmem:[#allocation2 + $0x110] sm:$0xff]  ;;  %v6278_v5 = vpack.c.bf16 %v3152_v61, %v3148_v60  ;;  %v3186_v60 = vld [vmem:[#allocation2 + $0x378] sm:$0xff] }
 0x654   :  { %v6324_v22 = vpack.c.bf16 %v3113_v7, %v3109_v26  ;;  %v3156_v26 = vld [vmem:[#allocation2 + $0x288] sm:$0xff] }
 0x655   :  { %v3160_v7 = vld [vmem:[#allocation2 + $0x2a8] sm:$0xff] }
 0x65d   :  { %v7157_v20 = vpop.eup %7156 }
 0x65e   :  { %v2770_v25 = vmul.f32 %v7157_v20, %v7155_v9  ;;  %v3118_v9 = vld [vmem:[#allocation2 + $0x158] sm:$0xff]  ;;  %v3124_v20 = vld [vmem:[#allocation2 + $0x188] sm:$0xff] }
 0x65f   :  { %v6326_v23 = vpack.c.bf16 %v3122_v10, %v3118_v9  ;;  %v6342_v9 = vpack.c.bf16 %v3154_v4, %v3150_v3  ;;  %v3149_v10 = vld [vmem:[#allocation2 + $0x250] sm:$0xff] }
 0x660   :  { %2968 = vmatmul.mubr.f32.vlgmr.msra.gmra.mrb[18].mxu0 %v2770_v25  ;;  %3039 = vmatmul.mubr.f32.vlgmr.msra.gmra.mrb[18].mxu1 %v2770_v25  ;;  %v3181_v4 = vld [vmem:[#allocation2 + $0x350] sm:$0xff] }
 0x661   :  { %6245 = vmatpush1.bf16.msra.mxu0 %v6244_v21  ;;  %3267 = vmatprep.mubr.f32.mxu0 %v2770_v25  ;;  %v3128_v21 = vld [vmem:[#allocation2 + $0x1a8] sm:$0xff] }
 0x662   :  { %6247 = vmatprep.subr.bf16.mxu0 %v6246_v27  ;;  %3338 = vmatprep.mubr.f32.mxu1 %v2770_v25  ;;  %v3117_v25 = vld [vmem:[#allocation2 + $0x150] sm:$0xff]  ;;  %v6266_v32 = vpack.c.bf16 %v3128_v21, %v3124_v20  ;;  %v3162_v20 = vld [vmem:[#allocation2 + $0x2b8] sm:$0xff]  ;;  %v6282_v21 = vpack.c.bf16 %v3160_v7, %v3156_v26 }
 0x663   :  { %6309 = vmatpush1.bf16.msra.mxu1 %v6308_v33  ;;  %v3121_v27 = vld [vmem:[#allocation2 + $0x170] sm:$0xff]  ;;  %v3123_v33 = vld [vmem:[#allocation2 + $0x180] sm:$0xff]  ;;  %v6346_v29 = vpack.c.bf16 %v3162_v20, %v3158_v19  ;;  %v3194_v26 = vld [vmem:[#allocation2 + $0x3b8] sm:$0xff] }
 0x664   :  { %6311 = vmatprep.subr.bf16.mxu1 %v6310_v34  ;;  %v3127_v34 = vld [vmem:[#allocation2 + $0x1a0] sm:$0xff]  ;;  %v3189_v20 = vld [vmem:[#allocation2 + $0x390] sm:$0xff] }
 0x665   :  { %6249 = vmatpush1.bf16.msra.mxu0 %v6248_v37  ;;  %v6328_v37 = vpack.c.bf16 %v3121_v27, %v3117_v25  ;;  %v6268_v41 = vpack.c.bf16 %v3127_v34, %v3123_v33  ;;  %v3164_v25 = vld [vmem:[#allocation2 + $0x2c8] sm:$0xff]  ;;  %v3166_v34 = vld [vmem:[#allocation2 + $0x2d8] sm:$0xff] }
 0x666   :  { %6251 = vmatprep.subr.bf16.mxu0 %v6250_v40  ;;  %v3129_v40 = vld [vmem:[#allocation2 + $0x1b0] sm:$0xff]  ;;  %v3168_v27 = vld [vmem:[#allocation2 + $0x2e8] sm:$0xff]  ;;  %v6350_v42 = vpack.c.bf16 %v3170_v35, %v3166_v34 }
 0x667   :  { %6313 = vmatpush1.bf16.msra.mxu1 %v6312_v45  ;;  %v3131_v45 = vld [vmem:[#allocation2 + $0x1c0] sm:$0xff]  ;;  %v6286_v36 = vpack.c.bf16 %v3168_v27, %v3164_v25  ;;  %v3202_v25 = vld [vmem:[#allocation2 + $0x3f8] sm:$0xff]  ;;  %v3201_v34 = vld [vmem:[#allocation2 + $0x3f0] sm:$0xff] }
 0x668   :  { %6315 = vmatprep.subr.bf16.mxu1 %v6314_v46  ;;  %v3135_v46 = vld [vmem:[#allocation2 + $0x1e0] sm:$0xff] }
 0x669   :  { %6253 = vmatpush1.bf16.msra.mxu0 %v6252_v51  ;;  %v6332_v51 = vpack.c.bf16 %v3129_v40, %v3125_v39  ;;  %v6272_v55 = vpack.c.bf16 %v3135_v46, %v3131_v45  ;;  %v3172_v39 = vld [vmem:[#allocation2 + $0x308] sm:$0xff]  ;;  %v3174_v46 = vld [vmem:[#allocation2 + $0x318] sm:$0xff] }
 0x66a   :  { %6255 = vmatprep.subr.bf16.mxu0 %v6254_v54  ;;  %v3137_v54 = vld [vmem:[#allocation2 + $0x1f0] sm:$0xff]  ;;  %v3176_v40 = vld [vmem:[#allocation2 + $0x328] sm:$0xff]  ;;  %v6354_v56 = vpack.c.bf16 %v3178_v47, %v3174_v46 }
 0x66b   :  { %6317 = vmatpush1.bf16.msra.mxu1 %v6316_v13  ;;  %v3139_v13 = vld [vmem:[#allocation2 + $0x200] sm:$0xff]  ;;  %v6290_v48 = vpack.c.bf16 %v3176_v40, %v3172_v39  ;;  %v3378_v39 = vld [vmem:[#allocation2 + $0x428] sm:$0xff]  ;;  %v3375_v46 = vld [vmem:[#allocation2 + $0x410] sm:$0xff] }
 0x66c   :  { %6319 = vmatprep.subr.bf16.mxu1 %v6318_v0  ;;  %v3143_v0 = vld [vmem:[#allocation2 + $0x220] sm:$0xff]  ;;  %v3379_v47 = vld [vmem:[#allocation2 + $0x430] sm:$0xff] }
 0x66d   :  { %6257 = vmatpush1.bf16.msra.mxu0 %v6256_v62  ;;  %v6336_v62 = vpack.c.bf16 %v3137_v54, %v3133_v53  ;;  %v6276_v2 = vpack.c.bf16 %v3143_v0, %v3139_v13  ;;  %v3180_v53 = vld [vmem:[#allocation2 + $0x348] sm:$0xff]  ;;  %v3182_v0 = vld [vmem:[#allocation2 + $0x358] sm:$0xff] }
 0x66e   :  { %6259 = vmatprep.subr.bf16.mxu0 %v6258_v18  ;;  %v3145_v18 = vld [vmem:[#allocation2 + $0x230] sm:$0xff]  ;;  %v3184_v54 = vld [vmem:[#allocation2 + $0x368] sm:$0xff]  ;;  %v6358_v3 = vpack.c.bf16 %v3186_v60, %v3182_v0 }
 0x66f   :  { %6321 = vmatpush1.bf16.msra.mxu1 %v6320_v6  ;;  %v3147_v6 = vld [vmem:[#allocation2 + $0x240] sm:$0xff]  ;;  %v6294_v61 = vpack.c.bf16 %v3184_v54, %v3180_v53  ;;  %v3386_v53 = vld [vmem:[#allocation2 + $0x468] sm:$0xff]  ;;  %v3383_v60 = vld [vmem:[#allocation2 + $0x450] sm:$0xff] }
 0x670   :  { %6323 = vmatprep.subr.bf16.mxu1 %v6322_v12  ;;  %v3151_v12 = vld [vmem:[#allocation2 + $0x260] sm:$0xff] }
 0x671   :  { %6261 = vmatpush1.bf16.msra.mxu0 %v6260_v8  ;;  %v6340_v8 = vpack.c.bf16 %v3145_v18, %v3141_v1  ;;  %v6280_v14 = vpack.c.bf16 %v3151_v12, %v3147_v6  ;;  %v3188_v1 = vld [vmem:[#allocation2 + $0x388] sm:$0xff]  ;;  %v3190_v12 = vld [vmem:[#allocation2 + $0x398] sm:$0xff]  ;;  %v3381_v54 = vld [vmem:[#allocation2 + $0x440] sm:$0xff] }
 0x672   :  { %6263 = vmatprep.subr.bf16.mxu0 %v6262_v11  ;;  %v3153_v11 = vld [vmem:[#allocation2 + $0x270] sm:$0xff]  ;;  %v3192_v18 = vld [vmem:[#allocation2 + $0x3a8] sm:$0xff]  ;;  %v6362_v19 = vpack.c.bf16 %v3194_v26, %v3190_v12 }
 0x673   :  { %6325 = vmatpush1.bf16.msra.mxu1 %v6324_v22  ;;  %v3155_v22 = vld [vmem:[#allocation2 + $0x280] sm:$0xff]  ;;  %v6298_v7 = vpack.c.bf16 %v3192_v18, %v3188_v1  ;;  %v3394_v1 = vld [vmem:[#allocation2 + $0x4a8] sm:$0xff] }
 0x674   :  { %6327 = vmatprep.subr.bf16.mxu1 %v6326_v23  ;;  %v3159_v23 = vld [vmem:[#allocation2 + $0x2a0] sm:$0xff] }
 0x675   :  { %6265 = vmatpush1.bf16.msra.mxu0 %v6264_v28  ;;  %v6344_v28 = vpack.c.bf16 %v3153_v11, %v3149_v10  ;;  %v6284_v33 = vpack.c.bf16 %v3159_v23, %v3155_v22  ;;  %v3196_v10 = vld [vmem:[#allocation2 + $0x3c8] sm:$0xff]  ;;  %v3198_v23 = vld [vmem:[#allocation2 + $0x3d8] sm:$0xff]  ;;  %v3389_v18 = vld [vmem:[#allocation2 + $0x480] sm:$0xff] }
 0x676   :  { %6267 = vmatprep.subr.bf16.mxu0 %v6266_v32  ;;  %v3161_v32 = vld [vmem:[#allocation2 + $0x2b0] sm:$0xff]  ;;  %v3200_v11 = vld [vmem:[#allocation2 + $0x3e8] sm:$0xff] }
 0x677   :  { %6329 = vmatpush1.bf16.msra.mxu1 %v6328_v37  ;;  %v3163_v37 = vld [vmem:[#allocation2 + $0x2c0] sm:$0xff]  ;;  %v6302_v27 = vpack.c.bf16 %v3200_v11, %v3196_v10 }
 0x678   :  { %6331 = vmatprep.subr.bf16.mxu1 %v6330_v38  ;;  %v3167_v38 = vld [vmem:[#allocation2 + $0x2e0] sm:$0xff] }
 0x679   :  { %6269 = vmatpush1.bf16.msra.mxu0 %v6268_v41  ;;  %v6348_v41 = vpack.c.bf16 %v3161_v32, %v3157_v31  ;;  %v6288_v45 = vpack.c.bf16 %v3167_v38, %v3163_v37  ;;  %v6366_v32 = vpack.c.bf16 %v3202_v25, %v3198_v23  ;;  %v4929_v37 = vld [vmem:[%s7565_s0 + $0x28] sm:$0xff]  ;;  %v3397_v11 = vld [vmem:[#allocation2 + $0x4c0] sm:$0xff]  ;;  %v3403_v25 = vld [vmem:[#allocation2 + $0x4f0] sm:$0xff] }
 0x67a   :  { %6271 = vmatprep.subr.bf16.mxu0 %v6270_v44  ;;  %v3169_v44 = vld [vmem:[#allocation2 + $0x2f0] sm:$0xff]  ;;  %v3374_v38 = vld [vmem:[#allocation2 + $0x408] sm:$0xff] }
 0x67b   :  { %6333 = vmatpush1.bf16.msra.mxu1 %v6332_v51  ;;  %v3171_v51 = vld [vmem:[#allocation2 + $0x300] sm:$0xff]  ;;  %v6370_v40 = vpack.c.bf16 %v3378_v39, %v3374_v38  ;;  %v3407_v39 = vld [vmem:[#allocation2 + $0x510] sm:$0xff] }
 0x67c   :  { %6335 = vmatprep.subr.bf16.mxu1 %v6334_v52  ;;  %v3175_v52 = vld [vmem:[#allocation2 + $0x320] sm:$0xff] }
 0x67d   :  { %6273 = vmatpush1.bf16.msra.mxu0 %v6272_v55  ;;  %v6352_v55 = vpack.c.bf16 %v3169_v44, %v3165_v43  ;;  %v6292_v13 = vpack.c.bf16 %v3175_v52, %v3171_v51  ;;  %v3376_v43 = vld [vmem:[#allocation2 + $0x418] sm:$0xff]  ;;  %v6436_v51 = vpack.c.bf16 %v3379_v47, %v3375_v46  ;;  %v3382_v52 = vld [vmem:[#allocation2 + $0x448] sm:$0xff]  ;;  %v3417_v46 = vld [vmem:[#allocation2 + $0x560] sm:$0xff] }
 0x67e   :  { %6275 = vmatprep.subr.bf16.mxu0 %v6274_v58  ;;  %v3177_v58 = vld [vmem:[#allocation2 + $0x330] sm:$0xff]  ;;  %v3416_v47 = vld [vmem:[#allocation2 + $0x558] sm:$0xff] }
 0x67f   :  { %6337 = vmatpush1.bf16.msra.mxu1 %v6336_v62  ;;  %v3179_v62 = vld [vmem:[#allocation2 + $0x340] sm:$0xff] }
 0x680   :  { %6339 = vmatprep.subr.bf16.mxu1 %v6338_v63  ;;  %v3183_v63 = vld [vmem:[#allocation2 + $0x360] sm:$0xff] }
 0x681   :  { %6277 = vmatpush1.bf16.msra.mxu0 %v6276_v2  ;;  %v6356_v2 = vpack.c.bf16 %v3177_v58, %v3173_v57  ;;  %v6296_v6 = vpack.c.bf16 %v3183_v63, %v3179_v62  ;;  %v3384_v57 = vld [vmem:[#allocation2 + $0x458] sm:$0xff]  ;;  %v3390_v62 = vld [vmem:[#allocation2 + $0x488] sm:$0xff] }
 0x682   :  { %6279 = vmatprep.subr.bf16.mxu0 %v6278_v5  ;;  %v3185_v5 = vld [vmem:[#allocation2 + $0x370] sm:$0xff]  ;;  %v3388_v58 = vld [vmem:[#allocation2 + $0x478] sm:$0xff] }
 0x683   :  { %6341 = vmatpush1.bf16.msra.mxu1 %v6340_v8  ;;  %v3187_v8 = vld [vmem:[#allocation2 + $0x380] sm:$0xff]  ;;  %v6438_v0 = vpack.c.bf16 %v3388_v58, %v3384_v57  ;;  %v3426_v57 = vld [vmem:[#allocation2 + $0x5a8] sm:$0xff] }
 0x684   :  { %6343 = vmatprep.subr.bf16.mxu1 %v6342_v9  ;;  %v3191_v9 = vld [vmem:[#allocation2 + $0x3a0] sm:$0xff] }
 0x685   :  { %6281 = vmatpush1.bf16.msra.mxu0 %v6280_v14  ;;  %v6360_v14 = vpack.c.bf16 %v3185_v5, %v3181_v4  ;;  %v6300_v22 = vpack.c.bf16 %v3191_v9, %v3187_v8  ;;  %v3392_v4 = vld [vmem:[#allocation2 + $0x498] sm:$0xff]  ;;  %v3398_v8 = vld [vmem:[#allocation2 + $0x4c8] sm:$0xff] }
 0x686   :  { %6283 = vmatprep.subr.bf16.mxu0 %v6282_v21  ;;  %v3193_v21 = vld [vmem:[#allocation2 + $0x3b0] sm:$0xff]  ;;  %v3396_v5 = vld [vmem:[#allocation2 + $0x4b8] sm:$0xff]  ;;  %v3402_v9 = vld [vmem:[#allocation2 + $0x4e8] sm:$0xff] }
 0x687   :  { %6345 = vmatpush1.bf16.msra.mxu1 %v6344_v28  ;;  %v3195_v28 = vld [vmem:[#allocation2 + $0x3c0] sm:$0xff]  ;;  %v6364_v31 = vpack.c.bf16 %v3193_v21, %v3189_v20  ;;  %v6442_v26 = vpack.c.bf16 %v3396_v5, %v3392_v4  ;;  %v6382_v10 = vpack.c.bf16 %v3402_v9, %v3398_v8  ;;  %v3404_v21 = vld [vmem:[#allocation2 + $0x4f8] sm:$0xff]  ;;  %v3434_v4 = vld [vmem:[#allocation2 + $0x5e8] sm:$0xff] }
 0x688   :  { %6347 = vmatprep.subr.bf16.mxu1 %v6346_v29  ;;  %v3199_v29 = vld [vmem:[#allocation2 + $0x3e0] sm:$0xff]  ;;  %v3436_v8 = vld [vmem:[#allocation2 + $0x5f8] sm:$0xff]  ;;  %v3431_v9 = vld [vmem:[#allocation2 + $0x5d0] sm:$0xff] }
 0x689   :  { %6285 = vmatpush1.bf16.msra.mxu0 %v6284_v33  ;;  %v3197_v33 = vld [vmem:[#allocation2 + $0x3d0] sm:$0xff]  ;;  %v6304_v35 = vpack.c.bf16 %v3199_v29, %v3195_v28  ;;  %v3410_v28 = vld [vmem:[#allocation2 + $0x528] sm:$0xff] }
 0x68a   :  { %6287 = vmatprep.subr.bf16.mxu0 %v6286_v36  ;;  %v6368_v36 = vpack.c.bf16 %v3201_v34, %v3197_v33  ;;  %v3405_v34 = vld [vmem:[#allocation2 + $0x500] sm:$0xff] }
 0x68b   :  { %6349 = vmatpush1.bf16.msra.mxu1 %v6348_v41  ;;  %v3373_v41 = vld [vmem:[#allocation2 + $0x400] sm:$0xff] }
 0x68c   :  { %6351 = vmatprep.subr.bf16.mxu1 %v6350_v42  ;;  %v3377_v42 = vld [vmem:[#allocation2 + $0x420] sm:$0xff] }
 0x68d   :  { %6289 = vmatpush1.bf16.msra.mxu0 %v6288_v45  ;;  %v6372_v44 = vpack.c.bf16 %v3377_v42, %v3373_v41  ;;  %v3380_v45 = vld [vmem:[#allocation2 + $0x438] sm:$0xff]  ;;  %v3414_v42 = vld [vmem:[#allocation2 + $0x548] sm:$0xff] }
 0x68e   :  { %6291 = vmatprep.subr.bf16.mxu0 %v6290_v48  ;;  %v6434_v48 = vpack.c.bf16 %v3380_v45, %v3376_v43  ;;  %v3418_v43 = vld [vmem:[#allocation2 + $0x568] sm:$0xff]  ;;  %v3413_v45 = vld [vmem:[#allocation2 + $0x540] sm:$0xff] }
 0x68f   :  { %6353 = vmatpush1.bf16.msra.mxu1 %v6352_v55  ;;  %v6374_v55 = vpack.c.bf16 %v3386_v53, %v3382_v52  ;;  %v3415_v52 = vld [vmem:[#allocation2 + $0x550] sm:$0xff] }
 0x690   :  { %6355 = vmatprep.subr.bf16.mxu1 %v6354_v56  ;;  %v3385_v56 = vld [vmem:[#allocation2 + $0x460] sm:$0xff]  ;;  %v3419_v53 = vld [vmem:[#allocation2 + $0x570] sm:$0xff] }
 0x691   :  { %6293 = vmatpush1.bf16.msra.mxu0 %v6292_v13  ;;  %v6376_v13 = vpack.c.bf16 %v3385_v56, %v3381_v54  ;;  %v3422_v56 = vld [vmem:[#allocation2 + $0x588] sm:$0xff] }
 0x692   :  { %6295 = vmatprep.subr.bf16.mxu0 %v6294_v61  ;;  %v3387_v61 = vld [vmem:[#allocation2 + $0x470] sm:$0xff]  ;;  %v6394_v58 = vpack.c.bf16 %v3426_v57, %v3422_v56 }
 0x693   :  { %6357 = vmatpush1.bf16.msra.mxu1 %v6356_v2  ;;  %v6440_v63 = vpack.c.bf16 %v3387_v61, %v3383_v60  ;;  %v3393_v2 = vld [vmem:[#allocation2 + $0x4a0] sm:$0xff]  ;;  %v3424_v60 = vld [vmem:[#allocation2 + $0x598] sm:$0xff]  ;;  %v3455_v56 = vld [vmem:[#allocation2 + $0x690] sm:$0xff] }
 0x694   :  { %6359 = vmatprep.subr.bf16.mxu1 %v6358_v3  ;;  %v6378_v3 = vpack.c.bf16 %v3394_v1, %v3390_v62  ;;  %v6380_v12 = vpack.c.bf16 %v3393_v2, %v3389_v18  ;;  %v3428_v62 = vld [vmem:[#allocation2 + $0x5b8] sm:$0xff]  ;;  %v3427_v1 = vld [vmem:[#allocation2 + $0x5b0] sm:$0xff] }
 0x695   :  { %6297 = vmatpush1.bf16.msra.mxu0 %v6296_v6  ;;  %v3391_v6 = vld [vmem:[#allocation2 + $0x490] sm:$0xff]  ;;  %v6458_v18 = vpack.c.bf16 %v3428_v62, %v3424_v60  ;;  %v3466_v60 = vld [vmem:[#allocation2 + $0x6e8] sm:$0xff]  ;;  %v3461_v62 = vld [vmem:[#allocation2 + $0x6c0] sm:$0xff] }
 0x696   :  { %6299 = vmatprep.subr.bf16.mxu0 %v6298_v7  ;;  %v3395_v7 = vld [vmem:[#allocation2 + $0x4b0] sm:$0xff] }
 0x697   :  { %6361 = vmatpush1.bf16.msra.mxu1 %v6360_v14  ;;  %v3401_v14 = vld [vmem:[#allocation2 + $0x4e0] sm:$0xff]  ;;  %v6444_v20 = vpack.c.bf16 %v3395_v7, %v3391_v6  ;;  %v3459_v57 = vld [vmem:[#allocation2 + $0x6b0] sm:$0xff] }
 0x698   :  { %6363 = vmatprep.subr.bf16.mxu1 %v6362_v19  ;;  %v3400_v19 = vld [vmem:[#allocation2 + $0x4d8] sm:$0xff]  ;;  %v6384_v29 = vpack.c.bf16 %v3401_v14, %v3397_v11  ;;  %v3429_v6 = vld [vmem:[#allocation2 + $0x5c0] sm:$0xff] }
 0x699   :  { %6301 = vmatpush1.bf16.msra.mxu0 %v6300_v22  ;;  %v3399_v22 = vld [vmem:[#allocation2 + $0x4d0] sm:$0xff]  ;;  %v6446_v23 = vpack.c.bf16 %v3404_v21, %v3400_v19  ;;  %v3438_v19 = vld [vmem:[#allocation2 + $0x608] sm:$0xff] }
 0x69a   :  { %6303 = vmatprep.subr.bf16.mxu0 %v6302_v27  ;;  %v3406_v27 = vld [vmem:[#allocation2 + $0x508] sm:$0xff] }
 0x69b   :  { %6365 = vmatpush1.bf16.msra.mxu1 %v6364_v31  ;;  %v3408_v31 = vld [vmem:[#allocation2 + $0x518] sm:$0xff]  ;;  %v6386_v33 = vpack.c.bf16 %v3410_v28, %v3406_v27 }
 0x69c   :  { %6367 = vmatprep.subr.bf16.mxu1 %v6366_v32  ;;  %v3412_v32 = vld [vmem:[#allocation2 + $0x538] sm:$0xff] }
 0x69d   :  { %6305 = vmatpush1.bf16.msra.mxu0 %v6304_v35  ;;  %v3409_v35 = vld [vmem:[#allocation2 + $0x520] sm:$0xff]  ;;  %v3444_v28 = vld [vmem:[#allocation2 + $0x638] sm:$0xff] }
 0x69e   :  { %6371 = vmatprep.subr.bf16.mxu0 %v6370_v40  ;;  %v6388_v38 = vpack.c.bf16 %v3409_v35, %v3405_v34  ;;  %v3411_v40 = vld [vmem:[#allocation2 + $0x530] sm:$0xff]  ;;  %v3446_v34 = vld [vmem:[#allocation2 + $0x648] sm:$0xff] }
 0x69f   :  { %6369 = vmatpush1.bf16.msra.mxu1 %v6368_v36  ;;  %v6448_v36 = vpack.c.bf16 %v3403_v25, %v3399_v22  ;;  %v6452_v41 = vpack.c.bf16 %v3411_v40, %v3407_v39  ;;  %v3437_v22 = vld [vmem:[#allocation2 + $0x600] sm:$0xff]  ;;  %v3440_v25 = vld [vmem:[#allocation2 + $0x618] sm:$0xff]  ;;  %v3450_v35 = vld [vmem:[#allocation2 + $0x668] sm:$0xff] }
 0x6a0   :  { %3268 = vmatmul.mubr.f32.vlgmr.msra.gmra.mrb[20].mxu0 %v4929_v37  ;;  %6435 = vmatprep.subr.bf16.mxu1 %v6434_v48  ;;  %v6392_v48 = vpack.c.bf16 %v3417_v46, %v3413_v45  ;;  %v3448_v39 = vld [vmem:[#allocation2 + $0x658] sm:$0xff]  ;;  %v3454_v46 = vld [vmem:[#allocation2 + $0x688] sm:$0xff] }
 0x6a1   :  { %6373 = vmatpush1.bf16.msra.mxu0 %v6372_v44  ;;  %v6390_v44 = vpack.c.bf16 %v3418_v43, %v3414_v42  ;;  %v3447_v42 = vld [vmem:[#allocation2 + $0x650] sm:$0xff] }
 0x6a2   :  { %3339 = vmatmul.mubr.f32.vlgmr.msra.gmra.mrb[20].mxu1 %v4929_v37  ;;  %6375 = vmatprep.subr.bf16.mxu0 %v6374_v55  ;;  %v6450_v37 = vpack.c.bf16 %v3412_v32, %v3408_v31  ;;  %v6456_v55 = vpack.c.bf16 %v3419_v53, %v3415_v52  ;;  %v3443_v31 = vld [vmem:[#allocation2 + $0x630] sm:$0xff]  ;;  %v6466_v32 = vpack.c.bf16 %v3444_v28, %v3440_v25  ;;  %v3457_v52 = vld [vmem:[#allocation2 + $0x6a0] sm:$0xff]  ;;  %v3456_v53 = vld [vmem:[#allocation2 + $0x698] sm:$0xff] }
 0x6a3   :  { %6437 = vmatpush1.bf16.msra.mxu1 %v6436_v51  ;;  %v3420_v51 = vld [vmem:[#allocation2 + $0x578] sm:$0xff]  ;;  %v3451_v43 = vld [vmem:[#allocation2 + $0x670] sm:$0xff]  ;;  %v3482_v25 = vld [vmem:[#allocation2 + $0x768] sm:$0xff] }
 0x6a4   :  { %6439 = vmatprep.subr.bf16.mxu1 %v6438_v0  ;;  %v6454_v54 = vpack.c.bf16 %v3420_v51, %v3416_v47  ;;  %v3425_v0 = vld [vmem:[#allocation2 + $0x5a0] sm:$0xff]  ;;  %v6472_v45 = vpack.c.bf16 %v3451_v43, %v3447_v42  ;;  %v3458_v47 = vld [vmem:[#allocation2 + $0x6a8] sm:$0xff]  ;;  %v3488_v43 = vld [vmem:[#allocation2 + $0x798] sm:$0xff] }
 0x6a5   :  { %6377 = vmatpush1.bf16.msra.mxu0 %v6376_v13  ;;  %v3421_v13 = vld [vmem:[#allocation2 + $0x580] sm:$0xff] }
 0x6a6   :  { %6379 = vmatprep.subr.bf16.mxu0 %v6378_v3  ;;  %v6396_v61 = vpack.c.bf16 %v3425_v0, %v3421_v13  ;;  %v3430_v3 = vld [vmem:[#allocation2 + $0x5c8] sm:$0xff]  ;;  %v3453_v51 = vld [vmem:[#allocation2 + $0x680] sm:$0xff]  ;;  %v6476_v13 = vpack.c.bf16 %v3459_v57, %v3455_v56  ;;  %v3496_v57 = vld [vmem:[#allocation2 + $0x7d8] sm:$0xff] }
 0x6a7   :  { %6441 = vmatpush1.bf16.msra.mxu1 %v6440_v63  ;;  %v3423_v63 = vld [vmem:[#allocation2 + $0x590] sm:$0xff]  ;;  %v6398_v5 = vpack.c.bf16 %v3434_v4, %v3430_v3  ;;  %v3462_v0 = vld [vmem:[#allocation2 + $0x6c8] sm:$0xff]  ;;  %v3477_v28 = vld [vmem:[#allocation2 + $0x740] sm:$0xff] }
 0x6a8   :  { %6443 = vmatprep.subr.bf16.mxu1 %v6442_v26  ;;  %v6460_v2 = vpack.c.bf16 %v3427_v1, %v3423_v63  ;;  %v3432_v26 = vld [vmem:[#allocation2 + $0x5d8] sm:$0xff]  ;;  %v3465_v63 = vld [vmem:[#allocation2 + $0x6e0] sm:$0xff]  ;;  %v3463_v3 = vld [vmem:[#allocation2 + $0x6d0] sm:$0xff] }
 0x6a9   :  { %6381 = vmatpush1.bf16.msra.mxu0 %v6380_v12  ;;  %v3433_v12 = vld [vmem:[#allocation2 + $0x5e0] sm:$0xff]  ;;  %v6462_v11 = vpack.c.bf16 %v3436_v8, %v3432_v26  ;;  %v3464_v1 = vld [vmem:[#allocation2 + $0x6d8] sm:$0xff]  ;;  %v3467_v4 = vld [vmem:[#allocation2 + $0x6f0] sm:$0xff] }
 0x6aa   :  { %6383 = vmatprep.subr.bf16.mxu0 %v6382_v10  ;;  %v6400_v7 = vpack.c.bf16 %v3433_v12, %v3429_v6  ;;  %v3435_v10 = vld [vmem:[#allocation2 + $0x5f0] sm:$0xff]  ;;  %v6480_v6 = vpack.c.bf16 %v3467_v4, %v3463_v3  ;;  %v3470_v12 = vld [vmem:[#allocation2 + $0x708] sm:$0xff]  ;;  %v3469_v8 = vld [vmem:[#allocation2 + $0x700] sm:$0xff] }
 0x6ab   :  { %6445 = vmatpush1.bf16.msra.mxu1 %v6444_v20  ;;  %v6464_v14 = vpack.c.bf16 %v3435_v10, %v3431_v9  ;;  %v3442_v20 = vld [vmem:[#allocation2 + $0x628] sm:$0xff]  ;;  %v3473_v9 = vld [vmem:[#allocation2 + $0x720] sm:$0xff]  ;;  %v3472_v10 = vld [vmem:[#allocation2 + $0x718] sm:$0xff] }
 0x6ac   :  { %6447 = vmatprep.subr.bf16.mxu1 %v6446_v23  ;;  %v6402_v21 = vpack.c.bf16 %v3442_v20, %v3438_v19  ;;  %v3441_v23 = vld [vmem:[#allocation2 + $0x620] sm:$0xff]  ;;  %v3474_v26 = vld [vmem:[#allocation2 + $0x728] sm:$0xff]  ;;  %v3471_v19 = vld [vmem:[#allocation2 + $0x710] sm:$0xff] }
 0x6ad   :  { %6385 = vmatpush1.bf16.msra.mxu0 %v6384_v29  ;;  %v6404_v27 = vpack.c.bf16 %v3441_v23, %v3437_v22  ;;  %v3439_v29 = vld [vmem:[#allocation2 + $0x610] sm:$0xff]  ;;  %v3478_v23 = vld [vmem:[#allocation2 + $0x748] sm:$0xff]  ;;  %v3489_v42 = vld [vmem:[#allocation2 + $0x7a0] sm:$0xff] }
 0x6ae   :  { %6387 = vmatprep.subr.bf16.mxu0 %v6386_v33  ;;  %v6468_v33 = vpack.c.bf16 %v3443_v31, %v3439_v29  ;;  %v3475_v20 = vld [vmem:[#allocation2 + $0x730] sm:$0xff]  ;;  %v3481_v29 = vld [vmem:[#allocation2 + $0x760] sm:$0xff]  ;;  %v3480_v31 = vld [vmem:[#allocation2 + $0x758] sm:$0xff] }
 0x6af   :  { %6449 = vmatpush1.bf16.msra.mxu1 %v6448_v36  ;;  %v6406_v36 = vpack.c.bf16 %v3450_v35, %v3446_v34  ;;  %v6484_v22 = vpack.c.bf16 %v3475_v20, %v3471_v19  ;;  %v3479_v34 = vld [vmem:[#allocation2 + $0x750] sm:$0xff]  ;;  %v3680_v3 = vld [vmem:[#allocation2 + $0x38] sm:$0xff] }
 0x6b0   :  { %6451 = vmatprep.subr.bf16.mxu1 %v6450_v37  ;;  %v3445_v37 = vld [vmem:[#allocation2 + $0x640] sm:$0xff]  ;;  %v3483_v35 = vld [vmem:[#allocation2 + $0x770] sm:$0xff] }
 0x6b1   :  { %6389 = vmatpush1.bf16.msra.mxu0 %v6388_v38  ;;  %v3449_v38 = vld [vmem:[#allocation2 + $0x660] sm:$0xff] }
 0x6b2   :  { %6391 = vmatprep.subr.bf16.mxu0 %v6390_v44  ;;  %v6408_v40 = vpack.c.bf16 %v3449_v38, %v3445_v37  ;;  %v6488_v37 = vpack.c.bf16 %v3483_v35, %v3479_v34  ;;  %v3486_v38 = vld [vmem:[#allocation2 + $0x788] sm:$0xff] }
 0x6b3   :  { %6453 = vmatpush1.bf16.msra.mxu1 %v6452_v41  ;;  %v3452_v41 = vld [vmem:[#allocation2 + $0x678] sm:$0xff] }
 0x6b4   :  { %6455 = vmatprep.subr.bf16.mxu1 %v6454_v54  ;;  %v6470_v44 = vpack.c.bf16 %v3452_v41, %v3448_v39  ;;  %v6412_v54 = vpack.c.bf16 %v3457_v52, %v3453_v51  ;;  %v3490_v39 = vld [vmem:[#allocation2 + $0x7a8] sm:$0xff] }
 0x6b5   :  { %6393 = vmatpush1.bf16.msra.mxu0 %v6392_v48  ;;  %v6410_v48 = vpack.c.bf16 %v3458_v47, %v3454_v46  ;;  %v6426_v41 = vpack.c.bf16 %v3490_v39, %v3486_v38  ;;  %v3487_v47 = vld [vmem:[#allocation2 + $0x790] sm:$0xff]  ;;  %v3494_v51 = vld [vmem:[#allocation2 + $0x7c8] sm:$0xff] }
 0x6b6   :  { %6395 = vmatprep.subr.bf16.mxu0 %v6394_v58 }
 0x6b7   :  { %6457 = vmatpush1.bf16.msra.mxu1 %v6456_v55  ;;  %v3460_v55 = vld [vmem:[#allocation2 + $0x6b8] sm:$0xff] }
 0x6b8   :  { %6459 = vmatprep.subr.bf16.mxu1 %v6458_v18  ;;  %v6474_v58 = vpack.c.bf16 %v3460_v55, %v3456_v53  ;;  %v6416_v18 = vpack.c.bf16 %v3465_v63, %v3461_v62  ;;  %v3498_v53 = vld [vmem:[#allocation2 + $0x7e8] sm:$0xff]  ;;  %v3497_v55 = vld [vmem:[#allocation2 + $0x7e0] sm:$0xff] }
 0x6b9   :  { %6397 = vmatpush1.bf16.msra.mxu0 %v6396_v61  ;;  %v6414_v61 = vpack.c.bf16 %v3466_v60, %v3462_v0  ;;  %v6430_v56 = vpack.c.bf16 %v3498_v53, %v3494_v51  ;;  %v3674_v62 = vld [vmem:[#allocation2 + $0x8] sm:$0xff] }
 0x6ba   :  { %6399 = vmatprep.subr.bf16.mxu0 %v6398_v5  ;;  %v3678_v63 = vld [vmem:[#allocation2 + $0x28] sm:$0xff] }
 0x6bb   :  { %6461 = vmatpush1.bf16.msra.mxu1 %v6460_v2  ;;  %v3468_v2 = vld [vmem:[#allocation2 + $0x6f8] sm:$0xff] }
 0x6bc   :  { %6463 = vmatprep.subr.bf16.mxu1 %v6462_v11  ;;  %v6478_v5 = vpack.c.bf16 %v3468_v2, %v3464_v1  ;;  %v6420_v11 = vpack.c.bf16 %v3473_v9, %v3469_v8  ;;  %v6498_v1 = vpack.c.bf16 %v3678_v63, %v3674_v62  ;;  %v3676_v2 = vld [vmem:[#allocation2 + $0x18] sm:$0xff] }
 0x6bd   :  { %6401 = vmatpush1.bf16.msra.mxu0 %v6400_v7  ;;  %v6418_v7 = vpack.c.bf16 %v3474_v26, %v3470_v12  ;;  %v6562_v4 = vpack.c.bf16 %v3680_v3, %v3676_v2  ;;  %v3682_v3 = vld [vmem:[#allocation2 + $0x48] sm:$0xff] }
 0x6be   :  { %6403 = vmatprep.subr.bf16.mxu0 %v6402_v21 }
 0x6bf   :  { %6465 = vmatpush1.bf16.msra.mxu1 %v6464_v14  ;;  %v3476_v14 = vld [vmem:[#allocation2 + $0x738] sm:$0xff] }
 0x6c0   :  { %6467 = vmatprep.subr.bf16.mxu1 %v6466_v32  ;;  %v6482_v21 = vpack.c.bf16 %v3476_v14, %v3472_v10  ;;  %v6424_v32 = vpack.c.bf16 %v3481_v29, %v3477_v28 }
 0x6c1   :  { %6405 = vmatpush1.bf16.msra.mxu0 %v6404_v27  ;;  %v6422_v27 = vpack.c.bf16 %v3482_v25, %v3478_v23 }
 0x6c2   :  { %6407 = vmatprep.subr.bf16.mxu0 %v6406_v36 }
 0x6c3   :  { %6469 = vmatpush1.bf16.msra.mxu1 %v6468_v33  ;;  %v3484_v33 = vld [vmem:[#allocation2 + $0x778] sm:$0xff] }
 0x6c4   :  { %6471 = vmatprep.subr.bf16.mxu1 %v6470_v44  ;;  %v6486_v36 = vpack.c.bf16 %v3484_v33, %v3480_v31  ;;  %v3492_v44 = vld [vmem:[#allocation2 + $0x7b8] sm:$0xff] }
 0x6c5   :  { %6409 = vmatpush1.bf16.msra.mxu0 %v6408_v40  ;;  %v3485_v40 = vld [vmem:[#allocation2 + $0x780] sm:$0xff]  ;;  %v6490_v46 = vpack.c.bf16 %v3492_v44, %v3488_v43 }
 0x6c6   :  { %6411 = vmatprep.subr.bf16.mxu0 %v6410_v48  ;;  %v3491_v48 = vld [vmem:[#allocation2 + $0x7b0] sm:$0xff] }
 0x6c7   :  { %6473 = vmatpush1.bf16.msra.mxu1 %v6472_v45  ;;  %v6428_v45 = vpack.c.bf16 %v3489_v42, %v3485_v40  ;;  %v6492_v52 = vpack.c.bf16 %v3491_v48, %v3487_v47 }
 0x6c8   :  { %6475 = vmatprep.subr.bf16.mxu1 %v6474_v58  ;;  %v3500_v58 = vld [vmem:[#allocation2 + $0x7f8] sm:$0xff] }
 0x6c9   :  { %6413 = vmatpush1.bf16.msra.mxu0 %v6412_v54  ;;  %v3493_v54 = vld [vmem:[#allocation2 + $0x7c0] sm:$0xff]  ;;  %v6494_v60 = vpack.c.bf16 %v3500_v58, %v3496_v57 }
 0x6ca   :  { %6415 = vmatprep.subr.bf16.mxu0 %v6414_v61  ;;  %v6432_v0 = vpack.c.bf16 %v3497_v55, %v3493_v54  ;;  %v3499_v61 = vld [vmem:[#allocation2 + $0x7f0] sm:$0xff] }
 0x6cb   :  { %6477 = vmatpush1.bf16.msra.mxu1 %v6476_v13  ;;  %v3495_v13 = vld [vmem:[#allocation2 + $0x7d0] sm:$0xff] }
 0x6cc   :  { %6479 = vmatprep.subr.bf16.mxu1 %v6478_v5 }
 0x6cd   :  { %6417 = vmatpush1.bf16.msra.mxu0 %v6416_v18  ;;  %v6496_v18 = vpack.c.bf16 %v3499_v61, %v3495_v13 }
 0x6ce   :  { %6419 = vmatprep.subr.bf16.mxu0 %v6418_v7 }
 0x6cf   :  { %6481 = vmatpush1.bf16.msra.mxu1 %v6480_v6 }
 0x6d0   :  { %6483 = vmatprep.subr.bf16.mxu1 %v6482_v21 }
 0x6d1   :  { %6421 = vmatpush1.bf16.msra.mxu0 %v6420_v11 }
 0x6d2   :  { %6423 = vmatprep.subr.bf16.mxu0 %v6422_v27 }
 0x6d3   :  { %6485 = vmatpush1.bf16.msra.mxu1 %v6484_v22 }
 0x6d4   :  { %6487 = vmatprep.subr.bf16.mxu1 %v6486_v36 }
 0x6d5   :  { %6425 = vmatpush1.bf16.msra.mxu0 %v6424_v32  ;;  %v4923_v32 = vld [vmem:[%s7569_s4 + $0x8] sm:$0xff] }
 0x6d6   :  { %6427 = vmatprep.subr.bf16.mxu0 %v6426_v41 }
 0x6d7   :  { %6489 = vmatpush1.bf16.msra.mxu1 %v6488_v37 }
 0x6d8   :  { %6491 = vmatprep.subr.bf16.mxu1 %v6490_v46 }
 0x6d9   :  { %6429 = vmatpush1.bf16.msra.mxu0 %v6428_v45 }
 0x6da   :  { %6431 = vmatprep.subr.bf16.mxu0 %v6430_v56 }
 0x6db   :  { %6493 = vmatpush1.bf16.msra.mxu1 %v6492_v52 }
 0x6dc   :  { %6495 = vmatprep.subr.bf16.mxu1 %v6494_v60  ;;  %v3074_v60 = vld [vmem:[%s7569_s4] sm:$0xff] }
 0x6dd   :  { %6433 = vmatpush1.bf16.msra.mxu0 %v6432_v0 }
 0x6de   :  { %6499 = vmatprep.subr.bf16.mxu0 %v6498_v1  ;;  %v3673_v1 = vld [vmem:[#allocation2] sm:$0xff] }
 0x6df   :  { %6497 = vmatpush1.bf16.msra.mxu1 %v6496_v18  ;;  %v3677_v18 = vld [vmem:[#allocation2 + $0x20] sm:$0xff] }
 0x6e0   :  { %6563 = vmatprep.subr.bf16.mxu1 %v6562_v4  ;;  %v3686_v4 = vld [vmem:[#allocation2 + $0x68] sm:$0xff] }
 0x733   :  { %v2969_v5 = vpop.f32.mrb[18].mxu0  ;;  %v3040_v6 = vpop.f32.mrb[18].mxu1 }
 0x734   :  { %v2970_v12 = vadd.f32 %v2969_v5, %v7382_v49  ;;  %v2971_v26 = vpop.f32.mrb[19].mxu0  ;;  %v3042_v7 = vpop.f32.mrb[19].mxu1  ;;  %v3041_v19 = vadd.f32 %v3040_v6, %v7397_v15  ;;  %v3675_v5 = vld [vmem:[#allocation2 + $0x10] sm:$0xff] }
 0x735   :  { %v2972_v8 = vadd.f32 %v2971_v26, %v7386_v50  ;;  %v3043_v11 = vadd.f32 %v3042_v7, %v7392_v59  ;;  %v3679_v6 = vld [vmem:[#allocation2 + $0x30] sm:$0xff]  ;;  %v6500_v26 = vpack.c.bf16 %v3677_v18, %v3673_v1  ;;  %v3684_v7 = vld [vmem:[#allocation2 + $0x58] sm:$0xff] }
 0x736   :  { %v4924_v9 = vmul.f32 -1.442695, %v2970_v12  ;;  %v3711_v1 = vld [vmem:[#allocation2 + $0x130] sm:$0xff] }
 0x737   :  { %v4925_v10 = vmul.f32 -1.442695, %v2972_v8  ;;  %v4926_v14 = vmul.f32 -1.442695, %v3043_v11  ;;  %v3688_v8 = vld [vmem:[#allocation2 + $0x78] sm:$0xff]  ;;  %v3681_v11 = vld [vmem:[#allocation2 + $0x40] sm:$0xff] }
 0x738   :  { %7158 = vpow2.f32 %v4924_v9 }
 0x739   :  { %7160 = vpow2.f32 %v4925_v10  ;;  %v6502_v10 = vpack.c.bf16 %v3686_v4, %v3682_v3  ;;  %v3720_v3 = vld [vmem:[#allocation2 + $0x178] sm:$0xff] }
 0x73a   :  { %7162 = vpow2.f32 %v4926_v14  ;;  %v3685_v14 = vld [vmem:[#allocation2 + $0x60] sm:$0xff] }
 0x73b   :  { %7164 = vtanh.f32 %v3041_v19  ;;  %v3690_v19 = vld [vmem:[#allocation2 + $0x88] sm:$0xff] }
 0x742   :  { %v7159_v20 = vpop.eup %7158 }
 0x743   :  { %v7161_v21 = vpop.eup %7160  ;;  %v3048_v22 = vadd.f32 1.0, %v7159_v20  ;;  %v3694_v20 = vld [vmem:[#allocation2 + $0xa8] sm:$0xff] }
 0x744   :  { %v3054_v23 = vadd.f32 1.0, %v7161_v21  ;;  %v7163_v25 = vpop.eup %7162  ;;  %v6564_v21 = vpack.c.bf16 %v3679_v6, %v3675_v5  ;;  %v3713_v5 = vld [vmem:[#allocation2 + $0x140] sm:$0xff] }
 0x745   :  { %7166 = vrcp.f32 %v3048_v22  ;;  %v7165_v27 = vpop.eup %7164  ;;  %v3061_v33 = vadd.f32 1.0, %v7163_v25  ;;  %v6566_v22 = vpack.c.bf16 %v3688_v8, %v3684_v7  ;;  %v3687_v25 = vld [vmem:[#allocation2 + $0x70] sm:$0xff]  ;;  %v3717_v6 = vld [vmem:[#allocation2 + $0x160] sm:$0xff] }
 0x746   :  { %7168 = vrcp.f32 %v3054_v23  ;;  %v3683_v23 = vld [vmem:[#allocation2 + $0x50] sm:$0xff] }
 0x747   :  { %7170 = vrcp.f32 %v3061_v33  ;;  %v3693_v33 = vld [vmem:[#allocation2 + $0xa0] sm:$0xff] }
 0x74f   :  { %v7167_v28 = vpop.eup %7166 }
 0x750   :  { %v7169_v29 = vpop.eup %7168  ;;  %v3065_v31 = vmul.f32 %v7167_v28, %v7165_v27  ;;  %v6504_v27 = vpack.c.bf16 %v3685_v14, %v3681_v11  ;;  %v3692_v28 = vld [vmem:[#allocation2 + $0x98] sm:$0xff]  ;;  %v6520_v11 = vpack.c.bf16 %v3717_v6, %v3713_v5 }
 0x751   :  { %v3064_v34 = vmul.f32 %v7169_v29, %v4923_v32  ;;  %v7171_v36 = vpop.eup %7170  ;;  %v3696_v29 = vld [vmem:[#allocation2 + $0xb8] sm:$0xff]  ;;  %v3689_v32 = vld [vmem:[#allocation2 + $0x80] sm:$0xff] }
 0x752   :  { %v3724_v14 = vld [vmem:[#allocation2 + $0x198] sm:$0xff] }
 0x753   :  { %v3066_v35 = vadd.f32 %v3065_v31, %v3064_v34  ;;  %v6506_v31 = vpack.c.bf16 %v3694_v20, %v3690_v19  ;;  %v3698_v34 = vld [vmem:[#allocation2 + $0xc8] sm:$0xff]  ;;  %v3728_v19 = vld [vmem:[#allocation2 + $0x1b8] sm:$0xff] }
 0x754   :  { %v3756_v6 = vld [vmem:[#allocation2 + $0x298] sm:$0xff] }
 0x755   :  { %7172 = vtanh.f32 %v3066_v35  ;;  %4928 = vst [vmem:[%s7569_s4 + $0x8] sm:$0xff] %v3066_v35  ;;  %v3702_v35 = vld [vmem:[#allocation2 + $0xe8] sm:$0xff] }
 0x75f   :  { %v7173_v37 = vpop.eup %7172 }
 0x760   :  { %v3068_v38 = vmul.f32 %v7173_v37, %v7171_v36  ;;  %v6568_v36 = vpack.c.bf16 %v3687_v25, %v3683_v23  ;;  %v6570_v37 = vpack.c.bf16 %v3696_v29, %v3692_v28  ;;  %v3730_v23 = vld [vmem:[#allocation2 + $0x1c8] sm:$0xff]  ;;  %v6586_v28 = vpack.c.bf16 %v3728_v19, %v3724_v14  ;;  %v3723_v29 = vld [vmem:[#allocation2 + $0x190] sm:$0xff] }
 0x761   :  { %v3734_v25 = vld [vmem:[#allocation2 + $0x1e8] sm:$0xff]  ;;  %v3755_v19 = vld [vmem:[#allocation2 + $0x290] sm:$0xff] }
 0x762   :  { %3565 = vmatprep.mubr.f32.mxu0 %v3068_v38  ;;  %3636 = vmatprep.mubr.f32.mxu1 %v3068_v38  ;;  %v3691_v38 = vld [vmem:[#allocation2 + $0x90] sm:$0xff] }
 0x773   :  { %v3269_v39 = vpop.f32.mrb[20].mxu0 }
 0x774   :  { %v3270_v40 = vadd.f32 %v3269_v39, %v7351_v16  ;;  %v3271_v41 = vpop.f32.mrb[21].mxu0  ;;  %v3695_v39 = vld [vmem:[#allocation2 + $0xb0] sm:$0xff] }
 0x775   :  { %v3272_v42 = vadd.f32 %v3271_v41, %v7355_v17  ;;  %v3340_v43 = vpop.f32.mrb[20].mxu1  ;;  %v3700_v41 = vld [vmem:[#allocation2 + $0xd8] sm:$0xff] }
 0x776   :  { %v4930_v44 = vmul.f32 -1.442695, %v3270_v40  ;;  %v3342_v45 = vpop.f32.mrb[21].mxu1  ;;  %v3341_v51 = vadd.f32 %v3340_v43, %v7368_v30  ;;  %v6508_v40 = vpack.c.bf16 %v3693_v33, %v3689_v32  ;;  %v6510_v43 = vpack.c.bf16 %v3702_v35, %v3698_v34  ;;  %v3732_v33 = vld [vmem:[#allocation2 + $0x1d8] sm:$0xff] }
 0x777   :  { %v4931_v46 = vmul.f32 -1.442695, %v3272_v42  ;;  %v3343_v47 = vadd.f32 %v3342_v45, %v7362_v24  ;;  %v3704_v42 = vld [vmem:[#allocation2 + $0xf8] sm:$0xff]  ;;  %v3701_v45 = vld [vmem:[#allocation2 + $0xe0] sm:$0xff]  ;;  %v6526_v35 = vpack.c.bf16 %v3734_v25, %v3730_v23 }
 0x778   :  { %7174 = vpow2.f32 %v4930_v44  ;;  %v3697_v44 = vld [vmem:[#allocation2 + $0xc0] sm:$0xff]  ;;  %v3736_v34 = vld [vmem:[#allocation2 + $0x1f8] sm:$0xff] }
 0x779   :  { %7176 = vpow2.f32 %v4931_v46  ;;  %v4932_v48 = vmul.f32 -1.442695, %v3343_v47  ;;  %v3706_v46 = vld [vmem:[#allocation2 + $0x108] sm:$0xff]  ;;  %v3768_v23 = vld [vmem:[#allocation2 + $0x2f8] sm:$0xff] }
 0x77a   :  { %v3710_v47 = vld [vmem:[#allocation2 + $0x128] sm:$0xff] }
 0x77b   :  { %7178 = vpow2.f32 %v4932_v48  ;;  %v6572_v48 = vpack.c.bf16 %v3695_v39, %v3691_v38  ;;  %v3738_v38 = vld [vmem:[#allocation2 + $0x208] sm:$0xff] }
 0x77c   :  { %7180 = vtanh.f32 %v3341_v51  ;;  %v6574_v51 = vpack.c.bf16 %v3704_v42, %v3700_v41  ;;  %v3742_v39 = vld [vmem:[#allocation2 + $0x228] sm:$0xff]  ;;  %v6590_v41 = vpack.c.bf16 %v3736_v34, %v3732_v33  ;;  %v3731_v42 = vld [vmem:[#allocation2 + $0x1d0] sm:$0xff] }
 0x77d   :  { %v3763_v34 = vld [vmem:[#allocation2 + $0x2d0] sm:$0xff] }
 0x782   :  { %v7175_v52 = vpop.eup %7174 }
 0x783   :  { %v7177_v53 = vpop.eup %7176  ;;  %v3348_v54 = vadd.f32 1.0, %v7175_v52  ;;  %v3699_v52 = vld [vmem:[#allocation2 + $0xd0] sm:$0xff] }
 0x784   :  { %v3354_v55 = vadd.f32 1.0, %v7177_v53  ;;  %v3703_v53 = vld [vmem:[#allocation2 + $0xf0] sm:$0xff] }
 0x785   :  { %7182 = vrcp.f32 %v3348_v54  ;;  %v7179_v56 = vpop.eup %7178  ;;  %v6512_v54 = vpack.c.bf16 %v3701_v45, %v3697_v44  ;;  %v3740_v45 = vld [vmem:[#allocation2 + $0x218] sm:$0xff] }
 0x786   :  { %7184 = vrcp.f32 %v3354_v55  ;;  %v7181_v57 = vpop.eup %7180  ;;  %v3361_v13 = vadd.f32 1.0, %v7179_v56  ;;  %v3708_v55 = vld [vmem:[#allocation2 + $0x118] sm:$0xff] }
 0x787   :  { %v3712_v56 = vld [vmem:[#allocation2 + $0x138] sm:$0xff] }
 0x788   :  { %7186 = vrcp.f32 %v3361_v13  ;;  %v3709_v13 = vld [vmem:[#allocation2 + $0x120] sm:$0xff] }
 0x78f   :  { %v7183_v58 = vpop.eup %7182 }
 0x790   :  { %v7185_v0 = vpop.eup %7184  ;;  %v3365_v61 = vmul.f32 %v7183_v58, %v7181_v57  ;;  %v6514_v57 = vpack.c.bf16 %v3710_v47, %v3706_v46  ;;  %v3705_v58 = vld [vmem:[#allocation2 + $0x100] sm:$0xff]  ;;  %v3744_v46 = vld [vmem:[#allocation2 + $0x238] sm:$0xff]  ;;  %v6530_v47 = vpack.c.bf16 %v3742_v39, %v3738_v38 }
 0x791   :  { %v3364_v62 = vmul.f32 %v7185_v0, %v3074_v60  ;;  %v3714_v0 = vld [vmem:[#allocation2 + $0x148] sm:$0xff]  ;;  %v6516_v18 = vpack.c.bf16 %v3709_v13, %v3705_v58  ;;  %v3748_v13 = vld [vmem:[#allocation2 + $0x258] sm:$0xff] }
 0x792   :  { %v7187_v2 = vpop.eup %7186  ;;  %v3718_v60 = vld [vmem:[#allocation2 + $0x168] sm:$0xff]  ;;  %v3776_v38 = vld [vmem:[#allocation2 + $0x338] sm:$0xff] }
 0x793   :  { %v3366_v63 = vadd.f32 %v3365_v61, %v3364_v62  ;;  %v6576_v61 = vpack.c.bf16 %v3703_v53, %v3699_v52  ;;  %v6578_v62 = vpack.c.bf16 %v3712_v56, %v3708_v55  ;;  %v6518_v4 = vpack.c.bf16 %v3718_v60, %v3714_v0  ;;  %v3746_v52 = vld [vmem:[#allocation2 + $0x248] sm:$0xff]  ;;  %v3739_v56 = vld [vmem:[#allocation2 + $0x210] sm:$0xff]  ;;  %v3752_v0 = vld [vmem:[#allocation2 + $0x278] sm:$0xff] }
 0x794   :  { %v3750_v53 = vld [vmem:[#allocation2 + $0x268] sm:$0xff]  ;;  %v6594_v55 = vpack.c.bf16 %v3744_v46, %v3740_v45  ;;  %v3771_v46 = vld [vmem:[#allocation2 + $0x310] sm:$0xff] }
 0x795   :  { %7188 = vtanh.f32 %v3366_v63  ;;  %3370 = vst [vmem:[%s7569_s4] sm:$0xff] %v3366_v63  ;;  %v3707_v63 = vld [vmem:[#allocation2 + $0x110] sm:$0xff]  ;;  %v6534_v60 = vpack.c.bf16 %v3750_v53, %v3746_v52  ;;  %v3784_v52 = vld [vmem:[#allocation2 + $0x378] sm:$0xff] }
 0x796   :  { %v6580_v7 = vpack.c.bf16 %v3711_v1, %v3707_v63  ;;  %v3754_v63 = vld [vmem:[#allocation2 + $0x288] sm:$0xff] }
 0x797   :  { %v3758_v1 = vld [vmem:[#allocation2 + $0x2a8] sm:$0xff] }
 0x79f   :  { %v7189_v12 = vpop.eup %7188 }
 0x7a0   :  { %v3368_v9 = vmul.f32 %v7189_v12, %v7187_v2  ;;  %v3716_v2 = vld [vmem:[#allocation2 + $0x158] sm:$0xff]  ;;  %v3722_v12 = vld [vmem:[#allocation2 + $0x188] sm:$0xff] }
 0x7a1   :  { %v6582_v8 = vpack.c.bf16 %v3720_v3, %v3716_v2  ;;  %v6598_v2 = vpack.c.bf16 %v3752_v0, %v3748_v13  ;;  %v3747_v3 = vld [vmem:[#allocation2 + $0x250] sm:$0xff] }
 0x7a2   :  { %3566 = vmatmul.mubr.f32.vlgmr.msra.gmra.mrb[22].mxu0 %v3368_v9  ;;  %3637 = vmatmul.mubr.f32.vlgmr.msra.gmra.mrb[22].mxu1 %v3368_v9  ;;  %v3779_v0 = vld [vmem:[#allocation2 + $0x350] sm:$0xff] }
 0x7a3   :  { %6501 = vmatpush1.bf16.msra.mxu0 %v6500_v26  ;;  %3865 = vmatprep.mubr.f32.mxu0 %v3368_v9  ;;  %v3726_v26 = vld [vmem:[#allocation2 + $0x1a8] sm:$0xff] }
 0x7a4   :  { %6503 = vmatprep.subr.bf16.mxu0 %v6502_v10  ;;  %3936 = vmatprep.mubr.f32.mxu1 %v3368_v9  ;;  %v3715_v9 = vld [vmem:[#allocation2 + $0x150] sm:$0xff]  ;;  %v6522_v20 = vpack.c.bf16 %v3726_v26, %v3722_v12  ;;  %v3760_v12 = vld [vmem:[#allocation2 + $0x2b8] sm:$0xff]  ;;  %v6538_v26 = vpack.c.bf16 %v3758_v1, %v3754_v63 }
 0x7a5   :  { %6565 = vmatpush1.bf16.msra.mxu1 %v6564_v21  ;;  %v3719_v10 = vld [vmem:[#allocation2 + $0x170] sm:$0xff]  ;;  %v3721_v21 = vld [vmem:[#allocation2 + $0x180] sm:$0xff]  ;;  %v6602_v14 = vpack.c.bf16 %v3760_v12, %v3756_v6  ;;  %v3792_v63 = vld [vmem:[#allocation2 + $0x3b8] sm:$0xff] }
 0x7a6   :  { %6567 = vmatprep.subr.bf16.mxu1 %v6566_v22  ;;  %v3725_v22 = vld [vmem:[#allocation2 + $0x1a0] sm:$0xff]  ;;  %v3787_v12 = vld [vmem:[#allocation2 + $0x390] sm:$0xff] }
 0x7a7   :  { %6505 = vmatpush1.bf16.msra.mxu0 %v6504_v27  ;;  %v6584_v27 = vpack.c.bf16 %v3719_v10, %v3715_v9  ;;  %v6524_v32 = vpack.c.bf16 %v3725_v22, %v3721_v21  ;;  %v3762_v9 = vld [vmem:[#allocation2 + $0x2c8] sm:$0xff]  ;;  %v3764_v22 = vld [vmem:[#allocation2 + $0x2d8] sm:$0xff] }
 0x7a8   :  { %6507 = vmatprep.subr.bf16.mxu0 %v6506_v31  ;;  %v3727_v31 = vld [vmem:[#allocation2 + $0x1b0] sm:$0xff]  ;;  %v3766_v10 = vld [vmem:[#allocation2 + $0x2e8] sm:$0xff]  ;;  %v6606_v33 = vpack.c.bf16 %v3768_v23, %v3764_v22 }
 0x7a9   :  { %6569 = vmatpush1.bf16.msra.mxu1 %v6568_v36  ;;  %v3729_v36 = vld [vmem:[#allocation2 + $0x1c0] sm:$0xff]  ;;  %v6542_v25 = vpack.c.bf16 %v3766_v10, %v3762_v9  ;;  %v3800_v9 = vld [vmem:[#allocation2 + $0x3f8] sm:$0xff]  ;;  %v3799_v22 = vld [vmem:[#allocation2 + $0x3f0] sm:$0xff] }
 0x7aa   :  { %6571 = vmatprep.subr.bf16.mxu1 %v6570_v37  ;;  %v3733_v37 = vld [vmem:[#allocation2 + $0x1e0] sm:$0xff] }
 0x7ab   :  { %6509 = vmatpush1.bf16.msra.mxu0 %v6508_v40  ;;  %v6588_v40 = vpack.c.bf16 %v3727_v31, %v3723_v29  ;;  %v6528_v44 = vpack.c.bf16 %v3733_v37, %v3729_v36  ;;  %v3770_v29 = vld [vmem:[#allocation2 + $0x308] sm:$0xff]  ;;  %v3772_v37 = vld [vmem:[#allocation2 + $0x318] sm:$0xff] }
 0x7ac   :  { %6511 = vmatprep.subr.bf16.mxu0 %v6510_v43  ;;  %v3735_v43 = vld [vmem:[#allocation2 + $0x1f0] sm:$0xff]  ;;  %v3774_v31 = vld [vmem:[#allocation2 + $0x328] sm:$0xff]  ;;  %v6610_v45 = vpack.c.bf16 %v3776_v38, %v3772_v37 }
 0x7ad   :  { %6573 = vmatpush1.bf16.msra.mxu1 %v6572_v48  ;;  %v3737_v48 = vld [vmem:[#allocation2 + $0x200] sm:$0xff]  ;;  %v6546_v39 = vpack.c.bf16 %v3774_v31, %v3770_v29  ;;  %v3976_v29 = vld [vmem:[#allocation2 + $0x428] sm:$0xff]  ;;  %v3973_v37 = vld [vmem:[#allocation2 + $0x410] sm:$0xff] }
 0x7ae   :  { %6575 = vmatprep.subr.bf16.mxu1 %v6574_v51  ;;  %v3741_v51 = vld [vmem:[#allocation2 + $0x220] sm:$0xff]  ;;  %v3977_v38 = vld [vmem:[#allocation2 + $0x430] sm:$0xff] }
 0x7af   :  { %6513 = vmatpush1.bf16.msra.mxu0 %v6512_v54  ;;  %v6592_v54 = vpack.c.bf16 %v3735_v43, %v3731_v42  ;;  %v6532_v58 = vpack.c.bf16 %v3741_v51, %v3737_v48  ;;  %v3778_v42 = vld [vmem:[#allocation2 + $0x348] sm:$0xff]  ;;  %v3780_v51 = vld [vmem:[#allocation2 + $0x358] sm:$0xff] }
 0x7b0   :  { %6515 = vmatprep.subr.bf16.mxu0 %v6514_v57  ;;  %v3743_v57 = vld [vmem:[#allocation2 + $0x230] sm:$0xff]  ;;  %v3782_v43 = vld [vmem:[#allocation2 + $0x368] sm:$0xff]  ;;  %v6614_v13 = vpack.c.bf16 %v3784_v52, %v3780_v51 }
 0x7b1   :  { %6577 = vmatpush1.bf16.msra.mxu1 %v6576_v61  ;;  %v3745_v61 = vld [vmem:[#allocation2 + $0x240] sm:$0xff]  ;;  %v6550_v53 = vpack.c.bf16 %v3782_v43, %v3778_v42  ;;  %v3984_v42 = vld [vmem:[#allocation2 + $0x468] sm:$0xff]  ;;  %v3981_v52 = vld [vmem:[#allocation2 + $0x450] sm:$0xff] }
 0x7b2   :  { %6579 = vmatprep.subr.bf16.mxu1 %v6578_v62  ;;  %v3749_v62 = vld [vmem:[#allocation2 + $0x260] sm:$0xff] }
 0x7b3   :  { %6517 = vmatpush1.bf16.msra.mxu0 %v6516_v18  ;;  %v6596_v18 = vpack.c.bf16 %v3743_v57, %v3739_v56  ;;  %v6536_v5 = vpack.c.bf16 %v3749_v62, %v3745_v61  ;;  %v3786_v56 = vld [vmem:[#allocation2 + $0x388] sm:$0xff]  ;;  %v3788_v62 = vld [vmem:[#allocation2 + $0x398] sm:$0xff]  ;;  %v3979_v43 = vld [vmem:[#allocation2 + $0x440] sm:$0xff] }
 0x7b4   :  { %6519 = vmatprep.subr.bf16.mxu0 %v6518_v4  ;;  %v3751_v4 = vld [vmem:[#allocation2 + $0x270] sm:$0xff]  ;;  %v3790_v57 = vld [vmem:[#allocation2 + $0x3a8] sm:$0xff]  ;;  %v6618_v6 = vpack.c.bf16 %v3792_v63, %v3788_v62 }
 0x7b5   :  { %6581 = vmatpush1.bf16.msra.mxu1 %v6580_v7  ;;  %v3753_v7 = vld [vmem:[#allocation2 + $0x280] sm:$0xff]  ;;  %v6554_v1 = vpack.c.bf16 %v3790_v57, %v3786_v56  ;;  %v3992_v56 = vld [vmem:[#allocation2 + $0x4a8] sm:$0xff] }
 0x7b6   :  { %6583 = vmatprep.subr.bf16.mxu1 %v6582_v8  ;;  %v3757_v8 = vld [vmem:[#allocation2 + $0x2a0] sm:$0xff] }
 0x7b7   :  { %6521 = vmatpush1.bf16.msra.mxu0 %v6520_v11  ;;  %v6600_v11 = vpack.c.bf16 %v3751_v4, %v3747_v3  ;;  %v6540_v21 = vpack.c.bf16 %v3757_v8, %v3753_v7  ;;  %v3794_v3 = vld [vmem:[#allocation2 + $0x3c8] sm:$0xff]  ;;  %v3796_v8 = vld [vmem:[#allocation2 + $0x3d8] sm:$0xff]  ;;  %v3987_v57 = vld [vmem:[#allocation2 + $0x480] sm:$0xff] }
 0x7b8   :  { %6523 = vmatprep.subr.bf16.mxu0 %v6522_v20  ;;  %v3759_v20 = vld [vmem:[#allocation2 + $0x2b0] sm:$0xff]  ;;  %v3798_v4 = vld [vmem:[#allocation2 + $0x3e8] sm:$0xff] }
 0x7b9   :  { %6585 = vmatpush1.bf16.msra.mxu1 %v6584_v27  ;;  %v3761_v27 = vld [vmem:[#allocation2 + $0x2c0] sm:$0xff]  ;;  %v6558_v10 = vpack.c.bf16 %v3798_v4, %v3794_v3 }
 0x7ba   :  { %6587 = vmatprep.subr.bf16.mxu1 %v6586_v28  ;;  %v3765_v28 = vld [vmem:[#allocation2 + $0x2e0] sm:$0xff] }
 0x7bb   :  { %6525 = vmatpush1.bf16.msra.mxu0 %v6524_v32  ;;  %v6604_v32 = vpack.c.bf16 %v3759_v20, %v3755_v19  ;;  %v6544_v36 = vpack.c.bf16 %v3765_v28, %v3761_v27  ;;  %v6622_v20 = vpack.c.bf16 %v3800_v9, %v3796_v8  ;;  %v4940_v27 = vld [vmem:[%s7565_s0 + $0x30] sm:$0xff]  ;;  %v3972_v28 = vld [vmem:[#allocation2 + $0x408] sm:$0xff]  ;;  %v3995_v4 = vld [vmem:[#allocation2 + $0x4c0] sm:$0xff] }
 0x7bc   :  { %6527 = vmatprep.subr.bf16.mxu0 %v6526_v35  ;;  %v3767_v35 = vld [vmem:[#allocation2 + $0x2f0] sm:$0xff]  ;;  %v6626_v31 = vpack.c.bf16 %v3976_v29, %v3972_v28 }
 0x7bd   :  { %6589 = vmatpush1.bf16.msra.mxu1 %v6588_v40  ;;  %v3769_v40 = vld [vmem:[#allocation2 + $0x300] sm:$0xff]  ;;  %v4001_v9 = vld [vmem:[#allocation2 + $0x4f0] sm:$0xff] }
 0x7be   :  { %6591 = vmatprep.subr.bf16.mxu1 %v6590_v41  ;;  %v3773_v41 = vld [vmem:[#allocation2 + $0x320] sm:$0xff]  ;;  %v4005_v29 = vld [vmem:[#allocation2 + $0x510] sm:$0xff] }
 0x7bf   :  { %6529 = vmatpush1.bf16.msra.mxu0 %v6528_v44  ;;  %v6608_v44 = vpack.c.bf16 %v3767_v35, %v3763_v34  ;;  %v6548_v48 = vpack.c.bf16 %v3773_v41, %v3769_v40  ;;  %v3974_v34 = vld [vmem:[#allocation2 + $0x418] sm:$0xff]  ;;  %v6692_v40 = vpack.c.bf16 %v3977_v38, %v3973_v37  ;;  %v3980_v41 = vld [vmem:[#allocation2 + $0x448] sm:$0xff]  ;;  %v4015_v37 = vld [vmem:[#allocation2 + $0x560] sm:$0xff] }
 0x7c0   :  { %6531 = vmatprep.subr.bf16.mxu0 %v6530_v47  ;;  %v3775_v47 = vld [vmem:[#allocation2 + $0x330] sm:$0xff]  ;;  %v4014_v38 = vld [vmem:[#allocation2 + $0x558] sm:$0xff] }
 0x7c1   :  { %6593 = vmatpush1.bf16.msra.mxu1 %v6592_v54  ;;  %v3777_v54 = vld [vmem:[#allocation2 + $0x340] sm:$0xff] }
 0x7c2   :  { %6595 = vmatprep.subr.bf16.mxu1 %v6594_v55  ;;  %v3781_v55 = vld [vmem:[#allocation2 + $0x360] sm:$0xff] }
 0x7c3   :  { %6533 = vmatpush1.bf16.msra.mxu0 %v6532_v58  ;;  %v6612_v58 = vpack.c.bf16 %v3775_v47, %v3771_v46  ;;  %v6552_v61 = vpack.c.bf16 %v3781_v55, %v3777_v54  ;;  %v3982_v46 = vld [vmem:[#allocation2 + $0x458] sm:$0xff]  ;;  %v3988_v54 = vld [vmem:[#allocation2 + $0x488] sm:$0xff] }
 0x7c4   :  { %6535 = vmatprep.subr.bf16.mxu0 %v6534_v60  ;;  %v3783_v60 = vld [vmem:[#allocation2 + $0x370] sm:$0xff]  ;;  %v3986_v47 = vld [vmem:[#allocation2 + $0x478] sm:$0xff] }
 0x7c5   :  { %6597 = vmatpush1.bf16.msra.mxu1 %v6596_v18  ;;  %v3785_v18 = vld [vmem:[#allocation2 + $0x380] sm:$0xff]  ;;  %v6694_v51 = vpack.c.bf16 %v3986_v47, %v3982_v46  ;;  %v4024_v46 = vld [vmem:[#allocation2 + $0x5a8] sm:$0xff] }
 0x7c6   :  { %6599 = vmatprep.subr.bf16.mxu1 %v6598_v2  ;;  %v3789_v2 = vld [vmem:[#allocation2 + $0x3a0] sm:$0xff] }
 0x7c7   :  { %6537 = vmatpush1.bf16.msra.mxu0 %v6536_v5  ;;  %v6616_v5 = vpack.c.bf16 %v3783_v60, %v3779_v0  ;;  %v6556_v7 = vpack.c.bf16 %v3789_v2, %v3785_v18  ;;  %v3990_v0 = vld [vmem:[#allocation2 + $0x498] sm:$0xff]  ;;  %v3996_v18 = vld [vmem:[#allocation2 + $0x4c8] sm:$0xff] }
 0x7c8   :  { %6539 = vmatprep.subr.bf16.mxu0 %v6538_v26  ;;  %v3791_v26 = vld [vmem:[#allocation2 + $0x3b0] sm:$0xff]  ;;  %v3994_v60 = vld [vmem:[#allocation2 + $0x4b8] sm:$0xff]  ;;  %v4000_v2 = vld [vmem:[#allocation2 + $0x4e8] sm:$0xff] }
 0x7c9   :  { %6601 = vmatpush1.bf16.msra.mxu1 %v6600_v11  ;;  %v3793_v11 = vld [vmem:[#allocation2 + $0x3c0] sm:$0xff]  ;;  %v6620_v19 = vpack.c.bf16 %v3791_v26, %v3787_v12  ;;  %v6698_v63 = vpack.c.bf16 %v3994_v60, %v3990_v0  ;;  %v6638_v3 = vpack.c.bf16 %v4000_v2, %v3996_v18  ;;  %v4002_v26 = vld [vmem:[#allocation2 + $0x4f8] sm:$0xff]  ;;  %v4032_v0 = vld [vmem:[#allocation2 + $0x5e8] sm:$0xff] }
 0x7ca   :  { %6603 = vmatprep.subr.bf16.mxu1 %v6602_v14  ;;  %v3797_v14 = vld [vmem:[#allocation2 + $0x3e0] sm:$0xff]  ;;  %v4034_v18 = vld [vmem:[#allocation2 + $0x5f8] sm:$0xff]  ;;  %v4029_v2 = vld [vmem:[#allocation2 + $0x5d0] sm:$0xff] }
 0x7cb   :  { %6541 = vmatpush1.bf16.msra.mxu0 %v6540_v21  ;;  %v3795_v21 = vld [vmem:[#allocation2 + $0x3d0] sm:$0xff]  ;;  %v6560_v23 = vpack.c.bf16 %v3797_v14, %v3793_v11  ;;  %v4008_v11 = vld [vmem:[#allocation2 + $0x528] sm:$0xff] }
 0x7cc   :  { %6543 = vmatprep.subr.bf16.mxu0 %v6542_v25  ;;  %v6624_v25 = vpack.c.bf16 %v3799_v22, %v3795_v21  ;;  %v4003_v22 = vld [vmem:[#allocation2 + $0x500] sm:$0xff] }
 0x7cd   :  { %6605 = vmatpush1.bf16.msra.mxu1 %v6604_v32  ;;  %v3971_v32 = vld [vmem:[#allocation2 + $0x400] sm:$0xff] }
 0x7ce   :  { %6607 = vmatprep.subr.bf16.mxu1 %v6606_v33  ;;  %v3975_v33 = vld [vmem:[#allocation2 + $0x420] sm:$0xff] }
 0x7cf   :  { %6545 = vmatpush1.bf16.msra.mxu0 %v6544_v36  ;;  %v6628_v35 = vpack.c.bf16 %v3975_v33, %v3971_v32  ;;  %v3978_v36 = vld [vmem:[#allocation2 + $0x438] sm:$0xff]  ;;  %v4012_v33 = vld [vmem:[#allocation2 + $0x548] sm:$0xff] }
 0x7d0   :  { %6547 = vmatprep.subr.bf16.mxu0 %v6546_v39  ;;  %v6690_v39 = vpack.c.bf16 %v3978_v36, %v3974_v34  ;;  %v4016_v34 = vld [vmem:[#allocation2 + $0x568] sm:$0xff]  ;;  %v4011_v36 = vld [vmem:[#allocation2 + $0x540] sm:$0xff] }
 0x7d1   :  { %6609 = vmatpush1.bf16.msra.mxu1 %v6608_v44  ;;  %v6630_v44 = vpack.c.bf16 %v3984_v42, %v3980_v41  ;;  %v4013_v41 = vld [vmem:[#allocation2 + $0x550] sm:$0xff] }
 0x7d2   :  { %6611 = vmatprep.subr.bf16.mxu1 %v6610_v45  ;;  %v3983_v45 = vld [vmem:[#allocation2 + $0x460] sm:$0xff]  ;;  %v4017_v42 = vld [vmem:[#allocation2 + $0x570] sm:$0xff] }
 0x7d3   :  { %6549 = vmatpush1.bf16.msra.mxu0 %v6548_v48  ;;  %v6632_v48 = vpack.c.bf16 %v3983_v45, %v3979_v43  ;;  %v4020_v45 = vld [vmem:[#allocation2 + $0x588] sm:$0xff] }
 0x7d4   :  { %6551 = vmatprep.subr.bf16.mxu0 %v6550_v53  ;;  %v3985_v53 = vld [vmem:[#allocation2 + $0x470] sm:$0xff]  ;;  %v6650_v47 = vpack.c.bf16 %v4024_v46, %v4020_v45 }
 0x7d5   :  { %6613 = vmatpush1.bf16.msra.mxu1 %v6612_v58  ;;  %v6696_v55 = vpack.c.bf16 %v3985_v53, %v3981_v52  ;;  %v3991_v58 = vld [vmem:[#allocation2 + $0x4a0] sm:$0xff]  ;;  %v4022_v52 = vld [vmem:[#allocation2 + $0x598] sm:$0xff]  ;;  %v4053_v45 = vld [vmem:[#allocation2 + $0x690] sm:$0xff] }
 0x7d6   :  { %6615 = vmatprep.subr.bf16.mxu1 %v6614_v13  ;;  %v6634_v13 = vpack.c.bf16 %v3992_v56, %v3988_v54  ;;  %v6636_v62 = vpack.c.bf16 %v3991_v58, %v3987_v57  ;;  %v4026_v54 = vld [vmem:[#allocation2 + $0x5b8] sm:$0xff]  ;;  %v4025_v56 = vld [vmem:[#allocation2 + $0x5b0] sm:$0xff] }
 0x7d7   :  { %6553 = vmatpush1.bf16.msra.mxu0 %v6552_v61  ;;  %v3989_v61 = vld [vmem:[#allocation2 + $0x490] sm:$0xff]  ;;  %v6714_v57 = vpack.c.bf16 %v4026_v54, %v4022_v52  ;;  %v4064_v52 = vld [vmem:[#allocation2 + $0x6e8] sm:$0xff]  ;;  %v4059_v54 = vld [vmem:[#allocation2 + $0x6c0] sm:$0xff] }
 0x7d8   :  { %6555 = vmatprep.subr.bf16.mxu0 %v6554_v1  ;;  %v3993_v1 = vld [vmem:[#allocation2 + $0x4b0] sm:$0xff] }
 0x7d9   :  { %6617 = vmatpush1.bf16.msra.mxu1 %v6616_v5  ;;  %v3999_v5 = vld [vmem:[#allocation2 + $0x4e0] sm:$0xff]  ;;  %v6700_v12 = vpack.c.bf16 %v3993_v1, %v3989_v61  ;;  %v4057_v46 = vld [vmem:[#allocation2 + $0x6b0] sm:$0xff] }
 0x7da   :  { %6619 = vmatprep.subr.bf16.mxu1 %v6618_v6  ;;  %v3998_v6 = vld [vmem:[#allocation2 + $0x4d8] sm:$0xff]  ;;  %v6640_v14 = vpack.c.bf16 %v3999_v5, %v3995_v4  ;;  %v4027_v61 = vld [vmem:[#allocation2 + $0x5c0] sm:$0xff] }
 0x7db   :  { %6557 = vmatpush1.bf16.msra.mxu0 %v6556_v7  ;;  %v3997_v7 = vld [vmem:[#allocation2 + $0x4d0] sm:$0xff]  ;;  %v6702_v8 = vpack.c.bf16 %v4002_v26, %v3998_v6  ;;  %v4036_v6 = vld [vmem:[#allocation2 + $0x608] sm:$0xff] }
 0x7dc   :  { %6559 = vmatprep.subr.bf16.mxu0 %v6558_v10  ;;  %v4004_v10 = vld [vmem:[#allocation2 + $0x508] sm:$0xff] }
 0x7dd   :  { %6621 = vmatpush1.bf16.msra.mxu1 %v6620_v19  ;;  %v4006_v19 = vld [vmem:[#allocation2 + $0x518] sm:$0xff]  ;;  %v6642_v21 = vpack.c.bf16 %v4008_v11, %v4004_v10 }
 0x7de   :  { %6623 = vmatprep.subr.bf16.mxu1 %v6622_v20  ;;  %v4010_v20 = vld [vmem:[#allocation2 + $0x538] sm:$0xff] }
 0x7df   :  { %6561 = vmatpush1.bf16.msra.mxu0 %v6560_v23  ;;  %v4007_v23 = vld [vmem:[#allocation2 + $0x520] sm:$0xff]  ;;  %v4042_v11 = vld [vmem:[#allocation2 + $0x638] sm:$0xff] }
 0x7e0   :  { %6627 = vmatprep.subr.bf16.mxu0 %v6626_v31  ;;  %v6644_v28 = vpack.c.bf16 %v4007_v23, %v4003_v22  ;;  %v4009_v31 = vld [vmem:[#allocation2 + $0x530] sm:$0xff]  ;;  %v4044_v22 = vld [vmem:[#allocation2 + $0x648] sm:$0xff] }
 0x7e1   :  { %6625 = vmatpush1.bf16.msra.mxu1 %v6624_v25  ;;  %v6704_v25 = vpack.c.bf16 %v4001_v9, %v3997_v7  ;;  %v6708_v32 = vpack.c.bf16 %v4009_v31, %v4005_v29  ;;  %v4035_v7 = vld [vmem:[#allocation2 + $0x600] sm:$0xff]  ;;  %v4038_v9 = vld [vmem:[#allocation2 + $0x618] sm:$0xff]  ;;  %v4048_v23 = vld [vmem:[#allocation2 + $0x668] sm:$0xff] }
 0x7e2   :  { %3866 = vmatmul.mubr.f32.vlgmr.msra.gmra.mrb[24].mxu0 %v4940_v27  ;;  %6691 = vmatprep.subr.bf16.mxu1 %v6690_v39  ;;  %v6648_v39 = vpack.c.bf16 %v4015_v37, %v4011_v36  ;;  %v4046_v29 = vld [vmem:[#allocation2 + $0x658] sm:$0xff]  ;;  %v4052_v37 = vld [vmem:[#allocation2 + $0x688] sm:$0xff] }
 0x7e3   :  { %6629 = vmatpush1.bf16.msra.mxu0 %v6628_v35  ;;  %v6646_v35 = vpack.c.bf16 %v4016_v34, %v4012_v33  ;;  %v4045_v33 = vld [vmem:[#allocation2 + $0x650] sm:$0xff] }
 0x7e4   :  { %3937 = vmatmul.mubr.f32.vlgmr.msra.gmra.mrb[24].mxu1 %v4940_v27  ;;  %6631 = vmatprep.subr.bf16.mxu0 %v6630_v44  ;;  %v6706_v27 = vpack.c.bf16 %v4010_v20, %v4006_v19  ;;  %v6712_v44 = vpack.c.bf16 %v4017_v42, %v4013_v41  ;;  %v4041_v19 = vld [vmem:[#allocation2 + $0x630] sm:$0xff]  ;;  %v6722_v20 = vpack.c.bf16 %v4042_v11, %v4038_v9  ;;  %v4055_v41 = vld [vmem:[#allocation2 + $0x6a0] sm:$0xff]  ;;  %v4054_v42 = vld [vmem:[#allocation2 + $0x698] sm:$0xff] }
 0x7e5   :  { %6693 = vmatpush1.bf16.msra.mxu1 %v6692_v40  ;;  %v4018_v40 = vld [vmem:[#allocation2 + $0x578] sm:$0xff]  ;;  %v4049_v34 = vld [vmem:[#allocation2 + $0x670] sm:$0xff]  ;;  %v4080_v9 = vld [vmem:[#allocation2 + $0x768] sm:$0xff] }
 0x7e6   :  { %6695 = vmatprep.subr.bf16.mxu1 %v6694_v51  ;;  %v6710_v43 = vpack.c.bf16 %v4018_v40, %v4014_v38  ;;  %v4023_v51 = vld [vmem:[#allocation2 + $0x5a0] sm:$0xff]  ;;  %v6728_v36 = vpack.c.bf16 %v4049_v34, %v4045_v33  ;;  %v4056_v38 = vld [vmem:[#allocation2 + $0x6a8] sm:$0xff]  ;;  %v4086_v34 = vld [vmem:[#allocation2 + $0x798] sm:$0xff] }
 0x7e7   :  { %6633 = vmatpush1.bf16.msra.mxu0 %v6632_v48  ;;  %v4019_v48 = vld [vmem:[#allocation2 + $0x580] sm:$0xff] }
 0x7e8   :  { %6635 = vmatprep.subr.bf16.mxu0 %v6634_v13  ;;  %v6652_v53 = vpack.c.bf16 %v4023_v51, %v4019_v48  ;;  %v4028_v13 = vld [vmem:[#allocation2 + $0x5c8] sm:$0xff]  ;;  %v4051_v40 = vld [vmem:[#allocation2 + $0x680] sm:$0xff]  ;;  %v6732_v48 = vpack.c.bf16 %v4057_v46, %v4053_v45  ;;  %v4094_v46 = vld [vmem:[#allocation2 + $0x7d8] sm:$0xff] }
 0x7e9   :  { %6697 = vmatpush1.bf16.msra.mxu1 %v6696_v55  ;;  %v4021_v55 = vld [vmem:[#allocation2 + $0x590] sm:$0xff]  ;;  %v6654_v60 = vpack.c.bf16 %v4032_v0, %v4028_v13  ;;  %v4060_v51 = vld [vmem:[#allocation2 + $0x6c8] sm:$0xff]  ;;  %v4075_v11 = vld [vmem:[#allocation2 + $0x740] sm:$0xff] }
 0x7ea   :  { %6699 = vmatprep.subr.bf16.mxu1 %v6698_v63  ;;  %v6716_v58 = vpack.c.bf16 %v4025_v56, %v4021_v55  ;;  %v4030_v63 = vld [vmem:[#allocation2 + $0x5d8] sm:$0xff]  ;;  %v4063_v55 = vld [vmem:[#allocation2 + $0x6e0] sm:$0xff]  ;;  %v4061_v13 = vld [vmem:[#allocation2 + $0x6d0] sm:$0xff] }
 0x7eb   :  { %6637 = vmatpush1.bf16.msra.mxu0 %v6636_v62  ;;  %v4031_v62 = vld [vmem:[#allocation2 + $0x5e0] sm:$0xff]  ;;  %v6718_v4 = vpack.c.bf16 %v4034_v18, %v4030_v63  ;;  %v4062_v56 = vld [vmem:[#allocation2 + $0x6d8] sm:$0xff]  ;;  %v4065_v0 = vld [vmem:[#allocation2 + $0x6f0] sm:$0xff] }
 0x7ec   :  { %6639 = vmatprep.subr.bf16.mxu0 %v6638_v3  ;;  %v6656_v1 = vpack.c.bf16 %v4031_v62, %v4027_v61  ;;  %v4033_v3 = vld [vmem:[#allocation2 + $0x5f0] sm:$0xff]  ;;  %v6736_v61 = vpack.c.bf16 %v4065_v0, %v4061_v13  ;;  %v4068_v62 = vld [vmem:[#allocation2 + $0x708] sm:$0xff]  ;;  %v4067_v18 = vld [vmem:[#allocation2 + $0x700] sm:$0xff] }
 0x7ed   :  { %6701 = vmatpush1.bf16.msra.mxu1 %v6700_v12  ;;  %v6720_v5 = vpack.c.bf16 %v4033_v3, %v4029_v2  ;;  %v4040_v12 = vld [vmem:[#allocation2 + $0x628] sm:$0xff]  ;;  %v4071_v2 = vld [vmem:[#allocation2 + $0x720] sm:$0xff]  ;;  %v4070_v3 = vld [vmem:[#allocation2 + $0x718] sm:$0xff] }
 0x7ee   :  { %6703 = vmatprep.subr.bf16.mxu1 %v6702_v8  ;;  %v6658_v26 = vpack.c.bf16 %v4040_v12, %v4036_v6  ;;  %v4039_v8 = vld [vmem:[#allocation2 + $0x620] sm:$0xff]  ;;  %v4072_v63 = vld [vmem:[#allocation2 + $0x728] sm:$0xff]  ;;  %v4069_v6 = vld [vmem:[#allocation2 + $0x710] sm:$0xff] }
 0x7ef   :  { %6641 = vmatpush1.bf16.msra.mxu0 %v6640_v14  ;;  %v6660_v10 = vpack.c.bf16 %v4039_v8, %v4035_v7  ;;  %v4037_v14 = vld [vmem:[#allocation2 + $0x610] sm:$0xff]  ;;  %v4076_v8 = vld [vmem:[#allocation2 + $0x748] sm:$0xff]  ;;  %v4087_v33 = vld [vmem:[#allocation2 + $0x7a0] sm:$0xff] }
 0x7f0   :  { %6643 = vmatprep.subr.bf16.mxu0 %v6642_v21  ;;  %v6724_v21 = vpack.c.bf16 %v4041_v19, %v4037_v14  ;;  %v4073_v12 = vld [vmem:[#allocation2 + $0x730] sm:$0xff]  ;;  %v4079_v14 = vld [vmem:[#allocation2 + $0x760] sm:$0xff]  ;;  %v4078_v19 = vld [vmem:[#allocation2 + $0x758] sm:$0xff] }
 0x7f1   :  { %6705 = vmatpush1.bf16.msra.mxu1 %v6704_v25  ;;  %v6662_v25 = vpack.c.bf16 %v4048_v23, %v4044_v22  ;;  %v6740_v7 = vpack.c.bf16 %v4073_v12, %v4069_v6  ;;  %v4077_v22 = vld [vmem:[#allocation2 + $0x750] sm:$0xff]  ;;  %v4278_v13 = vld [vmem:[#allocation2 + $0x38] sm:$0xff] }
 0x7f2   :  { %6707 = vmatprep.subr.bf16.mxu1 %v6706_v27  ;;  %v4043_v27 = vld [vmem:[#allocation2 + $0x640] sm:$0xff]  ;;  %v4081_v23 = vld [vmem:[#allocation2 + $0x770] sm:$0xff] }
 0x7f3   :  { %6645 = vmatpush1.bf16.msra.mxu0 %v6644_v28  ;;  %v4047_v28 = vld [vmem:[#allocation2 + $0x660] sm:$0xff] }
 0x7f4   :  { %6647 = vmatprep.subr.bf16.mxu0 %v6646_v35  ;;  %v6664_v31 = vpack.c.bf16 %v4047_v28, %v4043_v27  ;;  %v6744_v27 = vpack.c.bf16 %v4081_v23, %v4077_v22  ;;  %v4084_v28 = vld [vmem:[#allocation2 + $0x788] sm:$0xff] }
 0x7f5   :  { %6709 = vmatpush1.bf16.msra.mxu1 %v6708_v32  ;;  %v4050_v32 = vld [vmem:[#allocation2 + $0x678] sm:$0xff] }
 0x7f6   :  { %6711 = vmatprep.subr.bf16.mxu1 %v6710_v43  ;;  %v6726_v35 = vpack.c.bf16 %v4050_v32, %v4046_v29  ;;  %v6668_v43 = vpack.c.bf16 %v4055_v41, %v4051_v40  ;;  %v4088_v29 = vld [vmem:[#allocation2 + $0x7a8] sm:$0xff] }
 0x7f7   :  { %6649 = vmatpush1.bf16.msra.mxu0 %v6648_v39  ;;  %v6666_v39 = vpack.c.bf16 %v4056_v38, %v4052_v37  ;;  %v6682_v32 = vpack.c.bf16 %v4088_v29, %v4084_v28  ;;  %v4085_v38 = vld [vmem:[#allocation2 + $0x790] sm:$0xff]  ;;  %v4092_v40 = vld [vmem:[#allocation2 + $0x7c8] sm:$0xff] }
 0x7f8   :  { %6651 = vmatprep.subr.bf16.mxu0 %v6650_v47 }
 0x7f9   :  { %6713 = vmatpush1.bf16.msra.mxu1 %v6712_v44  ;;  %v4058_v44 = vld [vmem:[#allocation2 + $0x6b8] sm:$0xff] }
 0x7fa   :  { %6715 = vmatprep.subr.bf16.mxu1 %v6714_v57  ;;  %v6730_v47 = vpack.c.bf16 %v4058_v44, %v4054_v42  ;;  %v6672_v57 = vpack.c.bf16 %v4063_v55, %v4059_v54  ;;  %v4096_v42 = vld [vmem:[#allocation2 + $0x7e8] sm:$0xff]  ;;  %v4095_v44 = vld [vmem:[#allocation2 + $0x7e0] sm:$0xff] }
 0x7fb   :  { %6653 = vmatpush1.bf16.msra.mxu0 %v6652_v53  ;;  %v6670_v53 = vpack.c.bf16 %v4064_v52, %v4060_v51  ;;  %v6686_v45 = vpack.c.bf16 %v4096_v42, %v4092_v40  ;;  %v4272_v54 = vld [vmem:[#allocation2 + $0x8] sm:$0xff] }
 0x7fc   :  { %6655 = vmatprep.subr.bf16.mxu0 %v6654_v60  ;;  %v4276_v55 = vld [vmem:[#allocation2 + $0x28] sm:$0xff] }
 0x7fd   :  { %6717 = vmatpush1.bf16.msra.mxu1 %v6716_v58  ;;  %v4066_v58 = vld [vmem:[#allocation2 + $0x6f8] sm:$0xff] }
 0x7fe   :  { %6719 = vmatprep.subr.bf16.mxu1 %v6718_v4  ;;  %v6734_v60 = vpack.c.bf16 %v4066_v58, %v4062_v56  ;;  %v6676_v4 = vpack.c.bf16 %v4071_v2, %v4067_v18  ;;  %v6754_v56 = vpack.c.bf16 %v4276_v55, %v4272_v54  ;;  %v4274_v58 = vld [vmem:[#allocation2 + $0x18] sm:$0xff] }
 0x7ff   :  { %6657 = vmatpush1.bf16.msra.mxu0 %v6656_v1  ;;  %v6674_v1 = vpack.c.bf16 %v4072_v63, %v4068_v62  ;;  %v6818_v0 = vpack.c.bf16 %v4278_v13, %v4274_v58  ;;  %v4280_v13 = vld [vmem:[#allocation2 + $0x48] sm:$0xff] }
 0x800   :  { %6659 = vmatprep.subr.bf16.mxu0 %v6658_v26 }
 0x801   :  { %6721 = vmatpush1.bf16.msra.mxu1 %v6720_v5  ;;  %v4074_v5 = vld [vmem:[#allocation2 + $0x738] sm:$0xff] }
 0x802   :  { %6723 = vmatprep.subr.bf16.mxu1 %v6722_v20  ;;  %v6738_v26 = vpack.c.bf16 %v4074_v5, %v4070_v3  ;;  %v6680_v20 = vpack.c.bf16 %v4079_v14, %v4075_v11 }
 0x803   :  { %6661 = vmatpush1.bf16.msra.mxu0 %v6660_v10  ;;  %v6678_v10 = vpack.c.bf16 %v4080_v9, %v4076_v8 }
 0x804   :  { %6663 = vmatprep.subr.bf16.mxu0 %v6662_v25 }
 0x805   :  { %6725 = vmatpush1.bf16.msra.mxu1 %v6724_v21  ;;  %v4082_v21 = vld [vmem:[#allocation2 + $0x778] sm:$0xff] }
 0x806   :  { %6727 = vmatprep.subr.bf16.mxu1 %v6726_v35  ;;  %v6742_v25 = vpack.c.bf16 %v4082_v21, %v4078_v19  ;;  %v4090_v35 = vld [vmem:[#allocation2 + $0x7b8] sm:$0xff] }
 0x807   :  { %6665 = vmatpush1.bf16.msra.mxu0 %v6664_v31  ;;  %v4083_v31 = vld [vmem:[#allocation2 + $0x780] sm:$0xff]  ;;  %v6746_v37 = vpack.c.bf16 %v4090_v35, %v4086_v34 }
 0x808   :  { %6667 = vmatprep.subr.bf16.mxu0 %v6666_v39  ;;  %v4089_v39 = vld [vmem:[#allocation2 + $0x7b0] sm:$0xff] }
 0x809   :  { %6729 = vmatpush1.bf16.msra.mxu1 %v6728_v36  ;;  %v6684_v36 = vpack.c.bf16 %v4087_v33, %v4083_v31  ;;  %v6748_v41 = vpack.c.bf16 %v4089_v39, %v4085_v38 }
 0x80a   :  { %6731 = vmatprep.subr.bf16.mxu1 %v6730_v47  ;;  %v4098_v47 = vld [vmem:[#allocation2 + $0x7f8] sm:$0xff] }
 0x80b   :  { %6669 = vmatpush1.bf16.msra.mxu0 %v6668_v43  ;;  %v4091_v43 = vld [vmem:[#allocation2 + $0x7c0] sm:$0xff]  ;;  %v6750_v52 = vpack.c.bf16 %v4098_v47, %v4094_v46 }
 0x80c   :  { %6671 = vmatprep.subr.bf16.mxu0 %v6670_v53  ;;  %v6688_v51 = vpack.c.bf16 %v4095_v44, %v4091_v43  ;;  %v4097_v53 = vld [vmem:[#allocation2 + $0x7f0] sm:$0xff] }
 0x80d   :  { %6733 = vmatpush1.bf16.msra.mxu1 %v6732_v48  ;;  %v4093_v48 = vld [vmem:[#allocation2 + $0x7d0] sm:$0xff] }
 0x80e   :  { %6735 = vmatprep.subr.bf16.mxu1 %v6734_v60 }
 0x80f   :  { %6673 = vmatpush1.bf16.msra.mxu0 %v6672_v57  ;;  %v6752_v57 = vpack.c.bf16 %v4097_v53, %v4093_v48 }
 0x810   :  { %6675 = vmatprep.subr.bf16.mxu0 %v6674_v1 }
 0x811   :  { %6737 = vmatpush1.bf16.msra.mxu1 %v6736_v61 }
 0x812   :  { %6739 = vmatprep.subr.bf16.mxu1 %v6738_v26 }
 0x813   :  { %6677 = vmatpush1.bf16.msra.mxu0 %v6676_v4 }
 0x814   :  { %6679 = vmatprep.subr.bf16.mxu0 %v6678_v10 }
 0x815   :  { %6741 = vmatpush1.bf16.msra.mxu1 %v6740_v7 }
 0x816   :  { %6743 = vmatprep.subr.bf16.mxu1 %v6742_v25 }
 0x817   :  { %6681 = vmatpush1.bf16.msra.mxu0 %v6680_v20  ;;  %v4934_v20 = vld [vmem:[%s7569_s4 + $0x8] sm:$0xff] }
 0x818   :  { %6683 = vmatprep.subr.bf16.mxu0 %v6682_v32 }
 0x819   :  { %6745 = vmatpush1.bf16.msra.mxu1 %v6744_v27 }
 0x81a   :  { %6747 = vmatprep.subr.bf16.mxu1 %v6746_v37 }
 0x81b   :  { %6685 = vmatpush1.bf16.msra.mxu0 %v6684_v36 }
 0x81c   :  { %6687 = vmatprep.subr.bf16.mxu0 %v6686_v45 }
 0x81d   :  { %6749 = vmatpush1.bf16.msra.mxu1 %v6748_v41 }
 0x81e   :  { %6751 = vmatprep.subr.bf16.mxu1 %v6750_v52  ;;  %v3672_v52 = vld [vmem:[%s7569_s4] sm:$0xff] }
 0x81f   :  { %6689 = vmatpush1.bf16.msra.mxu0 %v6688_v51 }
 0x820   :  { %6755 = vmatprep.subr.bf16.mxu0 %v6754_v56  ;;  %v4271_v56 = vld [vmem:[#allocation2] sm:$0xff] }
 0x821   :  { %6753 = vmatpush1.bf16.msra.mxu1 %v6752_v57  ;;  %v4275_v57 = vld [vmem:[#allocation2 + $0x20] sm:$0xff] }
 0x822   :  { %6819 = vmatprep.subr.bf16.mxu1 %v6818_v0  ;;  %v4284_v0 = vld [vmem:[#allocation2 + $0x68] sm:$0xff] }
 0x875   :  { %v3567_v60 = vpop.f32.mrb[22].mxu0  ;;  %v3638_v61 = vpop.f32.mrb[22].mxu1 }
 0x876   :  { %v3568_v62 = vadd.f32 %v3567_v60, %v7382_v49  ;;  %v3569_v63 = vpop.f32.mrb[23].mxu0  ;;  %v3640_v1 = vpop.f32.mrb[23].mxu1  ;;  %v3639_v6 = vadd.f32 %v3638_v61, %v7397_v15  ;;  %v4273_v60 = vld [vmem:[#allocation2 + $0x10] sm:$0xff] }
 0x877   :  { %v3570_v18 = vadd.f32 %v3569_v63, %v7386_v50  ;;  %v3641_v4 = vadd.f32 %v3640_v1, %v7392_v59  ;;  %v4277_v61 = vld [vmem:[#allocation2 + $0x30] sm:$0xff]  ;;  %v6756_v63 = vpack.c.bf16 %v4275_v57, %v4271_v56  ;;  %v4282_v1 = vld [vmem:[#allocation2 + $0x58] sm:$0xff] }
 0x878   :  { %v4935_v2 = vmul.f32 -1.442695, %v3568_v62  ;;  %v4309_v56 = vld [vmem:[#allocation2 + $0x130] sm:$0xff] }
 0x879   :  { %v4936_v3 = vmul.f32 -1.442695, %v3570_v18  ;;  %v4937_v5 = vmul.f32 -1.442695, %v3641_v4  ;;  %v4286_v18 = vld [vmem:[#allocation2 + $0x78] sm:$0xff]  ;;  %v4279_v4 = vld [vmem:[#allocation2 + $0x40] sm:$0xff] }
 0x87a   :  { %7190 = vpow2.f32 %v4935_v2 }
 0x87b   :  { %7192 = vpow2.f32 %v4936_v3  ;;  %v6758_v3 = vpack.c.bf16 %v4284_v0, %v4280_v13  ;;  %v4318_v13 = vld [vmem:[#allocation2 + $0x178] sm:$0xff] }
 0x87c   :  { %7194 = vpow2.f32 %v4937_v5  ;;  %v4283_v5 = vld [vmem:[#allocation2 + $0x60] sm:$0xff] }
 0x87d   :  { %7196 = vtanh.f32 %v3639_v6  ;;  %v4288_v6 = vld [vmem:[#allocation2 + $0x88] sm:$0xff] }
 0x884   :  { %v7191_v12 = vpop.eup %7190 }
 0x885   :  { %v7193_v26 = vpop.eup %7192  ;;  %v3646_v7 = vadd.f32 1.0, %v7191_v12  ;;  %v4292_v12 = vld [vmem:[#allocation2 + $0xa8] sm:$0xff] }
 0x886   :  { %v3652_v8 = vadd.f32 1.0, %v7193_v26  ;;  %v7195_v9 = vpop.eup %7194  ;;  %v6820_v26 = vpack.c.bf16 %v4277_v61, %v4273_v60  ;;  %v4311_v60 = vld [vmem:[#allocation2 + $0x140] sm:$0xff] }
 0x887   :  { %7198 = vrcp.f32 %v3646_v7  ;;  %v7197_v10 = vpop.eup %7196  ;;  %v3659_v21 = vadd.f32 1.0, %v7195_v9  ;;  %v6822_v7 = vpack.c.bf16 %v4286_v18, %v4282_v1  ;;  %v4285_v9 = vld [vmem:[#allocation2 + $0x70] sm:$0xff]  ;;  %v4315_v61 = vld [vmem:[#allocation2 + $0x160] sm:$0xff] }
 0x888   :  { %7200 = vrcp.f32 %v3652_v8  ;;  %v4281_v8 = vld [vmem:[#allocation2 + $0x50] sm:$0xff] }
 0x889   :  { %7202 = vrcp.f32 %v3659_v21  ;;  %v4291_v21 = vld [vmem:[#allocation2 + $0xa0] sm:$0xff] }
 0x891   :  { %v7199_v11 = vpop.eup %7198 }
 0x892   :  { %v7201_v14 = vpop.eup %7200  ;;  %v3663_v19 = vmul.f32 %v7199_v11, %v7197_v10  ;;  %v6760_v10 = vpack.c.bf16 %v4283_v5, %v4279_v4  ;;  %v4290_v11 = vld [vmem:[#allocation2 + $0x98] sm:$0xff]  ;;  %v6776_v4 = vpack.c.bf16 %v4315_v61, %v4311_v60 }
 0x893   :  { %v3662_v22 = vmul.f32 %v7201_v14, %v4934_v20  ;;  %v7203_v25 = vpop.eup %7202  ;;  %v4294_v14 = vld [vmem:[#allocation2 + $0xb8] sm:$0xff]  ;;  %v4287_v20 = vld [vmem:[#allocation2 + $0x80] sm:$0xff] }
 0x894   :  { %v4322_v5 = vld [vmem:[#allocation2 + $0x198] sm:$0xff] }
 0x895   :  { %v3664_v23 = vadd.f32 %v3663_v19, %v3662_v22  ;;  %v6762_v19 = vpack.c.bf16 %v4292_v12, %v4288_v6  ;;  %v4296_v22 = vld [vmem:[#allocation2 + $0xc8] sm:$0xff]  ;;  %v4326_v6 = vld [vmem:[#allocation2 + $0x1b8] sm:$0xff] }
 0x896   :  { %v4354_v61 = vld [vmem:[#allocation2 + $0x298] sm:$0xff] }
 0x897   :  { %7204 = vtanh.f32 %v3664_v23  ;;  %4939 = vst [vmem:[%s7569_s4 + $0x8] sm:$0xff] %v3664_v23  ;;  %v4300_v23 = vld [vmem:[#allocation2 + $0xe8] sm:$0xff] }
 0x8a1   :  { %v7205_v27 = vpop.eup %7204 }
 0x8a2   :  { %v3666_v28 = vmul.f32 %v7205_v27, %v7203_v25  ;;  %v6824_v25 = vpack.c.bf16 %v4285_v9, %v4281_v8  ;;  %v6826_v27 = vpack.c.bf16 %v4294_v14, %v4290_v11  ;;  %v4328_v8 = vld [vmem:[#allocation2 + $0x1c8] sm:$0xff]  ;;  %v6842_v11 = vpack.c.bf16 %v4326_v6, %v4322_v5  ;;  %v4321_v14 = vld [vmem:[#allocation2 + $0x190] sm:$0xff] }
 0x8a3   :  { %v4332_v9 = vld [vmem:[#allocation2 + $0x1e8] sm:$0xff]  ;;  %v4353_v6 = vld [vmem:[#allocation2 + $0x290] sm:$0xff] }
 0x8a4   :  { %4163 = vmatprep.mubr.f32.mxu0 %v3666_v28  ;;  %4234 = vmatprep.mubr.f32.mxu1 %v3666_v28  ;;  %v4289_v28 = vld [vmem:[#allocation2 + $0x90] sm:$0xff] }
 0x8b5   :  { %v3867_v29 = vpop.f32.mrb[24].mxu0 }
 0x8b6   :  { %v3868_v31 = vadd.f32 %v3867_v29, %v7351_v16  ;;  %v3869_v32 = vpop.f32.mrb[25].mxu0  ;;  %v4293_v29 = vld [vmem:[#allocation2 + $0xb0] sm:$0xff] }
 0x8b7   :  { %v3870_v33 = vadd.f32 %v3869_v32, %v7355_v17  ;;  %v3938_v34 = vpop.f32.mrb[24].mxu1  ;;  %v4298_v32 = vld [vmem:[#allocation2 + $0xd8] sm:$0xff] }
 0x8b8   :  { %v4941_v35 = vmul.f32 -1.442695, %v3868_v31  ;;  %v3940_v36 = vpop.f32.mrb[25].mxu1  ;;  %v3939_v40 = vadd.f32 %v3938_v34, %v7368_v30  ;;  %v6764_v31 = vpack.c.bf16 %v4291_v21, %v4287_v20  ;;  %v6766_v34 = vpack.c.bf16 %v4300_v23, %v4296_v22  ;;  %v4330_v21 = vld [vmem:[#allocation2 + $0x1d8] sm:$0xff] }
 0x8b9   :  { %v4942_v37 = vmul.f32 -1.442695, %v3870_v33  ;;  %v3941_v38 = vadd.f32 %v3940_v36, %v7362_v24  ;;  %v4302_v33 = vld [vmem:[#allocation2 + $0xf8] sm:$0xff]  ;;  %v4299_v36 = vld [vmem:[#allocation2 + $0xe0] sm:$0xff]  ;;  %v6782_v23 = vpack.c.bf16 %v4332_v9, %v4328_v8 }
 0x8ba   :  { %7206 = vpow2.f32 %v4941_v35  ;;  %v4295_v35 = vld [vmem:[#allocation2 + $0xc0] sm:$0xff]  ;;  %v4334_v22 = vld [vmem:[#allocation2 + $0x1f8] sm:$0xff] }
 0x8bb   :  { %7208 = vpow2.f32 %v4942_v37  ;;  %v4943_v39 = vmul.f32 -1.442695, %v3941_v38  ;;  %v4304_v37 = vld [vmem:[#allocation2 + $0x108] sm:$0xff]  ;;  %v4366_v8 = vld [vmem:[#allocation2 + $0x2f8] sm:$0xff] }
 0x8bc   :  { %v4308_v38 = vld [vmem:[#allocation2 + $0x128] sm:$0xff] }
 0x8bd   :  { %7210 = vpow2.f32 %v4943_v39  ;;  %v6828_v39 = vpack.c.bf16 %v4293_v29, %v4289_v28  ;;  %v4336_v28 = vld [vmem:[#allocation2 + $0x208] sm:$0xff] }
 0x8be   :  { %7212 = vtanh.f32 %v3939_v40  ;;  %v6830_v40 = vpack.c.bf16 %v4302_v33, %v4298_v32  ;;  %v4340_v29 = vld [vmem:[#allocation2 + $0x228] sm:$0xff]  ;;  %v6846_v32 = vpack.c.bf16 %v4334_v22, %v4330_v21  ;;  %v4329_v33 = vld [vmem:[#allocation2 + $0x1d0] sm:$0xff] }
 0x8bf   :  { %v4361_v22 = vld [vmem:[#allocation2 + $0x2d0] sm:$0xff] }
 0x8c4   :  { %v7207_v41 = vpop.eup %7206 }
 0x8c5   :  { %v7209_v42 = vpop.eup %7208  ;;  %v3946_v43 = vadd.f32 1.0, %v7207_v41  ;;  %v4297_v41 = vld [vmem:[#allocation2 + $0xd0] sm:$0xff] }
 0x8c6   :  { %v3952_v44 = vadd.f32 1.0, %v7209_v42  ;;  %v4301_v42 = vld [vmem:[#allocation2 + $0xf0] sm:$0xff] }
 0x8c7   :  { %7214 = vrcp.f32 %v3946_v43  ;;  %v7211_v45 = vpop.eup %7210  ;;  %v6768_v43 = vpack.c.bf16 %v4299_v36, %v4295_v35  ;;  %v4338_v36 = vld [vmem:[#allocation2 + $0x218] sm:$0xff] }
 0x8c8   :  { %7216 = vrcp.f32 %v3952_v44  ;;  %v7213_v46 = vpop.eup %7212  ;;  %v3959_v48 = vadd.f32 1.0, %v7211_v45  ;;  %v4306_v44 = vld [vmem:[#allocation2 + $0x118] sm:$0xff] }
 0x8c9   :  { %v4310_v45 = vld [vmem:[#allocation2 + $0x138] sm:$0xff] }
 0x8ca   :  { %7218 = vrcp.f32 %v3959_v48  ;;  %v4307_v48 = vld [vmem:[#allocation2 + $0x120] sm:$0xff] }
 0x8d1   :  { %v7215_v47 = vpop.eup %7214 }
 0x8d2   :  { %v7217_v51 = vpop.eup %7216  ;;  %v3963_v53 = vmul.f32 %v7215_v47, %v7213_v46  ;;  %v6770_v46 = vpack.c.bf16 %v4308_v38, %v4304_v37  ;;  %v4303_v47 = vld [vmem:[#allocation2 + $0x100] sm:$0xff]  ;;  %v4342_v37 = vld [vmem:[#allocation2 + $0x238] sm:$0xff]  ;;  %v6786_v38 = vpack.c.bf16 %v4340_v29, %v4336_v28 }
 0x8d3   :  { %v3962_v54 = vmul.f32 %v7217_v51, %v3672_v52  ;;  %v4312_v51 = vld [vmem:[#allocation2 + $0x148] sm:$0xff]  ;;  %v6772_v57 = vpack.c.bf16 %v4307_v48, %v4303_v47  ;;  %v4346_v48 = vld [vmem:[#allocation2 + $0x258] sm:$0xff] }
 0x8d4   :  { %v7219_v58 = vpop.eup %7218  ;;  %v4316_v52 = vld [vmem:[#allocation2 + $0x168] sm:$0xff]  ;;  %v4374_v28 = vld [vmem:[#allocation2 + $0x338] sm:$0xff] }
 0x8d5   :  { %v3964_v55 = vadd.f32 %v3963_v53, %v3962_v54  ;;  %v6832_v53 = vpack.c.bf16 %v4301_v42, %v4297_v41  ;;  %v6834_v54 = vpack.c.bf16 %v4310_v45, %v4306_v44  ;;  %v6774_v0 = vpack.c.bf16 %v4316_v52, %v4312_v51  ;;  %v4344_v41 = vld [vmem:[#allocation2 + $0x248] sm:$0xff]  ;;  %v4337_v45 = vld [vmem:[#allocation2 + $0x210] sm:$0xff]  ;;  %v4350_v51 = vld [vmem:[#allocation2 + $0x278] sm:$0xff] }
 0x8d6   :  { %v4348_v42 = vld [vmem:[#allocation2 + $0x268] sm:$0xff]  ;;  %v6850_v44 = vpack.c.bf16 %v4342_v37, %v4338_v36  ;;  %v4369_v37 = vld [vmem:[#allocation2 + $0x310] sm:$0xff] }
 0x8d7   :  { %7220 = vtanh.f32 %v3964_v55  ;;  %3968 = vst [vmem:[%s7569_s4] sm:$0xff] %v3964_v55  ;;  %v4305_v55 = vld [vmem:[#allocation2 + $0x110] sm:$0xff]  ;;  %v6790_v52 = vpack.c.bf16 %v4348_v42, %v4344_v41  ;;  %v4382_v41 = vld [vmem:[#allocation2 + $0x378] sm:$0xff] }
 0x8d8   :  { %v6836_v1 = vpack.c.bf16 %v4309_v56, %v4305_v55  ;;  %v4352_v55 = vld [vmem:[#allocation2 + $0x288] sm:$0xff] }
 0x8d9   :  { %v4356_v56 = vld [vmem:[#allocation2 + $0x2a8] sm:$0xff] }
 0x8e1   :  { %v7221_v62 = vpop.eup %7220 }
 0x8e2   :  { %v3966_v2 = vmul.f32 %v7221_v62, %v7219_v58  ;;  %v4314_v58 = vld [vmem:[#allocation2 + $0x158] sm:$0xff]  ;;  %v4320_v62 = vld [vmem:[#allocation2 + $0x188] sm:$0xff] }
 0x8e3   :  { %v6838_v18 = vpack.c.bf16 %v4318_v13, %v4314_v58  ;;  %v6854_v58 = vpack.c.bf16 %v4350_v51, %v4346_v48  ;;  %v4345_v13 = vld [vmem:[#allocation2 + $0x250] sm:$0xff] }
 0x8e4   :  { %4164 = vmatmul.mubr.f32.vlgmr.msra.gmra.mrb[26].mxu0 %v3966_v2  ;;  %4235 = vmatmul.mubr.f32.vlgmr.msra.gmra.mrb[26].mxu1 %v3966_v2  ;;  %v4377_v51 = vld [vmem:[#allocation2 + $0x350] sm:$0xff] }
 0x8e5   :  { %6757 = vmatpush1.bf16.msra.mxu0 %v6756_v63  ;;  %4463 = vmatprep.mubr.f32.mxu0 %v3966_v2  ;;  %v4324_v63 = vld [vmem:[#allocation2 + $0x1a8] sm:$0xff] }
 0x8e6   :  { %6759 = vmatprep.subr.bf16.mxu0 %v6758_v3  ;;  %4534 = vmatprep.mubr.f32.mxu1 %v3966_v2  ;;  %v4313_v2 = vld [vmem:[#allocation2 + $0x150] sm:$0xff]  ;;  %v6778_v12 = vpack.c.bf16 %v4324_v63, %v4320_v62  ;;  %v4358_v62 = vld [vmem:[#allocation2 + $0x2b8] sm:$0xff]  ;;  %v6794_v63 = vpack.c.bf16 %v4356_v56, %v4352_v55 }
 0x8e7   :  { %6821 = vmatpush1.bf16.msra.mxu1 %v6820_v26  ;;  %v4317_v3 = vld [vmem:[#allocation2 + $0x170] sm:$0xff]  ;;  %v4319_v26 = vld [vmem:[#allocation2 + $0x180] sm:$0xff]  ;;  %v6858_v5 = vpack.c.bf16 %v4358_v62, %v4354_v61  ;;  %v4390_v55 = vld [vmem:[#allocation2 + $0x3b8] sm:$0xff] }
 0x8e8   :  { %6823 = vmatprep.subr.bf16.mxu1 %v6822_v7  ;;  %v4323_v7 = vld [vmem:[#allocation2 + $0x1a0] sm:$0xff]  ;;  %v4385_v62 = vld [vmem:[#allocation2 + $0x390] sm:$0xff] }
 0x8e9   :  { %6761 = vmatpush1.bf16.msra.mxu0 %v6760_v10  ;;  %v6840_v10 = vpack.c.bf16 %v4317_v3, %v4313_v2  ;;  %v6780_v20 = vpack.c.bf16 %v4323_v7, %v4319_v26  ;;  %v4360_v2 = vld [vmem:[#allocation2 + $0x2c8] sm:$0xff]  ;;  %v4362_v7 = vld [vmem:[#allocation2 + $0x2d8] sm:$0xff] }
 0x8ea   :  { %6763 = vmatprep.subr.bf16.mxu0 %v6762_v19  ;;  %v4325_v19 = vld [vmem:[#allocation2 + $0x1b0] sm:$0xff]  ;;  %v4364_v3 = vld [vmem:[#allocation2 + $0x2e8] sm:$0xff]  ;;  %v6862_v21 = vpack.c.bf16 %v4366_v8, %v4362_v7 }
 0x8eb   :  { %6825 = vmatpush1.bf16.msra.mxu1 %v6824_v25  ;;  %v4327_v25 = vld [vmem:[#allocation2 + $0x1c0] sm:$0xff]  ;;  %v6798_v9 = vpack.c.bf16 %v4364_v3, %v4360_v2  ;;  %v4398_v2 = vld [vmem:[#allocation2 + $0x3f8] sm:$0xff]  ;;  %v4397_v7 = vld [vmem:[#allocation2 + $0x3f0] sm:$0xff] }
 0x8ec   :  { %6827 = vmatprep.subr.bf16.mxu1 %v6826_v27  ;;  %v4331_v27 = vld [vmem:[#allocation2 + $0x1e0] sm:$0xff] }
 0x8ed   :  { %6765 = vmatpush1.bf16.msra.mxu0 %v6764_v31  ;;  %v6844_v31 = vpack.c.bf16 %v4325_v19, %v4321_v14  ;;  %v6784_v35 = vpack.c.bf16 %v4331_v27, %v4327_v25  ;;  %v4368_v14 = vld [vmem:[#allocation2 + $0x308] sm:$0xff]  ;;  %v4370_v27 = vld [vmem:[#allocation2 + $0x318] sm:$0xff] }
 0x8ee   :  { %6767 = vmatprep.subr.bf16.mxu0 %v6766_v34  ;;  %v4333_v34 = vld [vmem:[#allocation2 + $0x1f0] sm:$0xff]  ;;  %v4372_v19 = vld [vmem:[#allocation2 + $0x328] sm:$0xff]  ;;  %v6866_v36 = vpack.c.bf16 %v4374_v28, %v4370_v27 }
 0x8ef   :  { %6829 = vmatpush1.bf16.msra.mxu1 %v6828_v39  ;;  %v4335_v39 = vld [vmem:[#allocation2 + $0x200] sm:$0xff]  ;;  %v6802_v29 = vpack.c.bf16 %v4372_v19, %v4368_v14  ;;  %v4574_v14 = vld [vmem:[#allocation2 + $0x428] sm:$0xff]  ;;  %v4572_v19 = vld [vmem:[#allocation2 + $0x418] sm:$0xff] }
 0x8f0   :  { %6831 = vmatprep.subr.bf16.mxu1 %v6830_v40  ;;  %v4339_v40 = vld [vmem:[#allocation2 + $0x220] sm:$0xff]  ;;  %v4571_v28 = vld [vmem:[#allocation2 + $0x410] sm:$0xff] }
 0x8f1   :  { %6769 = vmatpush1.bf16.msra.mxu0 %v6768_v43  ;;  %v6848_v43 = vpack.c.bf16 %v4333_v34, %v4329_v33  ;;  %v6788_v47 = vpack.c.bf16 %v4339_v40, %v4335_v39  ;;  %v4376_v33 = vld [vmem:[#allocation2 + $0x348] sm:$0xff]  ;;  %v4378_v40 = vld [vmem:[#allocation2 + $0x358] sm:$0xff] }
 0x8f2   :  { %6771 = vmatprep.subr.bf16.mxu0 %v6770_v46  ;;  %v4341_v46 = vld [vmem:[#allocation2 + $0x230] sm:$0xff]  ;;  %v4380_v34 = vld [vmem:[#allocation2 + $0x368] sm:$0xff]  ;;  %v6870_v48 = vpack.c.bf16 %v4382_v41, %v4378_v40 }
 0x8f3   :  { %6833 = vmatpush1.bf16.msra.mxu1 %v6832_v53  ;;  %v4343_v53 = vld [vmem:[#allocation2 + $0x240] sm:$0xff]  ;;  %v6806_v42 = vpack.c.bf16 %v4380_v34, %v4376_v33  ;;  %v4582_v33 = vld [vmem:[#allocation2 + $0x468] sm:$0xff]  ;;  %v4580_v34 = vld [vmem:[#allocation2 + $0x458] sm:$0xff] }
 0x8f4   :  { %6835 = vmatprep.subr.bf16.mxu1 %v6834_v54  ;;  %v4347_v54 = vld [vmem:[#allocation2 + $0x260] sm:$0xff]  ;;  %v4579_v40 = vld [vmem:[#allocation2 + $0x450] sm:$0xff] }
 0x8f5   :  { %6773 = vmatpush1.bf16.msra.mxu0 %v6772_v57  ;;  %v6852_v57 = vpack.c.bf16 %v4341_v46, %v4337_v45  ;;  %v6792_v60 = vpack.c.bf16 %v4347_v54, %v4343_v53  ;;  %v4384_v45 = vld [vmem:[#allocation2 + $0x388] sm:$0xff]  ;;  %v4386_v54 = vld [vmem:[#allocation2 + $0x398] sm:$0xff] }
 0x8f6   :  { %6775 = vmatprep.subr.bf16.mxu0 %v6774_v0  ;;  %v4349_v0 = vld [vmem:[#allocation2 + $0x270] sm:$0xff]  ;;  %v4388_v46 = vld [vmem:[#allocation2 + $0x3a8] sm:$0xff]  ;;  %v6874_v61 = vpack.c.bf16 %v4390_v55, %v4386_v54 }
 0x8f7   :  { %6837 = vmatpush1.bf16.msra.mxu1 %v6836_v1  ;;  %v4351_v1 = vld [vmem:[#allocation2 + $0x280] sm:$0xff]  ;;  %v6810_v56 = vpack.c.bf16 %v4388_v46, %v4384_v45  ;;  %v4587_v54 = vld [vmem:[#allocation2 + $0x490] sm:$0xff] }
 0x8f8   :  { %6839 = vmatprep.subr.bf16.mxu1 %v6838_v18  ;;  %v4355_v18 = vld [vmem:[#allocation2 + $0x2a0] sm:$0xff]  ;;  %v4591_v55 = vld [vmem:[#allocation2 + $0x4b0] sm:$0xff] }
 0x8f9   :  { %6777 = vmatpush1.bf16.msra.mxu0 %v6776_v4  ;;  %v6856_v4 = vpack.c.bf16 %v4349_v0, %v4345_v13  ;;  %v6796_v26 = vpack.c.bf16 %v4355_v18, %v4351_v1  ;;  %v4392_v13 = vld [vmem:[#allocation2 + $0x3c8] sm:$0xff]  ;;  %v4394_v18 = vld [vmem:[#allocation2 + $0x3d8] sm:$0xff] }
 0x8fa   :  { %6779 = vmatprep.subr.bf16.mxu0 %v6778_v12  ;;  %v4357_v12 = vld [vmem:[#allocation2 + $0x2b0] sm:$0xff]  ;;  %v4396_v0 = vld [vmem:[#allocation2 + $0x3e8] sm:$0xff] }
 0x8fb   :  { %6841 = vmatpush1.bf16.msra.mxu1 %v6840_v10  ;;  %v4359_v10 = vld [vmem:[#allocation2 + $0x2c0] sm:$0xff]  ;;  %v6814_v3 = vpack.c.bf16 %v4396_v0, %v4392_v13  ;;  %v4596_v13 = vld [vmem:[#allocation2 + $0x4d8] sm:$0xff]  ;;  %v6956_v0 = vpack.c.bf16 %v4591_v55, %v4587_v54 }
 0x8fc   :  { %6843 = vmatprep.subr.bf16.mxu1 %v6842_v11  ;;  %v4363_v11 = vld [vmem:[#allocation2 + $0x2e0] sm:$0xff]  ;;  %v4632_v54 = vld [vmem:[#allocation2 + $0x5f8] sm:$0xff] }
 0x8fd   :  { %6781 = vmatpush1.bf16.msra.mxu0 %v6780_v20  ;;  %v6860_v20 = vpack.c.bf16 %v4357_v12, %v4353_v6  ;;  %v6800_v25 = vpack.c.bf16 %v4363_v11, %v4359_v10  ;;  %v6878_v12 = vpack.c.bf16 %v4398_v2, %v4394_v18  ;;  %v4951_v10 = vld [vmem:[%s7565_s0 + $0x38] sm:$0xff]  ;;  %v4570_v11 = vld [vmem:[#allocation2 + $0x408] sm:$0xff]  ;;  %v4595_v18 = vld [vmem:[#allocation2 + $0x4d0] sm:$0xff] }
 0x8fe   :  { %6783 = vmatprep.subr.bf16.mxu0 %v6782_v23  ;;  %v4365_v23 = vld [vmem:[#allocation2 + $0x2f0] sm:$0xff]  ;;  %v4625_v55 = vld [vmem:[#allocation2 + $0x5c0] sm:$0xff] }
 0x8ff   :  { %6845 = vmatpush1.bf16.msra.mxu1 %v6844_v31  ;;  %v4367_v31 = vld [vmem:[#allocation2 + $0x300] sm:$0xff]  ;;  %v4599_v2 = vld [vmem:[#allocation2 + $0x4f0] sm:$0xff] }
 0x900   :  { %6847 = vmatprep.subr.bf16.mxu1 %v6846_v32  ;;  %v4371_v32 = vld [vmem:[#allocation2 + $0x320] sm:$0xff] }
 0x901   :  { %6785 = vmatpush1.bf16.msra.mxu0 %v6784_v35  ;;  %v6864_v35 = vpack.c.bf16 %v4365_v23, %v4361_v22  ;;  %v6804_v39 = vpack.c.bf16 %v4371_v32, %v4367_v31  ;;  %v4569_v22 = vld [vmem:[#allocation2 + $0x400] sm:$0xff]  ;;  %v4578_v31 = vld [vmem:[#allocation2 + $0x448] sm:$0xff] }
 0x902   :  { %6787 = vmatprep.subr.bf16.mxu0 %v6786_v38  ;;  %v4373_v38 = vld [vmem:[#allocation2 + $0x330] sm:$0xff]  ;;  %v4573_v23 = vld [vmem:[#allocation2 + $0x420] sm:$0xff] }
 0x903   :  { %6849 = vmatpush1.bf16.msra.mxu1 %v6848_v43  ;;  %v4375_v43 = vld [vmem:[#allocation2 + $0x340] sm:$0xff]  ;;  %v6884_v27 = vpack.c.bf16 %v4573_v23, %v4569_v22  ;;  %v4614_v22 = vld [vmem:[#allocation2 + $0x568] sm:$0xff]  ;;  %v4612_v23 = vld [vmem:[#allocation2 + $0x558] sm:$0xff] }
 0x904   :  { %6851 = vmatprep.subr.bf16.mxu1 %v6850_v44  ;;  %v4379_v44 = vld [vmem:[#allocation2 + $0x360] sm:$0xff] }
 0x905   :  { %6789 = vmatpush1.bf16.msra.mxu0 %v6788_v47  ;;  %v6868_v47 = vpack.c.bf16 %v4373_v38, %v4369_v37  ;;  %v6808_v53 = vpack.c.bf16 %v4379_v44, %v4375_v43  ;;  %v4577_v38 = vld [vmem:[#allocation2 + $0x440] sm:$0xff]  ;;  %v4586_v43 = vld [vmem:[#allocation2 + $0x488] sm:$0xff] }
 0x906   :  { %6791 = vmatprep.subr.bf16.mxu0 %v6790_v52  ;;  %v4381_v52 = vld [vmem:[#allocation2 + $0x370] sm:$0xff]  ;;  %v4590_v44 = vld [vmem:[#allocation2 + $0x4a8] sm:$0xff] }
 0x907   :  { %6853 = vmatpush1.bf16.msra.mxu1 %v6852_v57  ;;  %v4383_v57 = vld [vmem:[#allocation2 + $0x380] sm:$0xff]  ;;  %v6890_v46 = vpack.c.bf16 %v4590_v44, %v4586_v43 }
 0x908   :  { %6855 = vmatprep.subr.bf16.mxu1 %v6854_v58  ;;  %v4387_v58 = vld [vmem:[#allocation2 + $0x3a0] sm:$0xff] }
 0x909   :  { %6793 = vmatpush1.bf16.msra.mxu0 %v6792_v60  ;;  %v6872_v60 = vpack.c.bf16 %v4381_v52, %v4377_v51  ;;  %v6812_v1 = vpack.c.bf16 %v4387_v58, %v4383_v57  ;;  %v4585_v51 = vld [vmem:[#allocation2 + $0x480] sm:$0xff]  ;;  %v4594_v57 = vld [vmem:[#allocation2 + $0x4c8] sm:$0xff] }
 0x90a   :  { %6795 = vmatprep.subr.bf16.mxu0 %v6794_v63  ;;  %v4389_v63 = vld [vmem:[#allocation2 + $0x3b0] sm:$0xff]  ;;  %v4598_v58 = vld [vmem:[#allocation2 + $0x4e8] sm:$0xff] }
 0x90b   :  { %6857 = vmatpush1.bf16.msra.mxu1 %v6856_v4  ;;  %v4391_v4 = vld [vmem:[#allocation2 + $0x3c0] sm:$0xff]  ;;  %v6876_v6 = vpack.c.bf16 %v4389_v63, %v4385_v62 }
 0x90c   :  { %6859 = vmatprep.subr.bf16.mxu1 %v6858_v5  ;;  %v4395_v5 = vld [vmem:[#allocation2 + $0x3e0] sm:$0xff] }
 0x90d   :  { %6797 = vmatpush1.bf16.msra.mxu0 %v6796_v26  ;;  %v4393_v26 = vld [vmem:[#allocation2 + $0x3d0] sm:$0xff]  ;;  %v6816_v8 = vpack.c.bf16 %v4395_v5, %v4391_v4  ;;  %v4593_v62 = vld [vmem:[#allocation2 + $0x4c0] sm:$0xff]  ;;  %v4606_v4 = vld [vmem:[#allocation2 + $0x528] sm:$0xff] }
 0x90e   :  { %6799 = vmatprep.subr.bf16.mxu0 %v6798_v9  ;;  %v6880_v9 = vpack.c.bf16 %v4397_v7, %v4393_v26  ;;  %v4597_v63 = vld [vmem:[#allocation2 + $0x4e0] sm:$0xff]  ;;  %v4604_v5 = vld [vmem:[#allocation2 + $0x518] sm:$0xff]  ;;  %v6960_v26 = vpack.c.bf16 %v4599_v2, %v4595_v18 }
 0x90f   :  { %6861 = vmatpush1.bf16.msra.mxu1 %v6860_v20  ;;  %v6882_v20 = vpack.c.bf16 %v4574_v14, %v4570_v11  ;;  %v4603_v11 = vld [vmem:[#allocation2 + $0x510] sm:$0xff]  ;;  %v4640_v18 = vld [vmem:[#allocation2 + $0x638] sm:$0xff]  ;;  %v4633_v2 = vld [vmem:[#allocation2 + $0x600] sm:$0xff] }
 0x910   :  { %6863 = vmatprep.subr.bf16.mxu1 %v6862_v21  ;;  %v4576_v21 = vld [vmem:[#allocation2 + $0x438] sm:$0xff] }
 0x911   :  { %6801 = vmatpush1.bf16.msra.mxu0 %v6800_v25  ;;  %v6946_v25 = vpack.c.bf16 %v4576_v21, %v4572_v19  ;;  %v4607_v19 = vld [vmem:[#allocation2 + $0x530] sm:$0xff]  ;;  %v4610_v21 = vld [vmem:[#allocation2 + $0x548] sm:$0xff] }
 0x912   :  { %6803 = vmatprep.subr.bf16.mxu0 %v6802_v29  ;;  %v4575_v29 = vld [vmem:[#allocation2 + $0x430] sm:$0xff] }
 0x913   :  { %6865 = vmatpush1.bf16.msra.mxu1 %v6864_v35  ;;  %v6948_v32 = vpack.c.bf16 %v4575_v29, %v4571_v28  ;;  %v4584_v35 = vld [vmem:[#allocation2 + $0x478] sm:$0xff]  ;;  %v4609_v28 = vld [vmem:[#allocation2 + $0x540] sm:$0xff] }
 0x914   :  { %6867 = vmatprep.subr.bf16.mxu1 %v6866_v36  ;;  %v6886_v36 = vpack.c.bf16 %v4582_v33, %v4578_v31  ;;  %v6950_v37 = vpack.c.bf16 %v4584_v35, %v4580_v34  ;;  %v4613_v29 = vld [vmem:[#allocation2 + $0x560] sm:$0xff]  ;;  %v4611_v33 = vld [vmem:[#allocation2 + $0x550] sm:$0xff] }
 0x915   :  { %6805 = vmatpush1.bf16.msra.mxu0 %v6804_v39  ;;  %v4581_v39 = vld [vmem:[#allocation2 + $0x460] sm:$0xff]  ;;  %v4615_v34 = vld [vmem:[#allocation2 + $0x570] sm:$0xff] }
 0x916   :  { %6807 = vmatprep.subr.bf16.mxu0 %v6806_v42  ;;  %v6888_v41 = vpack.c.bf16 %v4581_v39, %v4577_v38  ;;  %v4583_v42 = vld [vmem:[#allocation2 + $0x470] sm:$0xff]  ;;  %v6968_v35 = vpack.c.bf16 %v4615_v34, %v4611_v33  ;;  %v4620_v38 = vld [vmem:[#allocation2 + $0x598] sm:$0xff]  ;;  %v4649_v33 = vld [vmem:[#allocation2 + $0x680] sm:$0xff] }
 0x917   :  { %6869 = vmatpush1.bf16.msra.mxu1 %v6868_v47  ;;  %v6952_v45 = vpack.c.bf16 %v4583_v42, %v4579_v40  ;;  %v4588_v47 = vld [vmem:[#allocation2 + $0x498] sm:$0xff]  ;;  %v4621_v42 = vld [vmem:[#allocation2 + $0x5a0] sm:$0xff] }
 0x918   :  { %6871 = vmatprep.subr.bf16.mxu1 %v6870_v48  ;;  %v4592_v48 = vld [vmem:[#allocation2 + $0x4b8] sm:$0xff]  ;;  %v4653_v34 = vld [vmem:[#allocation2 + $0x6a0] sm:$0xff] }
 0x919   :  { %6809 = vmatpush1.bf16.msra.mxu0 %v6808_v53  ;;  %v6954_v52 = vpack.c.bf16 %v4592_v48, %v4588_v47  ;;  %v4589_v53 = vld [vmem:[#allocation2 + $0x4a0] sm:$0xff]  ;;  %v4624_v40 = vld [vmem:[#allocation2 + $0x5b8] sm:$0xff]  ;;  %v4626_v48 = vld [vmem:[#allocation2 + $0x5c8] sm:$0xff] }
 0x91a   :  { %6811 = vmatprep.subr.bf16.mxu0 %v6810_v56  ;;  %v6892_v56 = vpack.c.bf16 %v4589_v53, %v4585_v51  ;;  %v6970_v43 = vpack.c.bf16 %v4624_v40, %v4620_v38  ;;  %v4630_v51 = vld [vmem:[#allocation2 + $0x5e8] sm:$0xff]  ;;  %v4655_v38 = vld [vmem:[#allocation2 + $0x6b0] sm:$0xff] }
 0x91b   :  { %6873 = vmatpush1.bf16.msra.mxu1 %v6872_v60  ;;  %v6894_v60 = vpack.c.bf16 %v4598_v58, %v4594_v57  ;;  %v6910_v53 = vpack.c.bf16 %v4630_v51, %v4626_v48  ;;  %v4658_v40 = vld [vmem:[#allocation2 + $0x6c8] sm:$0xff]  ;;  %v4659_v51 = vld [vmem:[#allocation2 + $0x6d0] sm:$0xff] }
 0x91c   :  { %6875 = vmatprep.subr.bf16.mxu1 %v6874_v61  ;;  %v4600_v61 = vld [vmem:[#allocation2 + $0x4f8] sm:$0xff] }
 0x91d   :  { %6813 = vmatpush1.bf16.msra.mxu0 %v6812_v1  ;;  %v6958_v1 = vpack.c.bf16 %v4600_v61, %v4596_v13  ;;  %v4627_v13 = vld [vmem:[#allocation2 + $0x5d0] sm:$0xff]  ;;  %v4634_v61 = vld [vmem:[#allocation2 + $0x608] sm:$0xff] }
 0x91e   :  { %6815 = vmatprep.subr.bf16.mxu0 %v6814_v3  ;;  %v4602_v3 = vld [vmem:[#allocation2 + $0x508] sm:$0xff] }
 0x91f   :  { %6877 = vmatpush1.bf16.msra.mxu1 %v6876_v6  ;;  %v4608_v6 = vld [vmem:[#allocation2 + $0x538] sm:$0xff]  ;;  %v6898_v7 = vpack.c.bf16 %v4606_v4, %v4602_v3  ;;  %v4637_v3 = vld [vmem:[#allocation2 + $0x620] sm:$0xff] }
 0x920   :  { %6879 = vmatprep.subr.bf16.mxu1 %v6878_v12  ;;  %v6896_v12 = vpack.c.bf16 %v4597_v63, %v4593_v62  ;;  %v4638_v62 = vld [vmem:[#allocation2 + $0x628] sm:$0xff]  ;;  %v4636_v63 = vld [vmem:[#allocation2 + $0x618] sm:$0xff] }
 0x921   :  { %6817 = vmatpush1.bf16.msra.mxu0 %v6816_v8  ;;  %v6962_v8 = vpack.c.bf16 %v4608_v6, %v4604_v5  ;;  %v6978_v4 = vpack.c.bf16 %v4640_v18, %v4636_v63  ;;  %v6916_v5 = vpack.c.bf16 %v4637_v3, %v4633_v2  ;;  %v4635_v6 = vld [vmem:[#allocation2 + $0x610] sm:$0xff]  ;;  %v4674_v18 = vld [vmem:[#allocation2 + $0x748] sm:$0xff]  ;;  %v4676_v3 = vld [vmem:[#allocation2 + $0x758] sm:$0xff] }
 0x922   :  { %6883 = vmatprep.subr.bf16.mxu0 %v6882_v20  ;;  %v6964_v20 = vpack.c.bf16 %v4607_v19, %v4603_v11  ;;  %v4648_v11 = vld [vmem:[#allocation2 + $0x678] sm:$0xff]  ;;  %v4645_v19 = vld [vmem:[#allocation2 + $0x660] sm:$0xff]  ;;  %v4671_v63 = vld [vmem:[#allocation2 + $0x730] sm:$0xff] }
 0x923   :  { %6881 = vmatpush1.bf16.msra.mxu1 %v6880_v9  ;;  %v4601_v9 = vld [vmem:[#allocation2 + $0x500] sm:$0xff]  ;;  %v4678_v2 = vld [vmem:[#allocation2 + $0x768] sm:$0xff] }
 0x924   :  { %4464 = vmatmul.mubr.f32.vlgmr.msra.gmra.mrb[28].mxu0 %v4951_v10  ;;  %6947 = vmatprep.subr.bf16.mxu1 %v6946_v25  ;;  %v6902_v25 = vpack.c.bf16 %v4614_v22, %v4610_v21  ;;  %v4643_v22 = vld [vmem:[#allocation2 + $0x650] sm:$0xff] }
 0x925   :  { %6885 = vmatpush1.bf16.msra.mxu0 %v6884_v27  ;;  %v4616_v27 = vld [vmem:[#allocation2 + $0x578] sm:$0xff] }
 0x926   :  { %4535 = vmatmul.mubr.f32.vlgmr.msra.gmra.mrb[28].mxu1 %v4951_v10  ;;  %6887 = vmatprep.subr.bf16.mxu0 %v6886_v36  ;;  %v4605_v10 = vld [vmem:[#allocation2 + $0x520] sm:$0xff]  ;;  %v6966_v31 = vpack.c.bf16 %v4616_v27, %v4612_v23  ;;  %v4618_v36 = vld [vmem:[#allocation2 + $0x588] sm:$0xff]  ;;  %v4647_v23 = vld [vmem:[#allocation2 + $0x670] sm:$0xff] }
 0x927   :  { %6949 = vmatpush1.bf16.msra.mxu1 %v6948_v32  ;;  %v6900_v14 = vpack.c.bf16 %v4605_v10, %v4601_v9  ;;  %v6904_v32 = vpack.c.bf16 %v4613_v29, %v4609_v28  ;;  %v4644_v9 = vld [vmem:[#allocation2 + $0x658] sm:$0xff]  ;;  %v4650_v27 = vld [vmem:[#allocation2 + $0x688] sm:$0xff] }
 0x928   :  { %6951 = vmatprep.subr.bf16.mxu1 %v6950_v37  ;;  %v4622_v37 = vld [vmem:[#allocation2 + $0x5a8] sm:$0xff]  ;;  %v4652_v29 = vld [vmem:[#allocation2 + $0x698] sm:$0xff] }
 0x929   :  { %6889 = vmatpush1.bf16.msra.mxu0 %v6888_v41  ;;  %v6906_v39 = vpack.c.bf16 %v4622_v37, %v4618_v36  ;;  %v4617_v41 = vld [vmem:[#allocation2 + $0x580] sm:$0xff]  ;;  %v4654_v28 = vld [vmem:[#allocation2 + $0x6a8] sm:$0xff]  ;;  %v6924_v36 = vpack.c.bf16 %v4653_v34, %v4649_v33  ;;  %v4651_v37 = vld [vmem:[#allocation2 + $0x690] sm:$0xff] }
 0x92a   :  { %6891 = vmatprep.subr.bf16.mxu0 %v6890_v46  ;;  %v6908_v44 = vpack.c.bf16 %v4621_v42, %v4617_v41  ;;  %v4623_v46 = vld [vmem:[#allocation2 + $0x5b0] sm:$0xff]  ;;  %v4662_v41 = vld [vmem:[#allocation2 + $0x6e8] sm:$0xff]  ;;  %v4660_v42 = vld [vmem:[#allocation2 + $0x6d8] sm:$0xff] }
 0x92b   :  { %6953 = vmatpush1.bf16.msra.mxu1 %v6952_v45  ;;  %v4619_v45 = vld [vmem:[#allocation2 + $0x590] sm:$0xff] }
 0x92c   :  { %6955 = vmatprep.subr.bf16.mxu1 %v6954_v52  ;;  %v6972_v47 = vpack.c.bf16 %v4623_v46, %v4619_v45  ;;  %v4628_v52 = vld [vmem:[#allocation2 + $0x5d8] sm:$0xff]  ;;  %v4657_v45 = vld [vmem:[#allocation2 + $0x6c0] sm:$0xff] }
 0x92d   :  { %6893 = vmatpush1.bf16.msra.mxu0 %v6892_v56  ;;  %v4629_v56 = vld [vmem:[#allocation2 + $0x5e0] sm:$0xff]  ;;  %v6974_v57 = vpack.c.bf16 %v4632_v54, %v4628_v52  ;;  %v4663_v52 = vld [vmem:[#allocation2 + $0x6f0] sm:$0xff]  ;;  %v4666_v54 = vld [vmem:[#allocation2 + $0x708] sm:$0xff] }
 0x92e   :  { %6895 = vmatprep.subr.bf16.mxu0 %v6894_v60  ;;  %v6912_v58 = vpack.c.bf16 %v4629_v56, %v4625_v55  ;;  %v4661_v46 = vld [vmem:[#allocation2 + $0x6e0] sm:$0xff]  ;;  %v4670_v55 = vld [vmem:[#allocation2 + $0x728] sm:$0xff]  ;;  %v4668_v56 = vld [vmem:[#allocation2 + $0x718] sm:$0xff] }
 0x92f   :  { %6957 = vmatpush1.bf16.msra.mxu1 %v6956_v0  ;;  %v4631_v0 = vld [vmem:[#allocation2 + $0x5f0] sm:$0xff]  ;;  %v6928_v48 = vpack.c.bf16 %v4661_v46, %v4657_v45 }
 0x930   :  { %6959 = vmatprep.subr.bf16.mxu1 %v6958_v1  ;;  %v6976_v60 = vpack.c.bf16 %v4631_v0, %v4627_v13  ;;  %v6914_v1 = vpack.c.bf16 %v4638_v62, %v4634_v61  ;;  %v4665_v13 = vld [vmem:[#allocation2 + $0x700] sm:$0xff]  ;;  %v4667_v62 = vld [vmem:[#allocation2 + $0x710] sm:$0xff] }
 0x931   :  { %6897 = vmatpush1.bf16.msra.mxu0 %v6896_v12  ;;  %v4639_v12 = vld [vmem:[#allocation2 + $0x630] sm:$0xff]  ;;  %v4669_v0 = vld [vmem:[#allocation2 + $0x720] sm:$0xff] }
 0x932   :  { %6899 = vmatprep.subr.bf16.mxu0 %v6898_v7  ;;  %v4642_v7 = vld [vmem:[#allocation2 + $0x648] sm:$0xff]  ;;  %v6932_v61 = vpack.c.bf16 %v4669_v0, %v4665_v13 }
 0x933   :  { %6961 = vmatpush1.bf16.msra.mxu1 %v6960_v26  ;;  %v6980_v26 = vpack.c.bf16 %v4639_v12, %v4635_v6  ;;  %v4673_v6 = vld [vmem:[#allocation2 + $0x740] sm:$0xff] }
 0x934   :  { %6963 = vmatprep.subr.bf16.mxu1 %v6962_v8  ;;  %v4646_v8 = vld [vmem:[#allocation2 + $0x668] sm:$0xff]  ;;  %v4677_v12 = vld [vmem:[#allocation2 + $0x760] sm:$0xff] }
 0x935   :  { %6901 = vmatpush1.bf16.msra.mxu0 %v6900_v14  ;;  %v6918_v10 = vpack.c.bf16 %v4646_v8, %v4642_v7  ;;  %v4641_v14 = vld [vmem:[#allocation2 + $0x640] sm:$0xff]  ;;  %v6936_v7 = vpack.c.bf16 %v4677_v12, %v4673_v6  ;;  %v4675_v8 = vld [vmem:[#allocation2 + $0x750] sm:$0xff] }
 0x936   :  { %6903 = vmatprep.subr.bf16.mxu0 %v6902_v25  ;;  %v6920_v21 = vpack.c.bf16 %v4645_v19, %v4641_v14  ;;  %v6984_v25 = vpack.c.bf16 %v4647_v23, %v4643_v22  ;;  %v4686_v14 = vld [vmem:[#allocation2 + $0x7a8] sm:$0xff]  ;;  %v4684_v19 = vld [vmem:[#allocation2 + $0x798] sm:$0xff]  ;;  %v4681_v23 = vld [vmem:[#allocation2 + $0x780] sm:$0xff] }
 0x937   :  { %6965 = vmatpush1.bf16.msra.mxu1 %v6964_v20  ;;  %v6982_v20 = vpack.c.bf16 %v4648_v11, %v4644_v9  ;;  %v4679_v9 = vld [vmem:[#allocation2 + $0x770] sm:$0xff] }
 0x938   :  { %6967 = vmatprep.subr.bf16.mxu1 %v6966_v31  ;;  %v6922_v31 = vpack.c.bf16 %v4654_v28, %v4650_v27  ;;  %v7000_v11 = vpack.c.bf16 %v4679_v9, %v4675_v8  ;;  %v4683_v27 = vld [vmem:[#allocation2 + $0x790] sm:$0xff] }
 0x939   :  { %6905 = vmatpush1.bf16.msra.mxu0 %v6904_v32  ;;  %v4656_v32 = vld [vmem:[#allocation2 + $0x6b8] sm:$0xff] }
 0x93a   :  { %6907 = vmatprep.subr.bf16.mxu0 %v6906_v39  ;;  %v6988_v39 = vpack.c.bf16 %v4655_v38, %v4651_v37  ;;  %v4689_v37 = vld [vmem:[#allocation2 + $0x7c0] sm:$0xff] }
 0x93b   :  { %6969 = vmatpush1.bf16.msra.mxu1 %v6968_v35  ;;  %v6986_v35 = vpack.c.bf16 %v4656_v32, %v4652_v29  ;;  %v4687_v29 = vld [vmem:[#allocation2 + $0x7b0] sm:$0xff]  ;;  %v4694_v32 = vld [vmem:[#allocation2 + $0x7e8] sm:$0xff] }
 0x93c   :  { %6971 = vmatprep.subr.bf16.mxu1 %v6970_v43  ;;  %v6926_v43 = vpack.c.bf16 %v4662_v41, %v4658_v40  ;;  %v7004_v33 = vpack.c.bf16 %v4687_v29, %v4683_v27  ;;  %v4691_v40 = vld [vmem:[#allocation2 + $0x7d0] sm:$0xff] }
 0x93d   :  { %6909 = vmatpush1.bf16.msra.mxu0 %v6908_v44  ;;  %v4664_v44 = vld [vmem:[#allocation2 + $0x6f8] sm:$0xff]  ;;  %v4695_v41 = vld [vmem:[#allocation2 + $0x7f0] sm:$0xff] }
 0x93e   :  { %6911 = vmatprep.subr.bf16.mxu0 %v6910_v53  ;;  %v6992_v53 = vpack.c.bf16 %v4663_v52, %v4659_v51 }
 0x93f   :  { %6973 = vmatpush1.bf16.msra.mxu1 %v6972_v47  ;;  %v6990_v47 = vpack.c.bf16 %v4664_v44, %v4660_v42 }
 0x940   :  { %6975 = vmatprep.subr.bf16.mxu1 %v6974_v57  ;;  %v6930_v57 = vpack.c.bf16 %v4670_v55, %v4666_v54 }
 0x941   :  { %6913 = vmatpush1.bf16.msra.mxu0 %v6912_v58  ;;  %v4672_v58 = vld [vmem:[#allocation2 + $0x738] sm:$0xff] }
 0x942   :  { %6915 = vmatprep.subr.bf16.mxu0 %v6914_v1  ;;  %v6996_v1 = vpack.c.bf16 %v4671_v63, %v4667_v62 }
 0x943   :  { %6977 = vmatpush1.bf16.msra.mxu1 %v6976_v60  ;;  %v6994_v60 = vpack.c.bf16 %v4672_v58, %v4668_v56 }
 0x944   :  { %6979 = vmatprep.subr.bf16.mxu1 %v6978_v4  ;;  %v6934_v4 = vpack.c.bf16 %v4678_v2, %v4674_v18  ;;  %v4945_v18 = vld [vmem:[%s7569_s4 + $0x8] sm:$0xff] }
 0x945   :  { %6917 = vmatpush1.bf16.msra.mxu0 %v6916_v5  ;;  %v4680_v5 = vld [vmem:[#allocation2 + $0x778] sm:$0xff] }
 0x946   :  { %6919 = vmatprep.subr.bf16.mxu0 %v6918_v10  ;;  %v4682_v10 = vld [vmem:[#allocation2 + $0x788] sm:$0xff] }
 0x947   :  { %6981 = vmatpush1.bf16.msra.mxu1 %v6980_v26  ;;  %v6998_v26 = vpack.c.bf16 %v4680_v5, %v4676_v3 }
 0x948   :  { %6983 = vmatprep.subr.bf16.mxu1 %v6982_v20  ;;  %v4688_v20 = vld [vmem:[#allocation2 + $0x7b8] sm:$0xff] }
 0x949   :  { %6921 = vmatpush1.bf16.msra.mxu0 %v6920_v21  ;;  %v6938_v21 = vpack.c.bf16 %v4686_v14, %v4682_v10  ;;  %v7002_v22 = vpack.c.bf16 %v4688_v20, %v4684_v19 }
 0x94a   :  { %6923 = vmatprep.subr.bf16.mxu0 %v6922_v31  ;;  %v4690_v31 = vld [vmem:[#allocation2 + $0x7c8] sm:$0xff] }
 0x94b   :  { %6985 = vmatpush1.bf16.msra.mxu1 %v6984_v25  ;;  %v4685_v25 = vld [vmem:[#allocation2 + $0x7a0] sm:$0xff]  ;;  %v6942_v34 = vpack.c.bf16 %v4694_v32, %v4690_v31 }
 0x94c   :  { %6987 = vmatprep.subr.bf16.mxu1 %v6986_v35  ;;  %v6940_v28 = vpack.c.bf16 %v4685_v25, %v4681_v23  ;;  %v4692_v35 = vld [vmem:[#allocation2 + $0x7d8] sm:$0xff] }
 0x94d   :  { %6925 = vmatpush1.bf16.msra.mxu0 %v6924_v36  ;;  %v4696_v36 = vld [vmem:[#allocation2 + $0x7f8] sm:$0xff] }
 0x94e   :  { %6927 = vmatprep.subr.bf16.mxu0 %v6926_v43  ;;  %v7006_v38 = vpack.c.bf16 %v4696_v36, %v4692_v35  ;;  %v7008_v43 = vpack.c.bf16 %v4695_v41, %v4691_v40 }
 0x94f   :  { %6989 = vmatpush1.bf16.msra.mxu1 %v6988_v39  ;;  %v4693_v39 = vld [vmem:[#allocation2 + $0x7e0] sm:$0xff] }
 0x950   :  { %6991 = vmatprep.subr.bf16.mxu1 %v6990_v47  ;;  %v6944_v42 = vpack.c.bf16 %v4693_v39, %v4689_v37 }
 0x951   :  { %6929 = vmatpush1.bf16.msra.mxu0 %v6928_v48 }
 0x952   :  { %6931 = vmatprep.subr.bf16.mxu0 %v6930_v57 }
 0x953   :  { %6993 = vmatpush1.bf16.msra.mxu1 %v6992_v53 }
 0x954   :  { %6995 = vmatprep.subr.bf16.mxu1 %v6994_v60 }
 0x955   :  { %6933 = vmatpush1.bf16.msra.mxu0 %v6932_v61 }
 0x956   :  { %6935 = vmatprep.subr.bf16.mxu0 %v6934_v4 }
 0x957   :  { %6997 = vmatpush1.bf16.msra.mxu1 %v6996_v1 }
 0x958   :  { %6999 = vmatprep.subr.bf16.mxu1 %v6998_v26 }
 0x959   :  { %6937 = vmatpush1.bf16.msra.mxu0 %v6936_v7 }
 0x95a   :  { %6939 = vmatprep.subr.bf16.mxu0 %v6938_v21 }
 0x95b   :  { %7001 = vmatpush1.bf16.msra.mxu1 %v7000_v11 }
 0x95c   :  { %7003 = vmatprep.subr.bf16.mxu1 %v7002_v22 }
 0x95d   :  { %6941 = vmatpush1.bf16.msra.mxu0 %v6940_v28 }
 0x95e   :  { %6943 = vmatprep.subr.bf16.mxu0 %v6942_v34 }
 0x95f   :  { %7005 = vmatpush1.bf16.msra.mxu1 %v7004_v33 }
 0x960   :  { %7007 = vmatprep.subr.bf16.mxu1 %v7006_v38 }
 0x961   :  { %6945 = vmatpush1.bf16.msra.mxu0 %v6944_v42 }
 0x963   :  { %7009 = vmatpush1.bf16.msra.mxu1 %v7008_v43 }
 0x9b7   :  { %v4165_v44 = vpop.f32.mrb[26].mxu0  ;;  %v4236_v45 = vpop.f32.mrb[26].mxu1 }
 0x9b8   :  { %v4166_v46 = vadd.f32 %v4165_v44, %v7382_v49  ;;  %v4167_v47 = vpop.f32.mrb[27].mxu0  ;;  %v4238_v48 = vpop.f32.mrb[27].mxu1  ;;  %v4237_v56 = vadd.f32 %v4236_v45, %v7397_v15 }
 0x9b9   :  { %v4168_v51 = vadd.f32 %v4167_v47, %v7386_v50  ;;  %v4239_v54 = vadd.f32 %v4238_v48, %v7392_v59 }
 0x9ba   :  { %v4946_v52 = vmul.f32 -1.442695, %v4166_v46 }
 0x9bb   :  { %v4947_v53 = vmul.f32 -1.442695, %v4168_v51  ;;  %v4948_v55 = vmul.f32 -1.442695, %v4239_v54 }
 0x9bc   :  { %7222 = vpow2.f32 %v4946_v52 }
 0x9bd   :  { %7224 = vpow2.f32 %v4947_v53 }
 0x9be   :  { %7226 = vpow2.f32 %v4948_v55 }
 0x9bf   :  { %7228 = vtanh.f32 %v4237_v56 }
 0x9c6   :  { %v7223_v57 = vpop.eup %7222 }
 0x9c7   :  { %v7225_v58 = vpop.eup %7224  ;;  %v4244_v13 = vadd.f32 1.0, %v7223_v57 }
 0x9c8   :  { %v4250_v0 = vadd.f32 1.0, %v7225_v58  ;;  %v7227_v60 = vpop.eup %7226 }
 0x9c9   :  { %7230 = vrcp.f32 %v4244_v13  ;;  %v7229_v61 = vpop.eup %7228  ;;  %v4257_v2 = vadd.f32 1.0, %v7227_v60 }
 0x9ca   :  { %7232 = vrcp.f32 %v4250_v0 }
 0x9cb   :  { %7234 = vrcp.f32 %v4257_v2 }
 0x9d3   :  { %v7231_v62 = vpop.eup %7230 }
 0x9d4   :  { %v7233_v63 = vpop.eup %7232  ;;  %v4261_v1 = vmul.f32 %v7231_v62, %v7229_v61 }
 0x9d5   :  { %v4260_v3 = vmul.f32 %v7233_v63, %v4945_v18  ;;  %v7235_v5 = vpop.eup %7234 }
 0x9d7   :  { %v7538_v4 = vadd.f32 %v4261_v1, %v4260_v3 }
 0x9d9   :  { %7236 = vtanh.f32 %v7538_v4 }
 0x9e3   :  { %v7237_v6 = vpop.eup %7236 }
 0x9e4   :  { %v4264_v12 = vmul.f32 %v7237_v6, %v7235_v5 }
 0x9e6   :  { %4761 = vmatprep.mubr.f32.mxu0 %v4264_v12  ;;  %4832 = vmatprep.mubr.f32.mxu1 %v4264_v12 }
 0x9f7   :  { %v4465_v26 = vpop.f32.mrb[28].mxu0 }
 0x9f8   :  { %v4466_v7 = vadd.f32 %v4465_v26, %v7351_v16  ;;  %v4467_v8 = vpop.f32.mrb[29].mxu0 }
 0x9f9   :  { %v4468_v9 = vadd.f32 %v4467_v8, %v7355_v17  ;;  %v4536_v10 = vpop.f32.mrb[28].mxu1 }
 0x9fa   :  { %v4952_v11 = vmul.f32 -1.442695, %v4466_v7  ;;  %v4538_v14 = vpop.f32.mrb[29].mxu1  ;;  %v4537_v22 = vadd.f32 %v4536_v10, %v7368_v30 }
 0x9fb   :  { %v4953_v19 = vmul.f32 -1.442695, %v4468_v9  ;;  %v4539_v20 = vadd.f32 %v4538_v14, %v7362_v24  ;;  %v4270_v24 = vld [vmem:[%s7569_s4] sm:$0xff] }
 0x9fc   :  { %7238 = vpow2.f32 %v4952_v11 }
 0x9fd   :  { %7240 = vpow2.f32 %v4953_v19  ;;  %v4954_v21 = vmul.f32 -1.442695, %v4539_v20 }
 0x9ff   :  { %7242 = vpow2.f32 %v4954_v21 }
 0xa00   :  { %7244 = vtanh.f32 %v4537_v22 }
 0xa06   :  { %v7239_v23 = vpop.eup %7238 }
 0xa07   :  { %v7241_v25 = vpop.eup %7240  ;;  %v4544_v27 = vadd.f32 1.0, %v7239_v23 }
 0xa08   :  { %v4550_v16 = vadd.f32 1.0, %v7241_v25 }
 0xa09   :  { %7246 = vrcp.f32 %v4544_v27  ;;  %v7243_v17 = vpop.eup %7242 }
 0xa0a   :  { %7248 = vrcp.f32 %v4550_v16  ;;  %v7245_v28 = vpop.eup %7244  ;;  %v4557_v31 = vadd.f32 1.0, %v7243_v17 }
 0xa0c   :  { %7250 = vrcp.f32 %v4557_v31 }
 0xa13   :  { %v7247_v29 = vpop.eup %7246 }
 0xa14   :  { %v7249_v32 = vpop.eup %7248  ;;  %v4561_v33 = vmul.f32 %v7247_v29, %v7245_v28 }
 0xa15   :  { %v4560_v34 = vmul.f32 %v7249_v32, %v4270_v24 }
 0xa16   :  { %v7251_v35 = vpop.eup %7250 }
 0xa17   :  { %v4562_v30 = vadd.f32 %v4561_v33, %v4560_v34 }
 0xa19   :  { %7252 = vtanh.f32 %v4562_v30  ;;  %4566 = vst [vmem:[%s7569_s4] sm:$0xff] %v4562_v30 }
 0xa23   :  { %v7253_v36 = vpop.eup %7252 }
 0xa24   :  { %v4564_v37 = vmul.f32 %v7253_v36, %v7251_v35 }
 0xa26   :  { %4565 = vst [vmem:[%s7568_s3] sm:$0xff] %v4564_v37  ;;  %4762 = vmatmul.mubr.f32.vlgmr.msra.gmra.mrb[30].mxu0 %v4564_v37  ;;  %4833 = vmatmul.mubr.f32.vlgmr.msra.gmra.mrb[30].mxu1 %v4564_v37 }
 0xaf9   :  { %v4763_v38 = vpop.f32.mrb[30].mxu0  ;;  %v4834_v39 = vpop.f32.mrb[30].mxu1 }
 0xafa   :  { %v4764_v40 = vadd.f32 %v4763_v38, %v7382_v49  ;;  %v4765_v41 = vpop.f32.mrb[31].mxu0  ;;  %v4836_v42 = vpop.f32.mrb[31].mxu1  ;;  %v4835_v48 = vadd.f32 %v4834_v39, %v7397_v15 }
 0xafb   :  { %v4766_v43 = vadd.f32 %v4765_v41, %v7386_v50  ;;  %v4837_v46 = vadd.f32 %v4836_v42, %v7392_v59 }
 0xafc   :  { %v4957_v44 = vmul.f32 -1.442695, %v4764_v40 }
 0xafd   :  { %v4958_v45 = vmul.f32 -1.442695, %v4766_v43  ;;  %v4959_v47 = vmul.f32 -1.442695, %v4837_v46 }
 0xafe   :  { %7254 = vpow2.f32 %v4957_v44 }
 0xaff   :  { %7256 = vpow2.f32 %v4958_v45 }
 0xb00   :  { %7258 = vpow2.f32 %v4959_v47 }
 0xb01   :  { %7260 = vtanh.f32 %v4835_v48 }
 0xb08   :  { %v7255_v51 = vpop.eup %7254 }
 0xb09   :  { %v7257_v52 = vpop.eup %7256  ;;  %v4842_v53 = vadd.f32 1.0, %v7255_v51 }
 0xb0a   :  { %v4848_v54 = vadd.f32 1.0, %v7257_v52  ;;  %v7259_v49 = vpop.eup %7258 }
 0xb0b   :  { %7262 = vrcp.f32 %v4842_v53  ;;  %v7261_v55 = vpop.eup %7260  ;;  %v4855_v58 = vadd.f32 1.0, %v7259_v49 }
 0xb0c   :  { %7264 = vrcp.f32 %v4848_v54 }
 0xb0d   :  { %7266 = vrcp.f32 %v4855_v58 }
 0xb15   :  { %v7263_v50 = vpop.eup %7262 }
 0xb16   :  { %v7265_v56 = vpop.eup %7264  ;;  %v4859_v57 = vmul.f32 %v7263_v50, %v7261_v55 }
 0xb17   :  { %v4858_v13 = vmul.f32 %v7265_v56, %v7538_v4  ;;  %v7267_v15 = vpop.eup %7266 }
 0xb19   :  { %v4860_v59 = vadd.f32 %v4859_v57, %v4858_v13 }
 0xb1b   :  { %7268 = vtanh.f32 %v4860_v59  ;;  %4961 = vst [vmem:[%s7569_s4 + $0x8] sm:$0xff] %v4860_v59 }
 0xb25   :  { %v7269_v0 = vpop.eup %7268 }
 0xb26   :  { %v4862_v60 = vmul.f32 %v7269_v0, %v7267_v15 }
 0xb28   :  { %4960 = vst [vmem:[%s7568_s3 + $0x8] sm:$0xff] %v4862_v60 }
 0xb29   :  { %4873 = vsyncpa [#allocation3], 1 }

</bundles_post_ra>
